<compile_context>
chip_gen: v7x
topology: tpu7x:2x2x1
jax: 0.10.0
libtpu: 0.0.40
codegen_flags: <defaults>
</compile_context>

<pallas_src>
import functools

import jax
import jax.numpy as jnp
from jax.experimental import pallas as pl
from jax.experimental.pallas import tpu as pltpu

# --------------------------- config (lane-dense toy BERT) ---------------------
VOCAB = 512
HIDDEN = 256                       # 2 x 128 lanes
NUM_HEADS = 2
HEAD_DIM = HIDDEN // NUM_HEADS     # 128 -> head slices are lane-tile aligned
INTERMEDIATE = 4 * HIDDEN          # 1024
NUM_LAYERS = 2
MAX_POS = 128
TYPE_VOCAB = 2
NUM_LABELS = 2
LABEL_PAD = 128                    # classifier logits padded to one lane tile
LN_EPS = 1e-12
BATCH = 2
SEQ = 128


# ------------------------------ in-kernel helpers -----------------------------
def _layernorm(x, g, b, eps=LN_EPS):
    mean = jnp.mean(x, axis=-1, keepdims=True)
    xc = x - mean
    var = jnp.mean(xc * xc, axis=-1, keepdims=True)
    return xc * jax.lax.rsqrt(var + eps) * g + b


def _gelu(x):
    # TODO(synk): HF BERT uses erf-based GELU; tanh approximation used here.
    return 0.5 * x * (1.0 + jnp.tanh(
        0.7978845608028654 * (x + 0.044715 * x * x * x)))


# --------------------- fused encoder stack (grid = batch x layer) -------------
def _encoder_stack_kernel(emb_ref, eg_ref, eb_ref,
                          wqkv_ref, bqkv_ref, wo_ref, bo_ref, g1_ref, b1_ref,
                          wi_ref, bi_ref, wo2_ref, bo2_ref, g2_ref, b2_ref,
                          h_ref, *, num_heads, head_dim):
    layer = pl.program_id(1)

    @pl.when(layer == 0)
    def _():
        # Embedding sum -> LayerNorm, folded into the first layer step.
        h_ref[...] = _layernorm(emb_ref[...], eg_ref[...], eb_ref[...])

    x = h_ref[...]                                     # (SEQ, H) f32, resident
    x_bf = x.astype(jnp.bfloat16)
    hdim = num_heads * head_dim

    # Fused QKV projection: one lane-dense (SEQ, 3H) bf16 matmul, f32 acc.
    qkv = jnp.dot(x_bf, wqkv_ref[0],
                  preferred_element_type=jnp.float32) + bqkv_ref[0]

    # Self-attention. Heads are 128-aligned lane slices of qkv, so each head's
    # QK^T and PV are full 128x128x128 MXU passes (no tiny matmuls, no masked
    # stores); head contexts are concatenated in-register (no ctx scratch).
    # 1/sqrt(head_dim) is folded into wq at init time.
    # TODO(synk): no attention mask (matches HF default all-ones mask when
    # attention_mask is not supplied).
    ctx_heads = []
    for h in range(num_heads):
        c = h * head_dim
        q_h = qkv[:, c:c + head_dim].astype(jnp.bfloat16)
        k_h = qkv[:, hdim + c:hdim + c + head_dim].astype(jnp.bfloat16)
        v_h = qkv[:, 2 * hdim + c:2 * hdim + c + head_dim].astype(jnp.bfloat16)
        s = jax.lax.dot_general(q_h, k_h, (((1,), (1,)), ((), ())),
                                preferred_element_type=jnp.float32)
        m = jnp.max(s, axis=-1, keepdims=True)
        p = jnp.exp(s - m)                              # f32 softmax
        p = p * pl.reciprocal(jnp.sum(p, axis=-1, keepdims=True), approx=True)
        ctx_heads.append(jnp.dot(p.astype(jnp.bfloat16), v_h,
                                 preferred_element_type=jnp.float32))
    ctx = jnp.concatenate(ctx_heads, axis=-1)           # (SEQ, H) lane-dense

    attn = jnp.dot(ctx.astype(jnp.bfloat16), wo_ref[0],
                   preferred_element_type=jnp.float32) + bo_ref[0]
    h1 = _layernorm(attn + x, g1_ref[0], b1_ref[0])

    inter = _gelu(jnp.dot(h1.astype(jnp.bfloat16), wi_ref[0],
                          preferred_element_type=jnp.float32) + bi_ref[0])
    ffn = jnp.dot(inter.astype(jnp.bfloat16), wo2_ref[0],
                  preferred_element_type=jnp.float32) + bo2_ref[0]
    h_ref[...] = _layernorm(ffn + h1, g2_ref[0], b2_ref[0])


def encoder_stack(emb_sum, p):
    M, H = emb_sum.shape            # M = B * S
    I = INTERMEDIATE
    kernel = functools.partial(_encoder_stack_kernel,
                               num_heads=NUM_HEADS, head_dim=HEAD_DIM)

    act_map = lambda b, l: (b, 0)       # activation block follows batch axis
    w_map = lambda b, l: (l, 0, 0)      # weights follow layer axis (streamed)
    const_map = lambda b, l: (0, 0)     # emb-LN params resident

    return pl.pallas_call(
        kernel,
        out_shape=jax.ShapeDtypeStruct((M, H), jnp.float32),
        grid=(BATCH, NUM_LAYERS),
        in_specs=[
            pl.BlockSpec((SEQ, H), act_map),             # embeddings sum
            pl.BlockSpec((1, H), const_map),             # emb LN gamma
            pl.BlockSpec((1, H), const_map),             # emb LN beta
            pl.BlockSpec((1, H, 3 * H), w_map),          # wqkv (bf16)
            pl.BlockSpec((1, 1, 3 * H), w_map),          # bqkv
            pl.BlockSpec((1, H, H), w_map),              # wo (bf16)
            pl.BlockSpec((1, 1, H), w_map),              # bo
            pl.BlockSpec((1, 1, H), w_map),              # ln1 gamma
            pl.BlockSpec((1, 1, H), w_map),              # ln1 beta
            pl.BlockSpec((1, H, I), w_map),              # wi (bf16)
            pl.BlockSpec((1, 1, I), w_map),              # bi
            pl.BlockSpec((1, I, H), w_map),              # wo2 (bf16)
            pl.BlockSpec((1, 1, H), w_map),              # bo2
            pl.BlockSpec((1, 1, H), w_map),              # ln2 gamma
            pl.BlockSpec((1, 1, H), w_map),              # ln2 beta
        ],
        # Output block index is constant along the layer axis -> the hidden
        # state stays resident in VMEM across all layers (carry), written back
        # to HBM only once per batch block.
        out_specs=pl.BlockSpec((SEQ, H), act_map),
        compiler_params=pltpu.CompilerParams(
            dimension_semantics=("parallel", "arbitrary")),
    )(emb_sum, p["emb_ln_g"], p["emb_ln_b"],
      p["wqkv"], p["bqkv"], p["wo"], p["bo"], p["ln1_g"], p["ln1_b"],
      p["wi"], p["bi"], p["wo2"], p["bo2"], p["ln2_g"], p["ln2_b"])


# --------------- fused pooler + classifier + cross-entropy tail ---------------
def _tail_kernel(cls_ref, pw_ref, pb_ref, cw_ref, cb_ref, onehot_ref, o_ref):
    pooled = jnp.tanh(
        jnp.dot(cls_ref[...].astype(jnp.bfloat16), pw_ref[...],
                preferred_element_type=jnp.float32) + pb_ref[...])
    # Logits kept in a lane-padded (B, 128) tile; padded classes carry a -1e9
    # bias so they vanish from the log-sum-exp.
    logits = jnp.dot(pooled.astype(jnp.bfloat16), cw_ref[...],
                     preferred_element_type=jnp.float32) + cb_ref[...]
    m = jnp.max(logits, axis=-1, keepdims=True)
    lse = m + jnp.log(jnp.sum(jnp.exp(logits - m), axis=-1, keepdims=True))
    nll = lse - jnp.sum(onehot_ref[...] * logits, axis=-1, keepdims=True)
    # TODO(synk): an SMEM (1,1) output would avoid this one masked store; kept
    # in VMEM for lowering robustness.
    o_ref[...] = jnp.mean(nll, axis=0, keepdims=True)


def pooled_classifier_loss(cls_tok, p, onehot):
    B, H = cls_tok.shape
    L = LABEL_PAD
    full = lambda shape: pl.BlockSpec(shape, lambda: (0,) * len(shape))
    out = pl.pallas_call(
        _tail_kernel,
        out_shape=jax.ShapeDtypeStruct((1, 1), jnp.float32),
        in_specs=[full((B, H)), full((H, H)), full((1, H)),
                  full((H, L)), full((1, L)), full((B, L))],
        out_specs=full((1, 1)),
    )(cls_tok, p["pool_w"], p["pool_b"], p["cls_w"], p["cls_b"], onehot)
    return out[0, 0]


# ------------------------------ parameter setup -------------------------------
def init_params(key):
    def nrm(k, shape):
        return 0.02 * jax.random.normal(k, shape, dtype=jnp.float32)

    keys = jax.random.split(key, 6 + NUM_LAYERS)
    p = {
        "word_emb": nrm(keys[0], (VOCAB, HIDDEN)),
        "pos_emb": nrm(keys[1], (MAX_POS, HIDDEN)),
        "type_emb": nrm(keys[2], (TYPE_VOCAB, HIDDEN)),
        "emb_ln_g": jnp.ones((1, HIDDEN), jnp.float32),
        "emb_ln_b": jnp.zeros((1, HIDDEN), jnp.float32),
        "pool_w": nrm(keys[3], (HIDDEN, HIDDEN)).astype(jnp.bfloat16),
        "pool_b": jnp.zeros((1, HIDDEN), jnp.float32),
    }
    # Classifier weights padded to a full 128-lane tile; padded classes get a
    # -1e9 bias so exp(logit) == 0 in the softmax.
    cls_w = jnp.pad(nrm(keys[4], (HIDDEN, NUM_LABELS)),
                    ((0, 0), (0, LABEL_PAD - NUM_LABELS)))
    p["cls_w"] = cls_w.astype(jnp.bfloat16)
    p["cls_b"] = jnp.full((1, LABEL_PAD), -1e9,
                          jnp.float32).at[:, :NUM_LABELS].set(0.0)

    scale = 1.0 / (HEAD_DIM ** 0.5)
    stacks = {k: [] for k in ("wqkv", "bqkv", "wo", "bo", "ln1_g", "ln1_b",
                              "wi", "bi", "wo2", "bo2", "ln2_g", "ln2_b")}
    for li in range(NUM_LAYERS):
        lk = jax.random.split(keys[5 + li], 6)
        wq = nrm(lk[0], (HIDDEN, HIDDEN)) * scale      # fold 1/sqrt(hd) into wq
        wk = nrm(lk[1], (HIDDEN, HIDDEN))
        wv = nrm(lk[2], (HIDDEN, HIDDEN))
        stacks["wqkv"].append(jnp.concatenate([wq, wk, wv], axis=1))  # (H, 3H)
        stacks["bqkv"].append(jnp.zeros((1, 3 * HIDDEN), jnp.float32))
        stacks["wo"].append(nrm(lk[3], (HIDDEN, HIDDEN)))
        stacks["bo"].append(jnp.zeros((1, HIDDEN), jnp.float32))
        stacks["ln1_g"].append(jnp.ones((1, HIDDEN), jnp.float32))
        stacks["ln1_b"].append(jnp.zeros((1, HIDDEN), jnp.float32))
        stacks["wi"].append(nrm(lk[4], (HIDDEN, INTERMEDIATE)))
        stacks["bi"].append(jnp.zeros((1, INTERMEDIATE), jnp.float32))
        stacks["wo2"].append(nrm(lk[5], (INTERMEDIATE, HIDDEN)))
        stacks["bo2"].append(jnp.zeros((1, HIDDEN), jnp.float32))
        stacks["ln2_g"].append(jnp.ones((1, HIDDEN), jnp.float32))
        stacks["ln2_b"].append(jnp.zeros((1, HIDDEN), jnp.float32))

    matmul_weights = {"wqkv", "wo", "wi", "wo2"}         # bf16 on the MXU
    for name, lst in stacks.items():
        arr = jnp.stack(lst)                             # leading layer axis
        p[name] = arr.astype(jnp.bfloat16) if name in matmul_weights else arr
    return p


# ------------------------------- model forward --------------------------------
def bert_forward(params, text, label):
    """text: (B, S) int32 token ids, label: (B,) int32. Returns scalar CE loss."""
    B, S = text.shape

    # Embedding lookup as an XLA gather (memory op), pos/type added in f32.
    # TODO(synk): for a real 30k vocab, fold the gather into the encoder kernel
    # via PrefetchScalarGridSpec + pl.Element row indexing on word_emb.
    word = jnp.take(params["word_emb"], text.reshape(-1), axis=0)      # (B*S, H)
    pos = jnp.tile(params["pos_emb"][:S], (B, 1))                      # (B*S, H)
    tok_type = params["type_emb"][0][None, :]                          # ids == 0
    emb_sum = word + pos + tok_type

    # Whole encoder stack (emb-LN + all layers) in one pallas_call.
    hidden = encoder_stack(emb_sum, params)                            # (B*S, H)

    # Pooler (CLS token) + classifier + cross-entropy, fused in one kernel.
    cls_tok = hidden.reshape(B, S, HIDDEN)[:, 0, :]                    # (B, H)
    onehot = jax.nn.one_hot(label, LABEL_PAD, dtype=jnp.float32)
    return pooled_classifier_loss(cls_tok, params, onehot)


# ----------------------------------- main --------------------------------------
if __name__ == "__main__":
    key = jax.random.PRNGKey(0)
    pkey, tkey, lkey = jax.random.split(key, 3)

    params = init_params(pkey)
    text = jax.random.randint(tkey, (BATCH, SEQ), 0, VOCAB, dtype=jnp.int32)
    label = jax.random.randint(lkey, (BATCH,), 0, NUM_LABELS, dtype=jnp.int32)

    loss = jax.jit(bert_forward)(params, text, label)
    jax.block_until_ready(loss)
    assert loss.shape == () and bool(jnp.isfinite(loss))
    print("KERNEL_OK")
</pallas_src>

<mosaic_0001>
module attributes {stable_mosaic.version = 11 : i64} {
  func.func @_encoder_stack_kernel(%arg0: i32, %arg1: i32, %arg2: memref<128x256xf32, #tpu.memory_space<vmem>>, %arg3: memref<1x256xf32, #tpu.memory_space<vmem>>, %arg4: memref<1x256xf32, #tpu.memory_space<vmem>>, %arg5: memref<1x256x768xbf16, #tpu.memory_space<vmem>>, %arg6: memref<1x1x768xf32, #tpu.memory_space<vmem>>, %arg7: memref<1x256x256xbf16, #tpu.memory_space<vmem>>, %arg8: memref<1x1x256xf32, #tpu.memory_space<vmem>>, %arg9: memref<1x1x256xf32, #tpu.memory_space<vmem>>, %arg10: memref<1x1x256xf32, #tpu.memory_space<vmem>>, %arg11: memref<1x256x1024xbf16, #tpu.memory_space<vmem>>, %arg12: memref<1x1x1024xf32, #tpu.memory_space<vmem>>, %arg13: memref<1x1024x256xbf16, #tpu.memory_space<vmem>>, %arg14: memref<1x1x256xf32, #tpu.memory_space<vmem>>, %arg15: memref<1x1x256xf32, #tpu.memory_space<vmem>>, %arg16: memref<1x1x256xf32, #tpu.memory_space<vmem>>, %arg17: memref<128x256xf32, #tpu.memory_space<vmem>>) attributes {dimension_semantics = [#tpu.dimension_semantics<parallel>, #tpu.dimension_semantics<arbitrary>], iteration_bounds = array<i64: 2, 2>, scalar_prefetch = 0 : i64, scratch_operands = 0 : i64, tpu.core_type = #tpu.core_type<tc>, window_params = [{transform_indices = @transform_0, window_bounds = array<i64: 128, 256>}, {pipeline_mode = #tpu.pipeline_mode<synchronous>, transform_indices = @transform_1, window_bounds = array<i64: 1, 256>}, {pipeline_mode = #tpu.pipeline_mode<synchronous>, transform_indices = @transform_2, window_bounds = array<i64: 1, 256>}, {transform_indices = @transform_3, window_bounds = array<i64: 1, 256, 768>}, {transform_indices = @transform_4, window_bounds = array<i64: 1, 1, 768>}, {transform_indices = @transform_5, window_bounds = array<i64: 1, 256, 256>}, {transform_indices = @transform_6, window_bounds = array<i64: 1, 1, 256>}, {transform_indices = @transform_7, window_bounds = array<i64: 1, 1, 256>}, {transform_indices = @transform_8, window_bounds = array<i64: 1, 1, 256>}, {transform_indices = @transform_9, window_bounds = array<i64: 1, 256, 1024>}, {transform_indices = @transform_10, window_bounds = array<i64: 1, 1, 1024>}, {transform_indices = @transform_11, window_bounds = array<i64: 1, 1024, 256>}, {transform_indices = @transform_12, window_bounds = array<i64: 1, 1, 256>}, {transform_indices = @transform_13, window_bounds = array<i64: 1, 1, 256>}, {transform_indices = @transform_14, window_bounds = array<i64: 1, 1, 256>}, {transform_indices = @transform_15, window_bounds = array<i64: 128, 256>}]} {
    %c0_i32 = arith.constant 0 : i32
    %0 = arith.cmpi eq, %arg1, %c0_i32 : i32
    %1 = arith.extui %0 : i1 to i32
    %c0_i32_0 = arith.constant 0 : i32
    %2 = arith.cmpi ne, %1, %c0_i32_0 : i32
    scf.if %2 {
      %c0_65 = arith.constant 0 : index
      %c0_66 = arith.constant 0 : index
      %139 = vector.load %arg2[%c0_65, %c0_66] : memref<128x256xf32, #tpu.memory_space<vmem>>, vector<128x256xf32>
      %c0_67 = arith.constant 0 : index
      %c0_68 = arith.constant 0 : index
      %140 = vector.load %arg3[%c0_67, %c0_68] : memref<1x256xf32, #tpu.memory_space<vmem>>, vector<1x256xf32>
      %c0_69 = arith.constant 0 : index
      %c0_70 = arith.constant 0 : index
      %141 = vector.load %arg4[%c0_69, %c0_70] : memref<1x256xf32, #tpu.memory_space<vmem>>, vector<1x256xf32>
      %cst_71 = arith.constant dense<0.000000e+00> : vector<128xf32>
      %142 = vector.multi_reduction <add>, %139, %cst_71 [1] : vector<128x256xf32> to vector<128xf32>
      %143 = vector.shape_cast %142 : vector<128xf32> to vector<128x1xf32>
      %cst_72 = arith.constant 2.560000e+02 : f32
      %144 = vector.broadcast %cst_72 : f32 to vector<128x1xf32>
      %145 = arith.divf %143, %144 : vector<128x1xf32>
      %146 = vector.broadcast %145 : vector<128x1xf32> to vector<128x256xf32>
      %147 = arith.subf %139, %146 : vector<128x256xf32>
      %148 = arith.mulf %147, %147 : vector<128x256xf32>
      %cst_73 = arith.constant dense<0.000000e+00> : vector<128xf32>
      %149 = vector.multi_reduction <add>, %148, %cst_73 [1] : vector<128x256xf32> to vector<128xf32>
      %150 = vector.shape_cast %149 : vector<128xf32> to vector<128x1xf32>
      %cst_74 = arith.constant 2.560000e+02 : f32
      %151 = vector.broadcast %cst_74 : f32 to vector<128x1xf32>
      %152 = arith.divf %150, %151 : vector<128x1xf32>
      %cst_75 = arith.constant 9.99999996E-13 : f32
      %153 = vector.broadcast %cst_75 : f32 to vector<128x1xf32>
      %154 = arith.addf %152, %153 : vector<128x1xf32>
      %155 = math.rsqrt %154 : vector<128x1xf32>
      %156 = vector.broadcast %155 : vector<128x1xf32> to vector<128x256xf32>
      %157 = arith.mulf %147, %156 : vector<128x256xf32>
      %158 = vector.broadcast %140 : vector<1x256xf32> to vector<128x256xf32>
      %159 = arith.mulf %157, %158 : vector<128x256xf32>
      %160 = vector.broadcast %141 : vector<1x256xf32> to vector<128x256xf32>
      %161 = arith.addf %159, %160 : vector<128x256xf32>
      %c0_76 = arith.constant 0 : index
      %c0_77 = arith.constant 0 : index
      %162 = vector.load %arg17[%c0_76, %c0_77] : memref<128x256xf32, #tpu.memory_space<vmem>>, vector<128x256xf32>
      tpu.vector_store %arg17[%c0_76, %c0_77], %161 {strides = array<i32>} : memref<128x256xf32, #tpu.memory_space<vmem>>, vector<128x256xf32>,
    } else {
    }
    %c0 = arith.constant 0 : index
    %c0_1 = arith.constant 0 : index
    %3 = vector.load %arg17[%c0, %c0_1] : memref<128x256xf32, #tpu.memory_space<vmem>>, vector<128x256xf32>
    %4 = arith.truncf %3 : vector<128x256xf32> to vector<128x256xbf16>
    %c0_2 = arith.constant 0 : index
    %c0_3 = arith.constant 0 : index
    %c0_4 = arith.constant 0 : index
    %5 = vector.load %arg5[%c0_2, %c0_3, %c0_4] : memref<1x256x768xbf16, #tpu.memory_space<vmem>>, vector<1x256x768xbf16>
    %6 = vector.shape_cast %5 : vector<1x256x768xbf16> to vector<256x768xbf16>
    %cst = arith.constant dense<0.000000e+00> : vector<128x768xf32>
    %7 = tpu.matmul %4, %6, %cst {dimension_numbers = #tpu.dot_dimension_numbers<[1], [0], [0], [1], [0, 0, 1, 1], [], []>} : vector<128x256xbf16>, vector<256x768xbf16>, vector<128x768xf32> -> vector<128x768xf32>
    %c0_5 = arith.constant 0 : index
    %c0_6 = arith.constant 0 : index
    %c0_7 = arith.constant 0 : index
    %8 = vector.load %arg6[%c0_5, %c0_6, %c0_7] : memref<1x1x768xf32, #tpu.memory_space<vmem>>, vector<1x1x768xf32>
    %9 = vector.shape_cast %8 : vector<1x1x768xf32> to vector<1x768xf32>
    %10 = vector.broadcast %9 : vector<1x768xf32> to vector<128x768xf32>
    %11 = arith.addf %7, %10 : vector<128x768xf32>
    %12 = vector.extract_strided_slice %11 {offsets = [0, 0], sizes = [128, 128], strides = [1, 1]} : vector<128x768xf32> to vector<128x128xf32>
    %13 = arith.truncf %12 : vector<128x128xf32> to vector<128x128xbf16>
    %14 = vector.extract_strided_slice %11 {offsets = [0, 256], sizes = [128, 128], strides = [1, 1]} : vector<128x768xf32> to vector<128x128xf32>
    %15 = arith.truncf %14 : vector<128x128xf32> to vector<128x128xbf16>
    %16 = vector.extract_strided_slice %11 {offsets = [0, 512], sizes = [128, 128], strides = [1, 1]} : vector<128x768xf32> to vector<128x128xf32>
    %17 = arith.truncf %16 : vector<128x128xf32> to vector<128x128xbf16>
    %cst_8 = arith.constant dense<0.000000e+00> : vector<128x128xf32>
    %18 = tpu.matmul %13, %15, %cst_8 {dimension_numbers = #tpu.dot_dimension_numbers<[1], [1], [0], [0], [0, 0, 1, 0], [], []>} : vector<128x128xbf16>, vector<128x128xbf16>, vector<128x128xf32> -> vector<128x128xf32>
    %cst_9 = arith.constant dense<0xFF800000> : vector<128xf32>
    %19 = vector.multi_reduction <maximumf>, %18, %cst_9 [1] : vector<128x128xf32> to vector<128xf32>
    %20 = vector.shape_cast %19 : vector<128xf32> to vector<128x1xf32>
    %21 = vector.broadcast %20 : vector<128x1xf32> to vector<128x128xf32>
    %22 = arith.subf %18, %21 : vector<128x128xf32>
    %23 = math.exp %22 : vector<128x128xf32>
    %cst_10 = arith.constant dense<0.000000e+00> : vector<128xf32>
    %24 = vector.multi_reduction <add>, %23, %cst_10 [1] : vector<128x128xf32> to vector<128xf32>
    %25 = vector.shape_cast %24 : vector<128xf32> to vector<128x1xf32>
    %26 = tpu.reciprocal %25 {approx = true} : vector<128x1xf32> -> vector<128x1xf32>
    %27 = vector.broadcast %26 : vector<128x1xf32> to vector<128x128xf32>
    %28 = arith.mulf %23, %27 : vector<128x128xf32>
    %29 = arith.truncf %28 : vector<128x128xf32> to vector<128x128xbf16>
    %cst_11 = arith.constant dense<0.000000e+00> : vector<128x128xf32>
    %30 = tpu.matmul %29, %17, %cst_11 {dimension_numbers = #tpu.dot_dimension_numbers<[1], [0], [0], [1], [0, 0, 1, 1], [], []>} : vector<128x128xbf16>, vector<128x128xbf16>, vector<128x128xf32> -> vector<128x128xf32>
    %31 = vector.extract_strided_slice %11 {offsets = [0, 128], sizes = [128, 128], strides = [1, 1]} : vector<128x768xf32> to vector<128x128xf32>
    %32 = arith.truncf %31 : vector<128x128xf32> to vector<128x128xbf16>
    %33 = vector.extract_strided_slice %11 {offsets = [0, 384], sizes = [128, 128], strides = [1, 1]} : vector<128x768xf32> to vector<128x128xf32>
    %34 = arith.truncf %33 : vector<128x128xf32> to vector<128x128xbf16>
    %35 = vector.extract_strided_slice %11 {offsets = [0, 640], sizes = [128, 128], strides = [1, 1]} : vector<128x768xf32> to vector<128x128xf32>
    %36 = arith.truncf %35 : vector<128x128xf32> to vector<128x128xbf16>
    %cst_12 = arith.constant dense<0.000000e+00> : vector<128x128xf32>
    %37 = tpu.matmul %32, %34, %cst_12 {dimension_numbers = #tpu.dot_dimension_numbers<[1], [1], [0], [0], [0, 0, 1, 0], [], []>} : vector<128x128xbf16>, vector<128x128xbf16>, vector<128x128xf32> -> vector<128x128xf32>
    %cst_13 = arith.constant dense<0xFF800000> : vector<128xf32>
    %38 = vector.multi_reduction <maximumf>, %37, %cst_13 [1] : vector<128x128xf32> to vector<128xf32>
    %39 = vector.shape_cast %38 : vector<128xf32> to vector<128x1xf32>
    %40 = vector.broadcast %39 : vector<128x1xf32> to vector<128x128xf32>
    %41 = arith.subf %37, %40 : vector<128x128xf32>
    %42 = math.exp %41 : vector<128x128xf32>
    %cst_14 = arith.constant dense<0.000000e+00> : vector<128xf32>
    %43 = vector.multi_reduction <add>, %42, %cst_14 [1] : vector<128x128xf32> to vector<128xf32>
    %44 = vector.shape_cast %43 : vector<128xf32> to vector<128x1xf32>
    %45 = tpu.reciprocal %44 {approx = true} : vector<128x1xf32> -> vector<128x1xf32>
    %46 = vector.broadcast %45 : vector<128x1xf32> to vector<128x128xf32>
    %47 = arith.mulf %42, %46 : vector<128x128xf32>
    %48 = arith.truncf %47 : vector<128x128xf32> to vector<128x128xbf16>
    %cst_15 = arith.constant dense<0.000000e+00> : vector<128x128xf32>
    %49 = tpu.matmul %48, %36, %cst_15 {dimension_numbers = #tpu.dot_dimension_numbers<[1], [0], [0], [1], [0, 0, 1, 1], [], []>} : vector<128x128xbf16>, vector<128x128xbf16>, vector<128x128xf32> -> vector<128x128xf32>
    %50 = tpu.concatenate %30, %49 in 1 : vector<128x128xf32>, vector<128x128xf32> -> vector<128x256xf32>
    %51 = arith.truncf %50 : vector<128x256xf32> to vector<128x256xbf16>
    %c0_16 = arith.constant 0 : index
    %c0_17 = arith.constant 0 : index
    %c0_18 = arith.constant 0 : index
    %52 = vector.load %arg7[%c0_16, %c0_17, %c0_18] : memref<1x256x256xbf16, #tpu.memory_space<vmem>>, vector<1x256x256xbf16>
    %53 = vector.shape_cast %52 : vector<1x256x256xbf16> to vector<256x256xbf16>
    %cst_19 = arith.constant dense<0.000000e+00> : vector<128x256xf32>
    %54 = tpu.matmul %51, %53, %cst_19 {dimension_numbers = #tpu.dot_dimension_numbers<[1], [0], [0], [1], [0, 0, 1, 1], [], []>} : vector<128x256xbf16>, vector<256x256xbf16>, vector<128x256xf32> -> vector<128x256xf32>
    %c0_20 = arith.constant 0 : index
    %c0_21 = arith.constant 0 : index
    %c0_22 = arith.constant 0 : index
    %55 = vector.load %arg8[%c0_20, %c0_21, %c0_22] : memref<1x1x256xf32, #tpu.memory_space<vmem>>, vector<1x1x256xf32>
    %56 = vector.shape_cast %55 : vector<1x1x256xf32> to vector<1x256xf32>
    %57 = vector.broadcast %56 : vector<1x256xf32> to vector<128x256xf32>
    %58 = arith.addf %54, %57 : vector<128x256xf32>
    %59 = arith.addf %58, %3 : vector<128x256xf32>
    %c0_23 = arith.constant 0 : index
    %c0_24 = arith.constant 0 : index
    %c0_25 = arith.constant 0 : index
    %60 = vector.load %arg9[%c0_23, %c0_24, %c0_25] : memref<1x1x256xf32, #tpu.memory_space<vmem>>, vector<1x1x256xf32>
    %61 = vector.shape_cast %60 : vector<1x1x256xf32> to vector<1x256xf32>
    %c0_26 = arith.constant 0 : index
    %c0_27 = arith.constant 0 : index
    %c0_28 = arith.constant 0 : index
    %62 = vector.load %arg10[%c0_26, %c0_27, %c0_28] : memref<1x1x256xf32, #tpu.memory_space<vmem>>, vector<1x1x256xf32>
    %63 = vector.shape_cast %62 : vector<1x1x256xf32> to vector<1x256xf32>
    %cst_29 = arith.constant dense<0.000000e+00> : vector<128xf32>
    %64 = vector.multi_reduction <add>, %59, %cst_29 [1] : vector<128x256xf32> to vector<128xf32>
    %65 = vector.shape_cast %64 : vector<128xf32> to vector<128x1xf32>
    %cst_30 = arith.constant 2.560000e+02 : f32
    %66 = vector.broadcast %cst_30 : f32 to vector<128x1xf32>
    %67 = arith.divf %65, %66 : vector<128x1xf32>
    %68 = vector.broadcast %67 : vector<128x1xf32> to vector<128x256xf32>
    %69 = arith.subf %59, %68 : vector<128x256xf32>
    %70 = arith.mulf %69, %69 : vector<128x256xf32>
    %cst_31 = arith.constant dense<0.000000e+00> : vector<128xf32>
    %71 = vector.multi_reduction <add>, %70, %cst_31 [1] : vector<128x256xf32> to vector<128xf32>
    %72 = vector.shape_cast %71 : vector<128xf32> to vector<128x1xf32>
    %cst_32 = arith.constant 2.560000e+02 : f32
    %73 = vector.broadcast %cst_32 : f32 to vector<128x1xf32>
    %74 = arith.divf %72, %73 : vector<128x1xf32>
    %cst_33 = arith.constant 9.99999996E-13 : f32
    %75 = vector.broadcast %cst_33 : f32 to vector<128x1xf32>
    %76 = arith.addf %74, %75 : vector<128x1xf32>
    %77 = math.rsqrt %76 : vector<128x1xf32>
    %78 = vector.broadcast %77 : vector<128x1xf32> to vector<128x256xf32>
    %79 = arith.mulf %69, %78 : vector<128x256xf32>
    %80 = vector.broadcast %61 : vector<1x256xf32> to vector<128x256xf32>
    %81 = arith.mulf %79, %80 : vector<128x256xf32>
    %82 = vector.broadcast %63 : vector<1x256xf32> to vector<128x256xf32>
    %83 = arith.addf %81, %82 : vector<128x256xf32>
    %84 = arith.truncf %83 : vector<128x256xf32> to vector<128x256xbf16>
    %c0_34 = arith.constant 0 : index
    %c0_35 = arith.constant 0 : index
    %c0_36 = arith.constant 0 : index
    %85 = vector.load %arg11[%c0_34, %c0_35, %c0_36] : memref<1x256x1024xbf16, #tpu.memory_space<vmem>>, vector<1x256x1024xbf16>
    %86 = vector.shape_cast %85 : vector<1x256x1024xbf16> to vector<256x1024xbf16>
    %cst_37 = arith.constant dense<0.000000e+00> : vector<128x1024xf32>
    %87 = tpu.matmul %84, %86, %cst_37 {dimension_numbers = #tpu.dot_dimension_numbers<[1], [0], [0], [1], [0, 0, 1, 1], [], []>} : vector<128x256xbf16>, vector<256x1024xbf16>, vector<128x1024xf32> -> vector<128x1024xf32>
    %c0_38 = arith.constant 0 : index
    %c0_39 = arith.constant 0 : index
    %c0_40 = arith.constant 0 : index
    %88 = vector.load %arg12[%c0_38, %c0_39, %c0_40] : memref<1x1x1024xf32, #tpu.memory_space<vmem>>, vector<1x1x1024xf32>
    %89 = vector.shape_cast %88 : vector<1x1x1024xf32> to vector<1x1024xf32>
    %90 = vector.broadcast %89 : vector<1x1024xf32> to vector<128x1024xf32>
    %91 = arith.addf %87, %90 : vector<128x1024xf32>
    %cst_41 = arith.constant 5.000000e-01 : f32
    %92 = vector.broadcast %cst_41 : f32 to vector<128x1024xf32>
    %93 = arith.mulf %92, %91 : vector<128x1024xf32>
    %cst_42 = arith.constant 4.471500e-02 : f32
    %94 = vector.broadcast %cst_42 : f32 to vector<128x1024xf32>
    %95 = arith.mulf %94, %91 : vector<128x1024xf32>
    %96 = arith.mulf %95, %91 : vector<128x1024xf32>
    %97 = arith.mulf %96, %91 : vector<128x1024xf32>
    %98 = arith.addf %91, %97 : vector<128x1024xf32>
    %cst_43 = arith.constant 0.797884583 : f32
    %99 = vector.broadcast %cst_43 : f32 to vector<128x1024xf32>
    %100 = arith.mulf %99, %98 : vector<128x1024xf32>
    %101 = math.tanh %100 : vector<128x1024xf32>
    %cst_44 = arith.constant 1.000000e+00 : f32
    %102 = vector.broadcast %cst_44 : f32 to vector<128x1024xf32>
    %103 = arith.addf %102, %101 : vector<128x1024xf32>
    %104 = arith.mulf %93, %103 : vector<128x1024xf32>
    %105 = arith.truncf %104 : vector<128x1024xf32> to vector<128x1024xbf16>
    %c0_45 = arith.constant 0 : index
    %c0_46 = arith.constant 0 : index
    %c0_47 = arith.constant 0 : index
    %106 = vector.load %arg13[%c0_45, %c0_46, %c0_47] : memref<1x1024x256xbf16, #tpu.memory_space<vmem>>, vector<1x1024x256xbf16>
    %107 = vector.shape_cast %106 : vector<1x1024x256xbf16> to vector<1024x256xbf16>
    %cst_48 = arith.constant dense<0.000000e+00> : vector<128x256xf32>
    %108 = tpu.matmul %105, %107, %cst_48 {dimension_numbers = #tpu.dot_dimension_numbers<[1], [0], [0], [1], [0, 0, 1, 1], [], []>} : vector<128x1024xbf16>, vector<1024x256xbf16>, vector<128x256xf32> -> vector<128x256xf32>
    %c0_49 = arith.constant 0 : index
    %c0_50 = arith.constant 0 : index
    %c0_51 = arith.constant 0 : index
    %109 = vector.load %arg14[%c0_49, %c0_50, %c0_51] : memref<1x1x256xf32, #tpu.memory_space<vmem>>, vector<1x1x256xf32>
    %110 = vector.shape_cast %109 : vector<1x1x256xf32> to vector<1x256xf32>
    %111 = vector.broadcast %110 : vector<1x256xf32> to vector<128x256xf32>
    %112 = arith.addf %108, %111 : vector<128x256xf32>
    %113 = arith.addf %112, %83 : vector<128x256xf32>
    %c0_52 = arith.constant 0 : index
    %c0_53 = arith.constant 0 : index
    %c0_54 = arith.constant 0 : index
    %114 = vector.load %arg15[%c0_52, %c0_53, %c0_54] : memref<1x1x256xf32, #tpu.memory_space<vmem>>, vector<1x1x256xf32>
    %115 = vector.shape_cast %114 : vector<1x1x256xf32> to vector<1x256xf32>
    %c0_55 = arith.constant 0 : index
    %c0_56 = arith.constant 0 : index
    %c0_57 = arith.constant 0 : index
    %116 = vector.load %arg16[%c0_55, %c0_56, %c0_57] : memref<1x1x256xf32, #tpu.memory_space<vmem>>, vector<1x1x256xf32>
    %117 = vector.shape_cast %116 : vector<1x1x256xf32> to vector<1x256xf32>
    %cst_58 = arith.constant dense<0.000000e+00> : vector<128xf32>
    %118 = vector.multi_reduction <add>, %113, %cst_58 [1] : vector<128x256xf32> to vector<128xf32>
    %119 = vector.shape_cast %118 : vector<128xf32> to vector<128x1xf32>
    %cst_59 = arith.constant 2.560000e+02 : f32
    %120 = vector.broadcast %cst_59 : f32 to vector<128x1xf32>
    %121 = arith.divf %119, %120 : vector<128x1xf32>
    %122 = vector.broadcast %121 : vector<128x1xf32> to vector<128x256xf32>
    %123 = arith.subf %113, %122 : vector<128x256xf32>
    %124 = arith.mulf %123, %123 : vector<128x256xf32>
    %cst_60 = arith.constant dense<0.000000e+00> : vector<128xf32>
    %125 = vector.multi_reduction <add>, %124, %cst_60 [1] : vector<128x256xf32> to vector<128xf32>
    %126 = vector.shape_cast %125 : vector<128xf32> to vector<128x1xf32>
    %cst_61 = arith.constant 2.560000e+02 : f32
    %127 = vector.broadcast %cst_61 : f32 to vector<128x1xf32>
    %128 = arith.divf %126, %127 : vector<128x1xf32>
    %cst_62 = arith.constant 9.99999996E-13 : f32
    %129 = vector.broadcast %cst_62 : f32 to vector<128x1xf32>
    %130 = arith.addf %128, %129 : vector<128x1xf32>
    %131 = math.rsqrt %130 : vector<128x1xf32>
    %132 = vector.broadcast %131 : vector<128x1xf32> to vector<128x256xf32>
    %133 = arith.mulf %123, %132 : vector<128x256xf32>
    %134 = vector.broadcast %115 : vector<1x256xf32> to vector<128x256xf32>
    %135 = arith.mulf %133, %134 : vector<128x256xf32>
    %136 = vector.broadcast %117 : vector<1x256xf32> to vector<128x256xf32>
    %137 = arith.addf %135, %136 : vector<128x256xf32>
    %c0_63 = arith.constant 0 : index
    %c0_64 = arith.constant 0 : index
    %138 = vector.load %arg17[%c0_63, %c0_64] : memref<128x256xf32, #tpu.memory_space<vmem>>, vector<128x256xf32>
    tpu.vector_store %arg17[%c0_63, %c0_64], %137 {strides = array<i32>} : memref<128x256xf32, #tpu.memory_space<vmem>>, vector<128x256xf32>,
    return
  }
  func.func @transform_0(%arg0: i32, %arg1: i32) -> (i32, i32) {
    %c0_i32 = arith.constant 0 : i32
    %c0_i32_0 = arith.constant 0 : i32
    return %arg0, %c0_i32 : i32, i32
  }
  func.func @transform_1(%arg0: i32, %arg1: i32) -> (i32, i32) {
    %c0_i32 = arith.constant 0 : i32
    %c0_i32_0 = arith.constant 0 : i32
    %c0_i32_1 = arith.constant 0 : i32
    return %c0_i32, %c0_i32_0 : i32, i32
  }
  func.func @transform_2(%arg0: i32, %arg1: i32) -> (i32, i32) {
    %c0_i32 = arith.constant 0 : i32
    %c0_i32_0 = arith.constant 0 : i32
    %c0_i32_1 = arith.constant 0 : i32
    return %c0_i32, %c0_i32_0 : i32, i32
  }
  func.func @transform_3(%arg0: i32, %arg1: i32) -> (i32, i32, i32) {
    %c0_i32 = arith.constant 0 : i32
    %c0_i32_0 = arith.constant 0 : i32
    %c0_i32_1 = arith.constant 0 : i32
    return %arg1, %c0_i32, %c0_i32_0 : i32, i32, i32
  }
  func.func @transform_4(%arg0: i32, %arg1: i32) -> (i32, i32, i32) {
    %c0_i32 = arith.constant 0 : i32
    %c0_i32_0 = arith.constant 0 : i32
    %c0_i32_1 = arith.constant 0 : i32
    return %arg1, %c0_i32, %c0_i32_0 : i32, i32, i32
  }
  func.func @transform_5(%arg0: i32, %arg1: i32) -> (i32, i32, i32) {
    %c0_i32 = arith.constant 0 : i32
    %c0_i32_0 = arith.constant 0 : i32
    %c0_i32_1 = arith.constant 0 : i32
    return %arg1, %c0_i32, %c0_i32_0 : i32, i32, i32
  }
  func.func @transform_6(%arg0: i32, %arg1: i32) -> (i32, i32, i32) {
    %c0_i32 = arith.constant 0 : i32
    %c0_i32_0 = arith.constant 0 : i32
    %c0_i32_1 = arith.constant 0 : i32
    return %arg1, %c0_i32, %c0_i32_0 : i32, i32, i32
  }
  func.func @transform_7(%arg0: i32, %arg1: i32) -> (i32, i32, i32) {
    %c0_i32 = arith.constant 0 : i32
    %c0_i32_0 = arith.constant 0 : i32
    %c0_i32_1 = arith.constant 0 : i32
    return %arg1, %c0_i32, %c0_i32_0 : i32, i32, i32
  }
  func.func @transform_8(%arg0: i32, %arg1: i32) -> (i32, i32, i32) {
    %c0_i32 = arith.constant 0 : i32
    %c0_i32_0 = arith.constant 0 : i32
    %c0_i32_1 = arith.constant 0 : i32
    return %arg1, %c0_i32, %c0_i32_0 : i32, i32, i32
  }
  func.func @transform_9(%arg0: i32, %arg1: i32) -> (i32, i32, i32) {
    %c0_i32 = arith.constant 0 : i32
    %c0_i32_0 = arith.constant 0 : i32
    %c0_i32_1 = arith.constant 0 : i32
    return %arg1, %c0_i32, %c0_i32_0 : i32, i32, i32
  }
  func.func @transform_10(%arg0: i32, %arg1: i32) -> (i32, i32, i32) {
    %c0_i32 = arith.constant 0 : i32
    %c0_i32_0 = arith.constant 0 : i32
    %c0_i32_1 = arith.constant 0 : i32
    return %arg1, %c0_i32, %c0_i32_0 : i32, i32, i32
  }
  func.func @transform_11(%arg0: i32, %arg1: i32) -> (i32, i32, i32) {
    %c0_i32 = arith.constant 0 : i32
    %c0_i32_0 = arith.constant 0 : i32
    %c0_i32_1 = arith.constant 0 : i32
    return %arg1, %c0_i32, %c0_i32_0 : i32, i32, i32
  }
  func.func @transform_12(%arg0: i32, %arg1: i32) -> (i32, i32, i32) {
    %c0_i32 = arith.constant 0 : i32
    %c0_i32_0 = arith.constant 0 : i32
    %c0_i32_1 = arith.constant 0 : i32
    return %arg1, %c0_i32, %c0_i32_0 : i32, i32, i32
  }
  func.func @transform_13(%arg0: i32, %arg1: i32) -> (i32, i32, i32) {
    %c0_i32 = arith.constant 0 : i32
    %c0_i32_0 = arith.constant 0 : i32
    %c0_i32_1 = arith.constant 0 : i32
    return %arg1, %c0_i32, %c0_i32_0 : i32, i32, i32
  }
  func.func @transform_14(%arg0: i32, %arg1: i32) -> (i32, i32, i32) {
    %c0_i32 = arith.constant 0 : i32
    %c0_i32_0 = arith.constant 0 : i32
    %c0_i32_1 = arith.constant 0 : i32
    return %arg1, %c0_i32, %c0_i32_0 : i32, i32, i32
  }
  func.func @transform_15(%arg0: i32, %arg1: i32) -> (i32, i32) {
    %c0_i32 = arith.constant 0 : i32
    %c0_i32_0 = arith.constant 0 : i32
    return %arg0, %c0_i32 : i32, i32
  }
}

module attributes {stable_mosaic.version = 11 : i64} {
  func.func @_tail_kernel(%arg0: memref<2x256xf32, #tpu.memory_space<vmem>>, %arg1: memref<256x256xbf16, #tpu.memory_space<vmem>>, %arg2: memref<1x256xf32, #tpu.memory_space<vmem>>, %arg3: memref<256x128xbf16, #tpu.memory_space<vmem>>, %arg4: memref<1x128xf32, #tpu.memory_space<vmem>>, %arg5: memref<2x128xf32, #tpu.memory_space<vmem>>, %arg6: memref<1x1xf32, #tpu.memory_space<vmem>>) attributes {dimension_semantics = [], scalar_prefetch = 0 : i64, scratch_operands = 0 : i64, tpu.core_type = #tpu.core_type<tc>} {
    %c0 = arith.constant 0 : index
    %c0_0 = arith.constant 0 : index
    %0 = vector.load %arg0[%c0, %c0_0] : memref<2x256xf32, #tpu.memory_space<vmem>>, vector<2x256xf32>
    %1 = arith.truncf %0 : vector<2x256xf32> to vector<2x256xbf16>
    %c0_1 = arith.constant 0 : index
    %c0_2 = arith.constant 0 : index
    %2 = vector.load %arg1[%c0_1, %c0_2] : memref<256x256xbf16, #tpu.memory_space<vmem>>, vector<256x256xbf16>
    %cst = arith.constant dense<0.000000e+00> : vector<2x256xf32>
    %3 = tpu.matmul %1, %2, %cst {dimension_numbers = #tpu.dot_dimension_numbers<[1], [0], [0], [1], [0, 0, 1, 1], [], []>} : vector<2x256xbf16>, vector<256x256xbf16>, vector<2x256xf32> -> vector<2x256xf32>
    %c0_3 = arith.constant 0 : index
    %c0_4 = arith.constant 0 : index
    %4 = vector.load %arg2[%c0_3, %c0_4] : memref<1x256xf32, #tpu.memory_space<vmem>>, vector<1x256xf32>
    %5 = vector.broadcast %4 : vector<1x256xf32> to vector<2x256xf32>
    %6 = arith.addf %3, %5 : vector<2x256xf32>
    %7 = math.tanh %6 : vector<2x256xf32>
    %8 = arith.truncf %7 : vector<2x256xf32> to vector<2x256xbf16>
    %c0_5 = arith.constant 0 : index
    %c0_6 = arith.constant 0 : index
    %9 = vector.load %arg3[%c0_5, %c0_6] : memref<256x128xbf16, #tpu.memory_space<vmem>>, vector<256x128xbf16>
    %cst_7 = arith.constant dense<0.000000e+00> : vector<2x128xf32>
    %10 = tpu.matmul %8, %9, %cst_7 {dimension_numbers = #tpu.dot_dimension_numbers<[1], [0], [0], [1], [0, 0, 1, 1], [], []>} : vector<2x256xbf16>, vector<256x128xbf16>, vector<2x128xf32> -> vector<2x128xf32>
    %c0_8 = arith.constant 0 : index
    %c0_9 = arith.constant 0 : index
    %11 = vector.load %arg4[%c0_8, %c0_9] : memref<1x128xf32, #tpu.memory_space<vmem>>, vector<1x128xf32>
    %12 = vector.broadcast %11 : vector<1x128xf32> to vector<2x128xf32>
    %13 = arith.addf %10, %12 : vector<2x128xf32>
    %cst_10 = arith.constant dense<0xFF800000> : vector<2xf32>
    %14 = vector.multi_reduction <maximumf>, %13, %cst_10 [1] : vector<2x128xf32> to vector<2xf32>
    %15 = vector.shape_cast %14 : vector<2xf32> to vector<2x1xf32>
    %16 = vector.broadcast %15 : vector<2x1xf32> to vector<2x128xf32>
    %17 = arith.subf %13, %16 : vector<2x128xf32>
    %18 = math.exp %17 : vector<2x128xf32>
    %cst_11 = arith.constant dense<0.000000e+00> : vector<2xf32>
    %19 = vector.multi_reduction <add>, %18, %cst_11 [1] : vector<2x128xf32> to vector<2xf32>
    %20 = vector.shape_cast %19 : vector<2xf32> to vector<2x1xf32>
    %21 = math.log %20 : vector<2x1xf32>
    %22 = arith.addf %15, %21 : vector<2x1xf32>
    %c0_12 = arith.constant 0 : index
    %c0_13 = arith.constant 0 : index
    %23 = vector.load %arg5[%c0_12, %c0_13] : memref<2x128xf32, #tpu.memory_space<vmem>>, vector<2x128xf32>
    %24 = arith.mulf %23, %13 : vector<2x128xf32>
    %cst_14 = arith.constant dense<0.000000e+00> : vector<2xf32>
    %25 = vector.multi_reduction <add>, %24, %cst_14 [1] : vector<2x128xf32> to vector<2xf32>
    %26 = vector.shape_cast %25 : vector<2xf32> to vector<2x1xf32>
    %27 = arith.subf %22, %26 : vector<2x1xf32>
    %cst_15 = arith.constant dense<0.000000e+00> : vector<1xf32>
    %28 = vector.multi_reduction <add>, %27, %cst_15 [0] : vector<2x1xf32> to vector<1xf32>
    %29 = vector.shape_cast %28 : vector<1xf32> to vector<1x1xf32>
    %cst_16 = arith.constant 2.000000e+00 : f32
    %30 = vector.broadcast %cst_16 : f32 to vector<1x1xf32>
    %31 = arith.divf %29, %30 : vector<1x1xf32>
    %c0_17 = arith.constant 0 : index
    %c0_18 = arith.constant 0 : index
    %32 = vector.load %arg6[%c0_17, %c0_18] : memref<1x1xf32, #tpu.memory_space<vmem>>, vector<1x1xf32>
    tpu.vector_store %arg6[%c0_17, %c0_18], %31 {strides = array<i32>} : memref<1x1xf32, #tpu.memory_space<vmem>>, vector<1x1xf32>,
    return
  }
}

</mosaic_0001>

<bundles_post_ra>
// kernel: bert_forward.3
= control target key start
LH: loop header
LB: loop body
LE: loop exit
PB: predicated region body
PF: predicated region fallthrough
CT: control target
= control target key end

     0   :  { %s884_s0 = inlined_call_operand.vmem [shape: f32[2,256], index: 0, kind: input, shape index: {}]   ;;  %s885_s1 = inlined_call_operand.vmem [shape: bf16[256,256], index: 1, kind: input, shape index: {}]   ;;  %s886_s2 = inlined_call_operand.vmem [shape: f32[1,256], index: 2, kind: input, shape index: {}]   ;;  %s887_s3 = inlined_call_operand.vmem [shape: bf16[256,128], index: 3, kind: input, shape index: {}]   ;;  %s888_s4 = inlined_call_operand.vmem [shape: f32[1,128], index: 4, kind: input, shape index: {}]   ;;  %s889_s5 = inlined_call_operand.vmem [shape: f32[2,128], index: 5, kind: input, shape index: {}]   ;;  %s890_s6 = inlined_call_operand.hbm [shape: f32[1,1], index: 6, kind: output, shape index: {}]  }
   0x1   :  { %v580_v0 = vld [vmem:[%s885_s1 + $0x4] ss:$8 sps:$4 sm:$0xff]   ;;  %v582_v1 = vld [vmem:[%s885_s1] ss:$8 sps:$4 sm:$0xff]   ;;  %v583_v2 = vld [vmem:[%s885_s1 + $0x14] ss:$8 sps:$4 sm:$0xff]  }
   0x2   :  { %243 = vmatprep.subr.bf16.mxu0 %v580_v0  ;;  %v585_v3 = vld [vmem:[%s885_s1 + $0x10] ss:$8 sps:$4 sm:$0xff]   ;;  %v586_v4 = vld [vmem:[%s885_s1 + $0x24] ss:$8 sps:$4 sm:$0xff]   ;;  %v588_v5 = vld [vmem:[%s885_s1 + $0x20] ss:$8 sps:$4 sm:$0xff]  }
   0x3   :  { %244 = vmatpush1.bf16.msra.mxu0 %v582_v1  ;;  %v589_v6 = vld [vmem:[%s885_s1 + $0x34] ss:$8 sps:$4 sm:$0xff]   ;;  %v591_v7 = vld [vmem:[%s885_s1 + $0x30] ss:$8 sps:$4 sm:$0xff]   ;;  %v592_v8 = vld [vmem:[%s885_s1 + $0x44] ss:$8 sps:$4 sm:$0xff]  }
   0x4   :  { %245 = vmatprep.subr.bf16.mxu0 %v583_v2  ;;  %v594_v9 = vld [vmem:[%s885_s1 + $0x40] ss:$8 sps:$4 sm:$0xff]   ;;  %v595_v10 = vld [vmem:[%s885_s1 + $0x54] ss:$8 sps:$4 sm:$0xff]   ;;  %v597_v11 = vld [vmem:[%s885_s1 + $0x50] ss:$8 sps:$4 sm:$0xff]  }
   0x5   :  { %v598_v12 = vld [vmem:[%s885_s1 + $0x64] ss:$8 sps:$4 sm:$0xff]   ;;  %v600_v13 = vld [vmem:[%s885_s1 + $0x60] ss:$8 sps:$4 sm:$0xff]   ;;  %v601_v15 = vld [vmem:[%s885_s1 + $0x74] ss:$8 sps:$4 sm:$0xff]  }
   0x6   :  { %v507_v14 = vld.sshfl [vmem:[%s884_s0] sm:$0x33 pattern:$0x76325410]  ;;  %v630_v20 = vld [vmem:[%s887_s3 + $0x48] sm:$0xff]   ;;  %v632_v22 = vld [vmem:[%s887_s3 + $0x50] sm:$0xff]  }
   0x7   :  { %246 = vmatpush1.bf16.msra.mxu0 %v585_v3  ;;  %v34_v16 = vcombine.high %v507_v14, %v507_v14  ;;  %v628_v17 = vld [vmem:[%s887_s3 + $0x40] sm:$0xff]   ;;  %v631_v21 = vld [vmem:[%s887_s3 + $0x8] sm:$0xff]   ;;  %v603_v23 = vld [vmem:[%s885_s1 + $0x70] ss:$8 sps:$4 sm:$0xff]  }
   0x8   :  { %247 = vmatprep.subr.bf16.mxu0 %v586_v4  ;;  %v629_v18 = vld [vmem:[%s887_s3] sm:$0xff]   ;;  %557 = vmatprep.subr.bf16.mxu1 %v628_v17  ;;  %v633_v26 = vld [vmem:[%s887_s3 + $0x10] sm:$0xff]   ;;  %v634_v28 = vld [vmem:[%s887_s3 + $0x58] sm:$0xff]  }
   0x9   :  { %v38_v19 = vpack.c.bf16 %v34_v16, %v34_v16  ;;  %558 = vmatpush3.bf16.msra.mxu1 %v629_v18  ;;  %v604_v24 = vld [vmem:[%s885_s1 + $0x84] ss:$8 sps:$4 sm:$0xff]   ;;  %v606_v25 = vld [vmem:[%s885_s1 + $0x80] ss:$8 sps:$4 sm:$0xff]   ;;  %v607_v27 = vld [vmem:[%s885_s1 + $0x94] ss:$8 sps:$4 sm:$0xff]  }
   0xa   :  { %559 = vmatprep.subr.bf16.mxu1 %v630_v20  ;;  %v635_v29 = vld [vmem:[%s887_s3 + $0x18] sm:$0xff]  }
   0xb   :  { %248 = vmatpush1.bf16.msra.mxu0 %v588_v5  ;;  %275 = vmatprep.mubr.bf16.mxu0 %v38_v19  ;;  %v609_v30 = vld [vmem:[%s885_s1 + $0x90] ss:$8 sps:$4 sm:$0xff]  }
   0xc   :  { %249 = vmatprep.subr.bf16.mxu0 %v589_v6 }
   0xd   :  { %560 = vmatpush3.bf16.msra.mxu1 %v631_v21 }
   0xe   :  { %561 = vmatprep.subr.bf16.mxu1 %v632_v22 }
   0xf   :  { %250 = vmatpush1.bf16.msra.mxu0 %v591_v7 }
  0x10   :  { %251 = vmatprep.subr.bf16.mxu0 %v592_v8 }
  0x11   :  { %562 = vmatpush3.bf16.msra.mxu1 %v633_v26 }
  0x12   :  { %563 = vmatprep.subr.bf16.mxu1 %v634_v28 }
  0x13   :  { %252 = vmatpush1.bf16.msra.mxu0 %v594_v9 }
  0x14   :  { %253 = vmatprep.subr.bf16.mxu0 %v595_v10 }
  0x17   :  { %254 = vmatpush1.bf16.msra.mxu0 %v597_v11 }
  0x18   :  { %255 = vmatprep.subr.bf16.mxu0 %v598_v12 }
  0x1b   :  { %256 = vmatpush1.bf16.msra.mxu0 %v600_v13 }
  0x1c   :  { %257 = vmatprep.subr.bf16.mxu0 %v601_v15 }
  0x1f   :  { %258 = vmatpush1.bf16.msra.mxu0 %v603_v23 }
  0x20   :  { %259 = vmatprep.subr.bf16.mxu0 %v604_v24 }
  0x23   :  { %260 = vmatpush1.bf16.msra.mxu0 %v606_v25 }
  0x24   :  { %11 = vsyncpa [#allocation3], 0  ;;  %261 = vmatprep.subr.bf16.mxu0 %v607_v27  ;;  %v610_v31 = vld [vmem:[%s885_s1 + $0xa4] ss:$8 sps:$4 sm:$0xff]   ;;  %564 = vmatpush3.bf16.msra.mxu1 %v635_v29  ;;  %v612_v32 = vld [vmem:[%s885_s1 + $0xa0] ss:$8 sps:$4 sm:$0xff]   ;;  %v37_v43 = vpack.c.bf16 %v507_v14, %v507_v14  ;;  %v73_v52 = vlaneseq }
  0x25   :  { %v613_v33 = vld [vmem:[%s885_s1 + $0xb4] ss:$8 sps:$4 sm:$0xff]   ;;  %v615_v34 = vld [vmem:[%s885_s1 + $0xb0] ss:$8 sps:$4 sm:$0xff]   ;;  %v616_v35 = vld [vmem:[%s885_s1 + $0xc4] ss:$8 sps:$4 sm:$0xff]  }
  0x26   :  { %v618_v36 = vld [vmem:[%s885_s1 + $0xc0] ss:$8 sps:$4 sm:$0xff]   ;;  %v619_v37 = vld [vmem:[%s885_s1 + $0xd4] ss:$8 sps:$4 sm:$0xff]   ;;  %v621_v38 = vld [vmem:[%s885_s1 + $0xd0] ss:$8 sps:$4 sm:$0xff]  }
  0x27   :  { %262 = vmatpush1.bf16.msra.mxu0 %v609_v30  ;;  %v622_v39 = vld [vmem:[%s885_s1 + $0xe4] ss:$8 sps:$4 sm:$0xff]   ;;  %v624_v40 = vld [vmem:[%s885_s1 + $0xe0] ss:$8 sps:$4 sm:$0xff]   ;;  %v625_v41 = vld [vmem:[%s885_s1 + $0xf4] ss:$8 sps:$4 sm:$0xff]  }
  0x28   :  { %263 = vmatprep.subr.bf16.mxu0 %v610_v31  ;;  %v627_v42 = vld [vmem:[%s885_s1 + $0xf0] ss:$8 sps:$4 sm:$0xff]   ;;  %v636_v44 = vld [vmem:[%s887_s3 + $0x60] sm:$0xff]   ;;  %v638_v46 = vld [vmem:[%s887_s3 + $0x68] sm:$0xff]   ;;  %v74_v53 = vshrl.u32 %v73_v52, 7  ;;  %vm463_vm0 = vcmask 1041408  }
  0x29   :  { %v637_v45 = vld [vmem:[%s887_s3 + $0x20] sm:$0xff]   ;;  %565 = vmatprep.subr.bf16.mxu1 %v636_v44  ;;  %v639_v47 = vld [vmem:[%s887_s3 + $0x28] sm:$0xff]   ;;  %v640_v48 = vld [vmem:[%s887_s3 + $0x70] sm:$0xff]   ;;  %vm491_vm1 = vcmask 0  }
  0x2a   :  { %566 = vmatpush3.bf16.msra.mxu1 %v637_v45  ;;  %v641_v49 = vld [vmem:[%s887_s3 + $0x30] sm:$0xff]   ;;  %v642_v50 = vld [vmem:[%s887_s3 + $0x78] sm:$0xff]   ;;  %v75_v54 = vsub.s32 0, %v74_v53  ;;  %v71_v55 = vld [vmem:[%s886_s2] sm:$0x3]  ;;  %v79_v56 = vsub.s32 1, %v74_v53 }
  0x2b   :  { %264 = vmatpush1.bf16.msra.mxu0 %v612_v32  ;;  %567 = vmatprep.subr.bf16.mxu1 %v638_v46  ;;  %v643_v51 = vld [vmem:[%s887_s3 + $0x38] sm:$0xff]   ;;  %v540_v6 = vld [vmem:[%s888_s4] ss:$0 sm:$0xff]  ;;  %s676_s4 = smov [#allocation2]  }
  0x2c   :  { %265 = vmatprep.subr.bf16.mxu0 %v613_v33  ;;  %v76_v57 = vrot.slane %v71_v55, %v75_v54  ;;  %v80_v58 = vrot.slane %v71_v55, %v79_v56  ;;  %v476_v11 = vld [vmem:[%s889_s5] sm:$0x3]  ;;  %s499_s5 = sshll.u32 %s676_s4, 4  ;;  %s500_s5 = int_to_ptr.vmem [resolvable:$true] %s499_s5 }
  0x2d   :  { %s652_s23 = scalar_lea.vmem %s500_s5, 16  ;;  %s656_s24 = scalar_lea.vmem %s500_s5, 32 }
  0x2e   :  { %568 = vmatpush3.bf16.msra.mxu1 %v639_v47  ;;  %p653_p0 = scmp.ne.s32.totalorder %s500_s5, %s652_s23  ;;  %p657_p1 = scmp.lt.s32.totalorder %s500_s5, %s500_s5 }
  0x2f   :  { %266 = vmatpush1.bf16.msra.mxu0 %v615_v34  ;;  %569 = vmatprep.subr.bf16.mxu1 %v640_v48  ;;  %p658_p2 = scmp.lt.s32.totalorder %s656_s24, %s652_s23 }
  0x30   :  { %267 = vmatprep.subr.bf16.mxu0 %v616_v35 }
  0x31   :  { %p659_p3 = por %p658_p2, %p657_p1 }
  0x32   :  { %570 = vmatpush3.bf16.msra.mxu1 %v641_v49 }
  0x33   :  { %268 = vmatpush1.bf16.msra.mxu0 %v618_v36  ;;  %571 = vmatprep.subr.bf16.mxu1 %v642_v50  ;;  %p660_p4 = pnand %p659_p3, %p653_p0 }
  0x34   :  { %269 = vmatprep.subr.bf16.mxu0 %v619_v37 }
  0x36   :  { %572 = vmatpush3.bf16.msra.mxu1 %v643_v51 }
  0x37   :  { %270 = vmatpush1.bf16.msra.mxu0 %v621_v38 }
  0x38   :  { %271 = vmatprep.subr.bf16.mxu0 %v622_v39 }
  0x3b   :  { %272 = vmatpush1.bf16.msra.mxu0 %v624_v40 }
  0x3c   :  { %273 = vmatprep.subr.bf16.mxu0 %v625_v41 }
  0x3f   :  { %274 = vmatpush1.bf16.msra.mxu0 %v627_v42 }
  0x42   :  { %276 = vmatmul.mubr.bf16.vlgmr.msra.gmra.mrb[0].mxu0 %v37_v43 }
 0x115   :  { %v277_v59 = vpop.f32.mrb[0].mxu0 }
 0x116   :  { %v278_v60 = vadd.f32 %v277_v59, %v76_v57  ;;  %v279_v61 = vpop.f32.mrb[1].mxu0 }
 0x117   :  { %v280_v62 = vadd.f32 %v279_v61, %v80_v58  ;;  %v281_v63 = vpop.f32.mrb[2].mxu0 }
 0x118   :  { %644 = vtanh.f32 %v278_v60  ;;  %v282_v0 = vpop.f32.mrb[3].mxu0 }
 0x119   :  { %646 = vtanh.f32 %v280_v62 }
 0x122   :  { %v645_v1 = vpop.eup %644 }
 0x123   :  { %v647_v2 = vpop.eup %646  ;;  %v286_v4 = vpack.c.bf16 %v645_v1, %v645_v1 }
 0x124   :  { %v287_v3 = vpack.c.bf16 %v647_v2, %v647_v2 }
 0x126   :  { %455 = vmatprep.mubr.bf16.mxu1 %v287_v3 }
 0x127   :  { %456 = vmatmul.mubr.bf16.vlgmr.msra.gmra.mrb[0].mxu1 %v286_v4 }
 0x1fa   :  { %v573_v5 = vpop.f32.mrb[0].mxu1 }
 0x1fb   :  { %v574_v7 = vpop.f32.mrb[1].mxu1 }
 0x1fc   :  { %v575_v8 = vadd.f32 %v574_v7, %v573_v5  ;;  %v576_v9 = vpop.f32.mrb[2].mxu1 }
 0x1fd   :  { %v577_v10 = vpop.f32.mrb[3].mxu1 }
 0x1fe   :  { %v458_v12 = vadd.f32 %v575_v8, %v540_v6 }
 0x200   :  { %v464_v13 = vsel %vm463_vm0, %v458_v12, -inf  ;;  %v477_v14 = vmul.f32 %v476_v11, %v458_v12 }
 0x201   :  { %465 = vmax.xlane.f32.xlu0 %v464_v13 }
 0x202   :  { %v478_v15 = vsel %vm463_vm0, %v477_v14, 0.0 }
 0x203   :  { %479 = vadd.xlane.f32.xlu1 %v478_v15 }
 0x28e   :  { %v466_v16 = vpop.xlane.xlu0 %465 }
 0x28f   :  { %v467_v17 = vsub.f32 %v458_v12, %v466_v16 }
 0x290   :  { %v480_v25 = vpop.xlane.xlu1 %479 }
 0x291   :  { %v468_v18 = vmul.f32 1.442695, %v467_v17 }
 0x293   :  { %648 = vpow2.f32 %v468_v18 }
 0x29d   :  { %v649_v19 = vpop.eup %648 }
 0x29e   :  { %v470_v20 = vsel %vm463_vm0, %v649_v19, 0.0 }
 0x29f   :  { %471 = vadd.xlane.f32.xlu0 %v470_v20 }
 0x32c   :  { %v472_v21 = vpop.xlane.xlu0 %471 }
 0x32d   :  { %650 = vlog2.f32 %v472_v21 }
 0x337   :  { %v651_v22 = vpop.eup %650 }
 0x338   :  { %v474_v23 = vmul.f32 0.6931472, %v651_v22 }
 0x33a   :  { %v475_v24 = vadd.f32 %v474_v23, %v466_v16 }
 0x33c   :  { %v481_v26 = vsub.f32 %v475_v24, %v480_v25 }
 0x33e   :  { %v482_v27 = vsel %vm463_vm0, %v481_v26, 0.0 }
 0x33f   :  { %v483_v28 = vrot.slane %v482_v27, 4 }
 0x341   :  { %v484_v29 = vadd.f32 %v483_v28, %v482_v27 }
 0x343   :  { %v485_v30 = vrot.slane %v484_v29, 2 }
 0x345   :  { %v486_v31 = vadd.f32 %v485_v30, %v484_v29 }
 0x347   :  { %v487_v32 = vrot.slane %v486_v31, 1 }
 0x349   :  { %v488_v33 = vadd.f32 %v487_v32, %v486_v31 }
 0x34b   :  { %v490_v34 = vmul.f32 0.5, %v488_v33 }
 0x34d   :  { %492 = vst.msk [vmem:[#allocation2] sm:$0x1] %vm491_vm1, %v490_v34 }
 0x34e   :  { %663 = shalt.err (!%p660_p4)
}
 0x34f   :  { %s664_s27 = scalar_lea.hbm %s890_s6, 16 }
 0x350   :  { %p665_p5 = scmp.ne.s32.totalorder %s890_s6, %s664_s27  ;;  %p668_p6 = scmp.lt.u32.totalorder %s664_s27, %s890_s6 }
 0x352   :  { %p670_p7 = pnand %p668_p6, %p665_p5 }
 0x354   :  { %673 = shalt.err (!%p670_p7)
}
 0x355   :  { %502 = dma.vmem_to_hbm [thread:$0]  %s500_s5, 16, %s890_s6, [#allocation3]  }
 0x356   :  { %674 = dma.done.wait [#allocation3], 16  }
 0x357   :  { %675 = vsyncadd [#allocation3], 4294967280 }
 0x358   :  { %506 = vsyncpa [#allocation3], 1 }

// kernel: bert_forward.2
= control target key start
LH: loop header
LB: loop body
LE: loop exit
PB: predicated region body
PF: predicated region fallthrough
CT: control target
= control target key end

     0   :  { %s9733_s18 = smov 0   ;;  %s9735_s19 = smov 0   ;;  %s14482_s0 = inlined_call_operand.vmem [shape: f32[256,256], index: 0, kind: input, shape index: {}]   ;;  %s14483_s1 = inlined_call_operand.vmem [shape: f32[1,256], index: 1, kind: input, shape index: {}]   ;;  %s14484_s2 = inlined_call_operand.vmem [shape: f32[1,256], index: 2, kind: input, shape index: {}]   ;;  %s14485_s3 = inlined_call_operand.vmem [shape: bf16[2,256,768], index: 3, kind: input, shape index: {}]   ;;  %s14486_s4 = inlined_call_operand.vmem [shape: f32[2,1,768], index: 4, kind: input, shape index: {}]   ;;  %s14487_s5 = inlined_call_operand.vmem [shape: bf16[2,256,256], index: 5, kind: input, shape index: {}]   ;;  %s14488_s6 = inlined_call_operand.vmem [shape: f32[2,1,256], index: 6, kind: input, shape index: {}]   ;;  %s14489_s7 = inlined_call_operand.vmem [shape: f32[2,1,256], index: 7, kind: input, shape index: {}]   ;;  %s14490_s8 = inlined_call_operand.vmem [shape: f32[2,1,256], index: 8, kind: input, shape index: {}]   ;;  %s14491_s9 = inlined_call_operand.vmem [shape: bf16[2,256,1024], index: 9, kind: input, shape index: {}]   ;;  %s14492_s10 = inlined_call_operand.vmem [shape: f32[2,1,1024], index: 10, kind: input, shape index: {}]   ;;  %s14493_s11 = inlined_call_operand.vmem [shape: bf16[2,1024,256], index: 11, kind: input, shape index: {}]   ;;  %s14494_s12 = inlined_call_operand.vmem [shape: f32[2,1,256], index: 12, kind: input, shape index: {}]   ;;  %s14495_s13 = inlined_call_operand.vmem [shape: f32[2,1,256], index: 13, kind: input, shape index: {}]   ;;  %s14496_s14 = inlined_call_operand.vmem [shape: f32[2,1,256], index: 14, kind: input, shape index: {}]   ;;  %s14497_s15 = inlined_call_operand.vmem [shape: f32[256,256], index: 15, kind: output, shape index: {}]  }
   0x1   :  { %14727 = sst [smem:[#allocation177_spill]] %s14482_s0  ;;  %s9737_s20 = smov 0  }
   0x2   :  { %14728 = sst [smem:[#allocation178_spill]] %s14483_s1  ;;  %s9739_s21 = smov 0  }
   0x3   :  { %14729 = sst [smem:[#allocation179_spill]] %s14484_s2  ;;  %s9741_s22 = smov 0  }
   0x4   :  { %14730 = sst [smem:[#allocation180_spill]] %s14485_s3 }
   0x5   :  { %14731 = sst [smem:[#allocation181_spill]] %s14486_s4 }
   0x6   :  { %14732 = sst [smem:[#allocation182_spill]] %s14487_s5 }
   0x7   :  { %14733 = sst [smem:[#allocation183_spill]] %s14491_s9 }
   0x8   :  { %14734 = sst [smem:[#allocation184_spill]] %s14497_s15 }
   0x9 LB: > { %14735 = sst [smem:[#allocation2_spill]] %s9635_s18  ;;  %s34_s23 = sadd.s32 1, %s9643_s20  ;;  %s9651_s22 = sphi %s9741_s22, %s25_s22   ;;  %s9647_s21 = sphi %s9739_s21, %s15291_s21   ;;  %s9643_s20 = sphi %s9737_s20, %s15290_s20   ;;  %s9639_s19 = sphi %s9735_s19, %s15289_s19   ;;  %s9635_s18 = sphi %s9733_s18, %s15288_s18  }
   0xa   : > { %14736 = sst [smem:[#allocation3_spill]] %s9643_s20  ;;  %s37_s24 = sadd.s32 1, %s9647_s21 }
   0xb   : > { %14737 = sst [smem:[#allocation4_spill]] %s9647_s21  ;;  %p35_p0 = scmp.ge.s32.totalorder %s34_s23, 2 }
   0xc   : > { %14738 = sst [smem:[#allocation5_spill]] %s9651_s22  ;;  %p7942_p1 = scmp.ge.s32.totalorder %s9651_s22, 1 }
   0xd   : > { %p563_p2 = scmp.lt.s32.totalorder %s9651_s22, 5  ;;  %s15293_s23 = smov (%p35_p0, %s34_s23), 0 }
   0xe   : > { %14739 = sst [smem:[#allocation6_spill]] %s15293_s23  ;;  %s15295_s24 = smov (!%p35_p0, %s37_s24), %s9647_s21 }
   0xf   : > { %p564_p3 = pnand %p7942_p1, %p563_p2  ;;  %p39_p4 = scmp.ge.s32.totalorder %s15295_s24, 2 }
  0x11   : > { %s15297_s24 = smov (%p39_p4, %s15295_s24), 0  ;;  %567 = sbr.rel (%p564_p3) target bundleno = 3242 (0xcaa), region = 80 }
  0x12   : > { %14740 = sst [smem:[#allocation7_spill]] %s15297_s24 }
  0x18   : > { %s7943_s25 = sshll.u32 %s9639_s19, 4  ;;  %p672_p5 = scmp.lt.s32.totalorder %s9635_s18, 1 }
  0x19   : > { %p666_p6 = scmp.lt.s32.totalorder %s7943_s25, 31  ;;  %s14741_s0 = sld [smem:[#allocation177_spill]] }
  0x1a   : > { %s673_s26 = scalar_select %p672_p5, %s9635_s18, 1 }
  0x1b   : > { %s15299_s25 = smov (!%p666_p6, %s7943_s25), 31  ;;  %s14742_s3 = sld [smem:[#allocation180_spill]] }
  0x1c   : > { %s8675_s27 = smul.u32 768, %s673_s26  ;;  %s8351_s28 = sshll.u32 %s673_s26, 8 }
  0x1d   : > { %s8350_s29 = sshll.u32 %s15299_s25, 4  ;;  %s8676_s30 = smul.u32 6, %s673_s26 }
  0x1e   : > { %s14743_s4 = sld [smem:[#allocation181_spill]]  ;;  %s14745_s5 = sld [smem:[#allocation182_spill]] }
  0x1f   : > { %s9770_s23 = scalar_lea.vmem %s14741_s0, %s8350_s29  ;;  %s9787_s15 = sshll.u32 %s673_s26, 1 }
  0x20   : > { %s8352_s20 = sshll.u32 %s673_s26, 10  ;;  %s14747_s9 = sld [smem:[#allocation183_spill]] }
  0x21   : > { %s9775_s24 = scalar_lea.vmem %s14742_s3, %s8675_s27  ;;  %s715_s1 = scalar_lea.vmem %s14494_s12, %s9787_s15 }
  0x22   : > { %s719_s0 = scalar_lea.vmem %s14495_s13, %s9787_s15  ;;  %s723_s22 = scalar_lea.vmem %s14496_s14, %s9787_s15 }
  0x23   : > { %s14749_s21 = sld [smem:[#allocation2_spill]] }
  0x24   : > { %s9780_s2 = scalar_lea.vmem %s14743_s4, %s8676_s30  ;;  %s9785_s25 = scalar_lea.vmem %s14745_s5, %s8351_s28 }
  0x25   : > { %14744 = sst [smem:[#allocation8_spill]] %s9780_s2  ;;  %s7954_s4 = sshll.u32 %s673_s26, 3 }
  0x26   : > { %14746 = sst [smem:[#allocation9_spill]] %s9785_s25  ;;  %s9804_s3 = scalar_lea.vmem %s14747_s9, %s8352_s20 }
  0x27   : > { %s9809_s2 = scalar_lea.vmem %s14493_s11, %s8352_s20  ;;  %s9814_s30 = scalar_lea.vmem %s14492_s10, %s7954_s4 }
  0x28   : > { %s14748_s20 = sld [smem:[#allocation184_spill]] }
  0x29   : > { %p7963_p7 = scmp.ne.s32.totalorder %s14749_s21, 0 }
  0x2a   : > { %v9835_v0 = vld [vmem:[%s9770_s23] sm:$0xff] (!%p7963_p7)  ;;  %v9838_v1 = vld [vmem:[%s9770_s23 + $0x8] sm:$0xff] (!%p7963_p7)  ;;  %v9849_v5 = vld [vmem:[%s9770_s23 + $0x10] sm:$0xff] (!%p7963_p7)  ;;  %s14751_s27 = sld [smem:[#allocation179_spill]] (!%p7963_p7) }
  0x2b   : > { %735 = sbr.rel (%p7963_p7) target bundleno = 396 (0x18c), region = 84  ;;  %v9841_v2 = vld [vmem:[%s9770_s23 + $0x20] sm:$0xff] (!%p7963_p7)  ;;  %v770_v3 = vadd.f32 (!%p7963_p7), %v9838_v1, %v9835_v0  ;;  %v9846_v4 = vld [vmem:[%s9770_s23 + $0x28] sm:$0xff] (!%p7963_p7)  ;;  %v9852_v6 = vld [vmem:[%s9770_s23 + $0x18] sm:$0xff] (!%p7963_p7) }
  0x2c   : > { %v776_v7 = vadd.f32 (!%p7963_p7), %v9846_v4, %v9841_v2  ;;  %v9857_v8 = vld [vmem:[%s9770_s23 + $0x30] sm:$0xff] (!%p7963_p7)  ;;  %v9860_v9 = vld [vmem:[%s9770_s23 + $0x38] sm:$0xff] (!%p7963_p7)  ;;  %v773_v10 = vadd.f32 (!%p7963_p7), %v9852_v6, %v9849_v5  ;;  %v9867_v12 = vld [vmem:[%s9770_s23 + $0x40] sm:$0xff] (!%p7963_p7) }
  0x2d   : > { %771 = vadd.xlane.f32.xlu0 (!%p7963_p7), %v770_v3  ;;  %v779_v11 = vadd.f32 (!%p7963_p7), %v9860_v9, %v9857_v8  ;;  %v9870_v13 = vld [vmem:[%s9770_s23 + $0x48] sm:$0xff] (!%p7963_p7)  ;;  %v9873_v14 = vld [vmem:[%s9770_s23 + $0x50] sm:$0xff] (!%p7963_p7)  ;;  %v9876_v15 = vld [vmem:[%s9770_s23 + $0x58] sm:$0xff] (!%p7963_p7) }
  0x2e   : > { %s9831_s9 = scalar_lea.vmem %s14748_s20, %s8350_s29  ;;  %777 = vadd.xlane.f32.xlu1 (!%p7963_p7), %v776_v7  ;;  %v782_v16 = vadd.f32 (!%p7963_p7), %v9870_v13, %v9867_v12  ;;  %v785_v17 = vadd.f32 (!%p7963_p7), %v9876_v15, %v9873_v14  ;;  %v9883_v18 = vld [vmem:[%s9770_s23 + $0x60] sm:$0xff] (!%p7963_p7)  ;;  %v9886_v19 = vld [vmem:[%s9770_s23 + $0x68] sm:$0xff] (!%p7963_p7)  ;;  %v9889_v20 = vld [vmem:[%s9770_s23 + $0x70] sm:$0xff] (!%p7963_p7)  ;;  %s14750_s29 = sld [smem:[#allocation178_spill]] (!%p7963_p7) }
  0x2f   : > { %v9892_v21 = vld [vmem:[%s9770_s23 + $0x78] sm:$0xff] (!%p7963_p7)  ;;  %v788_v22 = vadd.f32 (!%p7963_p7), %v9886_v19, %v9883_v18  ;;  %v9899_v24 = vld [vmem:[%s9770_s23 + $0x80] sm:$0xff] (!%p7963_p7)  ;;  %v9902_v25 = vld [vmem:[%s9770_s23 + $0x88] sm:$0xff] (!%p7963_p7) }
  0x30   : > { %v791_v23 = vadd.f32 (!%p7963_p7), %v9892_v21, %v9889_v20  ;;  %v9905_v26 = vld [vmem:[%s9770_s23 + $0x90] sm:$0xff] (!%p7963_p7)  ;;  %v9908_v27 = vld [vmem:[%s9770_s23 + $0x98] sm:$0xff] (!%p7963_p7)  ;;  %v794_v28 = vadd.f32 (!%p7963_p7), %v9902_v25, %v9899_v24  ;;  %v9915_v30 = vld [vmem:[%s9770_s23 + $0xa0] sm:$0xff] (!%p7963_p7) }
  0x31   : > { %774 = vadd.xlane.f32.xlu0 (!%p7963_p7), %v773_v10  ;;  %v797_v29 = vadd.f32 (!%p7963_p7), %v9908_v27, %v9905_v26  ;;  %v9918_v31 = vld [vmem:[%s9770_s23 + $0xa8] sm:$0xff] (!%p7963_p7)  ;;  %v9921_v32 = vld [vmem:[%s9770_s23 + $0xb0] sm:$0xff] (!%p7963_p7)  ;;  %v9924_v33 = vld [vmem:[%s9770_s23 + $0xb8] sm:$0xff] (!%p7963_p7) }
  0x32   : > { %780 = vadd.xlane.f32.xlu1 %v779_v11  ;;  %v800_v34 = vadd.f32 %v9918_v31, %v9915_v30  ;;  %v803_v35 = vadd.f32 %v9924_v33, %v9921_v32  ;;  %v9931_v36 = vld [vmem:[%s9770_s23 + $0xc0] sm:$0xff]  ;;  %v9934_v37 = vld [vmem:[%s9770_s23 + $0xc8] sm:$0xff]  ;;  %v9937_v38 = vld [vmem:[%s9770_s23 + $0xd0] sm:$0xff] }
  0x33   : > { %v9940_v39 = vld [vmem:[%s9770_s23 + $0xd8] sm:$0xff]  ;;  %v806_v40 = vadd.f32 %v9934_v37, %v9931_v36  ;;  %v9947_v42 = vld [vmem:[%s9770_s23 + $0xe0] sm:$0xff]  ;;  %v9950_v43 = vld [vmem:[%s9770_s23 + $0xe8] sm:$0xff] }
  0x34   : > { %v809_v41 = vadd.f32 %v9940_v39, %v9937_v38  ;;  %v9953_v44 = vld [vmem:[%s9770_s23 + $0xf0] sm:$0xff]  ;;  %v9956_v45 = vld [vmem:[%s9770_s23 + $0xf8] sm:$0xff]  ;;  %v812_v46 = vadd.f32 %v9950_v43, %v9947_v42 }
  0x35   : > { %783 = vadd.xlane.f32.xlu0 %v782_v16  ;;  %v815_v47 = vadd.f32 %v9956_v45, %v9953_v44 }
  0x36   : > { %786 = vadd.xlane.f32.xlu1 %v785_v17 }
  0x39   : > { %789 = vadd.xlane.f32.xlu0 %v788_v22 }
  0x3a   : > { %792 = vadd.xlane.f32.xlu1 %v791_v23 }
  0x3d   : > { %795 = vadd.xlane.f32.xlu0 %v794_v28 }
  0x3e   : > { %798 = vadd.xlane.f32.xlu1 %v797_v29 }
  0x41   : > { %801 = vadd.xlane.f32.xlu0 %v800_v34 }
  0x42   : > { %804 = vadd.xlane.f32.xlu1 %v803_v35 }
  0x45   : > { %807 = vadd.xlane.f32.xlu0 %v806_v40 }
  0x46   : > { %810 = vadd.xlane.f32.xlu1 %v809_v41 }
  0x49   : > { %813 = vadd.xlane.f32.xlu0 %v812_v46 }
  0x4a   : > { %816 = vadd.xlane.f32.xlu1 %v815_v47 }
  0xba   : > { %v772_v48 = vpop.xlane.xlu0 %771 }
  0xbb   : > { %v819_v49 = vmul.f32 0.00390625, %v772_v48  ;;  %v778_v50 = vpop.xlane.xlu1 %777 }
  0xbc   : > { %v821_v51 = vmul.f32 0.00390625, %v778_v50 }
  0xbd   : > { %v9963_v52 = vsub.f32 %v9835_v0, %v819_v49  ;;  %v9966_v53 = vsub.f32 %v9838_v1, %v819_v49 }
  0xbe   : > { %v9969_v54 = vsub.f32 %v9841_v2, %v821_v51  ;;  %v9972_v55 = vsub.f32 %v9846_v4, %v821_v51  ;;  %v775_v56 = vpop.xlane.xlu0 %774 }
  0xbf   : > { %v820_v57 = vmul.f32 0.00390625, %v775_v56  ;;  %v781_v58 = vpop.xlane.xlu1 %780  ;;  %v867_v59 = vmul.f32 %v9963_v52, %v9963_v52  ;;  %v868_v60 = vmul.f32 %v9966_v53, %v9966_v53 }
  0xc0   : > { %v822_v61 = vmul.f32 0.00390625, %v781_v58  ;;  %v871_v62 = vmul.f32 %v9969_v54, %v9969_v54  ;;  %v872_v63 = vmul.f32 %v9972_v55, %v9972_v55 }
  0xc1   : > { %v9983_v0 = vsub.f32 %v9849_v5, %v820_v57  ;;  %v9986_v1 = vsub.f32 %v9852_v6, %v820_v57  ;;  %v899_v2 = vadd.f32 %v868_v60, %v867_v59 }
  0xc2   : > { %v9989_v3 = vsub.f32 %v9857_v8, %v822_v61  ;;  %v9992_v4 = vsub.f32 %v9860_v9, %v822_v61  ;;  %v784_v7 = vpop.xlane.xlu0 %783  ;;  %v905_v16 = vadd.f32 %v872_v63, %v871_v62 }
  0xc3   : > { %v823_v10 = vmul.f32 0.00390625, %v784_v7  ;;  %900 = vadd.xlane.f32.xlu0 %v899_v2  ;;  %v787_v11 = vpop.xlane.xlu1 %786  ;;  %v869_v17 = vmul.f32 %v9983_v0, %v9983_v0  ;;  %v870_v5 = vmul.f32 %v9986_v1, %v9986_v1 }
  0xc4   : > { %v824_v6 = vmul.f32 0.00390625, %v787_v11  ;;  %v873_v22 = vmul.f32 %v9989_v3, %v9989_v3  ;;  %v874_v8 = vmul.f32 %v9992_v4, %v9992_v4 }
  0xc5   : > { %v10003_v9 = vsub.f32 %v9867_v12, %v823_v10  ;;  %v10006_v23 = vsub.f32 %v9870_v13, %v823_v10  ;;  %v902_v28 = vadd.f32 %v870_v5, %v869_v17 }
  0xc6   : > { %v10009_v29 = vsub.f32 %v9873_v14, %v824_v6  ;;  %v10012_v34 = vsub.f32 %v9876_v15, %v824_v6  ;;  %v790_v35 = vpop.xlane.xlu0 %789  ;;  %v908_v46 = vadd.f32 %v874_v8, %v873_v22 }
  0xc7   : > { %v825_v40 = vmul.f32 0.00390625, %v790_v35  ;;  %906 = vadd.xlane.f32.xlu0 %v905_v16  ;;  %903 = vadd.xlane.f32.xlu1 %v902_v28  ;;  %v793_v41 = vpop.xlane.xlu1 %792  ;;  %v875_v12 = vmul.f32 %v10003_v9, %v10003_v9  ;;  %v876_v13 = vmul.f32 %v10006_v23, %v10006_v23 }
  0xc8   : > { %v826_v47 = vmul.f32 0.00390625, %v793_v41  ;;  %v877_v14 = vmul.f32 %v10009_v29, %v10009_v29  ;;  %v878_v15 = vmul.f32 %v10012_v34, %v10012_v34 }
  0xc9   : > { %v10023_v48 = vsub.f32 %v9883_v18, %v825_v40  ;;  %v10026_v49 = vsub.f32 %v9886_v19, %v825_v40  ;;  %v911_v50 = vadd.f32 %v876_v13, %v875_v12 }
  0xca   : > { %v10029_v51 = vsub.f32 %v9889_v20, %v826_v47  ;;  %v10032_v56 = vsub.f32 %v9892_v21, %v826_v47  ;;  %v796_v57 = vpop.xlane.xlu0 %795  ;;  %v914_v60 = vadd.f32 %v878_v15, %v877_v14 }
  0xcb   : > { %v827_v58 = vmul.f32 0.00390625, %v796_v57  ;;  %909 = vadd.xlane.f32.xlu1 %v908_v46  ;;  %912 = vadd.xlane.f32.xlu0 %v911_v50  ;;  %v799_v59 = vpop.xlane.xlu1 %798  ;;  %v879_v18 = vmul.f32 %v10023_v48, %v10023_v48  ;;  %v880_v19 = vmul.f32 %v10026_v49, %v10026_v49 }
  0xcc   : > { %v828_v61 = vmul.f32 0.00390625, %v799_v59  ;;  %v881_v20 = vmul.f32 %v10029_v51, %v10029_v51  ;;  %v882_v21 = vmul.f32 %v10032_v56, %v10032_v56 }
  0xcd   : > { %v10043_v62 = vsub.f32 %v9899_v24, %v827_v58  ;;  %v10046_v63 = vsub.f32 %v9902_v25, %v827_v58  ;;  %v917_v2 = vadd.f32 %v880_v19, %v879_v18 }
  0xce   : > { %v10049_v7 = vsub.f32 %v9905_v26, %v828_v61  ;;  %v10052_v10 = vsub.f32 %v9908_v27, %v828_v61  ;;  %v802_v11 = vpop.xlane.xlu0 %801  ;;  %v920_v5 = vadd.f32 %v882_v21, %v881_v20 }
  0xcf   : > { %v829_v16 = vmul.f32 0.00390625, %v802_v11  ;;  %915 = vadd.xlane.f32.xlu1 %v914_v60  ;;  %918 = vadd.xlane.f32.xlu0 %v917_v2  ;;  %v805_v17 = vpop.xlane.xlu1 %804  ;;  %v883_v24 = vmul.f32 %v10043_v62, %v10043_v62  ;;  %v884_v25 = vmul.f32 %v10046_v63, %v10046_v63 }
  0xd0   : > { %v830_v6 = vmul.f32 0.00390625, %v805_v17  ;;  %v885_v26 = vmul.f32 %v10049_v7, %v10049_v7  ;;  %v886_v27 = vmul.f32 %v10052_v10, %v10052_v10 }
  0xd1   : > { %v10063_v22 = vsub.f32 %v9915_v30, %v829_v16  ;;  %v10066_v8 = vsub.f32 %v9918_v31, %v829_v16  ;;  %v923_v28 = vadd.f32 %v884_v25, %v883_v24 }
  0xd2   : > { %v10069_v35 = vsub.f32 %v9921_v32, %v830_v6  ;;  %v10072_v40 = vsub.f32 %v9924_v33, %v830_v6  ;;  %v808_v41 = vpop.xlane.xlu0 %807  ;;  %v926_v13 = vadd.f32 %v886_v27, %v885_v26  ;;  %v1028_v26 = vlaneseq }
  0xd3   : > { %v831_v46 = vmul.f32 0.00390625, %v808_v41  ;;  %921 = vadd.xlane.f32.xlu1 %v920_v5  ;;  %924 = vadd.xlane.f32.xlu0 %v923_v28  ;;  %v811_v12 = vpop.xlane.xlu1 %810  ;;  %v887_v30 = vmul.f32 %v10063_v22, %v10063_v22  ;;  %v888_v31 = vmul.f32 %v10066_v8, %v10066_v8 }
  0xd4   : > { %v832_v47 = vmul.f32 0.00390625, %v811_v12  ;;  %v889_v32 = vmul.f32 %v10069_v35, %v10069_v35  ;;  %v890_v33 = vmul.f32 %v10072_v40, %v10072_v40 }
  0xd5   : > { %v10083_v14 = vsub.f32 %v9931_v36, %v831_v46  ;;  %v10086_v15 = vsub.f32 %v9934_v37, %v831_v46  ;;  %v929_v50 = vadd.f32 %v888_v31, %v887_v30 }
  0xd6   : > { %v10089_v57 = vsub.f32 %v9937_v38, %v832_v47  ;;  %v10092_v58 = vsub.f32 %v9940_v39, %v832_v47  ;;  %v814_v59 = vpop.xlane.xlu0 %813  ;;  %v932_v19 = vadd.f32 %v890_v33, %v889_v32 }
  0xd7   : > { %v833_v60 = vmul.f32 0.00390625, %v814_v59  ;;  %927 = vadd.xlane.f32.xlu1 %v926_v13  ;;  %930 = vadd.xlane.f32.xlu0 %v929_v50  ;;  %v817_v18 = vpop.xlane.xlu1 %816  ;;  %v891_v36 = vmul.f32 %v10083_v14, %v10083_v14  ;;  %v892_v37 = vmul.f32 %v10086_v15, %v10086_v15  ;;  %v1029_v13 = vshrl.u32 %v1028_v26, 7 }
  0xd8   : > { %v834_v61 = vmul.f32 0.00390625, %v817_v18  ;;  %v893_v38 = vmul.f32 %v10089_v57, %v10089_v57  ;;  %v894_v39 = vmul.f32 %v10092_v58, %v10092_v58  ;;  %v768_v18 = vld [vmem:[%s14750_s29] sm:$0x3] }
  0xd9   : > { %v10103_v20 = vsub.f32 %v9947_v42, %v833_v60  ;;  %v10106_v21 = vsub.f32 %v9950_v43, %v833_v60  ;;  %v935_v2 = vadd.f32 %v892_v37, %v891_v36  ;;  %v1030_v59 = vsub.s32 0, %v1029_v13 }
  0xda   : > { %v10109_v11 = vsub.f32 %v9953_v44, %v834_v61  ;;  %v10112_v16 = vsub.f32 %v9956_v45, %v834_v61  ;;  %v938_v17 = vadd.f32 %v894_v39, %v893_v38  ;;  %v1034_v60 = vsub.s32 1, %v1029_v13  ;;  %v769_v38 = vld [vmem:[%s14751_s27] sm:$0x3] }
  0xdb   : > { %933 = vadd.xlane.f32.xlu1 %v932_v19  ;;  %936 = vadd.xlane.f32.xlu0 %v935_v2  ;;  %v895_v5 = vmul.f32 %v10103_v20, %v10103_v20  ;;  %v896_v42 = vmul.f32 %v10106_v21, %v10106_v21 }
  0xdc   : > { %v897_v43 = vmul.f32 %v10109_v11, %v10109_v11  ;;  %v898_v24 = vmul.f32 %v10112_v16, %v10112_v16 }
  0xdd   : > { %v941_v44 = vadd.f32 %v896_v42, %v895_v5  ;;  %v10130_v5 = vrot.slane %v768_v18, %v1034_v60 }
  0xde   : > { %v944_v45 = vadd.f32 %v898_v24, %v897_v43 }
  0xdf   : > { %939 = vadd.xlane.f32.xlu1 %v938_v17  ;;  %942 = vadd.xlane.f32.xlu0 %v941_v44  ;;  %v10128_v17 = vrot.slane %v768_v18, %v1030_v59  ;;  %v10132_v44 = vrot.slane %v769_v38, %v1030_v59 }
  0xe3   : > { %945 = vadd.xlane.f32.xlu1 %v944_v45  ;;  %v10134_v45 = vrot.slane %v769_v38, %v1034_v60 }
 0x150   : > { %v901_v25 = vpop.xlane.xlu0 %900 }
 0x151   : > { %v947_v6 = vmul.f32 0.00390625, %v901_v25 }
 0x153   : > { %v963_v27 = vadd.f32 1e-12, %v947_v6 }
 0x154   : > { %v904_v28 = vpop.xlane.xlu1 %903  ;;  %v907_v41 = vpop.xlane.xlu0 %906 }
 0x155   : > { %8717 = vrsqrt.f32 %v963_v27  ;;  %v948_v46 = vmul.f32 0.00390625, %v904_v28  ;;  %v949_v12 = vmul.f32 0.00390625, %v907_v41 }
 0x157   : > { %v964_v30 = vadd.f32 1e-12, %v948_v46  ;;  %v965_v31 = vadd.f32 1e-12, %v949_v12 }
 0x158   : > { %v910_v47 = vpop.xlane.xlu1 %909  ;;  %v913_v32 = vpop.xlane.xlu0 %912 }
 0x159   : > { %8719 = vrsqrt.f32 %v964_v30  ;;  %v950_v33 = vmul.f32 0.00390625, %v910_v47  ;;  %v951_v50 = vmul.f32 0.00390625, %v913_v32 }
 0x15a   : > { %8721 = vrsqrt.f32 %v965_v31 }
 0x15b   : > { %v966_v19 = vadd.f32 1e-12, %v950_v33  ;;  %v967_v36 = vadd.f32 1e-12, %v951_v50 }
 0x15c   : > { %v916_v37 = vpop.xlane.xlu1 %915  ;;  %v919_v61 = vpop.xlane.xlu0 %918 }
 0x15d   : > { %8723 = vrsqrt.f32 %v966_v19  ;;  %v952_v39 = vmul.f32 0.00390625, %v916_v37  ;;  %v953_v2 = vmul.f32 0.00390625, %v919_v61 }
 0x15e   : > { %8725 = vrsqrt.f32 %v967_v36 }
 0x15f   : > { %v8718_v42 = vpop.eup %8717  ;;  %v968_v43 = vadd.f32 1e-12, %v952_v39  ;;  %v969_v24 = vadd.f32 1e-12, %v953_v2 }
 0x160   : > { %v995_v25 = vmul.f32 %v8718_v42, %v9963_v52  ;;  %v996_v6 = vmul.f32 %v8718_v42, %v9966_v53  ;;  %v922_v26 = vpop.xlane.xlu1 %921  ;;  %v925_v27 = vpop.xlane.xlu0 %924 }
 0x161   : > { %8727 = vrsqrt.f32 %v968_v43  ;;  %v954_v28 = vmul.f32 0.00390625, %v922_v26  ;;  %v955_v41 = vmul.f32 0.00390625, %v925_v27 }
 0x162   : > { %v1038_v46 = vmul.f32 %v10128_v17, %v995_v25  ;;  %v1039_v12 = vmul.f32 %v10130_v5, %v996_v6  ;;  %8729 = vrsqrt.f32 %v969_v24 }
 0x163   : > { %v8720_v13 = vpop.eup %8719  ;;  %v970_v30 = vadd.f32 1e-12, %v954_v28  ;;  %v971_v31 = vadd.f32 1e-12, %v955_v41 }
 0x164   : > { %v8722_v47 = vpop.eup %8721  ;;  %v1081_v52 = vadd.f32 %v10132_v44, %v1038_v46  ;;  %v1082_v53 = vadd.f32 %v10134_v45, %v1039_v12  ;;  %v997_v32 = vmul.f32 %v8720_v13, %v9983_v0  ;;  %v998_v33 = vmul.f32 %v8720_v13, %v9986_v1  ;;  %v928_v50 = vpop.xlane.xlu1 %927 }
 0x165   : > { %v931_v59 = vpop.xlane.xlu0 %930  ;;  %v999_v60 = vmul.f32 %v8722_v47, %v9969_v54  ;;  %v1000_v18 = vmul.f32 %v8722_v47, %v9972_v55  ;;  %8731 = vrsqrt.f32 %v970_v30  ;;  %v956_v19 = vmul.f32 0.00390625, %v928_v50 }
 0x166   : > { %1113 = vst [vmem:[%s9831_s9] sm:$0xff] %v1081_v52  ;;  %1114 = vst [vmem:[%s9831_s9 + $0x8] sm:$0xff] %v1082_v53  ;;  %v1040_v36 = vmul.f32 %v10128_v17, %v997_v32  ;;  %v1041_v37 = vmul.f32 %v10130_v5, %v998_v33  ;;  %8733 = vrsqrt.f32 %v971_v31  ;;  %v957_v61 = vmul.f32 0.00390625, %v931_v59 }
 0x167   : > { %v8724_v0 = vpop.eup %8723  ;;  %v1042_v1 = vmul.f32 %v10128_v17, %v999_v60  ;;  %v1043_v38 = vmul.f32 %v10130_v5, %v1000_v18  ;;  %v972_v54 = vadd.f32 1e-12, %v956_v19 }
 0x168   : > { %v8726_v39 = vpop.eup %8725  ;;  %v1083_v55 = vadd.f32 %v10132_v44, %v1040_v36  ;;  %v1084_v2 = vadd.f32 %v10134_v45, %v1041_v37  ;;  %v1001_v42 = vmul.f32 %v8724_v0, %v9989_v3  ;;  %v1002_v43 = vmul.f32 %v8724_v0, %v9992_v4  ;;  %v934_v24 = vpop.xlane.xlu1 %933 }
 0x169   : > { %v937_v25 = vpop.xlane.xlu0 %936  ;;  %v1085_v6 = vadd.f32 %v10132_v44, %v1042_v1  ;;  %v1086_v26 = vadd.f32 %v10134_v45, %v1043_v38  ;;  %v1003_v27 = vmul.f32 %v8726_v39, %v10003_v9  ;;  %v1004_v28 = vmul.f32 %v8726_v39, %v10006_v23 }
 0x16a   : > { %1115 = vst [vmem:[%s9831_s9 + $0x10] sm:$0xff] %v1083_v55  ;;  %1116 = vst [vmem:[%s9831_s9 + $0x18] sm:$0xff] %v1084_v2  ;;  %v1044_v41 = vmul.f32 %v10128_v17, %v1001_v42  ;;  %v1045_v46 = vmul.f32 %v10130_v5, %v1002_v43  ;;  %8735 = vrsqrt.f32 %v972_v54  ;;  %v973_v3 = vadd.f32 1e-12, %v957_v61 }
 0x16b   : > { %v8728_v12 = vpop.eup %8727  ;;  %1117 = vst [vmem:[%s9831_s9 + $0x20] sm:$0xff] %v1085_v6  ;;  %1118 = vst [vmem:[%s9831_s9 + $0x28] sm:$0xff] %v1086_v26  ;;  %v1046_v4 = vmul.f32 %v10128_v17, %v1003_v27  ;;  %v1047_v13 = vmul.f32 %v10130_v5, %v1004_v28  ;;  %v958_v9 = vmul.f32 0.00390625, %v934_v24  ;;  %v959_v30 = vmul.f32 0.00390625, %v937_v25 }
 0x16c   : > { %v8730_v23 = vpop.eup %8729  ;;  %v1087_v31 = vadd.f32 %v10132_v44, %v1044_v41  ;;  %v1088_v47 = vadd.f32 %v10134_v45, %v1045_v46  ;;  %v1005_v52 = vmul.f32 %v8728_v12, %v10009_v29  ;;  %v1006_v53 = vmul.f32 %v8728_v12, %v10012_v34  ;;  %v940_v32 = vpop.xlane.xlu1 %939 }
 0x16d   : > { %v1089_v33 = vadd.f32 %v10132_v44, %v1046_v4  ;;  %v1090_v50 = vadd.f32 %v10134_v45, %v1047_v13  ;;  %v1007_v59 = vmul.f32 %v8730_v23, %v10023_v48  ;;  %v1008_v60 = vmul.f32 %v8730_v23, %v10026_v49  ;;  %v943_v39 = vpop.xlane.xlu0 %942 }
 0x16e   : > { %1119 = vst [vmem:[%s9831_s9 + $0x30] sm:$0xff] %v1087_v31  ;;  %1120 = vst [vmem:[%s9831_s9 + $0x38] sm:$0xff] %v1088_v47  ;;  %v1048_v18 = vmul.f32 %v10128_v17, %v1005_v52  ;;  %v1049_v19 = vmul.f32 %v10130_v5, %v1006_v53  ;;  %8737 = vrsqrt.f32 %v973_v3  ;;  %v974_v36 = vadd.f32 1e-12, %v958_v9 }
 0x16f   : > { %v8732_v29 = vpop.eup %8731  ;;  %1121 = vst [vmem:[%s9831_s9 + $0x40] sm:$0xff] %v1089_v33  ;;  %1122 = vst [vmem:[%s9831_s9 + $0x48] sm:$0xff] %v1090_v50  ;;  %v1050_v34 = vmul.f32 %v10128_v17, %v1007_v59  ;;  %v1051_v37 = vmul.f32 %v10130_v5, %v1008_v60  ;;  %v975_v48 = vadd.f32 1e-12, %v959_v30  ;;  %v960_v61 = vmul.f32 0.00390625, %v940_v32 }
 0x170   : > { %v8734_v49 = vpop.eup %8733  ;;  %v1091_v0 = vadd.f32 %v10132_v44, %v1048_v18  ;;  %v1092_v1 = vadd.f32 %v10134_v45, %v1049_v19  ;;  %v1009_v38 = vmul.f32 %v8732_v29, %v10029_v51  ;;  %v1010_v54 = vmul.f32 %v8732_v29, %v10032_v56  ;;  %v946_v24 = vpop.xlane.xlu1 %945 }
 0x171   : > { %v1093_v55 = vadd.f32 %v10132_v44, %v1050_v34  ;;  %v1094_v2 = vadd.f32 %v10134_v45, %v1051_v37  ;;  %v1011_v42 = vmul.f32 %v8734_v49, %v10043_v62  ;;  %v1012_v43 = vmul.f32 %v8734_v49, %v10046_v63 }
 0x172   : > { %1123 = vst [vmem:[%s9831_s9 + $0x50] sm:$0xff] %v1091_v0  ;;  %1124 = vst [vmem:[%s9831_s9 + $0x58] sm:$0xff] %v1092_v1  ;;  %v1052_v25 = vmul.f32 %v10128_v17, %v1009_v38  ;;  %v1053_v6 = vmul.f32 %v10130_v5, %v1010_v54  ;;  %8739 = vrsqrt.f32 %v974_v36  ;;  %v976_v51 = vadd.f32 1e-12, %v960_v61 }
 0x173   : > { %1125 = vst [vmem:[%s9831_s9 + $0x60] sm:$0xff] %v1093_v55  ;;  %1126 = vst [vmem:[%s9831_s9 + $0x68] sm:$0xff] %v1094_v2  ;;  %v1054_v56 = vmul.f32 %v10128_v17, %v1011_v42  ;;  %v1055_v26 = vmul.f32 %v10130_v5, %v1012_v43  ;;  %8741 = vrsqrt.f32 %v975_v48  ;;  %v961_v62 = vmul.f32 0.00390625, %v943_v39 }
 0x174   : > { %v8736_v63 = vpop.eup %8735  ;;  %v1095_v27 = vadd.f32 %v10132_v44, %v1052_v25  ;;  %v1096_v28 = vadd.f32 %v10134_v45, %v1053_v6  ;;  %8743 = vrsqrt.f32 %v976_v51  ;;  %v962_v41 = vmul.f32 0.00390625, %v946_v24 }
 0x175   : > { %v1097_v46 = vadd.f32 %v10132_v44, %v1054_v56  ;;  %v1098_v3 = vadd.f32 %v10134_v45, %v1055_v26  ;;  %v1013_v12 = vmul.f32 %v8736_v63, %v10049_v7  ;;  %v1014_v4 = vmul.f32 %v8736_v63, %v10052_v10 }
 0x176   : > { %1127 = vst [vmem:[%s9831_s9 + $0x70] sm:$0xff] %v1095_v27  ;;  %1128 = vst [vmem:[%s9831_s9 + $0x78] sm:$0xff] %v1096_v28  ;;  %v977_v13 = vadd.f32 1e-12, %v961_v62  ;;  %v978_v9 = vadd.f32 1e-12, %v962_v41 }
 0x177   : > { %1129 = vst [vmem:[%s9831_s9 + $0x80] sm:$0xff] %v1097_v46  ;;  %1130 = vst [vmem:[%s9831_s9 + $0x88] sm:$0xff] %v1098_v3  ;;  %v1056_v30 = vmul.f32 %v10128_v17, %v1013_v12  ;;  %v1057_v23 = vmul.f32 %v10130_v5, %v1014_v4 }
 0x178   : > { %v8738_v31 = vpop.eup %8737  ;;  %8745 = vrsqrt.f32 %v977_v13 }
 0x179   : > { %v1099_v47 = vadd.f32 %v10132_v44, %v1056_v30  ;;  %v1100_v7 = vadd.f32 %v10134_v45, %v1057_v23  ;;  %v1015_v10 = vmul.f32 %v8738_v31, %v10063_v22  ;;  %v1016_v52 = vmul.f32 %v8738_v31, %v10066_v8 }
 0x17a   : > { %8747 = vrsqrt.f32 %v978_v9 }
 0x17b   : > { %1131 = vst [vmem:[%s9831_s9 + $0x90] sm:$0xff] %v1099_v47  ;;  %1132 = vst [vmem:[%s9831_s9 + $0x98] sm:$0xff] %v1100_v7  ;;  %v1058_v53 = vmul.f32 %v10128_v17, %v1015_v10  ;;  %v1059_v32 = vmul.f32 %v10130_v5, %v1016_v52 }
 0x17c   : > { %v8740_v33 = vpop.eup %8739 }
 0x17d   : > { %v8742_v50 = vpop.eup %8741  ;;  %v1101_v59 = vadd.f32 %v10132_v44, %v1058_v53  ;;  %v1102_v60 = vadd.f32 %v10134_v45, %v1059_v32  ;;  %v1017_v18 = vmul.f32 %v8740_v33, %v10069_v35  ;;  %v1018_v22 = vmul.f32 %v8740_v33, %v10072_v40 }
 0x17e   : > { %v8744_v19 = vpop.eup %8743  ;;  %v1019_v8 = vmul.f32 %v8742_v50, %v10083_v14  ;;  %v1020_v36 = vmul.f32 %v8742_v50, %v10086_v15 }
 0x17f   : > { %1133 = vst [vmem:[%s9831_s9 + $0xa0] sm:$0xff] %v1101_v59  ;;  %1134 = vst [vmem:[%s9831_s9 + $0xa8] sm:$0xff] %v1102_v60  ;;  %v1060_v29 = vmul.f32 %v10128_v17, %v1017_v18  ;;  %v1061_v34 = vmul.f32 %v10130_v5, %v1018_v22  ;;  %v1021_v37 = vmul.f32 %v8744_v19, %v10089_v57 }
 0x180   : > { %v1022_v48 = vmul.f32 %v8744_v19, %v10092_v58  ;;  %v1062_v35 = vmul.f32 %v10128_v17, %v1019_v8  ;;  %v1063_v40 = vmul.f32 %v10130_v5, %v1020_v36 }
 0x181   : > { %v1103_v14 = vadd.f32 %v10132_v44, %v1060_v29  ;;  %v1104_v15 = vadd.f32 %v10134_v45, %v1061_v34  ;;  %v1064_v61 = vmul.f32 %v10128_v17, %v1021_v37 }
 0x182   : > { %v1065_v49 = vmul.f32 %v10130_v5, %v1022_v48  ;;  %v8746_v0 = vpop.eup %8745  ;;  %v1105_v57 = vadd.f32 %v10132_v44, %v1062_v35  ;;  %v1106_v58 = vadd.f32 %v10134_v45, %v1063_v40 }
 0x183   : > { %1135 = vst [vmem:[%s9831_s9 + $0xb0] sm:$0xff] %v1103_v14  ;;  %1136 = vst [vmem:[%s9831_s9 + $0xb8] sm:$0xff] %v1104_v15  ;;  %v1107_v1 = vadd.f32 %v10132_v44, %v1064_v61  ;;  %v1023_v54 = vmul.f32 %v8746_v0, %v10103_v20  ;;  %v1024_v39 = vmul.f32 %v8746_v0, %v10106_v21 }
 0x184   : > { %v1108_v38 = vadd.f32 %v10134_v45, %v1065_v49  ;;  %v8748_v55 = vpop.eup %8747  ;;  %1137 = vst [vmem:[%s9831_s9 + $0xc0] sm:$0xff] %v1105_v57  ;;  %1138 = vst [vmem:[%s9831_s9 + $0xc8] sm:$0xff] %v1106_v58 }
 0x185   : > { %1139 = vst [vmem:[%s9831_s9 + $0xd0] sm:$0xff] %v1107_v1  ;;  %v1066_v2 = vmul.f32 %v10128_v17, %v1023_v54  ;;  %v1067_v42 = vmul.f32 %v10130_v5, %v1024_v39  ;;  %v1025_v43 = vmul.f32 %v8748_v55, %v10109_v11  ;;  %v1026_v24 = vmul.f32 %v8748_v55, %v10112_v16 }
 0x186   : > { %1140 = vst [vmem:[%s9831_s9 + $0xd8] sm:$0xff] %v1108_v38 }
 0x187   : > { %v1109_v20 = vadd.f32 %v10132_v44, %v1066_v2  ;;  %v1110_v25 = vadd.f32 %v10134_v45, %v1067_v42  ;;  %v1068_v21 = vmul.f32 %v10128_v17, %v1025_v43  ;;  %v1069_v6 = vmul.f32 %v10130_v5, %v1026_v24 }
 0x189   : > { %1141 = vst [vmem:[%s9831_s9 + $0xe0] sm:$0xff] %v1109_v20  ;;  %1142 = vst [vmem:[%s9831_s9 + $0xe8] sm:$0xff] %v1110_v25  ;;  %v1111_v51 = vadd.f32 %v10132_v44, %v1068_v21  ;;  %v1112_v56 = vadd.f32 %v10134_v45, %v1069_v6 }
 0x18b   : > { %1143 = vst [vmem:[%s9831_s9 + $0xf0] sm:$0xff] %v1111_v51  ;;  %1144 = vst [vmem:[%s9831_s9 + $0xf8] sm:$0xff] %v1112_v56 }
 0x18c PF: > { %v8749_v11 = vld [vmem:[%s9775_s24 + $0x4] ss:$24 sps:$4 sm:$0xff]   ;;  %v8751_v16 = vld [vmem:[%s9775_s24] ss:$24 sps:$4 sm:$0xff]   ;;  %v8752_v17 = vld [vmem:[%s9775_s24 + $0x34] ss:$24 sps:$4 sm:$0xff]   ;;  %s14756_s26 = scalar_lea.vmem %s14488_s6, %s9787_s15  ;;  %s14757_s20 = scalar_lea.vmem %s14489_s7, %s9787_s15 }
 0x18d   : > { %1801 = vmatprep.subr.bf16.mxu0 %v8749_v11  ;;  %v8754_v5 = vld [vmem:[%s9775_s24 + $0x30] ss:$24 sps:$4 sm:$0xff]   ;;  %v8755_v44 = vld [vmem:[%s9775_s24 + $0x64] ss:$24 sps:$4 sm:$0xff]   ;;  %v8757_v45 = vld [vmem:[%s9775_s24 + $0x60] ss:$24 sps:$4 sm:$0xff]   ;;  %s14758_s23 = scalar_lea.vmem %s14490_s8, %s9787_s15 }
 0x18e   : > { %1802 = vmatpush1.bf16.msra.mxu0 %v8751_v16  ;;  %v8758_v26 = vld [vmem:[%s9775_s24 + $0x94] ss:$24 sps:$4 sm:$0xff]   ;;  %v8760_v62 = vld [vmem:[%s9775_s24 + $0x90] ss:$24 sps:$4 sm:$0xff]   ;;  %v8761_v63 = vld [vmem:[%s9775_s24 + $0xc4] ss:$24 sps:$4 sm:$0xff]  }
 0x18f   : > { %1803 = vmatprep.subr.bf16.mxu0 %v8752_v17  ;;  %v8763_v27 = vld [vmem:[%s9775_s24 + $0xc0] ss:$24 sps:$4 sm:$0xff]   ;;  %v8764_v28 = vld [vmem:[%s9775_s24 + $0xf4] ss:$24 sps:$4 sm:$0xff]   ;;  %v8766_v41 = vld [vmem:[%s9775_s24 + $0xf0] ss:$24 sps:$4 sm:$0xff]  }
 0x190   : > { %v8767_v46 = vld [vmem:[%s9775_s24 + $0x124] ss:$24 sps:$4 sm:$0xff]   ;;  %v1146_v3 = vld [vmem:[%s9831_s9 + $0x8] sm:$0xff]  ;;  %v8769_v13 = vld [vmem:[%s9775_s24 + $0x120] ss:$24 sps:$4 sm:$0xff]   ;;  %s14752_s16 = sld [smem:[#allocation8_spill]] }
 0x191   : > { %v1148_v12 = vld [vmem:[%s9831_s9 + $0x18] sm:$0xff]  ;;  %v8770_v9 = vld [vmem:[%s9775_s24 + $0x154] ss:$24 sps:$4 sm:$0xff]   ;;  %v8772_v30 = vld [vmem:[%s9775_s24 + $0x150] ss:$24 sps:$4 sm:$0xff]  }
 0x192   : > { %1804 = vmatpush1.bf16.msra.mxu0 %v8754_v5  ;;  %v10279_v4 = vpack.c.bf16 %v1148_v12, %v1146_v3  ;;  %v8773_v23 = vld [vmem:[%s9775_s24 + $0x184] ss:$24 sps:$4 sm:$0xff]   ;;  %v8775_v31 = vld [vmem:[%s9775_s24 + $0x180] ss:$24 sps:$4 sm:$0xff]   ;;  %v8776_v47 = vld [vmem:[%s9775_s24 + $0x1b4] ss:$24 sps:$4 sm:$0xff]  }
 0x193   : > { %1805 = vmatprep.subr.bf16.mxu0 %v8755_v44  ;;  %v8778_v7 = vld [vmem:[%s9775_s24 + $0x1b0] ss:$24 sps:$4 sm:$0xff]   ;;  %v8779_v10 = vld [vmem:[%s9775_s24 + $0x1e4] ss:$24 sps:$4 sm:$0xff]   ;;  %v8781_v52 = vld [vmem:[%s9775_s24 + $0x1e0] ss:$24 sps:$4 sm:$0xff]  }
 0x194   : > { %1833 = vmatprep.mubr.bf16.mxu0 %v10279_v4  ;;  %v8782_v53 = vld [vmem:[%s9775_s24 + $0x214] ss:$24 sps:$4 sm:$0xff]   ;;  %v8784_v32 = vld [vmem:[%s9775_s24 + $0x210] ss:$24 sps:$4 sm:$0xff]   ;;  %v8785_v33 = vld [vmem:[%s9775_s24 + $0x244] ss:$24 sps:$4 sm:$0xff]  }
 0x195   : > { %v8787_v50 = vld [vmem:[%s9775_s24 + $0x240] ss:$24 sps:$4 sm:$0xff]   ;;  %v8788_v59 = vld [vmem:[%s9775_s24 + $0x274] ss:$24 sps:$4 sm:$0xff]   ;;  %v8790_v60 = vld [vmem:[%s9775_s24 + $0x270] ss:$24 sps:$4 sm:$0xff]  }
 0x196   : > { %1806 = vmatpush1.bf16.msra.mxu0 %v8757_v45  ;;  %v8791_v18 = vld [vmem:[%s9775_s24 + $0x2a4] ss:$24 sps:$4 sm:$0xff]   ;;  %v8793_v22 = vld [vmem:[%s9775_s24 + $0x2a0] ss:$24 sps:$4 sm:$0xff]   ;;  %v8794_v19 = vld [vmem:[%s9775_s24 + $0x2d4] ss:$24 sps:$4 sm:$0xff]  }
 0x197   : > { %1807 = vmatprep.subr.bf16.mxu0 %v8758_v26  ;;  %v8796_v8 = vld [vmem:[%s9775_s24 + $0x2d0] ss:$24 sps:$4 sm:$0xff]   ;;  %v1145_v36 = vld [vmem:[%s9831_s9] sm:$0xff]  ;;  %v1152_v48 = vld [vmem:[%s9831_s9 + $0x38] sm:$0xff] }
 0x198   : > { %v1147_v29 = vld [vmem:[%s9831_s9 + $0x10] sm:$0xff]  ;;  %v8799_v34 = vld [vmem:[%s9775_s24 + $0xc] ss:$24 sps:$4 sm:$0xff]   ;;  %v8797_v40 = vld [vmem:[%s9775_s24 + $0x8] ss:$24 sps:$4 sm:$0xff]  }
 0x199   : > { %v1150_v37 = vld [vmem:[%s9831_s9 + $0x28] sm:$0xff]  ;;  %v10306_v35 = vpack.c.bf16 %v1147_v29, %v1145_v36  ;;  %v8802_v15 = vld [vmem:[%s9775_s24 + $0x3c] ss:$24 sps:$4 sm:$0xff]   ;;  %v8800_v61 = vld [vmem:[%s9775_s24 + $0x38] ss:$24 sps:$4 sm:$0xff]  }
 0x19a   : > { %1808 = vmatpush1.bf16.msra.mxu0 %v8760_v62  ;;  %v10309_v14 = vpack.c.bf16 %v1152_v48, %v1150_v37  ;;  %v1149_v49 = vld [vmem:[%s9831_s9 + $0x20] sm:$0xff]  ;;  %v1151_v0 = vld [vmem:[%s9831_s9 + $0x30] sm:$0xff]  ;;  %v1154_v58 = vld [vmem:[%s9831_s9 + $0x48] sm:$0xff] }
 0x19b   : > { %1809 = vmatprep.subr.bf16.mxu0 %v8761_v63  ;;  %v8805_v57 = vld [vmem:[%s9775_s24 + $0x6c] ss:$24 sps:$4 sm:$0xff]   ;;  %v1156_v1 = vld [vmem:[%s9831_s9 + $0x58] sm:$0xff]  ;;  %v10320_v38 = vpack.c.bf16 %v1151_v0, %v1149_v49  ;;  %v8803_v54 = vld [vmem:[%s9775_s24 + $0x68] ss:$24 sps:$4 sm:$0xff]  }
 0x19c   : > { %v10323_v39 = vpack.c.bf16 %v1156_v1, %v1154_v58  ;;  %v8808_v55 = vld [vmem:[%s9775_s24 + $0x9c] ss:$24 sps:$4 sm:$0xff]   ;;  %v8806_v2 = vld [vmem:[%s9775_s24 + $0x98] ss:$24 sps:$4 sm:$0xff]   ;;  %v1153_v42 = vld [vmem:[%s9831_s9 + $0x40] sm:$0xff] }
 0x19d   : > { %v1155_v43 = vld [vmem:[%s9831_s9 + $0x50] sm:$0xff]  ;;  %v8811_v24 = vld [vmem:[%s9775_s24 + $0xcc] ss:$24 sps:$4 sm:$0xff]   ;;  %v1160_v25 = vld [vmem:[%s9831_s9 + $0x78] sm:$0xff] }
 0x19e   : > { %1810 = vmatpush1.bf16.msra.mxu0 %v8763_v27  ;;  %v1158_v20 = vld [vmem:[%s9831_s9 + $0x68] sm:$0xff]  ;;  %v10335_v6 = vpack.c.bf16 %v1155_v43, %v1153_v42  ;;  %v8814_v51 = vld [vmem:[%s9775_s24 + $0xfc] ss:$24 sps:$4 sm:$0xff]   ;;  %v8812_v11 = vld [vmem:[%s9775_s24 + $0xf8] ss:$24 sps:$4 sm:$0xff]  }
 0x19f   : > { %1811 = vmatprep.subr.bf16.mxu0 %v8764_v28  ;;  %v8809_v21 = vld [vmem:[%s9775_s24 + $0xc8] ss:$24 sps:$4 sm:$0xff]   ;;  %v10338_v56 = vpack.c.bf16 %v1160_v25, %v1158_v20  ;;  %v1159_v17 = vld [vmem:[%s9831_s9 + $0x70] sm:$0xff]  ;;  %v8817_v5 = vld [vmem:[%s9775_s24 + $0x12c] ss:$24 sps:$4 sm:$0xff]  }
 0x1a0   : > { %v1157_v16 = vld [vmem:[%s9831_s9 + $0x60] sm:$0xff]  ;;  %v1162_v44 = vld [vmem:[%s9831_s9 + $0x88] sm:$0xff]  ;;  %v1164_v45 = vld [vmem:[%s9831_s9 + $0x98] sm:$0xff] }
 0x1a1   : > { %v8815_v26 = vld [vmem:[%s9775_s24 + $0x128] ss:$24 sps:$4 sm:$0xff]   ;;  %v10349_v62 = vpack.c.bf16 %v1159_v17, %v1157_v16  ;;  %v8820_v63 = vld [vmem:[%s9775_s24 + $0x15c] ss:$24 sps:$4 sm:$0xff]   ;;  %v10352_v27 = vpack.c.bf16 %v1164_v45, %v1162_v44  ;;  %v8818_v28 = vld [vmem:[%s9775_s24 + $0x158] ss:$24 sps:$4 sm:$0xff]  }
 0x1a2   : > { %1812 = vmatpush1.bf16.msra.mxu0 %v8766_v41  ;;  %v1161_v41 = vld [vmem:[%s9831_s9 + $0x80] sm:$0xff]  ;;  %v1166_v12 = vld [vmem:[%s9831_s9 + $0xa8] sm:$0xff]  ;;  %v1176_v29 = vld [vmem:[%s9831_s9 + $0xf8] sm:$0xff] }
 0x1a3   : > { %1813 = vmatprep.subr.bf16.mxu0 %v8767_v46  ;;  %v1163_v46 = vld [vmem:[%s9831_s9 + $0x90] sm:$0xff]  ;;  %v8823_v3 = vld [vmem:[%s9775_s24 + $0x18c] ss:$24 sps:$4 sm:$0xff]   ;;  %v8848_v43 = vld [vmem:[%s9775_s24 + $0x40] ss:$24 sps:$4 sm:$0xff]  }
 0x1a4   : > { %v1174_v36 = vld [vmem:[%s9831_s9 + $0xe8] sm:$0xff]  ;;  %v8838_v48 = vld [vmem:[%s9775_s24 + $0x27c] ss:$24 sps:$4 sm:$0xff]   ;;  %v8860_v17 = vld [vmem:[%s9775_s24 + $0x100] ss:$24 sps:$4 sm:$0xff]  }
 0x1a5   : > { %v1175_v49 = vld [vmem:[%s9831_s9 + $0xf0] sm:$0xff]  ;;  %v8841_v0 = vld [vmem:[%s9775_s24 + $0x2ac] ss:$24 sps:$4 sm:$0xff]  }
 0x1a6   : > { %1814 = vmatpush1.bf16.msra.mxu0 %v8769_v13  ;;  %v1168_v13 = vld [vmem:[%s9831_s9 + $0xb8] sm:$0xff]  ;;  %v8851_v20 = vld [vmem:[%s9775_s24 + $0x70] ss:$24 sps:$4 sm:$0xff]  }
 0x1a7   : > { %1815 = vmatprep.subr.bf16.mxu0 %v8770_v9  ;;  %v8821_v9 = vld [vmem:[%s9775_s24 + $0x188] ss:$24 sps:$4 sm:$0xff]   ;;  %v8844_v1 = vld [vmem:[%s9775_s24 + $0x2dc] ss:$24 sps:$4 sm:$0xff]  }
 0x1a8   : > { %v8850_v42 = vld [vmem:[%s9775_s24 + $0x44] ss:$24 sps:$4 sm:$0xff]   ;;  %v8863_v44 = vld [vmem:[%s9775_s24 + $0x130] ss:$24 sps:$4 sm:$0xff]  }
 0x1a9   : > { %v8856_v25 = vld [vmem:[%s9775_s24 + $0xa4] ss:$24 sps:$4 sm:$0xff]  }
 0x1aa   : > { %1816 = vmatpush1.bf16.msra.mxu0 %v8772_v30  ;;  %v10363_v30 = vpack.c.bf16 %v1163_v46, %v1161_v41  ;;  %v8862_v16 = vld [vmem:[%s9775_s24 + $0x104] ss:$24 sps:$4 sm:$0xff]   ;;  %v8872_v46 = vld [vmem:[%s9775_s24 + $0x1c0] ss:$24 sps:$4 sm:$0xff]  }
 0x1ab   : > { %1817 = vmatprep.subr.bf16.mxu0 %v8773_v23  ;;  %v8826_v23 = vld [vmem:[%s9775_s24 + $0x1bc] ss:$24 sps:$4 sm:$0xff]  }
 0x1ac   : > { %v8868_v45 = vld [vmem:[%s9775_s24 + $0x164] ss:$24 sps:$4 sm:$0xff]  }
 0x1ad   : > { %v8874_v41 = vld [vmem:[%s9775_s24 + $0x1c4] ss:$24 sps:$4 sm:$0xff]  }
 0x1ae   : > { %1818 = vmatpush1.bf16.msra.mxu0 %v8775_v31  ;;  %v10366_v31 = vpack.c.bf16 %v1168_v13, %v1166_v12  ;;  %v8875_v12 = vld [vmem:[%s9775_s24 + $0x1f0] ss:$24 sps:$4 sm:$0xff]   ;;  %v8880_v13 = vld [vmem:[%s9775_s24 + $0x224] ss:$24 sps:$4 sm:$0xff]  }
 0x1af   : > { %1819 = vmatprep.subr.bf16.mxu0 %v8776_v47  ;;  %v8824_v47 = vld [vmem:[%s9775_s24 + $0x1b8] ss:$24 sps:$4 sm:$0xff]  }
 0x1b2   : > { %1820 = vmatpush1.bf16.msra.mxu0 %v8778_v7  ;;  %v1165_v7 = vld [vmem:[%s9831_s9 + $0xa0] sm:$0xff] }
 0x1b3   : > { %1821 = vmatprep.subr.bf16.mxu0 %v8779_v10  ;;  %v1167_v10 = vld [vmem:[%s9831_s9 + $0xb0] sm:$0xff] }
 0x1b6   : > { %1822 = vmatpush1.bf16.msra.mxu0 %v8781_v52  ;;  %v8829_v52 = vld [vmem:[%s9775_s24 + $0x1ec] ss:$24 sps:$4 sm:$0xff]  }
 0x1b7   : > { %1823 = vmatprep.subr.bf16.mxu0 %v8782_v53  ;;  %v1170_v53 = vld [vmem:[%s9831_s9 + $0xc8] sm:$0xff] }
 0x1ba   : > { %1824 = vmatpush1.bf16.msra.mxu0 %v8784_v32  ;;  %v1172_v32 = vld [vmem:[%s9831_s9 + $0xd8] sm:$0xff] }
 0x1bb   : > { %1825 = vmatprep.subr.bf16.mxu0 %v8785_v33  ;;  %v8827_v33 = vld [vmem:[%s9775_s24 + $0x1e8] ss:$24 sps:$4 sm:$0xff]  }
 0x1be   : > { %1826 = vmatpush1.bf16.msra.mxu0 %v8787_v50  ;;  %v10377_v50 = vpack.c.bf16 %v1167_v10, %v1165_v7  ;;  %v8886_v7 = vld [vmem:[%s9775_s24 + $0x284] ss:$24 sps:$4 sm:$0xff]   ;;  %v8884_v10 = vld [vmem:[%s9775_s24 + $0x280] ss:$24 sps:$4 sm:$0xff]  }
 0x1bf   : > { %1827 = vmatprep.subr.bf16.mxu0 %v8788_v59  ;;  %v8832_v59 = vld [vmem:[%s9775_s24 + $0x21c] ss:$24 sps:$4 sm:$0xff]  }
 0x1c2   : > { %1828 = vmatpush1.bf16.msra.mxu0 %v8790_v60  ;;  %v10380_v60 = vpack.c.bf16 %v1172_v32, %v1170_v53  ;;  %v8887_v53 = vld [vmem:[%s9775_s24 + $0x2b0] ss:$24 sps:$4 sm:$0xff]   ;;  %v8892_v32 = vld [vmem:[%s9775_s24 + $0x2e4] ss:$24 sps:$4 sm:$0xff]  }
 0x1c3   : > { %1829 = vmatprep.subr.bf16.mxu0 %v8791_v18  ;;  %v8830_v18 = vld [vmem:[%s9775_s24 + $0x218] ss:$24 sps:$4 sm:$0xff]  }
 0x1c6   : > { %1830 = vmatpush1.bf16.msra.mxu0 %v8793_v22  ;;  %v1169_v22 = vld [vmem:[%s9831_s9 + $0xc0] sm:$0xff] }
 0x1c7   : > { %1831 = vmatprep.subr.bf16.mxu0 %v8794_v19  ;;  %v1171_v19 = vld [vmem:[%s9831_s9 + $0xd0] sm:$0xff] }
 0x1c8   : > { %v10391_v37 = vpack.c.bf16 %v1171_v19, %v1169_v22 }
 0x1ca   : > { %1832 = vmatpush1.bf16.msra.mxu0 %v8796_v8  ;;  %v8835_v8 = vld [vmem:[%s9775_s24 + $0x24c] ss:$24 sps:$4 sm:$0xff]  }
 0x1cb   : > { %1914 = vmatprep.subr.bf16.mxu0 %v8799_v34  ;;  %v8833_v34 = vld [vmem:[%s9775_s24 + $0x248] ss:$24 sps:$4 sm:$0xff]  }
 0x1cd   : > { %1834 = vmatmul.mubr.bf16.vlgmr.msra.gmra.mrb[0].mxu0 %v10306_v35 }
 0x1ce   : > { %1915 = vmatpush1.bf16.msra.mxu0 %v8797_v40  ;;  %1843 = vmatprep.mubr.bf16.mxu0 %v10309_v14  ;;  %v10394_v40 = vpack.c.bf16 %v1176_v29, %v1174_v36 }
 0x1cf   : > { %1916 = vmatprep.subr.bf16.mxu0 %v8802_v15  ;;  %v8836_v15 = vld [vmem:[%s9775_s24 + $0x278] ss:$24 sps:$4 sm:$0xff]  }
 0x1d2   : > { %1917 = vmatpush1.bf16.msra.mxu0 %v8800_v61  ;;  %v1173_v61 = vld [vmem:[%s9831_s9 + $0xe0] sm:$0xff] }
 0x1d3   : > { %1918 = vmatprep.subr.bf16.mxu0 %v8805_v57  ;;  %v8839_v57 = vld [vmem:[%s9775_s24 + $0x2a8] ss:$24 sps:$4 sm:$0xff]   ;;  %v10403_v58 = vpack.c.bf16 %v1175_v49, %v1173_v61 }
 0x1d5   : > { %1844 = vmatmul.mubr.bf16.gmra.mrb[4].mxu0 %v10320_v38 }
 0x1d6   : > { %1919 = vmatpush1.bf16.msra.mxu0 %v8803_v54  ;;  %1853 = vmatprep.mubr.bf16.mxu0 %v10323_v39  ;;  %v8842_v54 = vld [vmem:[%s9775_s24 + $0x2d8] ss:$24 sps:$4 sm:$0xff]  }
 0x1d7   : > { %1920 = vmatprep.subr.bf16.mxu0 %v8808_v55  ;;  %v8847_v55 = vld [vmem:[%s9775_s24 + $0x14] ss:$24 sps:$4 sm:$0xff]  }
 0x1da   : > { %1921 = vmatpush1.bf16.msra.mxu0 %v8806_v2  ;;  %v8845_v2 = vld [vmem:[%s9775_s24 + $0x10] ss:$24 sps:$4 sm:$0xff]  }
 0x1db   : > { %1922 = vmatprep.subr.bf16.mxu0 %v8811_v24  ;;  %v8853_v24 = vld [vmem:[%s9775_s24 + $0x74] ss:$24 sps:$4 sm:$0xff]  }
 0x1dd   : > { %1854 = vmatmul.mubr.bf16.gmra.mrb[8].mxu0 %v10335_v6 }
 0x1de   : > { %1923 = vmatpush1.bf16.msra.mxu0 %v8809_v21  ;;  %1863 = vmatprep.mubr.bf16.mxu0 %v10338_v56  ;;  %v8854_v21 = vld [vmem:[%s9775_s24 + $0xa0] ss:$24 sps:$4 sm:$0xff]  }
 0x1df   : > { %1924 = vmatprep.subr.bf16.mxu0 %v8814_v51  ;;  %v8859_v51 = vld [vmem:[%s9775_s24 + $0xd4] ss:$24 sps:$4 sm:$0xff]  }
 0x1e2   : > { %1925 = vmatpush1.bf16.msra.mxu0 %v8812_v11  ;;  %v8857_v11 = vld [vmem:[%s9775_s24 + $0xd0] ss:$24 sps:$4 sm:$0xff]  }
 0x1e3   : > { %1926 = vmatprep.subr.bf16.mxu0 %v8817_v5  ;;  %v8865_v5 = vld [vmem:[%s9775_s24 + $0x134] ss:$24 sps:$4 sm:$0xff]  }
 0x1e5   : > { %1864 = vmatmul.mubr.bf16.gmra.mrb[12].mxu0 %v10349_v62 }
 0x1e6   : > { %1927 = vmatpush1.bf16.msra.mxu0 %v8815_v26  ;;  %1873 = vmatprep.mubr.bf16.mxu0 %v10352_v27  ;;  %v8866_v26 = vld [vmem:[%s9775_s24 + $0x160] ss:$24 sps:$4 sm:$0xff]  }
 0x1e7   : > { %1928 = vmatprep.subr.bf16.mxu0 %v8820_v63  ;;  %v8871_v63 = vld [vmem:[%s9775_s24 + $0x194] ss:$24 sps:$4 sm:$0xff]  }
 0x1ea   : > { %1929 = vmatpush1.bf16.msra.mxu0 %v8818_v28  ;;  %v8869_v28 = vld [vmem:[%s9775_s24 + $0x190] ss:$24 sps:$4 sm:$0xff]  }
 0x1eb   : > { %1930 = vmatprep.subr.bf16.mxu0 %v8823_v3  ;;  %v8877_v3 = vld [vmem:[%s9775_s24 + $0x1f4] ss:$24 sps:$4 sm:$0xff]  }
 0x1ed   : > { %1874 = vmatmul.mubr.bf16.gmra.mrb[16].mxu0 %v10363_v30 }
 0x1ee   : > { %1931 = vmatpush1.bf16.msra.mxu0 %v8821_v9  ;;  %1883 = vmatprep.mubr.bf16.mxu0 %v10366_v31  ;;  %v8878_v9 = vld [vmem:[%s9775_s24 + $0x220] ss:$24 sps:$4 sm:$0xff]  }
 0x1ef   : > { %1932 = vmatprep.subr.bf16.mxu0 %v8826_v23  ;;  %v8883_v23 = vld [vmem:[%s9775_s24 + $0x254] ss:$24 sps:$4 sm:$0xff]  }
 0x1f2   : > { %1933 = vmatpush1.bf16.msra.mxu0 %v8824_v47  ;;  %v8881_v47 = vld [vmem:[%s9775_s24 + $0x250] ss:$24 sps:$4 sm:$0xff]  }
 0x1f3   : > { %1934 = vmatprep.subr.bf16.mxu0 %v8829_v52  ;;  %v8889_v52 = vld [vmem:[%s9775_s24 + $0x2b4] ss:$24 sps:$4 sm:$0xff]  }
 0x1f5   : > { %1884 = vmatmul.mubr.bf16.gmra.mrb[20].mxu0 %v10377_v50 }
 0x1f6   : > { %1935 = vmatpush1.bf16.msra.mxu0 %v8827_v33  ;;  %1893 = vmatprep.mubr.bf16.mxu0 %v10380_v60  ;;  %v8890_v33 = vld [vmem:[%s9775_s24 + $0x2e0] ss:$24 sps:$4 sm:$0xff]   ;;  %s14755_s24 = sld [smem:[#allocation9_spill]] }
 0x1f7   : > { %1936 = vmatprep.subr.bf16.mxu0 %v8832_v59 }
 0x1fa   : > { %1937 = vmatpush1.bf16.msra.mxu0 %v8830_v18 }
 0x1fb   : > { %1938 = vmatprep.subr.bf16.mxu0 %v8835_v8 }
 0x1fd   : > { %1894 = vmatmul.mubr.bf16.gmra.mrb[24].mxu0 %v10391_v37 }
 0x1fe   : > { %1939 = vmatpush1.bf16.msra.mxu0 %v8833_v34  ;;  %1903 = vmatprep.mubr.bf16.mxu0 %v10394_v40 }
 0x1ff   : > { %1940 = vmatprep.subr.bf16.mxu0 %v8838_v48 }
 0x202   : > { %1941 = vmatpush1.bf16.msra.mxu0 %v8836_v15 }
 0x203   : > { %1942 = vmatprep.subr.bf16.mxu0 %v8841_v0 }
 0x205   : > { %1904 = vmatmul.mubr.bf16.gmra.mrb[28].mxu0 %v10403_v58 }
 0x206   : > { %1943 = vmatpush1.bf16.msra.mxu0 %v8839_v57  ;;  %1946 = vmatprep.mubr.bf16.mxu0 %v10279_v4 }
 0x207   : > { %1944 = vmatprep.subr.bf16.mxu0 %v8844_v1 }
 0x20a   : > { %1945 = vmatpush1.bf16.msra.mxu0 %v8842_v54 }
 0x20b   : > { %2027 = vmatprep.subr.bf16.mxu0 %v8847_v55 }
 0x20d   : > { %1947 = vmatmul.mubr.bf16.vlgmr.msra.gmra.mrb[32].mxu0 %v10306_v35 }
 0x20e   : > { %1956 = vmatprep.mubr.bf16.mxu0 %v10309_v14  ;;  %2028 = vmatpush1.bf16.msra.mxu0 %v8845_v2 }
 0x20f   : > { %2029 = vmatprep.subr.bf16.mxu0 %v8850_v42 }
 0x212   : > { %2030 = vmatpush1.bf16.msra.mxu0 %v8848_v43 }
 0x213   : > { %2031 = vmatprep.subr.bf16.mxu0 %v8853_v24 }
 0x215   : > { %1957 = vmatmul.mubr.bf16.gmra.mrb[36].mxu0 %v10320_v38 }
 0x216   : > { %1966 = vmatprep.mubr.bf16.mxu0 %v10323_v39  ;;  %2032 = vmatpush1.bf16.msra.mxu0 %v8851_v20 }
 0x217   : > { %2033 = vmatprep.subr.bf16.mxu0 %v8856_v25 }
 0x21a   : > { %2034 = vmatpush1.bf16.msra.mxu0 %v8854_v21 }
 0x21b   : > { %2035 = vmatprep.subr.bf16.mxu0 %v8859_v51 }
 0x21d   : > { %1967 = vmatmul.mubr.bf16.gmra.mrb[40].mxu0 %v10335_v6 }
 0x21e   : > { %1976 = vmatprep.mubr.bf16.mxu0 %v10338_v56  ;;  %2036 = vmatpush1.bf16.msra.mxu0 %v8857_v11 }
 0x21f   : > { %2037 = vmatprep.subr.bf16.mxu0 %v8862_v16 }
 0x222   : > { %2038 = vmatpush1.bf16.msra.mxu0 %v8860_v17 }
 0x223   : > { %2039 = vmatprep.subr.bf16.mxu0 %v8865_v5 }
 0x225   : > { %1977 = vmatmul.mubr.bf16.gmra.mrb[44].mxu0 %v10349_v62 }
 0x226   : > { %1986 = vmatprep.mubr.bf16.mxu0 %v10352_v27  ;;  %2040 = vmatpush1.bf16.msra.mxu0 %v8863_v44 }
 0x227   : > { %2041 = vmatprep.subr.bf16.mxu0 %v8868_v45 }
 0x22a   : > { %2042 = vmatpush1.bf16.msra.mxu0 %v8866_v26 }
 0x22b   : > { %2043 = vmatprep.subr.bf16.mxu0 %v8871_v63 }
 0x22d   : > { %1987 = vmatmul.mubr.bf16.gmra.mrb[48].mxu0 %v10363_v30 }
 0x22e   : > { %1996 = vmatprep.mubr.bf16.mxu0 %v10366_v31  ;;  %2044 = vmatpush1.bf16.msra.mxu0 %v8869_v28 }
 0x22f   : > { %2045 = vmatprep.subr.bf16.mxu0 %v8874_v41 }
 0x232   : > { %2046 = vmatpush1.bf16.msra.mxu0 %v8872_v46 }
 0x233   : > { %2047 = vmatprep.subr.bf16.mxu0 %v8877_v3 }
 0x235   : > { %1997 = vmatmul.mubr.bf16.gmra.mrb[52].mxu0 %v10377_v50 }
 0x236   : > { %2006 = vmatprep.mubr.bf16.mxu0 %v10380_v60  ;;  %2048 = vmatpush1.bf16.msra.mxu0 %v8875_v12 }
 0x237   : > { %2049 = vmatprep.subr.bf16.mxu0 %v8880_v13 }
 0x23a   : > { %2050 = vmatpush1.bf16.msra.mxu0 %v8878_v9 }
 0x23b   : > { %2051 = vmatprep.subr.bf16.mxu0 %v8883_v23 }
 0x23d   : > { %2007 = vmatmul.mubr.bf16.gmra.mrb[56].mxu0 %v10391_v37 }
 0x23e   : > { %2016 = vmatprep.mubr.bf16.mxu0 %v10394_v40  ;;  %2052 = vmatpush1.bf16.msra.mxu0 %v8881_v47 }
 0x23f   : > { %2053 = vmatprep.subr.bf16.mxu0 %v8886_v7 }
 0x242   : > { %2054 = vmatpush1.bf16.msra.mxu0 %v8884_v10 }
 0x243   : > { %2055 = vmatprep.subr.bf16.mxu0 %v8889_v52 }
 0x245   : > { %2017 = vmatmul.mubr.bf16.gmra.mrb[60].mxu0 %v10403_v58 }
 0x246   : > { %2056 = vmatpush1.bf16.msra.mxu0 %v8887_v53  ;;  %2059 = vmatprep.mubr.bf16.mxu0 %v10279_v4  ;;  %v1291_v4 = vlaneseq }
 0x247   : > { %2057 = vmatprep.subr.bf16.mxu0 %v8892_v32 }
 0x24a   : > { %2058 = vmatpush1.bf16.msra.mxu0 %v8890_v33 }
 0x24d   : > { %2060 = vmatmul.mubr.bf16.vlgmr.msra.gmra.mrb[64].mxu0 %v10306_v35  ;;  %v10472_v35 = vshrl.u32 %v1291_v4, 7 }
 0x24e   : > { %2069 = vmatprep.mubr.bf16.mxu0 %v10309_v14 }
 0x24f   : > { %v10475_v14 = vsub.s32 0, %v10472_v35 }
 0x251   : > { %14753 = vst [vmem:[#allocation10_spill] sm:$0xff] %v10475_v14 }
 0x255   : > { %2070 = vmatmul.mubr.bf16.gmra.mrb[68].mxu0 %v10320_v38  ;;  %v10478_v38 = vld [vmem:[%s14752_s16] sm:$0x3f] }
 0x256   : > { %2079 = vmatprep.mubr.bf16.mxu0 %v10323_v39  ;;  %v10481_v39 = vsub.s32 1, %v10472_v35 }
 0x258   : > { %14754 = vst [vmem:[#allocation11_spill] sm:$0xff] %v10481_v39 }
 0x25d   : > { %2080 = vmatmul.mubr.bf16.gmra.mrb[72].mxu0 %v10335_v6  ;;  %v10485_v6 = vrot.slane %v10478_v38, %v10475_v14 }
 0x25e   : > { %2089 = vmatprep.mubr.bf16.mxu0 %v10338_v56 }
 0x265   : > { %2090 = vmatmul.mubr.bf16.gmra.mrb[76].mxu0 %v10349_v62  ;;  %v10489_v62 = vrot.slane %v10478_v38, %v10481_v39 }
 0x266   : > { %2099 = vmatprep.mubr.bf16.mxu0 %v10352_v27 }
 0x26d   : > { %2100 = vmatmul.mubr.bf16.gmra.mrb[80].mxu0 %v10363_v30 }
 0x26e   : > { %2109 = vmatprep.mubr.bf16.mxu0 %v10366_v31 }
 0x275   : > { %2110 = vmatmul.mubr.bf16.gmra.mrb[84].mxu0 %v10377_v50 }
 0x276   : > { %2119 = vmatprep.mubr.bf16.mxu0 %v10380_v60 }
 0x27d   : > { %2120 = vmatmul.mubr.bf16.gmra.mrb[88].mxu0 %v10391_v37 }
 0x27e   : > { %2129 = vmatprep.mubr.bf16.mxu0 %v10394_v40 }
 0x285   : > { %2130 = vmatmul.mubr.bf16.gmra.mrb[92].mxu0 %v10403_v58 }
 0x2a0   : > { %v1835_v56 = vpop.f32.mrb[0].mxu0 }
 0x2a1   : > { %v1837_v27 = vpop.f32.mrb[1].mxu0  ;;  %v1836_v31 = vadd.f32 %v1835_v56, %v10485_v6 }
 0x2a2   : > { %v1839_v30 = vpop.f32.mrb[2].mxu0  ;;  %v1838_v60 = vadd.f32 %v1837_v27, %v10489_v62 }
 0x2a3   : > { %v1840_v50 = vadd.f32 %v1839_v30, %v10485_v6  ;;  %v1841_v59 = vpop.f32.mrb[3].mxu0 }
 0x2a4   : > { %v1842_v18 = vadd.f32 %v1841_v59, %v10489_v62 }
 0x2a5   : > { %v2140_v22 = vpack.c.bf16 %v1840_v50, %v1836_v31 }
 0x2a6   : > { %v2510_v19 = vpack.c.bf16 %v1842_v18, %v1838_v60 }
 0x2a7   : > { %8435 = vmatprep.mubr.bf16.mxu1 %v2140_v22 }
 0x2a8   : > { %v1845_v8 = vpop.f32.mrb[4].mxu0  ;;  %8499 = vmatprep.mubr.bf16.mxu0 %v2510_v19 }
 0x2a9   : > { %v10496_v36 = vadd.f32 %v1845_v8, %v10485_v6  ;;  %v1847_v29 = vpop.f32.mrb[5].mxu0 }
 0x2aa   : > { %v10499_v34 = vadd.f32 %v1847_v29, %v10489_v62  ;;  %v1849_v37 = vpop.f32.mrb[6].mxu0 }
 0x2ab   : > { %v10502_v48 = vadd.f32 %v1849_v37, %v10485_v6  ;;  %v1851_v40 = vpop.f32.mrb[7].mxu0 }
 0x2ac   : > { %v10505_v15 = vadd.f32 %v1851_v40, %v10489_v62 }
 0x2ad   : > { %v2141_v61 = vpack.c.bf16 %v10502_v48, %v10496_v36 }
 0x2ae   : > { %v2511_v49 = vpack.c.bf16 %v10505_v15, %v10499_v34 }
 0x2b0   : > { %v1855_v0 = vpop.f32.mrb[8].mxu0 }
 0x2b1   : > { %v10512_v57 = vadd.f32 %v1855_v0, %v10485_v6  ;;  %v1857_v58 = vpop.f32.mrb[9].mxu0 }
 0x2b2   : > { %v10515_v1 = vadd.f32 %v1857_v58, %v10489_v62  ;;  %v1859_v54 = vpop.f32.mrb[10].mxu0 }
 0x2b3   : > { %v10518_v55 = vadd.f32 %v1859_v54, %v10485_v6  ;;  %v1861_v2 = vpop.f32.mrb[11].mxu0 }
 0x2b4   : > { %v10521_v42 = vadd.f32 %v1861_v2, %v10489_v62 }
 0x2b5   : > { %v2142_v43 = vpack.c.bf16 %v10518_v55, %v10512_v57 }
 0x2b6   : > { %v2512_v24 = vpack.c.bf16 %v10521_v42, %v10515_v1 }
 0x2b8   : > { %v1865_v20 = vpop.f32.mrb[12].mxu0 }
 0x2b9   : > { %v10528_v25 = vadd.f32 %v1865_v20, %v10485_v6  ;;  %v1867_v21 = vpop.f32.mrb[13].mxu0 }
 0x2ba   : > { %v10531_v51 = vadd.f32 %v1867_v21, %v10489_v62  ;;  %v1869_v11 = vpop.f32.mrb[14].mxu0  ;;  %v14504_v21 = vsub.s32 2, %v10472_v35 }
 0x2bb   : > { %v10534_v16 = vadd.f32 %v1869_v11, %v10485_v6  ;;  %v1871_v17 = vpop.f32.mrb[15].mxu0 }
 0x2bc   : > { %v10537_v5 = vadd.f32 %v1871_v17, %v10489_v62  ;;  %v14503_v17 = vsub.s32 3, %v10472_v35 }
 0x2bd   : > { %v2143_v44 = vpack.c.bf16 %v10534_v16, %v10528_v25 }
 0x2be   : > { %v2513_v45 = vpack.c.bf16 %v10537_v5, %v10531_v51 }
 0x2c0   : > { %v1875_v26 = vpop.f32.mrb[16].mxu0 }
 0x2c1   : > { %v10544_v63 = vadd.f32 %v1875_v26, %v10485_v6  ;;  %v1877_v28 = vpop.f32.mrb[17].mxu0 }
 0x2c2   : > { %v10547_v41 = vadd.f32 %v1877_v28, %v10489_v62  ;;  %v1879_v46 = vpop.f32.mrb[18].mxu0 }
 0x2c3   : > { %v10550_v3 = vadd.f32 %v1879_v46, %v10485_v6  ;;  %v1881_v12 = vpop.f32.mrb[19].mxu0  ;;  %v10612_v46 = vrot.slane %v10478_v38, %v14504_v21 }
 0x2c4   : > { %v10553_v13 = vadd.f32 %v1881_v12, %v10489_v62  ;;  %v10617_v12 = vrot.slane %v10478_v38, %v14503_v17 }
 0x2c5   : > { %v2144_v9 = vpack.c.bf16 %v10550_v3, %v10544_v63 }
 0x2c6   : > { %v2514_v23 = vpack.c.bf16 %v10553_v13, %v10547_v41 }
 0x2c8   : > { %v1885_v47 = vpop.f32.mrb[20].mxu0 }
 0x2c9   : > { %v10560_v7 = vadd.f32 %v1885_v47, %v10485_v6  ;;  %v1887_v10 = vpop.f32.mrb[21].mxu0 }
 0x2ca   : > { %v10563_v52 = vadd.f32 %v1887_v10, %v10489_v62  ;;  %v1889_v53 = vpop.f32.mrb[22].mxu0 }
 0x2cb   : > { %v10566_v32 = vadd.f32 %v1889_v53, %v10485_v6  ;;  %v1891_v33 = vpop.f32.mrb[23].mxu0 }
 0x2cc   : > { %v10569_v4 = vadd.f32 %v1891_v33, %v10489_v62 }
 0x2cd   : > { %v2145_v56 = vpack.c.bf16 %v10566_v32, %v10560_v7 }
 0x2ce   : > { %v2515_v27 = vpack.c.bf16 %v10569_v4, %v10563_v52 }
 0x2d0   : > { %v1895_v30 = vpop.f32.mrb[24].mxu0 }
 0x2d1   : > { %v10576_v31 = vadd.f32 %v1895_v30, %v10485_v6  ;;  %v1897_v50 = vpop.f32.mrb[25].mxu0 }
 0x2d2   : > { %v10579_v59 = vadd.f32 %v1897_v50, %v10489_v62  ;;  %v1899_v60 = vpop.f32.mrb[26].mxu0 }
 0x2d3   : > { %v10582_v18 = vadd.f32 %v1899_v60, %v10485_v6  ;;  %v1901_v22 = vpop.f32.mrb[27].mxu0 }
 0x2d4   : > { %v10585_v19 = vadd.f32 %v1901_v22, %v10489_v62 }
 0x2d5   : > { %v2146_v8 = vpack.c.bf16 %v10582_v18, %v10576_v31 }
 0x2d6   : > { %v2516_v29 = vpack.c.bf16 %v10585_v19, %v10579_v59 }
 0x2d8   : > { %v1905_v37 = vpop.f32.mrb[28].mxu0 }
 0x2d9   : > { %v10592_v40 = vadd.f32 %v1905_v37, %v10485_v6  ;;  %v1907_v0 = vpop.f32.mrb[29].mxu0 }
 0x2da   : > { %v10595_v58 = vadd.f32 %v1907_v0, %v10489_v62  ;;  %v1909_v54 = vpop.f32.mrb[30].mxu0 }
 0x2db   : > { %v10598_v2 = vadd.f32 %v1909_v54, %v10485_v6  ;;  %v1911_v20 = vpop.f32.mrb[31].mxu0 }
 0x2dc   : > { %v10602_v11 = vadd.f32 %v1911_v20, %v10489_v62 }
 0x2dd   : > { %v2147_v26 = vpack.c.bf16 %v10598_v2, %v10592_v40 }
 0x2de   : > { %v2517_v28 = vpack.c.bf16 %v10602_v11, %v10595_v58 }
 0x2e0   : > { %v1948_v6 = vpop.f32.mrb[32].mxu0 }
 0x2e1   : > { %v1950_v62 = vpop.f32.mrb[33].mxu0  ;;  %v1949_v10 = vadd.f32 %v1948_v6, %v10612_v46 }
 0x2e2   : > { %v1952_v47 = vpop.f32.mrb[34].mxu0  ;;  %v1951_v30 = vadd.f32 %v1950_v62, %v10617_v12 }
 0x2e3   : > { %v1953_v53 = vadd.f32 %v1952_v47, %v10612_v46  ;;  %v1954_v33 = vpop.f32.mrb[35].mxu0 }
 0x2e4   : > { %v1955_v50 = vadd.f32 %v1954_v33, %v10617_v12 }
 0x2e5   : > { %v2148_v60 = vpack.c.bf16 %v1953_v53, %v1949_v10 }
 0x2e6   : > { %v2518_v22 = vpack.c.bf16 %v1955_v50, %v1951_v30 }
 0x2e7   : > { %8419 = vmatprep.subr.bf16.mxu1 %v2148_v60 }
 0x2e8   : > { %v1958_v37 = vpop.f32.mrb[36].mxu0  ;;  %8420 = vmatpush3.bf16.xpose.msra.mxu1 %v2148_v60  ;;  %8483 = vmatprep.subr.bf16.mxu0 %v2518_v22 }
 0x2e9   : > { %v1960_v0 = vpop.f32.mrb[37].mxu0  ;;  %8484 = vmatpush3.bf16.xpose.msra.mxu0 %v2518_v22  ;;  %v1959_v20 = vadd.f32 %v1958_v37, %v10612_v46 }
 0x2ea   : > { %v1962_v54 = vpop.f32.mrb[38].mxu0  ;;  %v1961_v47 = vadd.f32 %v1960_v0, %v10617_v12 }
 0x2eb   : > { %v1963_v6 = vadd.f32 %v1962_v54, %v10612_v46  ;;  %v1964_v17 = vpop.f32.mrb[39].mxu0 }
 0x2ec   : > { %v1965_v62 = vadd.f32 %v1964_v17, %v10617_v12 }
 0x2ed   : > { %v2149_v21 = vpack.c.bf16 %v1963_v6, %v1959_v20 }
 0x2ee   : > { %v2519_v33 = vpack.c.bf16 %v1965_v62, %v1961_v47 }
 0x2ef   : > { %8421 = vmatprep.subr.bf16.mxu1 %v2149_v21 }
 0x2f0   : > { %v1968_v10 = vpop.f32.mrb[40].mxu0  ;;  %8422 = vmatpush3.bf16.xpose.msra.mxu1 %v2149_v21  ;;  %8485 = vmatprep.subr.bf16.mxu0 %v2519_v33 }
 0x2f1   : > { %v1970_v53 = vpop.f32.mrb[41].mxu0  ;;  %8486 = vmatpush3.bf16.xpose.msra.mxu0 %v2519_v33  ;;  %v1969_v50 = vadd.f32 %v1968_v10, %v10612_v46 }
 0x2f2   : > { %v1972_v30 = vpop.f32.mrb[42].mxu0  ;;  %v1971_v37 = vadd.f32 %v1970_v53, %v10617_v12 }
 0x2f3   : > { %v1973_v60 = vadd.f32 %v1972_v30, %v10612_v46  ;;  %v1974_v22 = vpop.f32.mrb[43].mxu0 }
 0x2f4   : > { %v1975_v0 = vadd.f32 %v1974_v22, %v10617_v12 }
 0x2f5   : > { %v2150_v54 = vpack.c.bf16 %v1973_v60, %v1969_v50 }
 0x2f6   : > { %v2520_v17 = vpack.c.bf16 %v1975_v0, %v1971_v37 }
 0x2f7   : > { %8423 = vmatprep.subr.bf16.mxu1 %v2150_v54 }
 0x2f8   : > { %v1978_v20 = vpop.f32.mrb[44].mxu0  ;;  %8424 = vmatpush3.bf16.xpose.msra.mxu1 %v2150_v54  ;;  %8487 = vmatprep.subr.bf16.mxu0 %v2520_v17 }
 0x2f9   : > { %v1980_v21 = vpop.f32.mrb[45].mxu0  ;;  %8488 = vmatpush3.bf16.xpose.msra.mxu0 %v2520_v17  ;;  %v1979_v47 = vadd.f32 %v1978_v20, %v10612_v46 }
 0x2fa   : > { %v1982_v6 = vpop.f32.mrb[46].mxu0  ;;  %v1981_v10 = vadd.f32 %v1980_v21, %v10617_v12 }
 0x2fb   : > { %v1983_v62 = vadd.f32 %v1982_v6, %v10612_v46  ;;  %v1984_v33 = vpop.f32.mrb[47].mxu0 }
 0x2fc   : > { %v1985_v53 = vadd.f32 %v1984_v33, %v10617_v12 }
 0x2fd   : > { %v2151_v30 = vpack.c.bf16 %v1983_v62, %v1979_v47 }
 0x2fe   : > { %v2521_v22 = vpack.c.bf16 %v1985_v53, %v1981_v10 }
 0x2ff   : > { %8425 = vmatprep.subr.bf16.mxu1 %v2151_v30 }
 0x300   : > { %v1988_v50 = vpop.f32.mrb[48].mxu0  ;;  %8426 = vmatpush3.bf16.xpose.msra.mxu1 %v2151_v30  ;;  %8489 = vmatprep.subr.bf16.mxu0 %v2521_v22 }
 0x301   : > { %v1990_v60 = vpop.f32.mrb[49].mxu0  ;;  %8490 = vmatpush3.bf16.xpose.msra.mxu0 %v2521_v22  ;;  %v1989_v0 = vadd.f32 %v1988_v50, %v10612_v46 }
 0x302   : > { %v1992_v37 = vpop.f32.mrb[50].mxu0  ;;  %v1991_v20 = vadd.f32 %v1990_v60, %v10617_v12 }
 0x303   : > { %v1993_v54 = vadd.f32 %v1992_v37, %v10612_v46  ;;  %v1994_v17 = vpop.f32.mrb[51].mxu0 }
 0x304   : > { %v1995_v21 = vadd.f32 %v1994_v17, %v10617_v12 }
 0x305   : > { %v2152_v6 = vpack.c.bf16 %v1993_v54, %v1989_v0 }
 0x306   : > { %v2522_v33 = vpack.c.bf16 %v1995_v21, %v1991_v20 }
 0x307   : > { %8427 = vmatprep.subr.bf16.mxu1 %v2152_v6 }
 0x308   : > { %v1998_v47 = vpop.f32.mrb[52].mxu0  ;;  %8428 = vmatpush3.bf16.xpose.msra.mxu1 %v2152_v6  ;;  %8491 = vmatprep.subr.bf16.mxu0 %v2522_v33 }
 0x309   : > { %v2000_v62 = vpop.f32.mrb[53].mxu0  ;;  %8492 = vmatpush3.bf16.xpose.msra.mxu0 %v2522_v33  ;;  %v1999_v53 = vadd.f32 %v1998_v47, %v10612_v46 }
 0x30a   : > { %v2002_v10 = vpop.f32.mrb[54].mxu0  ;;  %v2001_v50 = vadd.f32 %v2000_v62, %v10617_v12 }
 0x30b   : > { %v2003_v30 = vadd.f32 %v2002_v10, %v10612_v46  ;;  %v2004_v22 = vpop.f32.mrb[55].mxu0 }
 0x30c   : > { %v2005_v60 = vadd.f32 %v2004_v22, %v10617_v12 }
 0x30d   : > { %v2153_v37 = vpack.c.bf16 %v2003_v30, %v1999_v53 }
 0x30e   : > { %v2523_v17 = vpack.c.bf16 %v2005_v60, %v2001_v50  ;;  %v14506_v50 = vsub.s32 4, %v10472_v35 }
 0x30f   : > { %8429 = vmatprep.subr.bf16.mxu1 %v2153_v37 }
 0x310   : > { %v2008_v0 = vpop.f32.mrb[56].mxu0  ;;  %8430 = vmatpush3.bf16.xpose.msra.mxu1 %v2153_v37  ;;  %8493 = vmatprep.subr.bf16.mxu0 %v2523_v17  ;;  %v14505_v37 = vsub.s32 5, %v10472_v35 }
 0x311   : > { %v2010_v54 = vpop.f32.mrb[57].mxu0  ;;  %8494 = vmatpush3.bf16.xpose.msra.mxu0 %v2523_v17  ;;  %v2009_v21 = vadd.f32 %v2008_v0, %v10612_v46 }
 0x312   : > { %v2012_v20 = vpop.f32.mrb[58].mxu0  ;;  %v2011_v47 = vadd.f32 %v2010_v54, %v10617_v12 }
 0x313   : > { %v2013_v6 = vadd.f32 %v2012_v20, %v10612_v46  ;;  %v2014_v33 = vpop.f32.mrb[59].mxu0 }
 0x314   : > { %v2015_v62 = vadd.f32 %v2014_v33, %v10617_v12  ;;  %v10656_v33 = vrot.slane %v10478_v38, %v14506_v50  ;;  %v3629_v50 = vld [vmem:[%s9804_s3 + $0xb8] sm:$0xff] }
 0x315   : > { %v2154_v10 = vpack.c.bf16 %v2013_v6, %v2009_v21 }
 0x316   : > { %v2524_v22 = vpack.c.bf16 %v2015_v62, %v2011_v47  ;;  %v10661_v62 = vrot.slane %v10478_v38, %v14505_v37  ;;  %v3625_v37 = vld [vmem:[%s9804_s3 + $0x98] sm:$0xff] }
 0x317   : > { %8431 = vmatprep.subr.bf16.mxu1 %v2154_v10 }
 0x318   : > { %v2018_v53 = vpop.f32.mrb[60].mxu0  ;;  %8432 = vmatpush3.bf16.xpose.msra.mxu1 %v2154_v10  ;;  %8495 = vmatprep.subr.bf16.mxu0 %v2524_v22 }
 0x319   : > { %v2020_v30 = vpop.f32.mrb[61].mxu0  ;;  %8496 = vmatpush3.bf16.xpose.msra.mxu0 %v2524_v22  ;;  %v2019_v17 = vadd.f32 %v2018_v53, %v10612_v46 }
 0x31a   : > { %v2022_v60 = vpop.f32.mrb[62].mxu0  ;;  %v2021_v20 = vadd.f32 %v2020_v30, %v10617_v12 }
 0x31b   : > { %v2023_v0 = vadd.f32 %v2022_v60, %v10612_v46  ;;  %v2024_v54 = vpop.f32.mrb[63].mxu0 }
 0x31c   : > { %v2025_v21 = vadd.f32 %v2024_v54, %v10617_v12 }
 0x31d   : > { %v2155_v6 = vpack.c.bf16 %v2023_v0, %v2019_v17 }
 0x31e   : > { %v2525_v47 = vpack.c.bf16 %v2025_v21, %v2021_v20 }
 0x31f   : > { %8433 = vmatprep.subr.bf16.mxu1 %v2155_v6 }
 0x320   : > { %8434 = vmatpush3.bf16.xpose.msra.mxu1 %v2155_v6  ;;  %8497 = vmatprep.subr.bf16.mxu0 %v2525_v47  ;;  %v2061_v46 = vpop.f32.mrb[64].mxu0 }
 0x321   : > { %8498 = vmatpush3.bf16.xpose.msra.mxu0 %v2525_v47  ;;  %v2062_v10 = vadd.f32 %v2061_v46, %v10656_v33  ;;  %v2063_v12 = vpop.f32.mrb[65].mxu0 }
 0x322   : > { %v2064_v22 = vadd.f32 %v2063_v12, %v10661_v62  ;;  %v2065_v53 = vpop.f32.mrb[66].mxu0 }
 0x323   : > { %v2066_v30 = vadd.f32 %v2065_v53, %v10656_v33  ;;  %v2067_v60 = vpop.f32.mrb[67].mxu0 }
 0x324   : > { %v2068_v17 = vadd.f32 %v2067_v60, %v10661_v62 }
 0x325   : > { %v2156_v0 = vpack.c.bf16 %v2066_v30, %v2062_v10 }
 0x326   : > { %v2526_v54 = vpack.c.bf16 %v2068_v17, %v2064_v22 }
 0x327   : > { %8436 = vmatmul.mubr.bf16.vlgmr.msra.gmra.mrb[0].mxu1 %v2141_v61  ;;  %8451 = vmatprep.subr.bf16.mxu1 %v2156_v0 }
 0x328   : > { %8439 = vmatprep.mubr.bf16.mxu1 %v2142_v43  ;;  %8500 = vmatmul.mubr.bf16.vlgmr.msra.gmra.mrb[96].mxu0 %v2511_v49  ;;  %v2071_v38 = vpop.f32.mrb[68].mxu0 }
 0x329   : > { %8503 = vmatprep.mubr.bf16.mxu0 %v2512_v24  ;;  %v2072_v20 = vadd.f32 %v2071_v38, %v10656_v33  ;;  %8515 = vmatprep.subr.bf16.mxu0 %v2526_v54  ;;  %v2073_v21 = vpop.f32.mrb[69].mxu0 }
 0x32a   : > { %v2074_v36 = vadd.f32 %v2073_v21, %v10661_v62  ;;  %8452 = vmatpush3.bf16.msra.mxu1 %v2156_v0  ;;  %8516 = vmatpush3.bf16.msra.mxu0 %v2526_v54  ;;  %v2075_v48 = vpop.f32.mrb[70].mxu0 }
 0x32b   : > { %v2076_v61 = vadd.f32 %v2075_v48, %v10656_v33  ;;  %v2077_v57 = vpop.f32.mrb[71].mxu0 }
 0x32c   : > { %v2078_v34 = vadd.f32 %v2077_v57, %v10661_v62 }
 0x32d   : > { %v2157_v15 = vpack.c.bf16 %v2076_v61, %v2072_v20 }
 0x32e   : > { %v2527_v49 = vpack.c.bf16 %v2078_v34, %v2074_v36 }
 0x32f   : > { %8440 = vmatmul.mubr.bf16.gmra.mrb[4].mxu1 %v2143_v44  ;;  %8453 = vmatprep.subr.bf16.mxu1 %v2157_v15 }
 0x330   : > { %8443 = vmatprep.mubr.bf16.mxu1 %v2144_v9  ;;  %8504 = vmatmul.mubr.bf16.gmra.mrb[100].mxu0 %v2513_v45  ;;  %v2081_v1 = vpop.f32.mrb[72].mxu0 }
 0x331   : > { %8507 = vmatprep.mubr.bf16.mxu0 %v2514_v23  ;;  %v2082_v55 = vadd.f32 %v2081_v1, %v10656_v33  ;;  %8517 = vmatprep.subr.bf16.mxu0 %v2527_v49  ;;  %v2083_v42 = vpop.f32.mrb[73].mxu0 }
 0x332   : > { %v2084_v43 = vadd.f32 %v2083_v42, %v10661_v62  ;;  %8454 = vmatpush3.bf16.msra.mxu1 %v2157_v15  ;;  %8518 = vmatpush3.bf16.msra.mxu0 %v2527_v49  ;;  %v2085_v24 = vpop.f32.mrb[74].mxu0 }
 0x333   : > { %v2086_v25 = vadd.f32 %v2085_v24, %v10656_v33  ;;  %v2087_v16 = vpop.f32.mrb[75].mxu0 }
 0x334   : > { %v2088_v51 = vadd.f32 %v2087_v16, %v10661_v62 }
 0x335   : > { %v2158_v5 = vpack.c.bf16 %v2086_v25, %v2082_v55 }
 0x336   : > { %v2528_v44 = vpack.c.bf16 %v2088_v51, %v2084_v43 }
 0x337   : > { %8444 = vmatmul.mubr.bf16.gmra.mrb[8].mxu1 %v2145_v56  ;;  %8455 = vmatprep.subr.bf16.mxu1 %v2158_v5 }
 0x338   : > { %8447 = vmatprep.mubr.bf16.mxu1 %v2146_v8  ;;  %8508 = vmatmul.mubr.bf16.gmra.mrb[104].mxu0 %v2515_v27  ;;  %v2091_v45 = vpop.f32.mrb[76].mxu0 }
 0x339   : > { %8511 = vmatprep.mubr.bf16.mxu0 %v2516_v29  ;;  %v2092_v63 = vadd.f32 %v2091_v45, %v10656_v33  ;;  %8519 = vmatprep.subr.bf16.mxu0 %v2528_v44  ;;  %v2093_v41 = vpop.f32.mrb[77].mxu0 }
 0x33a   : > { %v2094_v3 = vadd.f32 %v2093_v41, %v10661_v62  ;;  %8456 = vmatpush3.bf16.msra.mxu1 %v2158_v5  ;;  %8520 = vmatpush3.bf16.msra.mxu0 %v2528_v44  ;;  %v2095_v13 = vpop.f32.mrb[78].mxu0 }
 0x33b   : > { %v2096_v9 = vadd.f32 %v2095_v13, %v10656_v33  ;;  %v2097_v23 = vpop.f32.mrb[79].mxu0 }
 0x33c   : > { %v2098_v7 = vadd.f32 %v2097_v23, %v10661_v62 }
 0x33d   : > { %v2159_v52 = vpack.c.bf16 %v2096_v9, %v2092_v63 }
 0x33e   : > { %v2529_v32 = vpack.c.bf16 %v2098_v7, %v2094_v3 }
 0x33f   : > { %8448 = vmatmul.mubr.bf16.gmra.mrb[12].mxu1 %v2147_v26  ;;  %8457 = vmatprep.subr.bf16.mxu1 %v2159_v52 }
 0x340   : > { %8512 = vmatmul.mubr.bf16.gmra.mrb[108].mxu0 %v2517_v28  ;;  %v2101_v4 = vpop.f32.mrb[80].mxu0  ;;  %8521 = vmatprep.subr.bf16.mxu0 %v2529_v32 }
 0x341   : > { %v2102_v56 = vadd.f32 %v2101_v4, %v10656_v33  ;;  %v2103_v27 = vpop.f32.mrb[81].mxu0  ;;  %8458 = vmatpush3.bf16.msra.mxu1 %v2159_v52  ;;  %8522 = vmatpush3.bf16.msra.mxu0 %v2529_v32 }
 0x342   : > { %v2104_v31 = vadd.f32 %v2103_v27, %v10661_v62  ;;  %v2105_v59 = vpop.f32.mrb[82].mxu0 }
 0x343   : > { %v2106_v18 = vadd.f32 %v2105_v59, %v10656_v33  ;;  %v2107_v19 = vpop.f32.mrb[83].mxu0 }
 0x344   : > { %v2108_v8 = vadd.f32 %v2107_v19, %v10661_v62 }
 0x345   : > { %v2160_v29 = vpack.c.bf16 %v2106_v18, %v2102_v56 }
 0x346   : > { %v2530_v40 = vpack.c.bf16 %v2108_v8, %v2104_v31 }
 0x347   : > { %8459 = vmatprep.subr.bf16.mxu1 %v2160_v29 }
 0x348   : > { %v2111_v58 = vpop.f32.mrb[84].mxu0  ;;  %8523 = vmatprep.subr.bf16.mxu0 %v2530_v40  ;;  %8460 = vmatpush3.bf16.msra.mxu1 %v2160_v29 }
 0x349   : > { %v2112_v2 = vadd.f32 %v2111_v58, %v10656_v33  ;;  %v2113_v11 = vpop.f32.mrb[85].mxu0  ;;  %8524 = vmatpush3.bf16.msra.mxu0 %v2530_v40 }
 0x34a   : > { %v2114_v26 = vadd.f32 %v2113_v11, %v10661_v62  ;;  %v2115_v28 = vpop.f32.mrb[86].mxu0 }
 0x34b   : > { %v2116_v6 = vadd.f32 %v2115_v28, %v10656_v33  ;;  %v2117_v47 = vpop.f32.mrb[87].mxu0 }
 0x34c   : > { %v2118_v46 = vadd.f32 %v2117_v47, %v10661_v62 }
 0x34d   : > { %v2161_v10 = vpack.c.bf16 %v2116_v6, %v2112_v2 }
 0x34e   : > { %v2531_v12 = vpack.c.bf16 %v2118_v46, %v2114_v26 }
 0x34f   : > { %8461 = vmatprep.subr.bf16.mxu1 %v2161_v10 }
 0x350   : > { %v2121_v22 = vpop.f32.mrb[88].mxu0  ;;  %8525 = vmatprep.subr.bf16.mxu0 %v2531_v12  ;;  %8462 = vmatpush3.bf16.msra.mxu1 %v2161_v10 }
 0x351   : > { %v2122_v53 = vadd.f32 %v2121_v22, %v10656_v33  ;;  %v2123_v30 = vpop.f32.mrb[89].mxu0  ;;  %8526 = vmatpush3.bf16.msra.mxu0 %v2531_v12 }
 0x352   : > { %v2124_v60 = vadd.f32 %v2123_v30, %v10661_v62  ;;  %v2125_v17 = vpop.f32.mrb[90].mxu0 }
 0x353   : > { %v2126_v0 = vadd.f32 %v2125_v17, %v10656_v33  ;;  %v2127_v54 = vpop.f32.mrb[91].mxu0 }
 0x354   : > { %v2128_v38 = vadd.f32 %v2127_v54, %v10661_v62 }
 0x355   : > { %v2162_v20 = vpack.c.bf16 %v2126_v0, %v2122_v53 }
 0x356   : > { %v2532_v21 = vpack.c.bf16 %v2128_v38, %v2124_v60 }
 0x357   : > { %8463 = vmatprep.subr.bf16.mxu1 %v2162_v20 }
 0x358   : > { %v2131_v36 = vpop.f32.mrb[92].mxu0  ;;  %8527 = vmatprep.subr.bf16.mxu0 %v2532_v21  ;;  %8464 = vmatpush3.bf16.msra.mxu1 %v2162_v20 }
 0x359   : > { %v2132_v48 = vadd.f32 %v2131_v36, %v10656_v33  ;;  %v2133_v61 = vpop.f32.mrb[93].mxu0  ;;  %8528 = vmatpush3.bf16.msra.mxu0 %v2532_v21 }
 0x35a   : > { %v2134_v57 = vadd.f32 %v2133_v61, %v10661_v62  ;;  %v2135_v34 = vpop.f32.mrb[94].mxu0 }
 0x35b   : > { %v2136_v15 = vadd.f32 %v2135_v34, %v10656_v33  ;;  %v2137_v49 = vpop.f32.mrb[95].mxu0 }
 0x35c   : > { %v2138_v1 = vadd.f32 %v2137_v49, %v10661_v62 }
 0x35d   : > { %v2163_v55 = vpack.c.bf16 %v2136_v15, %v2132_v48 }
 0x35e   : > { %v2533_v42 = vpack.c.bf16 %v2138_v1, %v2134_v57 }
 0x35f   : > { %8465 = vmatprep.subr.bf16.mxu1 %v2163_v55 }
 0x360   : > { %8529 = vmatprep.subr.bf16.mxu0 %v2533_v42  ;;  %8466 = vmatpush3.bf16.msra.mxu1 %v2163_v55 }
 0x361   : > { %8530 = vmatpush3.bf16.msra.mxu0 %v2533_v42 }
 0x3fa   : > { %v10737_v43 = vpop.f32.mrb[0].mxu1 }
 0x3fb   : > { %v10739_v24 = vpop.f32.mrb[1].mxu1  ;;  %v10741_v25 = vpop.f32.mrb[96].mxu0 }
 0x3fc   : > { %2635 = vmax.xlane.f32.xlu0 %v10741_v25  ;;  %v10744_v16 = vpop.f32.mrb[97].mxu0  ;;  %2261 = vmax.xlane.f32.xlu1 %v10739_v24  ;;  %v10747_v33 = vpop.f32.mrb[2].mxu1 }
 0x3fd   : > { %v10749_v62 = vpop.f32.mrb[3].mxu1  ;;  %v10751_v51 = vpop.f32.mrb[98].mxu0 }
 0x3fe   : > { %v10753_v5 = vpop.f32.mrb[99].mxu0 }
 0x400   : > { %2631 = vmax.xlane.f32.xlu0 %v10744_v16  ;;  %2263 = vmax.xlane.f32.xlu1 %v10749_v62 }
 0x402   : > { %v10757_v44 = vpop.f32.mrb[4].mxu1 }
 0x403   : > { %v10759_v45 = vpop.f32.mrb[5].mxu1  ;;  %v10761_v63 = vpop.f32.mrb[100].mxu0 }
 0x404   : > { %2633 = vmax.xlane.f32.xlu0 %v10753_v5  ;;  %v10764_v41 = vpop.f32.mrb[101].mxu0  ;;  %2637 = vmax.xlane.f32.xlu1 %v10751_v51  ;;  %v10767_v3 = vpop.f32.mrb[6].mxu1 }
 0x405   : > { %v10769_v13 = vpop.f32.mrb[7].mxu1  ;;  %v10771_v9 = vpop.f32.mrb[102].mxu0 }
 0x406   : > { %v10773_v23 = vpop.f32.mrb[103].mxu0 }
 0x408   : > { %2265 = vmax.xlane.f32.xlu0 %v10737_v43  ;;  %2267 = vmax.xlane.f32.xlu1 %v10747_v33 }
 0x40a   : > { %v10777_v7 = vpop.f32.mrb[8].mxu1 }
 0x40b   : > { %v10779_v52 = vpop.f32.mrb[9].mxu1  ;;  %v10781_v32 = vpop.f32.mrb[104].mxu0 }
 0x40c   : > { %v10783_v4 = vpop.f32.mrb[105].mxu0  ;;  %2269 = vmax.xlane.f32.xlu0 %v10759_v45  ;;  %2271 = vmax.xlane.f32.xlu1 %v10769_v13  ;;  %v10787_v56 = vpop.f32.mrb[10].mxu1 }
 0x40d   : > { %v10789_v27 = vpop.f32.mrb[11].mxu1  ;;  %v10791_v31 = vpop.f32.mrb[106].mxu0 }
 0x40e   : > { %v10793_v59 = vpop.f32.mrb[107].mxu0 }
 0x410   : > { %2643 = vmax.xlane.f32.xlu0 %v10761_v63  ;;  %2645 = vmax.xlane.f32.xlu1 %v10771_v9 }
 0x412   : > { %v10797_v18 = vpop.f32.mrb[12].mxu1 }
 0x413   : > { %v10799_v19 = vpop.f32.mrb[13].mxu1  ;;  %v10801_v8 = vpop.f32.mrb[108].mxu0 }
 0x414   : > { %v10803_v29 = vpop.f32.mrb[109].mxu0  ;;  %2639 = vmax.xlane.f32.xlu0 %v10764_v41  ;;  %2641 = vmax.xlane.f32.xlu1 %v10773_v23  ;;  %v10807_v40 = vpop.f32.mrb[14].mxu1 }
 0x415   : > { %v10809_v58 = vpop.f32.mrb[15].mxu1  ;;  %v10811_v2 = vpop.f32.mrb[110].mxu0 }
 0x416   : > { %v10813_v11 = vpop.f32.mrb[111].mxu0 }
 0x418   : > { %2273 = vmax.xlane.f32.xlu0 %v10757_v44  ;;  %2275 = vmax.xlane.f32.xlu1 %v10767_v3 }
 0x41c   : > { %2277 = vmax.xlane.f32.xlu0 %v10779_v52  ;;  %2279 = vmax.xlane.f32.xlu1 %v10789_v27 }
 0x420   : > { %2651 = vmax.xlane.f32.xlu0 %v10781_v32  ;;  %2653 = vmax.xlane.f32.xlu1 %v10791_v31 }
 0x424   : > { %2647 = vmax.xlane.f32.xlu0 %v10783_v4  ;;  %2649 = vmax.xlane.f32.xlu1 %v10793_v59 }
 0x428   : > { %2281 = vmax.xlane.f32.xlu0 %v10777_v7  ;;  %2283 = vmax.xlane.f32.xlu1 %v10787_v56 }
 0x42c   : > { %2285 = vmax.xlane.f32.xlu0 %v10799_v19  ;;  %2287 = vmax.xlane.f32.xlu1 %v10809_v58 }
 0x430   : > { %2659 = vmax.xlane.f32.xlu0 %v10801_v8  ;;  %2661 = vmax.xlane.f32.xlu1 %v10811_v2 }
 0x434   : > { %2655 = vmax.xlane.f32.xlu0 %v10803_v29  ;;  %2657 = vmax.xlane.f32.xlu1 %v10813_v11 }
 0x438   : > { %2289 = vmax.xlane.f32.xlu0 %v10797_v18  ;;  %2291 = vmax.xlane.f32.xlu1 %v10807_v40 }
 0x489   : > { %v2636_v26 = vpop.xlane.xlu0 %2635  ;;  %v2262_v28 = vpop.xlane.xlu1 %2261 }
 0x48a   : > { %v2665_v6 = vsub.f32 %v10741_v25, %v2636_v26  ;;  %v2293_v47 = vsub.f32 %v10739_v24, %v2262_v28 }
 0x48c   : > { %v2309_v46 = vmul.f32 1.442695, %v2293_v47  ;;  %v2683_v22 = vmul.f32 1.442695, %v2665_v6 }
 0x48d   : > { %v2632_v10 = vpop.xlane.xlu0 %2631  ;;  %v2264_v12 = vpop.xlane.xlu1 %2263 }
 0x48e   : > { %v2663_v53 = vsub.f32 %v10744_v16, %v2632_v10  ;;  %v2294_v30 = vsub.f32 %v10749_v62, %v2264_v12  ;;  %9133 = vpow2.f32 %v2309_v46 }
 0x48f   : > { %9135 = vpow2.f32 %v2683_v22 }
 0x490   : > { %v2311_v60 = vmul.f32 1.442695, %v2294_v30  ;;  %v2679_v54 = vmul.f32 1.442695, %v2663_v53 }
 0x491   : > { %v2634_v17 = vpop.xlane.xlu0 %2633  ;;  %v2638_v0 = vpop.xlane.xlu1 %2637 }
 0x492   : > { %v2666_v38 = vsub.f32 %v10751_v51, %v2638_v0  ;;  %9137 = vpow2.f32 %v2311_v60  ;;  %v2664_v20 = vsub.f32 %v10753_v5, %v2634_v17 }
 0x493   : > { %9139 = vpow2.f32 %v2679_v54 }
 0x494   : > { %v2685_v21 = vmul.f32 1.442695, %v2666_v38  ;;  %v2681_v57 = vmul.f32 1.442695, %v2664_v20 }
 0x495   : > { %v2266_v36 = vpop.xlane.xlu0 %2265  ;;  %v2268_v48 = vpop.xlane.xlu1 %2267 }
 0x496   : > { %v2295_v61 = vsub.f32 %v10737_v43, %v2266_v36  ;;  %9141 = vpow2.f32 %v2685_v21  ;;  %v2296_v34 = vsub.f32 %v10747_v33, %v2268_v48 }
 0x498   : > { %v2313_v15 = vmul.f32 1.442695, %v2295_v61  ;;  %v10841_v49 = vpop.eup %9133  ;;  %v2315_v24 = vmul.f32 1.442695, %v2296_v34 }
 0x499   : > { %v2270_v1 = vpop.xlane.xlu0 %2269  ;;  %v2272_v55 = vpop.xlane.xlu1 %2271  ;;  %2341 = vadd.xlane.f32.xlu0 %v10841_v49 }
 0x49a   : > { %9143 = vpow2.f32 %v2313_v15  ;;  %v2297_v42 = vsub.f32 %v10759_v45, %v2270_v1  ;;  %v2298_v25 = vsub.f32 %v10769_v13, %v2272_v55  ;;  %v10846_v16 = vpop.eup %9135 }
 0x49b   : > { %9145 = vpow2.f32 %v2681_v57 }
 0x49c   : > { %v2317_v43 = vmul.f32 1.442695, %v2297_v42  ;;  %v10848_v62 = vpop.eup %9137  ;;  %v2319_v45 = vmul.f32 1.442695, %v2298_v25 }
 0x49d   : > { %v2644_v33 = vpop.xlane.xlu0 %2643  ;;  %v2646_v51 = vpop.xlane.xlu1 %2645  ;;  %2715 = vadd.xlane.f32.xlu0 %v10846_v16  ;;  %2343 = vadd.xlane.f32.xlu1 %v10848_v62 }
 0x49e   : > { %9147 = vpow2.f32 %v2317_v43  ;;  %v2669_v5 = vsub.f32 %v10761_v63, %v2644_v33  ;;  %v2670_v26 = vsub.f32 %v10771_v9, %v2646_v51  ;;  %v10854_v28 = vpop.eup %9139 }
 0x49f   : > { %9149 = vpow2.f32 %v2315_v24 }
 0x4a0   : > { %v2691_v13 = vmul.f32 1.442695, %v2669_v5  ;;  %v10856_v6 = vpop.eup %9141  ;;  %v2693_v63 = vmul.f32 1.442695, %v2670_v26 }
 0x4a1   : > { %v2640_v47 = vpop.xlane.xlu0 %2639  ;;  %v2642_v46 = vpop.xlane.xlu1 %2641  ;;  %2711 = vadd.xlane.f32.xlu0 %v10854_v28  ;;  %2717 = vadd.xlane.f32.xlu1 %v10856_v6 }
 0x4a2   : > { %9151 = vpow2.f32 %v2691_v13  ;;  %v2667_v10 = vsub.f32 %v10764_v41, %v2640_v47  ;;  %v2668_v12 = vsub.f32 %v10773_v23, %v2642_v46 }
 0x4a3   : > { %9153 = vpow2.f32 %v2319_v45 }
 0x4a4   : > { %v10862_v22 = vpop.eup %9143  ;;  %v2687_v9 = vmul.f32 1.442695, %v2667_v10  ;;  %v2689_v41 = vmul.f32 1.442695, %v2668_v12 }
 0x4a5   : > { %v10864_v53 = vpop.eup %9145  ;;  %v2274_v30 = vpop.xlane.xlu0 %2273  ;;  %2345 = vadd.xlane.f32.xlu0 %v10862_v22 }
 0x4a6   : > { %v2276_v60 = vpop.xlane.xlu1 %2275  ;;  %9155 = vpow2.f32 %v2687_v9  ;;  %v2299_v17 = vsub.f32 %v10757_v44, %v2274_v30  ;;  %2713 = vadd.xlane.f32.xlu1 %v10864_v53 }
 0x4a7   : > { %9157 = vpow2.f32 %v2693_v63  ;;  %v2300_v0 = vsub.f32 %v10767_v3, %v2276_v60 }
 0x4a8   : > { %v10870_v54 = vpop.eup %9147  ;;  %v2321_v23 = vmul.f32 1.442695, %v2299_v17 }
 0x4a9   : > { %v10872_v38 = vpop.eup %9149  ;;  %v2278_v20 = vpop.xlane.xlu0 %2277  ;;  %2349 = vadd.xlane.f32.xlu0 %v10870_v54  ;;  %v2323_v44 = vmul.f32 1.442695, %v2300_v0 }
 0x4aa   : > { %v2280_v21 = vpop.xlane.xlu1 %2279  ;;  %9159 = vpow2.f32 %v2321_v23  ;;  %v2301_v36 = vsub.f32 %v10779_v52, %v2278_v20  ;;  %2347 = vadd.xlane.f32.xlu1 %v10872_v38 }
 0x4ab   : > { %9161 = vpow2.f32 %v2689_v41  ;;  %v2302_v48 = vsub.f32 %v10789_v27, %v2280_v21 }
 0x4ac   : > { %v10878_v61 = vpop.eup %9151  ;;  %v2325_v3 = vmul.f32 1.442695, %v2301_v36 }
 0x4ad   : > { %v10880_v57 = vpop.eup %9153  ;;  %v2652_v34 = vpop.xlane.xlu0 %2651  ;;  %2723 = vadd.xlane.f32.xlu0 %v10878_v61  ;;  %v2327_v52 = vmul.f32 1.442695, %v2302_v48 }
 0x4ae   : > { %v2654_v15 = vpop.xlane.xlu1 %2653  ;;  %9163 = vpow2.f32 %v2325_v3  ;;  %v2673_v1 = vsub.f32 %v10781_v32, %v2652_v34  ;;  %2351 = vadd.xlane.f32.xlu1 %v10880_v57 }
 0x4af   : > { %9165 = vpow2.f32 %v2323_v44  ;;  %v2674_v55 = vsub.f32 %v10791_v31, %v2654_v15 }
 0x4b0   : > { %v10886_v42 = vpop.eup %9155  ;;  %v2699_v27 = vmul.f32 1.442695, %v2673_v1 }
 0x4b1   : > { %v10888_v24 = vpop.eup %9157  ;;  %v2648_v25 = vpop.xlane.xlu0 %2647  ;;  %2719 = vadd.xlane.f32.xlu0 %v10886_v42  ;;  %v2701_v32 = vmul.f32 1.442695, %v2674_v55 }
 0x4b2   : > { %v2650_v43 = vpop.xlane.xlu1 %2649  ;;  %9167 = vpow2.f32 %v2699_v27  ;;  %v2671_v33 = vsub.f32 %v10783_v4, %v2648_v25  ;;  %2725 = vadd.xlane.f32.xlu1 %v10888_v24 }
 0x4b3   : > { %9169 = vpow2.f32 %v2327_v52  ;;  %v2672_v51 = vsub.f32 %v10793_v59, %v2650_v43 }
 0x4b4   : > { %v10894_v5 = vpop.eup %9159  ;;  %v2695_v31 = vmul.f32 1.442695, %v2671_v33 }
 0x4b5   : > { %v10896_v45 = vpop.eup %9161  ;;  %v2282_v26 = vpop.xlane.xlu0 %2281  ;;  %2353 = vadd.xlane.f32.xlu0 %v10894_v5  ;;  %v2697_v4 = vmul.f32 1.442695, %v2672_v51 }
 0x4b6   : > { %v2284_v13 = vpop.xlane.xlu1 %2283  ;;  %9171 = vpow2.f32 %v2695_v31  ;;  %v2303_v47 = vsub.f32 %v10777_v7, %v2282_v26  ;;  %2721 = vadd.xlane.f32.xlu1 %v10896_v45 }
 0x4b7   : > { %9173 = vpow2.f32 %v2701_v32  ;;  %v2304_v46 = vsub.f32 %v10787_v56, %v2284_v13 }
 0x4b8   : > { %v10902_v10 = vpop.eup %9163  ;;  %v2329_v59 = vmul.f32 1.442695, %v2303_v47 }
 0x4b9   : > { %v10904_v63 = vpop.eup %9165  ;;  %v2286_v12 = vpop.xlane.xlu0 %2285  ;;  %2357 = vadd.xlane.f32.xlu0 %v10902_v10  ;;  %v2331_v30 = vmul.f32 1.442695, %v2304_v46  ;;  %v8895_v46 = vld [vmem:[%s14755_s24 + $0x4] ss:$8 sps:$4 sm:$0xff]  }
 0x4ba   : > { %v2288_v9 = vpop.xlane.xlu1 %2287  ;;  %9175 = vpow2.f32 %v2329_v59  ;;  %v2305_v7 = vsub.f32 %v10799_v19, %v2286_v12  ;;  %2355 = vadd.xlane.f32.xlu1 %v10904_v63  ;;  %3100 = vmatprep.subr.bf16.mxu0 %v8895_v46  ;;  %v8893_v46 = vld [vmem:[%s14755_s24] ss:$8 sps:$4 sm:$0xff]  }
 0x4bb   : > { %9177 = vpow2.f32 %v2697_v4  ;;  %v2306_v60 = vsub.f32 %v10809_v58, %v2288_v9 }
 0x4bc   : > { %v10910_v17 = vpop.eup %9167  ;;  %v2333_v56 = vmul.f32 1.442695, %v2305_v7 }
 0x4bd   : > { %v10912_v41 = vpop.eup %9169  ;;  %v2660_v0 = vpop.xlane.xlu0 %2659  ;;  %2731 = vadd.xlane.f32.xlu0 %v10910_v17  ;;  %v2335_v19 = vmul.f32 1.442695, %v2306_v60 }
 0x4be   : > { %v2662_v23 = vpop.xlane.xlu1 %2661  ;;  %9179 = vpow2.f32 %v2333_v56  ;;  %v2677_v20 = vsub.f32 %v10801_v8, %v2660_v0  ;;  %2359 = vadd.xlane.f32.xlu1 %v10912_v41 }
 0x4bf   : > { %9181 = vpow2.f32 %v2331_v30  ;;  %v2678_v21 = vsub.f32 %v10811_v2, %v2662_v23 }
 0x4c0   : > { %v10918_v36 = vpop.eup %9171  ;;  %v2707_v58 = vmul.f32 1.442695, %v2677_v20 }
 0x4c1   : > { %v10920_v44 = vpop.eup %9173  ;;  %v2656_v48 = vpop.xlane.xlu0 %2655  ;;  %2727 = vadd.xlane.f32.xlu0 %v10918_v36  ;;  %v2709_v8 = vmul.f32 1.442695, %v2678_v21 }
 0x4c2   : > { %v2658_v3 = vpop.xlane.xlu1 %2657  ;;  %9183 = vpow2.f32 %v2707_v58  ;;  %v2675_v34 = vsub.f32 %v10803_v29, %v2656_v48  ;;  %2733 = vadd.xlane.f32.xlu1 %v10920_v44 }
 0x4c3   : > { %9185 = vpow2.f32 %v2335_v19  ;;  %v2676_v15 = vsub.f32 %v10813_v11, %v2658_v3 }
 0x4c4   : > { %v10926_v1 = vpop.eup %9175  ;;  %v2703_v2 = vmul.f32 1.442695, %v2675_v34 }
 0x4c5   : > { %v10928_v52 = vpop.eup %9177  ;;  %v2290_v55 = vpop.xlane.xlu0 %2289  ;;  %2361 = vadd.xlane.f32.xlu0 %v10926_v1  ;;  %v2705_v29 = vmul.f32 1.442695, %v2676_v15 }
 0x4c6   : > { %v2292_v27 = vpop.xlane.xlu1 %2291  ;;  %9187 = vpow2.f32 %v2703_v2  ;;  %v2307_v25 = vsub.f32 %v10797_v18, %v2290_v55  ;;  %2729 = vadd.xlane.f32.xlu1 %v10928_v52 }
 0x4c7   : > { %9189 = vpow2.f32 %v2709_v8  ;;  %v2308_v43 = vsub.f32 %v10807_v40, %v2292_v27 }
 0x4c8   : > { %v10934_v33 = vpop.eup %9179  ;;  %v2337_v11 = vmul.f32 1.442695, %v2307_v25 }
 0x4c9   : > { %v10936_v32 = vpop.eup %9181  ;;  %2365 = vadd.xlane.f32.xlu0 %v10934_v33  ;;  %v2339_v51 = vmul.f32 1.442695, %v2308_v43 }
 0x4ca   : > { %9191 = vpow2.f32 %v2337_v11  ;;  %2363 = vadd.xlane.f32.xlu1 %v10936_v32 }
 0x4cb   : > { %9193 = vpow2.f32 %v2705_v29 }
 0x4cc   : > { %v10940_v18 = vpop.eup %9183  ;;  %9195 = vpow2.f32 %v2339_v51 }
 0x4cd   : > { %v10942_v31 = vpop.eup %9185  ;;  %2739 = vadd.xlane.f32.xlu0 %v10940_v18 }
 0x4ce   : > { %2367 = vadd.xlane.f32.xlu1 %v10942_v31 }
 0x4d0   : > { %v10946_v40 = vpop.eup %9187 }
 0x4d1   : > { %v10948_v26 = vpop.eup %9189  ;;  %2735 = vadd.xlane.f32.xlu0 %v10946_v40 }
 0x4d2   : > { %2741 = vadd.xlane.f32.xlu1 %v10948_v26 }
 0x4d4   : > { %v10952_v13 = vpop.eup %9191 }
 0x4d5   : > { %v10954_v47 = vpop.eup %9193  ;;  %2369 = vadd.xlane.f32.xlu0 %v10952_v13 }
 0x4d6   : > { %2737 = vadd.xlane.f32.xlu1 %v10954_v47  ;;  %v10958_v4 = vpop.eup %9195 }
 0x4da   : > { %2371 = vadd.xlane.f32.xlu1 %v10958_v4 }
 0x526   : > { %v2342_v59 = vpop.xlane.xlu0 %2341 }
 0x527   : > { %9197 = vrcp.f32 %v2342_v59 }
 0x52a   : > { %v2716_v12 = vpop.xlane.xlu0 %2715  ;;  %v2344_v9 = vpop.xlane.xlu1 %2343 }
 0x52b   : > { %9199 = vrcp.f32 %v2344_v9 }
 0x52e   : > { %v2712_v7 = vpop.xlane.xlu0 %2711  ;;  %v2718_v30 = vpop.xlane.xlu1 %2717 }
 0x52f   : > { %9201 = vrcp.f32 %v2718_v30  ;;  %v8898_v30 = vld [vmem:[%s14755_s24 + $0x14] ss:$8 sps:$4 sm:$0xff]  }
 0x530   : > { %9203 = vrcp.f32 %v2712_v7 }
 0x531   : > { %9205 = vrcp.f32 %v2716_v12  ;;  %v9198_v0 = vpop.eup %9197 }
 0x532   : > { %v2346_v60 = vpop.xlane.xlu0 %2345  ;;  %v2389_v21 = vmul.f32 %v9198_v0, %v10841_v49 }
 0x533   : > { %v2714_v56 = vpop.xlane.xlu1 %2713 }
 0x534   : > { %9207 = vrcp.f32 %v2714_v56 }
 0x535   : > { %v9200_v23 = vpop.eup %9199  ;;  %9209 = vrcp.f32 %v2346_v60  ;;  %v8896_v60 = vld [vmem:[%s14755_s24 + $0x10] ss:$8 sps:$4 sm:$0xff]  }
 0x536   : > { %v2350_v20 = vpop.xlane.xlu0 %2349  ;;  %v2390_v58 = vmul.f32 %v9200_v23, %v10848_v62 }
 0x537   : > { %v2348_v19 = vpop.xlane.xlu1 %2347 }
 0x538   : > { %9211 = vrcp.f32 %v2348_v19  ;;  %v2405_v48 = vpack.c.bf16 %v2390_v58, %v2389_v21  ;;  %v8899_v21 = vld [vmem:[%s14755_s24 + $0x20] ss:$8 sps:$4 sm:$0xff]  }
 0x539   : > { %9213 = vrcp.f32 %v2350_v20  ;;  %v9202_v8 = vpop.eup %9201  ;;  %v8901_v20 = vld [vmem:[%s14755_s24 + $0x24] ss:$8 sps:$4 sm:$0xff]  }
 0x53a   : > { %v2724_v3 = vpop.xlane.xlu0 %2723  ;;  %8467 = vmatprep.mubr.bf16.mxu1 %v2405_v48  ;;  %v9204_v15 = vpop.eup %9203  ;;  %v2762_v27 = vmul.f32 %v9202_v8, %v10856_v6 }
 0x53b   : > { %v2352_v34 = vpop.xlane.xlu1 %2351  ;;  %v9206_v2 = vpop.eup %9205  ;;  %v2759_v49 = vmul.f32 %v9204_v15, %v10854_v28 }
 0x53c   : > { %9215 = vrcp.f32 %v2352_v34  ;;  %v2761_v11 = vmul.f32 %v9206_v2, %v10846_v16 }
 0x53e   : > { %v9208_v55 = vpop.eup %9207  ;;  %v2720_v25 = vpop.xlane.xlu0 %2719  ;;  %v2776_v7 = vpack.c.bf16 %v2762_v27, %v2761_v11 }
 0x53f   : > { %v2726_v29 = vpop.xlane.xlu1 %2725  ;;  %v2760_v62 = vmul.f32 %v9208_v55, %v10864_v53  ;;  %v9210_v43 = vpop.eup %9209 }
 0x540   : > { %9217 = vrcp.f32 %v2726_v29  ;;  %v2391_v6 = vmul.f32 %v9210_v43, %v10862_v22 }
 0x541   : > { %v2775_v51 = vpack.c.bf16 %v2760_v62, %v2759_v49  ;;  %9219 = vrcp.f32 %v2720_v25  ;;  %v8907_v25 = vld [vmem:[%s14755_s24 + $0x44] ss:$8 sps:$4 sm:$0xff]  }
 0x542   : > { %v9212_v59 = vpop.eup %9211  ;;  %v2354_v12 = vpop.xlane.xlu0 %2353  ;;  %9221 = vrcp.f32 %v2724_v3  ;;  %v8904_v3 = vld [vmem:[%s14755_s24 + $0x34] ss:$8 sps:$4 sm:$0xff]  }
 0x543   : > { %v2722_v9 = vpop.xlane.xlu1 %2721  ;;  %v2392_v28 = vmul.f32 %v9212_v59, %v10872_v38  ;;  %8531 = vmatprep.mubr.bf16.mxu0 %v2775_v51  ;;  %v9214_v53 = vpop.eup %9213  ;;  %v8905_v51 = vld [vmem:[%s14755_s24 + $0x40] ss:$8 sps:$4 sm:$0xff]  }
 0x544   : > { %9223 = vrcp.f32 %v2722_v9  ;;  %8532 = vmatmul.mubr.bf16.vlgmr.msra.gmra.mrb[112].mxu0 %v2776_v7  ;;  %v2393_v22 = vmul.f32 %v9214_v53, %v10870_v54  ;;  %v8902_v54 = vld [vmem:[%s14755_s24 + $0x30] ss:$8 sps:$4 sm:$0xff]   ;;  %v8910_v9 = vld [vmem:[%s14755_s24 + $0x54] ss:$8 sps:$4 sm:$0xff]  }
 0x545   : > { %v2406_v16 = vpack.c.bf16 %v2392_v28, %v2391_v6  ;;  %3101 = vmatpush1.bf16.msra.mxu0 %v8893_v46  ;;  %9225 = vrcp.f32 %v2354_v12 }
 0x546   : > { %v9216_v56 = vpop.eup %9215  ;;  %v2358_v0 = vpop.xlane.xlu0 %2357  ;;  %3102 = vmatprep.subr.bf16.mxu0 %v8898_v30  ;;  %v8908_v30 = vld [vmem:[%s14755_s24 + $0x50] ss:$8 sps:$4 sm:$0xff]  }
 0x547   : > { %v2356_v23 = vpop.xlane.xlu1 %2355  ;;  %8468 = vmatmul.mubr.bf16.vlgmr.msra.gmra.mrb[16].mxu1 %v2406_v16  ;;  %v2394_v38 = vmul.f32 %v9216_v56, %v10880_v57  ;;  %v8913_v16 = vld [vmem:[%s14755_s24 + $0x64] ss:$8 sps:$4 sm:$0xff]   ;;  %v8911_v56 = vld [vmem:[%s14755_s24 + $0x60] ss:$8 sps:$4 sm:$0xff]  }
 0x548   : > { %9227 = vrcp.f32 %v2356_v23 }
 0x549   : > { %v2407_v19 = vpack.c.bf16 %v2394_v38, %v2393_v22  ;;  %3103 = vmatpush1.bf16.msra.mxu0 %v8896_v60  ;;  %9229 = vrcp.f32 %v2358_v0 }
 0x54a   : > { %v2732_v58 = vpop.xlane.xlu0 %2731  ;;  %3104 = vmatprep.subr.bf16.mxu0 %v8901_v20  ;;  %v9218_v34 = vpop.eup %9217  ;;  %v8916_v20 = vld [vmem:[%s14755_s24 + $0x74] ss:$8 sps:$4 sm:$0xff]  }
 0x54b   : > { %v2360_v48 = vpop.xlane.xlu1 %2359  ;;  %8471 = vmatprep.mubr.bf16.mxu1 %v2407_v19  ;;  %v9220_v8 = vpop.eup %9219  ;;  %v2766_v27 = vmul.f32 %v9218_v34, %v10888_v24 }
 0x54c   : > { %9231 = vrcp.f32 %v2360_v48  ;;  %v9222_v15 = vpop.eup %9221  ;;  %v2763_v29 = vmul.f32 %v9220_v8, %v10886_v42 }
 0x54d   : > { %3105 = vmatpush1.bf16.msra.mxu0 %v8899_v21  ;;  %v2765_v43 = vmul.f32 %v9222_v15, %v10878_v61 }
 0x54e   : > { %v9224_v57 = vpop.eup %9223  ;;  %v2728_v2 = vpop.xlane.xlu0 %2727  ;;  %3106 = vmatprep.subr.bf16.mxu0 %v8904_v3  ;;  %v8919_v3 = vld [vmem:[%s14755_s24 + $0x84] ss:$8 sps:$4 sm:$0xff]  }
 0x54f   : > { %v2734_v55 = vpop.xlane.xlu1 %2733  ;;  %v2764_v49 = vmul.f32 %v9224_v57, %v10896_v45  ;;  %v9226_v62 = vpop.eup %9225  ;;  %v2778_v24 = vpack.c.bf16 %v2766_v27, %v2765_v43 }
 0x550   : > { %9233 = vrcp.f32 %v2734_v55  ;;  %v2395_v42 = vmul.f32 %v9226_v62, %v10894_v5  ;;  %v8920_v62 = vld [vmem:[%s14755_s24 + $0x90] ss:$8 sps:$4 sm:$0xff]  }
 0x551   : > { %v2777_v11 = vpack.c.bf16 %v2764_v49, %v2763_v29  ;;  %3107 = vmatpush1.bf16.msra.mxu0 %v8902_v54  ;;  %9235 = vrcp.f32 %v2728_v2  ;;  %v8917_v2 = vld [vmem:[%s14755_s24 + $0x80] ss:$8 sps:$4 sm:$0xff]   ;;  %v8922_v29 = vld [vmem:[%s14755_s24 + $0x94] ss:$8 sps:$4 sm:$0xff]  }
 0x552   : > { %v9228_v46 = vpop.eup %9227  ;;  %v2362_v59 = vpop.xlane.xlu0 %2361  ;;  %3108 = vmatprep.subr.bf16.mxu0 %v8907_v25  ;;  %9237 = vrcp.f32 %v2732_v58 }
 0x553   : > { %v2730_v12 = vpop.xlane.xlu1 %2729  ;;  %8535 = vmatprep.mubr.bf16.mxu0 %v2777_v11  ;;  %v2396_v45 = vmul.f32 %v9228_v46, %v10904_v63  ;;  %v9230_v61 = vpop.eup %9229 }
 0x554   : > { %9239 = vrcp.f32 %v2730_v12  ;;  %8536 = vmatmul.mubr.bf16.gmra.mrb[116].mxu0 %v2778_v24  ;;  %v2397_v60 = vmul.f32 %v9230_v61, %v10902_v10  ;;  %v8914_v10 = vld [vmem:[%s14755_s24 + $0x70] ss:$8 sps:$4 sm:$0xff]   ;;  %v8928_v12 = vld [vmem:[%s14755_s24 + $0xb4] ss:$8 sps:$4 sm:$0xff]  }
 0x555   : > { %v2408_v7 = vpack.c.bf16 %v2396_v45, %v2395_v42  ;;  %3109 = vmatpush1.bf16.msra.mxu0 %v8905_v51  ;;  %9241 = vrcp.f32 %v2362_v59  ;;  %v8925_v51 = vld [vmem:[%s14755_s24 + $0xa4] ss:$8 sps:$4 sm:$0xff]   ;;  %v8923_v59 = vld [vmem:[%s14755_s24 + $0xa0] ss:$8 sps:$4 sm:$0xff]   ;;  %v8926_v45 = vld [vmem:[%s14755_s24 + $0xb0] ss:$8 sps:$4 sm:$0xff]  }
 0x556   : > { %v9232_v6 = vpop.eup %9231  ;;  %v2366_v28 = vpop.xlane.xlu0 %2365  ;;  %3110 = vmatprep.subr.bf16.mxu0 %v8910_v9 }
 0x557   : > { %v2364_v53 = vpop.xlane.xlu1 %2363  ;;  %8472 = vmatmul.mubr.bf16.gmra.mrb[20].mxu1 %v2408_v7  ;;  %v2398_v5 = vmul.f32 %v9232_v6, %v10912_v41 }
 0x558   : > { %9243 = vrcp.f32 %v2364_v53 }
 0x559   : > { %v2409_v63 = vpack.c.bf16 %v2398_v5, %v2397_v60  ;;  %3111 = vmatpush1.bf16.msra.mxu0 %v8908_v30  ;;  %9245 = vrcp.f32 %v2366_v28  ;;  %v8929_v60 = vld [vmem:[%s14755_s24 + $0xc0] ss:$8 sps:$4 sm:$0xff]  }
 0x55a   : > { %v2740_v0 = vpop.xlane.xlu0 %2739  ;;  %3112 = vmatprep.subr.bf16.mxu0 %v8913_v16  ;;  %v9234_v22 = vpop.eup %9233 }
 0x55b   : > { %v2368_v23 = vpop.xlane.xlu1 %2367  ;;  %8475 = vmatprep.mubr.bf16.mxu1 %v2409_v63  ;;  %v9236_v38 = vpop.eup %9235  ;;  %v2770_v48 = vmul.f32 %v9234_v22, %v10920_v44 }
 0x55c   : > { %9247 = vrcp.f32 %v2368_v23  ;;  %v9238_v19 = vpop.eup %9237  ;;  %v2767_v34 = vmul.f32 %v9236_v38, %v10918_v36  ;;  %v8940_v23 = vld [vmem:[%s14755_s24 + $0xf4] ss:$8 sps:$4 sm:$0xff]  }
 0x55d   : > { %3113 = vmatpush1.bf16.msra.mxu0 %v8911_v56  ;;  %v2769_v54 = vmul.f32 %v9238_v19, %v10910_v17  ;;  %v8937_v56 = vld [vmem:[%s14755_s24 + $0xe4] ss:$8 sps:$4 sm:$0xff]  }
 0x55e   : > { %v9240_v41 = vpop.eup %9239  ;;  %v2736_v21 = vpop.xlane.xlu0 %2735  ;;  %3114 = vmatprep.subr.bf16.mxu0 %v8916_v20 }
 0x55f   : > { %v2742_v58 = vpop.xlane.xlu1 %2741  ;;  %v2768_v8 = vmul.f32 %v9240_v41, %v10928_v52  ;;  %v9242_v15 = vpop.eup %9241  ;;  %v2780_v44 = vpack.c.bf16 %v2770_v48, %v2769_v54 }
 0x560   : > { %9249 = vrcp.f32 %v2742_v58  ;;  %v2399_v36 = vmul.f32 %v9242_v15, %v10926_v1 }
 0x561   : > { %v2779_v57 = vpack.c.bf16 %v2768_v8, %v2767_v34  ;;  %3115 = vmatpush1.bf16.msra.mxu0 %v8914_v10  ;;  %9251 = vrcp.f32 %v2736_v21 }
 0x562   : > { %v9244_v55 = vpop.eup %9243  ;;  %v2370_v27 = vpop.xlane.xlu0 %2369  ;;  %3116 = vmatprep.subr.bf16.mxu0 %v8919_v3  ;;  %9253 = vrcp.f32 %v2740_v0  ;;  %v8935_v0 = vld [vmem:[%s14755_s24 + $0xe0] ss:$8 sps:$4 sm:$0xff]  }
 0x563   : > { %v2738_v25 = vpop.xlane.xlu1 %2737  ;;  %8539 = vmatprep.mubr.bf16.mxu0 %v2779_v57  ;;  %v2400_v52 = vmul.f32 %v9244_v55, %v10936_v32  ;;  %v9246_v17 = vpop.eup %9245 }
 0x564   : > { %9255 = vrcp.f32 %v2738_v25  ;;  %8540 = vmatmul.mubr.bf16.gmra.mrb[120].mxu0 %v2780_v44  ;;  %v2401_v1 = vmul.f32 %v9246_v17, %v10934_v33  ;;  %v8931_v33 = vld [vmem:[%s14755_s24 + $0xc4] ss:$8 sps:$4 sm:$0xff]  }
 0x565   : > { %9257 = vrcp.f32 %v2370_v27  ;;  %v2410_v49 = vpack.c.bf16 %v2400_v52, %v2399_v36  ;;  %3117 = vmatpush1.bf16.msra.mxu0 %v8917_v2 }
 0x566   : > { %v9248_v43 = vpop.eup %9247  ;;  %3118 = vmatprep.subr.bf16.mxu0 %v8922_v29 }
 0x567   : > { %v2372_v11 = vpop.xlane.xlu1 %2371  ;;  %8476 = vmatmul.mubr.bf16.gmra.mrb[24].mxu1 %v2410_v49  ;;  %v2402_v32 = vmul.f32 %v9248_v43, %v10942_v31 }
 0x568   : > { %9259 = vrcp.f32 %v2372_v11 }
 0x569   : > { %v2411_v46 = vpack.c.bf16 %v2402_v32, %v2401_v1  ;;  %3119 = vmatpush1.bf16.msra.mxu0 %v8920_v62 }
 0x56a   : > { %3120 = vmatprep.subr.bf16.mxu0 %v8925_v51  ;;  %v9250_v24 = vpop.eup %9249 }
 0x56b   : > { %8479 = vmatprep.mubr.bf16.mxu1 %v2411_v46  ;;  %v9252_v9 = vpop.eup %9251  ;;  %v2774_v7 = vmul.f32 %v9250_v24, %v10948_v26 }
 0x56c   : > { %v9254_v42 = vpop.eup %9253  ;;  %v2771_v31 = vmul.f32 %v9252_v9, %v10946_v40  ;;  %v8934_v40 = vld [vmem:[%s14755_s24 + $0xd4] ss:$8 sps:$4 sm:$0xff]  }
 0x56d   : > { %3121 = vmatpush1.bf16.msra.mxu0 %v8923_v59  ;;  %v2773_v28 = vmul.f32 %v9254_v42, %v10940_v18  ;;  %v8932_v18 = vld [vmem:[%s14755_s24 + $0xd0] ss:$8 sps:$4 sm:$0xff]  }
 0x56e   : > { %v9256_v61 = vpop.eup %9255  ;;  %3122 = vmatprep.subr.bf16.mxu0 %v8928_v12 }
 0x56f   : > { %v9258_v30 = vpop.eup %9257  ;;  %v2772_v6 = vmul.f32 %v9256_v61, %v10954_v47  ;;  %v2782_v5 = vpack.c.bf16 %v2774_v7, %v2773_v28 }
 0x570   : > { %v2403_v63 = vmul.f32 %v9258_v30, %v10952_v13  ;;  %v8938_v13 = vld [vmem:[%s14755_s24 + $0xf0] ss:$8 sps:$4 sm:$0xff]  }
 0x571   : > { %v2781_v16 = vpack.c.bf16 %v2772_v6, %v2771_v31  ;;  %3123 = vmatpush1.bf16.msra.mxu0 %v8926_v45 }
 0x572   : > { %v9260_v53 = vpop.eup %9259  ;;  %3124 = vmatprep.subr.bf16.mxu0 %v8931_v33 }
 0x573   : > { %v2404_v26 = vmul.f32 %v9260_v53, %v10958_v4  ;;  %8543 = vmatprep.mubr.bf16.mxu0 %v2781_v16 }
 0x574   : > { %8544 = vmatmul.mubr.bf16.gmra.mrb[124].mxu0 %v2782_v5 }
 0x575   : > { %v2412_v47 = vpack.c.bf16 %v2404_v26, %v2403_v63  ;;  %3125 = vmatpush1.bf16.msra.mxu0 %v8929_v60  ;;  %v2928_v60 = vld [vmem:[%s14756_s26] sm:$0x3] }
 0x576   : > { %3126 = vmatprep.subr.bf16.mxu0 %v8934_v40  ;;  %v11031_v5 = vrot.slane %v2928_v60, %v10475_v14  ;;  %v11034_v63 = vrot.slane %v2928_v60, %v10481_v39 }
 0x577   : > { %8480 = vmatmul.mubr.bf16.gmra.mrb[28].mxu1 %v2412_v47 }
 0x579   : > { %3127 = vmatpush1.bf16.msra.mxu0 %v8932_v18 }
 0x57a   : > { %3128 = vmatprep.subr.bf16.mxu0 %v8937_v56 }
 0x57d   : > { %3129 = vmatpush1.bf16.msra.mxu0 %v8935_v0  ;;  %v9581_v0 = vld [vmem:[%s9831_s9] sm:$0xff] }
 0x57e   : > { %3130 = vmatprep.subr.bf16.mxu0 %v8940_v23 }
 0x581   : > { %3131 = vmatpush1.bf16.msra.mxu0 %v8938_v13 }
 0x617   : > { %v8533_v4 = vpop.f32.mrb[112].mxu0 }
 0x618   : > { %v2817_v20 = vpop.f32.mrb[113].mxu0 }
 0x619   : > { %v8534_v22 = vpop.f32.mrb[114].mxu0 }
 0x61a   : > { %v2883_v38 = vpack.c.bf16 %v8534_v22, %v8533_v4  ;;  %v8469_v19 = vpop.f32.mrb[16].mxu1  ;;  %v2820_v10 = vpop.f32.mrb[115].mxu0 }
 0x61b   : > { %v2881_v41 = vpack.c.bf16 %v2820_v10, %v2817_v20  ;;  %v2447_v21 = vpop.f32.mrb[17].mxu1  ;;  %v9582_v20 = vld [vmem:[%s9831_s9 + $0x8] sm:$0xff] }
 0x61c   : > { %v8470_v58 = vpop.f32.mrb[18].mxu1 }
 0x61d   : > { %v2882_v48 = vpack.c.bf16 %v8470_v58, %v8469_v19  ;;  %v2450_v3 = vpop.f32.mrb[19].mxu1  ;;  %3132 = vmatprep.mubr.bf16.mxu0 %v2881_v41  ;;  %v9583_v19 = vld [vmem:[%s9831_s9 + $0x10] sm:$0xff]  ;;  %v9584_v41 = vld [vmem:[%s9831_s9 + $0x18] sm:$0xff] }
 0x61e   : > { %v2880_v34 = vpack.c.bf16 %v2450_v3, %v2447_v21 }
 0x620   : > { %3133 = vmatmul.mubr.bf16.vlgmr.msra.gmra.mrb[128].mxu0 %v2880_v34 }
 0x621   : > { %3142 = vmatprep.mubr.bf16.mxu0 %v2883_v38 }
 0x627   : > { %v8537_v8 = vpop.f32.mrb[116].mxu0 }
 0x628   : > { %v2833_v15 = vpop.f32.mrb[117].mxu0  ;;  %3143 = vmatmul.mubr.bf16.gmra.mrb[132].mxu0 %v2882_v48 }
 0x629   : > { %v8538_v54 = vpop.f32.mrb[118].mxu0 }
 0x62a   : > { %v2887_v57 = vpack.c.bf16 %v8538_v54, %v8537_v8  ;;  %v8473_v2 = vpop.f32.mrb[20].mxu1  ;;  %v2836_v55 = vpop.f32.mrb[119].mxu0 }
 0x62b   : > { %v2885_v27 = vpack.c.bf16 %v2836_v55, %v2833_v15  ;;  %v2463_v25 = vpop.f32.mrb[21].mxu1 }
 0x62c   : > { %v8474_v44 = vpop.f32.mrb[22].mxu1 }
 0x62d   : > { %v2886_v29 = vpack.c.bf16 %v8474_v44, %v8473_v2  ;;  %v2466_v36 = vpop.f32.mrb[23].mxu1  ;;  %3152 = vmatprep.mubr.bf16.mxu0 %v2885_v27 }
 0x62e   : > { %v2884_v52 = vpack.c.bf16 %v2466_v36, %v2463_v25  ;;  %v9586_v25 = vld [vmem:[%s9831_s9 + $0x28] sm:$0xff]  ;;  %v9587_v36 = vld [vmem:[%s9831_s9 + $0x30] sm:$0xff] }
 0x630   : > { %3153 = vmatmul.mubr.bf16.gmra.mrb[136].mxu0 %v2884_v52 }
 0x631   : > { %3162 = vmatprep.mubr.bf16.mxu0 %v2887_v57  ;;  %v9585_v57 = vld [vmem:[%s9831_s9 + $0x20] sm:$0xff] }
 0x637   : > { %v8541_v17 = vpop.f32.mrb[120].mxu0 }
 0x638   : > { %v2849_v49 = vpop.f32.mrb[121].mxu0  ;;  %3163 = vmatmul.mubr.bf16.gmra.mrb[140].mxu0 %v2886_v29 }
 0x639   : > { %v8542_v62 = vpop.f32.mrb[122].mxu0 }
 0x63a   : > { %v2891_v43 = vpack.c.bf16 %v8542_v62, %v8541_v17  ;;  %v8477_v11 = vpop.f32.mrb[24].mxu1  ;;  %v2852_v51 = vpop.f32.mrb[123].mxu0  ;;  %v9588_v17 = vld [vmem:[%s9831_s9 + $0x38] sm:$0xff] }
 0x63b   : > { %v2889_v1 = vpack.c.bf16 %v2852_v51, %v2849_v49  ;;  %v2479_v32 = vpop.f32.mrb[25].mxu1 }
 0x63c   : > { %v8478_v46 = vpop.f32.mrb[26].mxu1 }
 0x63d   : > { %v2890_v59 = vpack.c.bf16 %v8478_v46, %v8477_v11  ;;  %v2482_v12 = vpop.f32.mrb[27].mxu1  ;;  %3172 = vmatprep.mubr.bf16.mxu0 %v2889_v1 }
 0x63e   : > { %v2888_v24 = vpack.c.bf16 %v2482_v12, %v2479_v32 }
 0x640   : > { %3173 = vmatmul.mubr.bf16.gmra.mrb[144].mxu0 %v2888_v24 }
 0x641   : > { %3182 = vmatprep.mubr.bf16.mxu0 %v2891_v43 }
 0x647   : > { %v8545_v9 = vpop.f32.mrb[124].mxu0 }
 0x648   : > { %v2865_v42 = vpop.f32.mrb[125].mxu0  ;;  %3183 = vmatmul.mubr.bf16.gmra.mrb[148].mxu0 %v2890_v59  ;;  %v9589_v59 = vld [vmem:[%s9831_s9 + $0x40] sm:$0xff] }
 0x649   : > { %v8546_v45 = vpop.f32.mrb[126].mxu0 }
 0x64a   : > { %v8481_v61 = vpop.f32.mrb[28].mxu1  ;;  %v2895_v7 = vpack.c.bf16 %v8546_v45, %v8545_v9  ;;  %v2868_v33 = vpop.f32.mrb[127].mxu0 }
 0x64b   : > { %v2495_v30 = vpop.f32.mrb[29].mxu1  ;;  %v2893_v31 = vpack.c.bf16 %v2868_v33, %v2865_v42  ;;  %v9590_v42 = vld [vmem:[%s9831_s9 + $0x48] sm:$0xff] }
 0x64c   : > { %v8482_v6 = vpop.f32.mrb[30].mxu1 }
 0x64d   : > { %v2894_v28 = vpack.c.bf16 %v8482_v6, %v8481_v61  ;;  %v2498_v53 = vpop.f32.mrb[31].mxu1  ;;  %3192 = vmatprep.mubr.bf16.mxu0 %v2893_v31 }
 0x64e   : > { %v2892_v16 = vpack.c.bf16 %v2498_v53, %v2495_v30  ;;  %v9592_v30 = vld [vmem:[%s9831_s9 + $0x58] sm:$0xff] }
 0x650   : > { %3193 = vmatmul.mubr.bf16.gmra.mrb[152].mxu0 %v2892_v16 }
 0x651   : > { %3202 = vmatprep.mubr.bf16.mxu0 %v2895_v7  ;;  %v9591_v7 = vld [vmem:[%s9831_s9 + $0x50] sm:$0xff] }
 0x658   : > { %3203 = vmatmul.mubr.bf16.gmra.mrb[156].mxu0 %v2894_v28 }
 0x6f3   : > { %v3134_v26 = vpop.f32.mrb[128].mxu0 }
 0x6f4   : > { %v3135_v40 = vadd.f32 %v3134_v26, %v11031_v5  ;;  %v3136_v47 = vpop.f32.mrb[129].mxu0 }
 0x6f5   : > { %v3137_v18 = vadd.f32 %v3136_v47, %v11034_v63  ;;  %v3138_v56 = vpop.f32.mrb[130].mxu0  ;;  %v9593_v47 = vld [vmem:[%s9831_s9 + $0x60] sm:$0xff] }
 0x6f6   : > { %v11039_v23 = vadd.f32 %v9581_v0, %v3135_v40  ;;  %v3139_v13 = vadd.f32 %v3138_v56, %v11031_v5  ;;  %v3140_v4 = vpop.f32.mrb[131].mxu0 }
 0x6f7   : > { %v11043_v22 = vadd.f32 %v9582_v20, %v3137_v18  ;;  %v3141_v38 = vadd.f32 %v3140_v4, %v11034_v63 }
 0x6f8   : > { %v11047_v10 = vadd.f32 %v9583_v19, %v3139_v13  ;;  %v9594_v13 = vld [vmem:[%s9831_s9 + $0x68] sm:$0xff] }
 0x6f9   : > { %v11050_v21 = vadd.f32 %v9584_v41, %v3141_v38  ;;  %v3247_v58 = vadd.f32 %v11043_v22, %v11039_v23  ;;  %v9595_v38 = vld [vmem:[%s9831_s9 + $0x70] sm:$0xff]  ;;  %v9596_v41 = vld [vmem:[%s9831_s9 + $0x78] sm:$0xff] }
 0x6fb   : > { %v3144_v48 = vpop.f32.mrb[132].mxu0  ;;  %3248 = vadd.xlane.f32.xlu0 %v3247_v58  ;;  %v3250_v3 = vadd.f32 %v11050_v21, %v11047_v10 }
 0x6fc   : > { %v3145_v34 = vadd.f32 %v3144_v48, %v11031_v5  ;;  %v3146_v8 = vpop.f32.mrb[133].mxu0 }
 0x6fd   : > { %v3147_v15 = vadd.f32 %v3146_v8, %v11034_v63  ;;  %v3148_v54 = vpop.f32.mrb[134].mxu0  ;;  %3251 = vadd.xlane.f32.xlu1 %v3250_v3 }
 0x6fe   : > { %v11059_v2 = vadd.f32 %v9585_v57, %v3145_v34  ;;  %v3149_v55 = vadd.f32 %v3148_v54, %v11031_v5  ;;  %v3150_v27 = vpop.f32.mrb[135].mxu0 }
 0x6ff   : > { %v11063_v44 = vadd.f32 %v9586_v25, %v3147_v15  ;;  %v3151_v29 = vadd.f32 %v3150_v27, %v11034_v63 }
 0x700   : > { %v11067_v52 = vadd.f32 %v9587_v36, %v3149_v55  ;;  %v9597_v55 = vld [vmem:[%s9831_s9 + $0x80] sm:$0xff]  ;;  %v9598_v36 = vld [vmem:[%s9831_s9 + $0x88] sm:$0xff] }
 0x701   : > { %v11070_v49 = vadd.f32 %v9588_v17, %v3151_v29  ;;  %v3253_v62 = vadd.f32 %v11063_v44, %v11059_v2 }
 0x703   : > { %v3154_v43 = vpop.f32.mrb[136].mxu0  ;;  %3254 = vadd.xlane.f32.xlu0 %v3253_v62  ;;  %v3256_v11 = vadd.f32 %v11070_v49, %v11067_v52 }
 0x704   : > { %v3155_v51 = vadd.f32 %v3154_v43, %v11031_v5  ;;  %v3156_v1 = vpop.f32.mrb[137].mxu0  ;;  %v9599_v43 = vld [vmem:[%s9831_s9 + $0x90] sm:$0xff] }
 0x705   : > { %v3157_v32 = vadd.f32 %v3156_v1, %v11034_v63  ;;  %v3158_v46 = vpop.f32.mrb[138].mxu0  ;;  %3257 = vadd.xlane.f32.xlu1 %v3256_v11 }
 0x706   : > { %v11079_v12 = vadd.f32 %v9589_v59, %v3155_v51  ;;  %v3159_v24 = vadd.f32 %v3158_v46, %v11031_v5  ;;  %v3160_v9 = vpop.f32.mrb[139].mxu0  ;;  %v9600_v51 = vld [vmem:[%s9831_s9 + $0x98] sm:$0xff] }
 0x707   : > { %v11083_v45 = vadd.f32 %v9590_v42, %v3157_v32  ;;  %v3161_v61 = vadd.f32 %v3160_v9, %v11034_v63 }
 0x708   : > { %v11087_v33 = vadd.f32 %v9591_v7, %v3159_v24  ;;  %v9601_v7 = vld [vmem:[%s9831_s9 + $0xa0] sm:$0xff] }
 0x709   : > { %v11090_v31 = vadd.f32 %v9592_v30, %v3161_v61  ;;  %v3259_v6 = vadd.f32 %v11083_v45, %v11079_v12 }
 0x70b   : > { %v3164_v28 = vpop.f32.mrb[140].mxu0  ;;  %3260 = vadd.xlane.f32.xlu0 %v3259_v6  ;;  %v3262_v53 = vadd.f32 %v11090_v31, %v11087_v33 }
 0x70c   : > { %v3165_v16 = vadd.f32 %v3164_v28, %v11031_v5  ;;  %v3166_v60 = vpop.f32.mrb[141].mxu0 }
 0x70d   : > { %v3167_v26 = vadd.f32 %v3166_v60, %v11034_v63  ;;  %v3168_v40 = vpop.f32.mrb[142].mxu0  ;;  %3263 = vadd.xlane.f32.xlu1 %v3262_v53  ;;  %v9602_v53 = vld [vmem:[%s9831_s9 + $0xa8] sm:$0xff] }
 0x70e   : > { %v11099_v18 = vadd.f32 %v9593_v47, %v3165_v16  ;;  %v3169_v56 = vadd.f32 %v3168_v40, %v11031_v5  ;;  %v3170_v0 = vpop.f32.mrb[143].mxu0  ;;  %v9604_v47 = vld [vmem:[%s9831_s9 + $0xb8] sm:$0xff] }
 0x70f   : > { %v11103_v4 = vadd.f32 %v9594_v13, %v3167_v26  ;;  %v3171_v20 = vadd.f32 %v3170_v0, %v11034_v63  ;;  %v9603_v26 = vld [vmem:[%s9831_s9 + $0xb0] sm:$0xff] }
 0x710   : > { %v11107_v19 = vadd.f32 %v9595_v38, %v3169_v56 }
 0x711   : > { %v11110_v58 = vadd.f32 %v9596_v41, %v3171_v20  ;;  %v3265_v48 = vadd.f32 %v11103_v4, %v11099_v18 }
 0x713   : > { %v3174_v3 = vpop.f32.mrb[144].mxu0  ;;  %3266 = vadd.xlane.f32.xlu0 %v3265_v48  ;;  %v3268_v34 = vadd.f32 %v11110_v58, %v11107_v19 }
 0x714   : > { %v3175_v8 = vadd.f32 %v3174_v3, %v11031_v5  ;;  %v3176_v15 = vpop.f32.mrb[145].mxu0 }
 0x715   : > { %v3177_v54 = vadd.f32 %v3176_v15, %v11034_v63  ;;  %v3178_v57 = vpop.f32.mrb[146].mxu0  ;;  %3269 = vadd.xlane.f32.xlu1 %v3268_v34  ;;  %v9605_v34 = vld [vmem:[%s9831_s9 + $0xc0] sm:$0xff] }
 0x716   : > { %v11119_v27 = vadd.f32 %v9597_v55, %v3175_v8  ;;  %v3179_v25 = vadd.f32 %v3178_v57, %v11031_v5  ;;  %v3180_v29 = vpop.f32.mrb[147].mxu0  ;;  %v9606_v57 = vld [vmem:[%s9831_s9 + $0xc8] sm:$0xff] }
 0x717   : > { %v11123_v17 = vadd.f32 %v9598_v36, %v3177_v54  ;;  %v3181_v62 = vadd.f32 %v3180_v29, %v11034_v63  ;;  %v9607_v29 = vld [vmem:[%s9831_s9 + $0xd0] sm:$0xff] }
 0x718   : > { %v11127_v11 = vadd.f32 %v9599_v43, %v3179_v25 }
 0x719   : > { %v11130_v1 = vadd.f32 %v9600_v51, %v3181_v62  ;;  %v3271_v32 = vadd.f32 %v11123_v17, %v11119_v27  ;;  %v9608_v62 = vld [vmem:[%s9831_s9 + $0xd8] sm:$0xff] }
 0x71b   : > { %v3184_v46 = vpop.f32.mrb[148].mxu0  ;;  %3272 = vadd.xlane.f32.xlu0 %v3271_v32  ;;  %v3274_v59 = vadd.f32 %v11130_v1, %v11127_v11 }
 0x71c   : > { %v3185_v24 = vadd.f32 %v3184_v46, %v11031_v5  ;;  %v3186_v9 = vpop.f32.mrb[149].mxu0 }
 0x71d   : > { %v3187_v42 = vadd.f32 %v3186_v9, %v11034_v63  ;;  %v3188_v61 = vpop.f32.mrb[150].mxu0  ;;  %3275 = vadd.xlane.f32.xlu1 %v3274_v59 }
 0x71e   : > { %v11139_v30 = vadd.f32 %v9601_v7, %v3185_v24  ;;  %v3189_v6 = vadd.f32 %v3188_v61, %v11031_v5  ;;  %v3190_v28 = vpop.f32.mrb[151].mxu0  ;;  %v9609_v61 = vld [vmem:[%s9831_s9 + $0xe0] sm:$0xff] }
 0x71f   : > { %v11143_v16 = vadd.f32 %v9602_v53, %v3187_v42  ;;  %v3191_v60 = vadd.f32 %v3190_v28, %v11034_v63  ;;  %v9610_v53 = vld [vmem:[%s9831_s9 + $0xe8] sm:$0xff] }
 0x720   : > { %v11147_v40 = vadd.f32 %v9603_v26, %v3189_v6 }
 0x721   : > { %v11150_v56 = vadd.f32 %v9604_v47, %v3191_v60  ;;  %v3277_v0 = vadd.f32 %v11143_v16, %v11139_v30  ;;  %v9611_v47 = vld [vmem:[%s9831_s9 + $0xf0] sm:$0xff] }
 0x723   : > { %3278 = vadd.xlane.f32.xlu0 %v3277_v0  ;;  %v3194_v13 = vpop.f32.mrb[152].mxu0  ;;  %v3280_v20 = vadd.f32 %v11150_v56, %v11147_v40 }
 0x724   : > { %v3195_v38 = vadd.f32 %v3194_v13, %v11031_v5  ;;  %v3196_v41 = vpop.f32.mrb[153].mxu0  ;;  %v9612_v13 = vld [vmem:[%s9831_s9 + $0xf8] sm:$0xff] }
 0x725   : > { %v3197_v48 = vadd.f32 %v3196_v41, %v11034_v63  ;;  %3281 = vadd.xlane.f32.xlu1 %v3280_v20  ;;  %v3198_v3 = vpop.f32.mrb[154].mxu0  ;;  %v3606_v41 = vld [vmem:[%s9804_s3] sm:$0xff] }
 0x726   : > { %v11159_v8 = vadd.f32 %v9605_v34, %v3195_v38  ;;  %v3199_v15 = vadd.f32 %v3198_v3, %v11031_v5  ;;  %v3200_v54 = vpop.f32.mrb[155].mxu0 }
 0x727   : > { %v11163_v55 = vadd.f32 %v9606_v57, %v3197_v48  ;;  %v3201_v25 = vadd.f32 %v3200_v54, %v11034_v63  ;;  %v3607_v48 = vld [vmem:[%s9804_s3 + $0x8] sm:$0xff]  ;;  %v3614_v54 = vld [vmem:[%s9804_s3 + $0x40] sm:$0xff] }
 0x728   : > { %v11167_v36 = vadd.f32 %v9607_v29, %v3199_v15  ;;  %v3611_v15 = vld [vmem:[%s9804_s3 + $0x28] sm:$0xff]  ;;  %v3618_v57 = vld [vmem:[%s9804_s3 + $0x60] sm:$0xff] }
 0x729   : > { %v11170_v43 = vadd.f32 %v9608_v62, %v3201_v25  ;;  %v3283_v51 = vadd.f32 %v11163_v55, %v11159_v8  ;;  %v8094_v25 = vcombine.low %v3607_v48, %v3611_v15  ;;  %v8095_v29 = vcombine.high %v3607_v48, %v3611_v15  ;;  %v3639_v15 = vld [vmem:[%s9804_s3 + $0x108] sm:$0xff] }
 0x72a   : > { %v8101_v62 = vcombine.high %v3614_v54, %v3618_v57 }
 0x72b   : > { %v3204_v32 = vpop.f32.mrb[156].mxu0  ;;  %3284 = vadd.xlane.f32.xlu0 %v3283_v51  ;;  %v3286_v46 = vadd.f32 %v11170_v43, %v11167_v36  ;;  %v3615_v51 = vld [vmem:[%s9804_s3 + $0x48] sm:$0xff]  ;;  %4529 = vmatprep.subr.bf16.mxu0 %v8095_v29 }
 0x72c   : > { %v3205_v59 = vadd.f32 %v3204_v32, %v11031_v5  ;;  %v3206_v24 = vpop.f32.mrb[157].mxu0  ;;  %v3619_v32 = vld [vmem:[%s9804_s3 + $0x68] sm:$0xff]  ;;  %4530 = vmatpush1.bf16.msra.mxu0 %v8094_v25 }
 0x72d   : > { %v3207_v9 = vadd.f32 %v3206_v24, %v11034_v63  ;;  %v3208_v42 = vpop.f32.mrb[158].mxu0  ;;  %3287 = vadd.xlane.f32.xlu1 %v3286_v46  ;;  %v3622_v46 = vld [vmem:[%s9804_s3 + $0x80] sm:$0xff] }
 0x72e   : > { %v11179_v7 = vadd.f32 %v9609_v61, %v3205_v59  ;;  %v3209_v6 = vadd.f32 %v3208_v42, %v11031_v5  ;;  %v3210_v28 = vpop.f32.mrb[159].mxu0  ;;  %v8103_v59 = vcombine.high %v3615_v51, %v3619_v32  ;;  %v3626_v24 = vld [vmem:[%s9804_s3 + $0xa0] sm:$0xff]  ;;  %v3627_v42 = vld [vmem:[%s9804_s3 + $0xa8] sm:$0xff]  ;;  %v8100_v61 = vcombine.low %v3614_v54, %v3618_v57 }
 0x72f   : > { %v11183_v60 = vadd.f32 %v9610_v53, %v3207_v9  ;;  %v3211_v26 = vadd.f32 %v3210_v28, %v11034_v63  ;;  %v3610_v63 = vld [vmem:[%s9804_s3 + $0x20] sm:$0xff]  ;;  %v3623_v9 = vld [vmem:[%s9804_s3 + $0x88] sm:$0xff]  ;;  %v8109_v28 = vcombine.high %v3622_v46, %v3626_v24 }
 0x730   : > { %v11187_v0 = vadd.f32 %v9611_v47, %v3209_v6  ;;  %v8092_v3 = vcombine.low %v3606_v41, %v3610_v63  ;;  %v8093_v34 = vcombine.high %v3606_v41, %v3610_v63  ;;  %v8102_v6 = vcombine.low %v3615_v51, %v3619_v32  ;;  %4531 = vmatprep.subr.bf16.mxu0 %v8103_v59  ;;  %v3634_v47 = vld [vmem:[%s9804_s3 + $0xe0] sm:$0xff]  ;;  %v3643_v54 = vld [vmem:[%s9804_s3 + $0x128] sm:$0xff] }
 0x731   : > { %v11190_v20 = vadd.f32 %v9612_v13, %v3211_v26  ;;  %v3289_v38 = vadd.f32 %v11183_v60, %v11179_v7  ;;  %v8111_v53 = vcombine.high %v3623_v9, %v3627_v42  ;;  %v3630_v26 = vld [vmem:[%s9804_s3 + $0xc0] sm:$0xff]  ;;  %v3631_v13 = vld [vmem:[%s9804_s3 + $0xc8] sm:$0xff]  ;;  %v8110_v41 = vcombine.low %v3623_v9, %v3627_v42 }
 0x732   : > { %4416 = vmatprep.subr.bf16.mxu1 %v8093_v34  ;;  %4532 = vmatpush1.bf16.msra.mxu0 %v8102_v6  ;;  %v8117_v63 = vcombine.high %v3630_v26, %v3634_v47  ;;  %v3642_v34 = vld [vmem:[%s9804_s3 + $0x120] sm:$0xff]  ;;  %v8116_v57 = vcombine.low %v3630_v26, %v3634_v47  ;;  %v3651_v59 = vld [vmem:[%s9804_s3 + $0x168] sm:$0xff]  ;;  %v8126_v9 = vcombine.low %v3639_v15, %v3643_v54 }
 0x733   : > { %3290 = vadd.xlane.f32.xlu0 %v3289_v38  ;;  %v3292_v5 = vadd.f32 %v11190_v20, %v11187_v0  ;;  %4417 = vmatpush1.bf16.msra.mxu1 %v8092_v3  ;;  %v3635_v38 = vld [vmem:[%s9804_s3 + $0xe8] sm:$0xff]  ;;  %v3638_v3 = vld [vmem:[%s9804_s3 + $0x100] sm:$0xff] }
 0x734   : > { %4418 = vmatprep.subr.bf16.mxu1 %v8101_v62  ;;  %4533 = vmatprep.subr.bf16.mxu0 %v8111_v53  ;;  %v8119_v48 = vcombine.high %v3631_v13, %v3635_v38  ;;  %v8118_v25 = vcombine.low %v3631_v13, %v3635_v38  ;;  %v8125_v29 = vcombine.high %v3638_v3, %v3642_v34  ;;  %v3646_v51 = vld [vmem:[%s9804_s3 + $0x140] sm:$0xff]  ;;  %v3655_v53 = vld [vmem:[%s9804_s3 + $0x188] sm:$0xff] }
 0x735   : > { %3293 = vadd.xlane.f32.xlu1 %v3292_v5  ;;  %v8108_v5 = vcombine.low %v3622_v46, %v3626_v24  ;;  %v8127_v62 = vcombine.high %v3639_v15, %v3643_v54  ;;  %v3650_v32 = vld [vmem:[%s9804_s3 + $0x160] sm:$0xff]  ;;  %v3647_v46 = vld [vmem:[%s9804_s3 + $0x148] sm:$0xff]  ;;  %v8124_v24 = vcombine.low %v3638_v3, %v3642_v34 }
 0x736   : > { %4534 = vmatpush1.bf16.msra.mxu0 %v8110_v41  ;;  %v8133_v42 = vcombine.high %v3646_v51, %v3650_v32  ;;  %v3654_v6 = vld [vmem:[%s9804_s3 + $0x180] sm:$0xff]  ;;  %v3659_v26 = vld [vmem:[%s9804_s3 + $0x1a8] sm:$0xff]  ;;  %v8132_v47 = vcombine.low %v3646_v51, %v3650_v32  ;;  %v8134_v13 = vcombine.low %v3647_v46, %v3651_v59 }
 0x737   : > { %4419 = vmatpush1.bf16.msra.mxu1 %v8100_v61  ;;  %4535 = vmatprep.subr.bf16.mxu0 %v8119_v48  ;;  %v8135_v61 = vcombine.high %v3647_v46, %v3651_v59  ;;  %v3662_v41 = vld [vmem:[%s9804_s3 + $0x1c0] sm:$0xff]  ;;  %v3663_v48 = vld [vmem:[%s9804_s3 + $0x1c8] sm:$0xff]  ;;  %v8142_v15 = vcombine.low %v3655_v53, %v3659_v26 }
 0x738   : > { %4420 = vmatprep.subr.bf16.mxu1 %v8109_v28  ;;  %v3658_v28 = vld [vmem:[%s9804_s3 + $0x1a0] sm:$0xff]  ;;  %v3667_v3 = vld [vmem:[%s9804_s3 + $0x1e8] sm:$0xff] }
 0x739   : > { %v8141_v38 = vcombine.high %v3654_v6, %v3658_v28  ;;  %v8140_v34 = vcombine.low %v3654_v6, %v3658_v28  ;;  %v3675_v51 = vld [vmem:[%s9804_s3 + $0x228] sm:$0xff]  ;;  %v8150_v46 = vcombine.low %v3663_v48, %v3667_v3 }
 0x73a   : > { %4536 = vmatpush1.bf16.msra.mxu0 %v8118_v25  ;;  %v3670_v25 = vld [vmem:[%s9804_s3 + $0x200] sm:$0xff]  ;;  %v3683_v6 = vld [vmem:[%s9804_s3 + $0x268] sm:$0xff] }
 0x73b   : > { %4421 = vmatpush1.bf16.msra.mxu1 %v8108_v5  ;;  %4537 = vmatprep.subr.bf16.mxu0 %v8127_v62  ;;  %v8143_v5 = vcombine.high %v3655_v53, %v3659_v26  ;;  %v3671_v62 = vld [vmem:[%s9804_s3 + $0x208] sm:$0xff] }
 0x73c   : > { %4422 = vmatprep.subr.bf16.mxu1 %v8117_v63  ;;  %v3666_v63 = vld [vmem:[%s9804_s3 + $0x1e0] sm:$0xff]  ;;  %v8158_v53 = vcombine.low %v3671_v62, %v3675_v51 }
 0x73d   : > { %v8149_v54 = vcombine.high %v3662_v41, %v3666_v63  ;;  %v8148_v32 = vcombine.low %v3662_v41, %v3666_v63 }
 0x73e   : > { %4538 = vmatpush1.bf16.msra.mxu0 %v8126_v9  ;;  %v3678_v9 = vld [vmem:[%s9804_s3 + $0x240] sm:$0xff] }
 0x73f   : > { %4423 = vmatpush1.bf16.msra.mxu1 %v8116_v57  ;;  %4539 = vmatprep.subr.bf16.mxu0 %v8135_v61  ;;  %v8151_v57 = vcombine.high %v3663_v48, %v3667_v3  ;;  %v3679_v61 = vld [vmem:[%s9804_s3 + $0x248] sm:$0xff] }
 0x740   : > { %4424 = vmatprep.subr.bf16.mxu1 %v8125_v29  ;;  %v3674_v29 = vld [vmem:[%s9804_s3 + $0x220] sm:$0xff] }
 0x741   : > { %v8157_v59 = vcombine.high %v3670_v25, %v3674_v29  ;;  %v8156_v28 = vcombine.low %v3670_v25, %v3674_v29 }
 0x742   : > { %4540 = vmatpush1.bf16.msra.mxu0 %v8134_v13 }
 0x743   : > { %4425 = vmatpush1.bf16.msra.mxu1 %v8124_v24  ;;  %4541 = vmatprep.subr.bf16.mxu0 %v8143_v5  ;;  %v8159_v24 = vcombine.high %v3671_v62, %v3675_v51 }
 0x744   : > { %4426 = vmatprep.subr.bf16.mxu1 %v8133_v42  ;;  %v3682_v42 = vld [vmem:[%s9804_s3 + $0x260] sm:$0xff] }
 0x745   : > { %v8165_v26 = vcombine.high %v3678_v9, %v3682_v42  ;;  %v8164_v13 = vcombine.low %v3678_v9, %v3682_v42 }
 0x746   : > { %4542 = vmatpush1.bf16.msra.mxu0 %v8142_v15 }
 0x747   : > { %4427 = vmatpush1.bf16.msra.mxu1 %v8132_v47  ;;  %4543 = vmatprep.subr.bf16.mxu0 %v8151_v57  ;;  %v8167_v47 = vcombine.high %v3679_v61, %v3683_v6 }
 0x748   : > { %4428 = vmatprep.subr.bf16.mxu1 %v8141_v38  ;;  %v8166_v38 = vcombine.low %v3679_v61, %v3683_v6 }
 0x74a   : > { %4544 = vmatpush1.bf16.msra.mxu0 %v8150_v46 }
 0x74b   : > { %4429 = vmatpush1.bf16.msra.mxu1 %v8140_v34  ;;  %4545 = vmatprep.subr.bf16.mxu0 %v8159_v24 }
 0x74c   : > { %4430 = vmatprep.subr.bf16.mxu1 %v8149_v54 }
 0x74e   : > { %4546 = vmatpush1.bf16.msra.mxu0 %v8158_v53 }
 0x74f   : > { %4431 = vmatpush1.bf16.msra.mxu1 %v8148_v32  ;;  %4547 = vmatprep.subr.bf16.mxu0 %v8167_v47 }
 0x750   : > { %4432 = vmatprep.subr.bf16.mxu1 %v8157_v59 }
 0x752   : > { %4548 = vmatpush1.bf16.msra.mxu0 %v8166_v38 }
 0x753   : > { %4433 = vmatpush1.bf16.msra.mxu1 %v8156_v28 }
 0x754   : > { %4434 = vmatprep.subr.bf16.mxu1 %v8165_v26 }
 0x757   : > { %4435 = vmatpush1.bf16.msra.mxu1 %v8164_v13 }
 0x788   : > { %v3249_v5 = vpop.xlane.xlu0 %3248 }
 0x789   : > { %v3296_v41 = vmul.f32 0.00390625, %v3249_v5 }
 0x78a   : > { %v3252_v63 = vpop.xlane.xlu1 %3251 }
 0x78b   : > { %v11237_v48 = vsub.f32 %v11039_v23, %v3296_v41  ;;  %v11240_v3 = vsub.f32 %v11043_v22, %v3296_v41  ;;  %v3297_v34 = vmul.f32 0.00390625, %v3252_v63 }
 0x78d   : > { %v11243_v15 = vsub.f32 %v11047_v10, %v3297_v34  ;;  %v11246_v54 = vsub.f32 %v11050_v21, %v3297_v34  ;;  %v3344_v57 = vmul.f32 %v11237_v48, %v11237_v48  ;;  %v3345_v25 = vmul.f32 %v11240_v3, %v11240_v3  ;;  %v3686_v34 = vld [vmem:[%s9804_s3 + $0x280] sm:$0xff] }
 0x78f   : > { %v3376_v29 = vadd.f32 %v3345_v25, %v3344_v57  ;;  %v3346_v23 = vmul.f32 %v11243_v15, %v11243_v15  ;;  %v3347_v22 = vmul.f32 %v11246_v54, %v11246_v54  ;;  %v3687_v57 = vld [vmem:[%s9804_s3 + $0x288] sm:$0xff] }
 0x790   : > { %v3255_v62 = vpop.xlane.xlu0 %3254 }
 0x791   : > { %v3298_v51 = vmul.f32 0.00390625, %v3255_v62  ;;  %3377 = vadd.xlane.f32.xlu0 %v3376_v29  ;;  %v3379_v10 = vadd.f32 %v3347_v22, %v3346_v23  ;;  %v3691_v29 = vld [vmem:[%s9804_s3 + $0x2a8] sm:$0xff] }
 0x792   : > { %v3258_v32 = vpop.xlane.xlu1 %3257  ;;  %v8174_v62 = vcombine.low %v3687_v57, %v3691_v29 }
 0x793   : > { %v11257_v21 = vsub.f32 %v11059_v2, %v3298_v51  ;;  %v11260_v46 = vsub.f32 %v11063_v44, %v3298_v51  ;;  %v3299_v59 = vmul.f32 0.00390625, %v3258_v32  ;;  %3380 = vadd.xlane.f32.xlu1 %v3379_v10  ;;  %v8175_v51 = vcombine.high %v3687_v57, %v3691_v29  ;;  %v3706_v57 = vld [vmem:[%s9804_s3 + $0x320] sm:$0xff] }
 0x795   : > { %v11263_v24 = vsub.f32 %v11067_v52, %v3299_v59  ;;  %v11266_v9 = vsub.f32 %v11070_v49, %v3299_v59  ;;  %v3348_v42 = vmul.f32 %v11257_v21, %v11257_v21  ;;  %v3349_v61 = vmul.f32 %v11260_v46, %v11260_v46  ;;  %4549 = vmatprep.subr.bf16.mxu0 %v8175_v51 }
 0x796   : > { %4550 = vmatpush1.bf16.msra.mxu0 %v8174_v62 }
 0x797   : > { %v3382_v6 = vadd.f32 %v3349_v61, %v3348_v42  ;;  %v3350_v2 = vmul.f32 %v11263_v24, %v11263_v24  ;;  %v3351_v44 = vmul.f32 %v11266_v9, %v11266_v9  ;;  %v3694_v42 = vld [vmem:[%s9804_s3 + $0x2c0] sm:$0xff] }
 0x798   : > { %v3261_v52 = vpop.xlane.xlu0 %3260  ;;  %v3698_v61 = vld [vmem:[%s9804_s3 + $0x2e0] sm:$0xff] }
 0x799   : > { %v3300_v28 = vmul.f32 0.00390625, %v3261_v52  ;;  %3383 = vadd.xlane.f32.xlu0 %v3382_v6  ;;  %v3385_v49 = vadd.f32 %v3351_v44, %v3350_v2  ;;  %v3695_v6 = vld [vmem:[%s9804_s3 + $0x2c8] sm:$0xff] }
 0x79a   : > { %v3264_v53 = vpop.xlane.xlu1 %3263 }
 0x79b   : > { %v11277_v26 = vsub.f32 %v11079_v12, %v3300_v28  ;;  %v11280_v47 = vsub.f32 %v11083_v45, %v3300_v28  ;;  %v3301_v13 = vmul.f32 0.00390625, %v3264_v53  ;;  %3386 = vadd.xlane.f32.xlu1 %v3385_v49  ;;  %v3690_v12 = vld [vmem:[%s9804_s3 + $0x2a0] sm:$0xff]  ;;  %v8181_v28 = vcombine.high %v3694_v42, %v3698_v61  ;;  %v3699_v49 = vld [vmem:[%s9804_s3 + $0x2e8] sm:$0xff] }
 0x79c   : > { %v8172_v22 = vcombine.low %v3686_v34, %v3690_v12  ;;  %v8180_v53 = vcombine.low %v3694_v42, %v3698_v61  ;;  %v3714_v42 = vld [vmem:[%s9804_s3 + $0x360] sm:$0xff]  ;;  %v3711_v61 = vld [vmem:[%s9804_s3 + $0x348] sm:$0xff] }
 0x79d   : > { %v11283_v38 = vsub.f32 %v11087_v33, %v3301_v13  ;;  %v11286_v5 = vsub.f32 %v11090_v31, %v3301_v13  ;;  %v3352_v41 = vmul.f32 %v11277_v26, %v11277_v26  ;;  %v3353_v63 = vmul.f32 %v11280_v47, %v11280_v47 }
 0x79e   : > { %v8173_v31 = vcombine.high %v3686_v34, %v3690_v12  ;;  %v8182_v13 = vcombine.low %v3695_v6, %v3699_v49  ;;  %v3702_v12 = vld [vmem:[%s9804_s3 + $0x300] sm:$0xff] }
 0x79f   : > { %v3388_v25 = vadd.f32 %v3353_v63, %v3352_v41  ;;  %v3354_v45 = vmul.f32 %v11283_v38, %v11283_v38  ;;  %v3355_v33 = vmul.f32 %v11286_v5, %v11286_v5  ;;  %v8183_v41 = vcombine.high %v3695_v6, %v3699_v49 }
 0x7a0   : > { %v3267_v23 = vpop.xlane.xlu0 %3266  ;;  %4436 = vmatprep.subr.bf16.mxu1 %v8173_v31  ;;  %v3707_v31 = vld [vmem:[%s9804_s3 + $0x328] sm:$0xff] }
 0x7a1   : > { %v3302_v10 = vmul.f32 0.00390625, %v3267_v23  ;;  %3389 = vadd.xlane.f32.xlu0 %v3388_v25  ;;  %v3391_v32 = vadd.f32 %v3355_v33, %v3354_v45  ;;  %4437 = vmatpush1.bf16.msra.mxu1 %v8172_v22  ;;  %v3703_v25 = vld [vmem:[%s9804_s3 + $0x308] sm:$0xff]  ;;  %v8189_v33 = vcombine.high %v3702_v12, %v3706_v57  ;;  %v8188_v23 = vcombine.low %v3702_v12, %v3706_v57  ;;  %v3718_v57 = vld [vmem:[%s9804_s3 + $0x380] sm:$0xff] }
 0x7a2   : > { %v3270_v59 = vpop.xlane.xlu1 %3269  ;;  %4438 = vmatprep.subr.bf16.mxu1 %v8181_v28  ;;  %4551 = vmatprep.subr.bf16.mxu0 %v8183_v41  ;;  %v8190_v22 = vcombine.low %v3703_v25, %v3707_v31  ;;  %v8191_v62 = vcombine.high %v3703_v25, %v3707_v31  ;;  %v3722_v25 = vld [vmem:[%s9804_s3 + $0x3a0] sm:$0xff] }
 0x7a3   : > { %v11304_v2 = vsub.f32 %v11099_v18, %v3302_v10  ;;  %v11307_v44 = vsub.f32 %v11103_v4, %v3302_v10  ;;  %v3303_v52 = vmul.f32 0.00390625, %v3270_v59  ;;  %3392 = vadd.xlane.f32.xlu1 %v3391_v32  ;;  %4552 = vmatpush1.bf16.msra.mxu0 %v8182_v13  ;;  %v3710_v59 = vld [vmem:[%s9804_s3 + $0x340] sm:$0xff] }
 0x7a4   : > { %4553 = vmatprep.subr.bf16.mxu0 %v8191_v62  ;;  %v8197_v49 = vcombine.high %v3710_v59, %v3714_v42  ;;  %v8196_v13 = vcombine.low %v3710_v59, %v3714_v42  ;;  %v3730_v59 = vld [vmem:[%s9804_s3 + $0x3e0] sm:$0xff]  ;;  %v3727_v42 = vld [vmem:[%s9804_s3 + $0x3c8] sm:$0xff] }
 0x7a5   : > { %v11311_v63 = vsub.f32 %v11107_v19, %v3303_v52  ;;  %v11314_v18 = vsub.f32 %v11110_v58, %v3303_v52  ;;  %v3356_v4 = vmul.f32 %v11304_v2, %v11304_v2  ;;  %v3357_v34 = vmul.f32 %v11307_v44, %v11307_v44  ;;  %4439 = vmatpush1.bf16.msra.mxu1 %v8180_v53  ;;  %v3715_v53 = vld [vmem:[%s9804_s3 + $0x368] sm:$0xff] }
 0x7a6   : > { %4440 = vmatprep.subr.bf16.mxu1 %v8189_v33  ;;  %v8198_v41 = vcombine.low %v3711_v61, %v3715_v53  ;;  %v3723_v33 = vld [vmem:[%s9804_s3 + $0x3a8] sm:$0xff] }
 0x7a7   : > { %v3394_v45 = vadd.f32 %v3357_v34, %v3356_v4  ;;  %v3358_v19 = vmul.f32 %v11311_v63, %v11311_v63  ;;  %v3359_v58 = vmul.f32 %v11314_v18, %v11314_v18  ;;  %4554 = vmatpush1.bf16.msra.mxu0 %v8190_v22  ;;  %v8199_v4 = vcombine.high %v3711_v61, %v3715_v53 }
 0x7a8   : > { %v3273_v29 = vpop.xlane.xlu0 %3272 }
 0x7a9   : > { %v3304_v51 = vmul.f32 0.00390625, %v3273_v29  ;;  %3395 = vadd.xlane.f32.xlu0 %v3394_v45  ;;  %v3397_v10 = vadd.f32 %v3359_v58, %v3358_v19  ;;  %4441 = vmatpush1.bf16.msra.mxu1 %v8188_v23  ;;  %v3719_v45 = vld [vmem:[%s9804_s3 + $0x388] sm:$0xff]  ;;  %v8205_v58 = vcombine.high %v3718_v57, %v3722_v25  ;;  %v8204_v29 = vcombine.low %v3718_v57, %v3722_v25  ;;  %v11377_v25 = vld [vmem:[%s9804_s3 + $0x10] sm:$0xff] }
 0x7aa   : > { %v3276_v32 = vpop.xlane.xlu1 %3275  ;;  %4442 = vmatprep.subr.bf16.mxu1 %v8197_v49  ;;  %4555 = vmatprep.subr.bf16.mxu0 %v8199_v4  ;;  %v8206_v23 = vcombine.low %v3719_v45, %v3723_v33  ;;  %v8207_v22 = vcombine.high %v3719_v45, %v3723_v33  ;;  %v11380_v45 = vld [vmem:[%s9804_s3 + $0x30] sm:$0xff] }
 0x7ab   : > { %v11332_v6 = vsub.f32 %v11119_v27, %v3304_v51  ;;  %v11335_v52 = vsub.f32 %v11123_v17, %v3304_v51  ;;  %v3305_v28 = vmul.f32 0.00390625, %v3276_v32  ;;  %3398 = vadd.xlane.f32.xlu1 %v3397_v10  ;;  %4556 = vmatpush1.bf16.msra.mxu0 %v8198_v41  ;;  %v3726_v32 = vld [vmem:[%s9804_s3 + $0x3c0] sm:$0xff] }
 0x7ac   : > { %4557 = vmatprep.subr.bf16.mxu0 %v8207_v22  ;;  %v8213_v53 = vcombine.high %v3726_v32, %v3730_v59  ;;  %v8212_v41 = vcombine.low %v3726_v32, %v3730_v59 }
 0x7ad   : > { %v11339_v34 = vsub.f32 %v11127_v11, %v3305_v28  ;;  %v11342_v27 = vsub.f32 %v11130_v1, %v3305_v28  ;;  %v3360_v17 = vmul.f32 %v11332_v6, %v11332_v6  ;;  %v3361_v12 = vmul.f32 %v11335_v52, %v11335_v52  ;;  %4443 = vmatpush1.bf16.msra.mxu1 %v8196_v13  ;;  %v3731_v13 = vld [vmem:[%s9804_s3 + $0x3e8] sm:$0xff] }
 0x7ae   : > { %4444 = vmatprep.subr.bf16.mxu1 %v8205_v58  ;;  %v8214_v4 = vcombine.low %v3727_v42, %v3731_v13  ;;  %v11392_v58 = vld [vmem:[%s9804_s3 + $0x38] sm:$0xff] }
 0x7af   : > { %v3400_v19 = vadd.f32 %v3361_v12, %v3360_v17  ;;  %v3362_v11 = vmul.f32 %v11339_v34, %v11339_v34  ;;  %v3363_v1 = vmul.f32 %v11342_v27, %v11342_v27  ;;  %4558 = vmatpush1.bf16.msra.mxu0 %v8206_v23  ;;  %v8215_v17 = vcombine.high %v3727_v42, %v3731_v13 }
 0x7b0   : > { %v3279_v31 = vpop.xlane.xlu0 %3278 }
 0x7b1   : > { %v3306_v62 = vmul.f32 0.00390625, %v3279_v31  ;;  %3401 = vadd.xlane.f32.xlu0 %v3400_v19  ;;  %v3403_v51 = vadd.f32 %v3363_v1, %v3362_v11  ;;  %4445 = vmatpush1.bf16.msra.mxu1 %v8204_v29  ;;  %v11383_v19 = vld [vmem:[%s9804_s3 + $0x18] sm:$0xff]  ;;  %v8097_v1 = vcombine.high %v11377_v25, %v11380_v45  ;;  %v8096_v31 = vcombine.low %v11377_v25, %v11380_v45  ;;  %v11520_v45 = vld [vmem:[%s9804_s3 + $0xd0] sm:$0xff] }
 0x7b2   : > { %v3282_v10 = vpop.xlane.xlu1 %3281  ;;  %4446 = vmatprep.subr.bf16.mxu1 %v8213_v53  ;;  %4559 = vmatprep.subr.bf16.mxu0 %v8215_v17  ;;  %v8099_v23 = vcombine.high %v11383_v19, %v11392_v58  ;;  %v8115_v25 = vcombine.high %v3625_v37, %v3629_v50 }
 0x7b3   : > { %v11360_v61 = vsub.f32 %v11139_v30, %v3306_v62  ;;  %v11363_v28 = vsub.f32 %v11143_v16, %v3306_v62  ;;  %v3307_v49 = vmul.f32 0.00390625, %v3282_v10  ;;  %3404 = vadd.xlane.f32.xlu1 %v3403_v51  ;;  %4560 = vmatpush1.bf16.msra.mxu0 %v8214_v4 }
 0x7b4   : > { %4755 = vmatprep.subr.bf16.mxu0 %v8099_v23 }
 0x7b5   : > { %v11367_v12 = vsub.f32 %v11147_v40, %v3307_v49  ;;  %v11370_v30 = vsub.f32 %v11150_v56, %v3307_v49  ;;  %v3364_v16 = vmul.f32 %v11360_v61, %v11360_v61  ;;  %v3365_v57 = vmul.f32 %v11363_v28, %v11363_v28  ;;  %4447 = vmatpush1.bf16.msra.mxu1 %v8212_v41 }
 0x7b6   : > { %4642 = vmatprep.subr.bf16.mxu1 %v8097_v1 }
 0x7b7   : > { %v3406_v40 = vadd.f32 %v3365_v57, %v3364_v16  ;;  %v3366_v56 = vmul.f32 %v11367_v12, %v11367_v12  ;;  %v3367_v11 = vmul.f32 %v11370_v30, %v11370_v30 }
 0x7b8   : > { %v3285_v33 = vpop.xlane.xlu0 %3284 }
 0x7b9   : > { %v3308_v22 = vmul.f32 0.00390625, %v3285_v33  ;;  %3407 = vadd.xlane.f32.xlu0 %v3406_v40  ;;  %v3409_v62 = vadd.f32 %v3367_v11, %v3366_v56 }
 0x7ba   : > { %v3288_v51 = vpop.xlane.xlu1 %3287 }
 0x7bb   : > { %v11401_v10 = vsub.f32 %v11159_v8, %v3308_v22  ;;  %v11404_v32 = vsub.f32 %v11163_v55, %v3308_v22  ;;  %v3309_v59 = vmul.f32 0.00390625, %v3288_v51  ;;  %3410 = vadd.xlane.f32.xlu1 %v3409_v62 }
 0x7bd   : > { %v11407_v42 = vsub.f32 %v11167_v36, %v3309_v59  ;;  %v11410_v49 = vsub.f32 %v11170_v43, %v3309_v59  ;;  %v3368_v53 = vmul.f32 %v11401_v10, %v11401_v10  ;;  %v3369_v13 = vmul.f32 %v11404_v32, %v11404_v32 }
 0x7bf   : > { %v3412_v41 = vadd.f32 %v3369_v13, %v3368_v53  ;;  %v3370_v8 = vmul.f32 %v11407_v42, %v11407_v42  ;;  %v3371_v55 = vmul.f32 %v11410_v49, %v11410_v49 }
 0x7c0   : > { %v3291_v4 = vpop.xlane.xlu0 %3290 }
 0x7c1   : > { %v3310_v17 = vmul.f32 0.00390625, %v3291_v4  ;;  %3413 = vadd.xlane.f32.xlu0 %v3412_v41  ;;  %v3415_v36 = vadd.f32 %v3371_v55, %v3370_v8  ;;  %v3245_v55 = vld [vmem:[%s14757_s20] sm:$0x3] }
 0x7c2   : > { %v3294_v16 = vpop.xlane.xlu1 %3293 }
 0x7c3   : > { %v11421_v43 = vsub.f32 %v11179_v7, %v3310_v17  ;;  %v11424_v57 = vsub.f32 %v11183_v60, %v3310_v17  ;;  %v3311_v40 = vmul.f32 0.00390625, %v3294_v16  ;;  %3416 = vadd.xlane.f32.xlu1 %v3415_v36  ;;  %v11446_v16 = vrot.slane %v3245_v55, %v10475_v14 }
 0x7c5   : > { %v11427_v56 = vsub.f32 %v11187_v0, %v3311_v40  ;;  %v11430_v11 = vsub.f32 %v11190_v20, %v3311_v40  ;;  %v3372_v1 = vmul.f32 %v11421_v43, %v11421_v43  ;;  %v3373_v33 = vmul.f32 %v11424_v57, %v11424_v57  ;;  %v3246_v40 = vld [vmem:[%s14758_s23] sm:$0x3] }
 0x7c7   : > { %v3418_v23 = vadd.f32 %v3373_v33, %v3372_v1  ;;  %v3374_v7 = vmul.f32 %v11427_v56, %v11427_v56  ;;  %v3375_v60 = vmul.f32 %v11430_v11, %v11430_v11  ;;  %v11454_v1 = vrot.slane %v3245_v55, %v10481_v39 }
 0x7c9   : > { %3419 = vadd.xlane.f32.xlu0 %v3418_v23  ;;  %v3421_v0 = vadd.f32 %v3375_v60, %v3374_v7 }
 0x7cb   : > { %3422 = vadd.xlane.f32.xlu1 %v3421_v0 }
 0x81e   : > { %v3378_v22 = vpop.xlane.xlu0 %3377 }
 0x81f   : > { %v3424_v20 = vmul.f32 0.00390625, %v3378_v22 }
 0x820   : > { %v3381_v62 = vpop.xlane.xlu1 %3380 }
 0x821   : > { %v3440_v51 = vadd.f32 1e-12, %v3424_v20  ;;  %v3425_v59 = vmul.f32 0.00390625, %v3381_v62  ;;  %v11459_v20 = vrot.slane %v3246_v40, %v10475_v14  ;;  %v11462_v62 = vrot.slane %v3246_v40, %v10481_v39 }
 0x823   : > { %9261 = vrsqrt.f32 %v3440_v51  ;;  %v3441_v53 = vadd.f32 1e-12, %v3425_v59 }
 0x825   : > { %9263 = vrsqrt.f32 %v3441_v53 }
 0x826   : > { %v3384_v13 = vpop.xlane.xlu0 %3383 }
 0x827   : > { %v3426_v41 = vmul.f32 0.00390625, %v3384_v13 }
 0x828   : > { %v3387_v8 = vpop.xlane.xlu1 %3386 }
 0x829   : > { %v3442_v4 = vadd.f32 1e-12, %v3426_v41  ;;  %v3427_v17 = vmul.f32 0.00390625, %v3387_v8 }
 0x82b   : > { %9265 = vrsqrt.f32 %v3442_v4  ;;  %v3443_v36 = vadd.f32 1e-12, %v3427_v17  ;;  %v3616_v17 = vld [vmem:[%s9804_s3 + $0x50] sm:$0xff] }
 0x82d   : > { %v9262_v33 = vpop.eup %9261  ;;  %9267 = vrsqrt.f32 %v3443_v36 }
 0x82e   : > { %v3472_v23 = vmul.f32 %v9262_v33, %v11237_v48  ;;  %v3473_v7 = vmul.f32 %v9262_v33, %v11240_v3  ;;  %v3390_v60 = vpop.xlane.xlu0 %3389  ;;  %v3620_v33 = vld [vmem:[%s9804_s3 + $0x70] sm:$0xff] }
 0x82f   : > { %v9264_v0 = vpop.eup %9263  ;;  %v3428_v22 = vmul.f32 0.00390625, %v3390_v60 }
 0x830   : > { %v3515_v51 = vmul.f32 %v11446_v16, %v3472_v23  ;;  %v3474_v59 = vmul.f32 %v9264_v0, %v11243_v15  ;;  %v3475_v48 = vmul.f32 %v9264_v0, %v11246_v54  ;;  %v3393_v3 = vpop.xlane.xlu1 %3392  ;;  %v3516_v53 = vmul.f32 %v11454_v1, %v3473_v7  ;;  %v3617_v23 = vld [vmem:[%s9804_s3 + $0x58] sm:$0xff] }
 0x831   : > { %v3444_v13 = vadd.f32 1e-12, %v3428_v22  ;;  %v3429_v41 = vmul.f32 0.00390625, %v3393_v3  ;;  %v3621_v7 = vld [vmem:[%s9804_s3 + $0x78] sm:$0xff] }
 0x832   : > { %v3517_v8 = vmul.f32 %v11446_v16, %v3474_v59  ;;  %v3518_v55 = vmul.f32 %v11454_v1, %v3475_v48  ;;  %v11472_v36 = vadd.f32 %v11462_v62, %v3516_v53  ;;  %v11478_v54 = vadd.f32 %v11459_v20, %v3515_v51 }
 0x833   : > { %9269 = vrsqrt.f32 %v3444_v13  ;;  %v3445_v4 = vadd.f32 1e-12, %v3429_v41  ;;  %v8105_v13 = vcombine.high %v3616_v17, %v3620_v33  ;;  %v8107_v41 = vcombine.high %v3617_v23, %v3621_v7 }
 0x834   : > { %14759 = vst [vmem:[#allocation12_spill] sm:$0xff] %v11472_v36  ;;  %v11475_v15 = vadd.f32 %v11462_v62, %v3518_v55  ;;  %14761 = vst [vmem:[#allocation14_spill] sm:$0xff] %v11478_v54  ;;  %v11481_v40 = vadd.f32 %v11459_v20, %v3517_v8  ;;  %v11497_v8 = vld [vmem:[%s9804_s3 + $0x90] sm:$0xff] }
 0x835   : > { %v9266_v60 = vpop.eup %9265  ;;  %9271 = vrsqrt.f32 %v3445_v4 }
 0x836   : > { %14760 = vst [vmem:[#allocation13_spill] sm:$0xff] %v11475_v15  ;;  %14762 = vst [vmem:[#allocation15_spill] sm:$0xff] %v11481_v40  ;;  %v3476_v0 = vmul.f32 %v9266_v60, %v11257_v21  ;;  %v3477_v22 = vmul.f32 %v9266_v60, %v11260_v46  ;;  %v3396_v59 = vpop.xlane.xlu0 %3395  ;;  %v11490_v51 = vpack.c.bf16 %v11475_v15, %v11472_v36  ;;  %v3628_v60 = vld [vmem:[%s9804_s3 + $0xb0] sm:$0xff] }
 0x837   : > { %v11494_v48 = vpack.c.bf16 %v11481_v40, %v11478_v54  ;;  %v9268_v3 = vpop.eup %9267  ;;  %v3430_v53 = vmul.f32 0.00390625, %v3396_v59 }
 0x838   : > { %v3478_v21 = vmul.f32 %v9268_v3, %v11263_v24  ;;  %v3479_v46 = vmul.f32 %v9268_v3, %v11266_v9  ;;  %4448 = vmatprep.mubr.bf16.mxu1 %v11490_v51  ;;  %4561 = vmatprep.mubr.bf16.mxu0 %v11490_v51  ;;  %v3399_v55 = vpop.xlane.xlu1 %3398  ;;  %v3520_v4 = vmul.f32 %v11454_v1, %v3477_v22 }
 0x839   : > { %v3446_v29 = vadd.f32 1e-12, %v3430_v53  ;;  %v3431_v59 = vmul.f32 0.00390625, %v3399_v55  ;;  %4449 = vmatmul.mubr.bf16.vlgmr.msra.gmra.mrb[32].mxu1 %v11494_v48  ;;  %4562 = vmatmul.mubr.bf16.vlgmr.msra.gmra.mrb[160].mxu0 %v11494_v48  ;;  %v8104_v24 = vcombine.low %v3616_v17, %v3620_v33  ;;  %v3519_v9 = vmul.f32 %v11446_v16, %v3476_v0 }
 0x83a   : > { %4643 = vmatpush1.bf16.msra.mxu1 %v8096_v31  ;;  %v14763_v22 = vcombine.low %v11383_v19, %v11392_v58  ;;  %v8106_v3 = vcombine.low %v3617_v23, %v3621_v7  ;;  %v3522_v53 = vmul.f32 %v11454_v1, %v3479_v46  ;;  %v3521_v55 = vmul.f32 %v11446_v16, %v3478_v21  ;;  %v11532_v23 = vld [vmem:[%s9804_s3 + $0xf0] sm:$0xff]  ;;  %v3637_v7 = vld [vmem:[%s9804_s3 + $0xf8] sm:$0xff] }
 0x83b   : > { %9273 = vrsqrt.f32 %v3446_v29  ;;  %v3447_v17 = vadd.f32 1e-12, %v3431_v59  ;;  %4644 = vmatprep.subr.bf16.mxu1 %v8105_v13  ;;  %v8113_v33 = vcombine.high %v11497_v8, %v3628_v60  ;;  %v11523_v31 = vadd.f32 %v11462_v62, %v3520_v4  ;;  %v11535_v29 = vld [vmem:[%s9804_s3 + $0xd8] sm:$0xff] }
 0x83c   : > { %4756 = vmatpush1.bf16.msra.mxu0 %v14763_v22  ;;  %v11526_v19 = vadd.f32 %v11462_v62, %v3522_v53  ;;  %v11529_v58 = vadd.f32 %v11459_v20, %v3521_v55  ;;  %v11539_v13 = vadd.f32 %v11459_v20, %v3519_v9  ;;  %v8114_v21 = vcombine.low %v3625_v37, %v3629_v50  ;;  %v3644_v55 = vld [vmem:[%s9804_s3 + $0x130] sm:$0xff] }
 0x83d   : > { %4757 = vmatprep.subr.bf16.mxu0 %v8107_v41  ;;  %14764 = vst [vmem:[#allocation16_spill] sm:$0xff] %v11523_v31  ;;  %v9270_v0 = vpop.eup %9269  ;;  %9275 = vrsqrt.f32 %v3447_v17  ;;  %v8112_v41 = vcombine.low %v11497_v8, %v3628_v60  ;;  %v8121_v50 = vcombine.high %v11520_v45, %v11532_v23  ;;  %v8123_v37 = vcombine.high %v11535_v29, %v3637_v7  ;;  %v3641_v17 = vld [vmem:[%s9804_s3 + $0x118] sm:$0xff] }
 0x83e   : > { %14765 = vst [vmem:[#allocation17_spill] sm:$0xff] %v11526_v19  ;;  %14766 = vst [vmem:[#allocation18_spill] sm:$0xff] %v11529_v58  ;;  %v3480_v46 = vmul.f32 %v9270_v0, %v11277_v26  ;;  %v3481_v4 = vmul.f32 %v9270_v0, %v11280_v47  ;;  %v3402_v59 = vpop.xlane.xlu0 %3401  ;;  %4645 = vmatpush1.bf16.msra.mxu1 %v8104_v24  ;;  %v11546_v22 = vpack.c.bf16 %v11526_v19, %v11523_v31  ;;  %v11556_v26 = vld [vmem:[%s9804_s3 + $0x110] sm:$0xff] }
 0x83f   : > { %14767 = vst [vmem:[#allocation19_spill] sm:$0xff] %v11539_v13  ;;  %v9272_v53 = vpop.eup %9271  ;;  %v3432_v9 = vmul.f32 0.00390625, %v3402_v59  ;;  %v11550_v8 = vpack.c.bf16 %v11529_v58, %v11539_v13  ;;  %4646 = vmatprep.subr.bf16.mxu1 %v8113_v33  ;;  %v3645_v33 = vld [vmem:[%s9804_s3 + $0x138] sm:$0xff] }
 0x840   : > { %4758 = vmatpush1.bf16.msra.mxu0 %v8106_v3  ;;  %v3482_v47 = vmul.f32 %v9272_v53, %v11283_v38  ;;  %v3483_v60 = vmul.f32 %v9272_v53, %v11286_v5  ;;  %4458 = vmatprep.mubr.bf16.mxu1 %v11546_v22  ;;  %v3405_v24 = vpop.xlane.xlu1 %3404  ;;  %v3524_v3 = vmul.f32 %v11454_v1, %v3481_v4 }
 0x841   : > { %4759 = vmatprep.subr.bf16.mxu0 %v8115_v25  ;;  %4571 = vmatprep.mubr.bf16.mxu0 %v11546_v22  ;;  %v3448_v25 = vadd.f32 1e-12, %v3432_v9  ;;  %v3433_v0 = vmul.f32 0.00390625, %v3405_v24  ;;  %v8120_v38 = vcombine.low %v11520_v45, %v11532_v23  ;;  %v3523_v5 = vmul.f32 %v11446_v16, %v3480_v46  ;;  %v11576_v23 = vld [vmem:[%s9804_s3 + $0x150] sm:$0xff]  ;;  %v11591_v46 = vld [vmem:[%s9804_s3 + $0x158] sm:$0xff] }
 0x842   : > { %4459 = vmatmul.mubr.bf16.gmra.mrb[36].mxu1 %v11550_v8  ;;  %4572 = vmatmul.mubr.bf16.gmra.mrb[164].mxu0 %v11550_v8  ;;  %v8122_v4 = vcombine.low %v11535_v29, %v3637_v7  ;;  %v3526_v59 = vmul.f32 %v11454_v1, %v3483_v60  ;;  %v3525_v53 = vmul.f32 %v11446_v16, %v3482_v47  ;;  %v11588_v7 = vld [vmem:[%s9804_s3 + $0x170] sm:$0xff] }
 0x843   : > { %4647 = vmatpush1.bf16.msra.mxu1 %v8112_v41  ;;  %9277 = vrsqrt.f32 %v3448_v25  ;;  %v3449_v9 = vadd.f32 1e-12, %v3433_v0  ;;  %v8129_v24 = vcombine.high %v11556_v26, %v3644_v55  ;;  %v8131_v45 = vcombine.high %v3641_v17, %v3645_v33 }
 0x844   : > { %4760 = vmatpush1.bf16.msra.mxu0 %v8114_v21  ;;  %4648 = vmatprep.subr.bf16.mxu1 %v8121_v50  ;;  %v11579_v41 = vadd.f32 %v11462_v62, %v3524_v3  ;;  %v11582_v21 = vadd.f32 %v11462_v62, %v3526_v59  ;;  %v11585_v29 = vadd.f32 %v11459_v20, %v3525_v53  ;;  %v3653_v50 = vld [vmem:[%s9804_s3 + $0x178] sm:$0xff] }
 0x845   : > { %4761 = vmatprep.subr.bf16.mxu0 %v8123_v37  ;;  %v9274_v37 = vpop.eup %9273  ;;  %9279 = vrsqrt.f32 %v3449_v9  ;;  %v11595_v47 = vadd.f32 %v11459_v20, %v3523_v5  ;;  %v8128_v60 = vcombine.low %v11556_v26, %v3644_v55  ;;  %v8130_v3 = vcombine.low %v3641_v17, %v3645_v33  ;;  %v11612_v55 = vld [vmem:[%s9804_s3 + $0x190] sm:$0xff] }
 0x846   : > { %14768 = vst [vmem:[#allocation20_spill] sm:$0xff] %v11579_v41  ;;  %14769 = vst [vmem:[#allocation21_spill] sm:$0xff] %v11582_v21  ;;  %v3484_v25 = vmul.f32 %v9274_v37, %v11304_v2  ;;  %v3485_v0 = vmul.f32 %v9274_v37, %v11307_v44  ;;  %v3408_v59 = vpop.xlane.xlu0 %3407  ;;  %v11602_v53 = vpack.c.bf16 %v11582_v21, %v11579_v41  ;;  %v3661_v37 = vld [vmem:[%s9804_s3 + $0x1b8] sm:$0xff] }
 0x847   : > { %14770 = vst [vmem:[#allocation22_spill] sm:$0xff] %v11585_v29  ;;  %14771 = vst [vmem:[#allocation23_spill] sm:$0xff] %v11595_v47  ;;  %4649 = vmatpush1.bf16.msra.mxu1 %v8120_v38  ;;  %v9276_v9 = vpop.eup %9275  ;;  %v3434_v5 = vmul.f32 0.00390625, %v3408_v59  ;;  %v11606_v26 = vpack.c.bf16 %v11585_v29, %v11595_v47  ;;  %v8137_v2 = vcombine.high %v11576_v23, %v11588_v7 }
 0x848   : > { %4762 = vmatpush1.bf16.msra.mxu0 %v8122_v4  ;;  %4650 = vmatprep.subr.bf16.mxu1 %v8129_v24  ;;  %v8139_v44 = vcombine.high %v11591_v46, %v3653_v50  ;;  %v3486_v17 = vmul.f32 %v9276_v9, %v11311_v63  ;;  %v3487_v33 = vmul.f32 %v9276_v9, %v11314_v18  ;;  %v3411_v38 = vpop.xlane.xlu1 %3410  ;;  %v3660_v24 = vld [vmem:[%s9804_s3 + $0x1b0] sm:$0xff] }
 0x849   : > { %4763 = vmatprep.subr.bf16.mxu0 %v8131_v45  ;;  %4468 = vmatprep.mubr.bf16.mxu1 %v11602_v53  ;;  %v3528_v4 = vmul.f32 %v11454_v1, %v3485_v0  ;;  %v3657_v45 = vld [vmem:[%s9804_s3 + $0x198] sm:$0xff]  ;;  %v3450_v59 = vadd.f32 1e-12, %v3434_v5  ;;  %v3435_v21 = vmul.f32 0.00390625, %v3411_v38  ;;  %v8136_v63 = vcombine.low %v11576_v23, %v11588_v7  ;;  %v11632_v7 = vld [vmem:[%s9804_s3 + $0x1d0] sm:$0xff] }
 0x84a   : > { %4581 = vmatprep.mubr.bf16.mxu0 %v11602_v53  ;;  %4469 = vmatmul.mubr.bf16.gmra.mrb[40].mxu1 %v11606_v26  ;;  %v3527_v18 = vmul.f32 %v11446_v16, %v3484_v25  ;;  %v8138_v0 = vcombine.low %v11591_v46, %v3653_v50  ;;  %v3530_v9 = vmul.f32 %v11454_v1, %v3487_v33  ;;  %v11644_v50 = vld [vmem:[%s9804_s3 + $0x1f0] sm:$0xff]  ;;  %v11647_v25 = vld [vmem:[%s9804_s3 + $0x1d8] sm:$0xff] }
 0x84b   : > { %4582 = vmatmul.mubr.bf16.gmra.mrb[168].mxu0 %v11606_v26  ;;  %4651 = vmatpush1.bf16.msra.mxu1 %v8128_v60  ;;  %v3529_v5 = vmul.f32 %v11446_v16, %v3486_v17  ;;  %9281 = vrsqrt.f32 %v3450_v59  ;;  %v3451_v38 = vadd.f32 1e-12, %v3435_v21  ;;  %v8145_v29 = vcombine.high %v11612_v55, %v3660_v24  ;;  %v3669_v21 = vld [vmem:[%s9804_s3 + $0x1f8] sm:$0xff] }
 0x84c   : > { %4764 = vmatpush1.bf16.msra.mxu0 %v8130_v3  ;;  %4652 = vmatprep.subr.bf16.mxu1 %v8137_v2  ;;  %v8147_v23 = vcombine.high %v3657_v45, %v3661_v37  ;;  %v11635_v60 = vadd.f32 %v11462_v62, %v3528_v4  ;;  %v11638_v3 = vadd.f32 %v11462_v62, %v3530_v9 }
 0x84d   : > { %4765 = vmatprep.subr.bf16.mxu0 %v8139_v44  ;;  %v11641_v46 = vadd.f32 %v11459_v20, %v3529_v5  ;;  %v9278_v2 = vpop.eup %9277  ;;  %9283 = vrsqrt.f32 %v3451_v38  ;;  %v11651_v44 = vadd.f32 %v11459_v20, %v3527_v18  ;;  %v8144_v17 = vcombine.low %v11612_v55, %v3660_v24  ;;  %v11668_v24 = vld [vmem:[%s9804_s3 + $0x210] sm:$0xff] }
 0x84e   : > { %14772 = vst [vmem:[#allocation24_spill] sm:$0xff] %v11635_v60  ;;  %14773 = vst [vmem:[#allocation25_spill] sm:$0xff] %v11638_v3  ;;  %v8146_v33 = vcombine.low %v3657_v45, %v3661_v37  ;;  %v3488_v4 = vmul.f32 %v9278_v2, %v11332_v6  ;;  %v3489_v59 = vmul.f32 %v9278_v2, %v11335_v52  ;;  %v3414_v9 = vpop.xlane.xlu0 %3413  ;;  %v3677_v2 = vld [vmem:[%s9804_s3 + $0x238] sm:$0xff] }
 0x84f   : > { %14774 = vst [vmem:[#allocation26_spill] sm:$0xff] %v11641_v46  ;;  %14775 = vst [vmem:[#allocation27_spill] sm:$0xff] %v11651_v44  ;;  %4653 = vmatpush1.bf16.msra.mxu1 %v8136_v63  ;;  %v11658_v5 = vpack.c.bf16 %v11638_v3, %v11635_v60  ;;  %v9280_v38 = vpop.eup %9279  ;;  %v3436_v18 = vmul.f32 0.00390625, %v3414_v9  ;;  %v11662_v55 = vpack.c.bf16 %v11641_v46, %v11651_v44 }
 0x850   : > { %4766 = vmatpush1.bf16.msra.mxu0 %v8138_v0  ;;  %4654 = vmatprep.subr.bf16.mxu1 %v8145_v29  ;;  %v8153_v6 = vcombine.high %v11632_v7, %v11644_v50  ;;  %v8155_v52 = vcombine.high %v11647_v25, %v3669_v21  ;;  %v3490_v45 = vmul.f32 %v9280_v38, %v11339_v34  ;;  %v3417_v63 = vpop.xlane.xlu1 %3416  ;;  %v3676_v29 = vld [vmem:[%s9804_s3 + $0x230] sm:$0xff] }
 0x851   : > { %4767 = vmatprep.subr.bf16.mxu0 %v8147_v23  ;;  %v3491_v37 = vmul.f32 %v9280_v38, %v11342_v27  ;;  %4478 = vmatprep.mubr.bf16.mxu1 %v11658_v5  ;;  %v3532_v0 = vmul.f32 %v11454_v1, %v3489_v59  ;;  %v3673_v23 = vld [vmem:[%s9804_s3 + $0x218] sm:$0xff]  ;;  %v3452_v9 = vadd.f32 1e-12, %v3436_v18  ;;  %v3437_v3 = vmul.f32 0.00390625, %v3417_v63 }
 0x852   : > { %4591 = vmatprep.mubr.bf16.mxu0 %v11658_v5  ;;  %4479 = vmatmul.mubr.bf16.gmra.mrb[44].mxu1 %v11662_v55  ;;  %v8152_v34 = vcombine.low %v11632_v7, %v11644_v50  ;;  %v3531_v27 = vmul.f32 %v11446_v16, %v3488_v4  ;;  %v8154_v59 = vcombine.low %v11647_v25, %v3669_v21  ;;  %v11688_v50 = vld [vmem:[%s9804_s3 + $0x250] sm:$0xff]  ;;  %v3681_v4 = vld [vmem:[%s9804_s3 + $0x258] sm:$0xff] }
 0x853   : > { %4592 = vmatmul.mubr.bf16.gmra.mrb[172].mxu0 %v11662_v55  ;;  %4655 = vmatpush1.bf16.msra.mxu1 %v8144_v17  ;;  %v3534_v38 = vmul.f32 %v11454_v1, %v3491_v37  ;;  %v3533_v18 = vmul.f32 %v11446_v16, %v3490_v45  ;;  %9285 = vrsqrt.f32 %v3452_v9  ;;  %v3453_v63 = vadd.f32 1e-12, %v3437_v3  ;;  %v3684_v21 = vld [vmem:[%s9804_s3 + $0x270] sm:$0xff]  ;;  %v3685_v45 = vld [vmem:[%s9804_s3 + $0x278] sm:$0xff] }
 0x854   : > { %4768 = vmatpush1.bf16.msra.mxu0 %v8146_v33  ;;  %4656 = vmatprep.subr.bf16.mxu1 %v8153_v6  ;;  %v8161_v46 = vcombine.high %v11668_v24, %v3676_v29  ;;  %v8163_v7 = vcombine.high %v3673_v23, %v3677_v2  ;;  %v11691_v17 = vadd.f32 %v11462_v62, %v3532_v0 }
 0x855   : > { %4769 = vmatprep.subr.bf16.mxu0 %v8155_v52  ;;  %v11694_v33 = vadd.f32 %v11462_v62, %v3534_v38  ;;  %v11697_v25 = vadd.f32 %v11459_v20, %v3533_v18  ;;  %v9282_v3 = vpop.eup %9281  ;;  %9287 = vrsqrt.f32 %v3453_v63  ;;  %v11703_v6 = vadd.f32 %v11459_v20, %v3531_v27 }
 0x856   : > { %14776 = vst [vmem:[#allocation28_spill] sm:$0xff] %v11691_v17  ;;  %v8160_v52 = vcombine.low %v11668_v24, %v3676_v29  ;;  %v8162_v37 = vcombine.low %v3673_v23, %v3677_v2  ;;  %v3492_v0 = vmul.f32 %v9282_v3, %v11360_v61  ;;  %v3493_v9 = vmul.f32 %v9282_v3, %v11363_v28  ;;  %v3420_v38 = vpop.xlane.xlu0 %3419  ;;  %v11718_v29 = vld [vmem:[%s9804_s3 + $0x290] sm:$0xff] }
 0x857   : > { %14777 = vst [vmem:[#allocation29_spill] sm:$0xff] %v11694_v33  ;;  %14778 = vst [vmem:[#allocation30_spill] sm:$0xff] %v11697_v25  ;;  %4657 = vmatpush1.bf16.msra.mxu1 %v8152_v34  ;;  %v11710_v18 = vpack.c.bf16 %v11694_v33, %v11691_v17  ;;  %v9284_v63 = vpop.eup %9283  ;;  %v3438_v27 = vmul.f32 0.00390625, %v3420_v38  ;;  %v11714_v24 = vpack.c.bf16 %v11697_v25, %v11703_v6  ;;  %v3692_v3 = vld [vmem:[%s9804_s3 + $0x2b0] sm:$0xff]  ;;  %v3689_v38 = vld [vmem:[%s9804_s3 + $0x298] sm:$0xff] }
 0x858   : > { %14779 = vst [vmem:[#allocation31_spill] sm:$0xff] %v11703_v6  ;;  %4770 = vmatpush1.bf16.msra.mxu0 %v8154_v59  ;;  %4658 = vmatprep.subr.bf16.mxu1 %v8161_v46  ;;  %v8169_v61 = vcombine.high %v11688_v50, %v3684_v21  ;;  %v8171_v28 = vcombine.high %v3681_v4, %v3685_v45  ;;  %v3423_v34 = vpop.xlane.xlu1 %3422  ;;  %v3693_v46 = vld [vmem:[%s9804_s3 + $0x2b8] sm:$0xff] }
 0x859   : > { %4771 = vmatprep.subr.bf16.mxu0 %v8163_v7  ;;  %v3494_v23 = vmul.f32 %v9284_v63, %v11367_v12  ;;  %v3495_v2 = vmul.f32 %v9284_v63, %v11370_v30  ;;  %4488 = vmatprep.mubr.bf16.mxu1 %v11710_v18  ;;  %v3536_v59 = vmul.f32 %v11454_v1, %v3493_v9  ;;  %v3454_v7 = vadd.f32 1e-12, %v3438_v27 }
 0x85a   : > { %4601 = vmatprep.mubr.bf16.mxu0 %v11710_v18  ;;  %v3439_v33 = vmul.f32 0.00390625, %v3423_v34  ;;  %4489 = vmatmul.mubr.bf16.gmra.mrb[48].mxu1 %v11714_v24  ;;  %v8168_v12 = vcombine.low %v11688_v50, %v3684_v21  ;;  %v3535_v30 = vmul.f32 %v11446_v16, %v3492_v0  ;;  %v8170_v9 = vcombine.low %v3681_v4, %v3685_v45  ;;  %v3696_v50 = vld [vmem:[%s9804_s3 + $0x2d0] sm:$0xff]  ;;  %v3701_v0 = vld [vmem:[%s9804_s3 + $0x2f8] sm:$0xff] }
 0x85b   : > { %4602 = vmatmul.mubr.bf16.gmra.mrb[176].mxu0 %v11714_v24  ;;  %4659 = vmatpush1.bf16.msra.mxu1 %v8160_v52  ;;  %v3538_v63 = vmul.f32 %v11454_v1, %v3495_v2  ;;  %v3537_v27 = vmul.f32 %v11446_v16, %v3494_v23  ;;  %9289 = vrsqrt.f32 %v3454_v7  ;;  %v8177_v25 = vcombine.high %v11718_v29, %v3692_v3  ;;  %v3700_v45 = vld [vmem:[%s9804_s3 + $0x2f0] sm:$0xff] }
 0x85c   : > { %4772 = vmatpush1.bf16.msra.mxu0 %v8162_v37  ;;  %v3455_v34 = vadd.f32 1e-12, %v3439_v33  ;;  %4660 = vmatprep.subr.bf16.mxu1 %v8169_v61  ;;  %v8179_v17 = vcombine.high %v3689_v38, %v3693_v46  ;;  %v11737_v21 = vadd.f32 %v11462_v62, %v3536_v59  ;;  %v3697_v37 = vld [vmem:[%s9804_s3 + $0x2d8] sm:$0xff]  ;;  %v11749_v33 = vadd.f32 %v11459_v20, %v3535_v30 }
 0x85d   : > { %4773 = vmatprep.subr.bf16.mxu0 %v8171_v28  ;;  %v11740_v52 = vadd.f32 %v11462_v62, %v3538_v63  ;;  %v11743_v4 = vadd.f32 %v11459_v20, %v3537_v27  ;;  %v9286_v23 = vpop.eup %9285  ;;  %v8176_v61 = vcombine.low %v11718_v29, %v3692_v3  ;;  %v8178_v28 = vcombine.low %v3689_v38, %v3693_v46  ;;  %v3704_v3 = vld [vmem:[%s9804_s3 + $0x310] sm:$0xff]  ;;  %v3709_v27 = vld [vmem:[%s9804_s3 + $0x338] sm:$0xff] }
 0x85e   : > { %14780 = vst [vmem:[#allocation32_spill] sm:$0xff] %v11737_v21  ;;  %9291 = vrsqrt.f32 %v3455_v34  ;;  %14783 = vst [vmem:[#allocation35_spill] sm:$0xff] %v11749_v33  ;;  %v3496_v2 = vmul.f32 %v9286_v23, %v11401_v10  ;;  %v3497_v59 = vmul.f32 %v9286_v23, %v11404_v32  ;;  %v8185_v29 = vcombine.high %v3696_v50, %v3700_v45 }
 0x85f   : > { %14781 = vst [vmem:[#allocation33_spill] sm:$0xff] %v11740_v52  ;;  %14782 = vst [vmem:[#allocation34_spill] sm:$0xff] %v11743_v4  ;;  %4661 = vmatpush1.bf16.msra.mxu1 %v8168_v12  ;;  %v11756_v7 = vpack.c.bf16 %v11740_v52, %v11737_v21  ;;  %v9288_v63 = vpop.eup %9287  ;;  %v11760_v30 = vpack.c.bf16 %v11743_v4, %v11749_v33  ;;  %v8187_v10 = vcombine.high %v3697_v37, %v3701_v0  ;;  %v3708_v12 = vld [vmem:[%s9804_s3 + $0x330] sm:$0xff] }
 0x860   : > { %4774 = vmatpush1.bf16.msra.mxu0 %v8170_v9  ;;  %4662 = vmatprep.subr.bf16.mxu1 %v8177_v25  ;;  %v3498_v32 = vmul.f32 %v9288_v63, %v11407_v42  ;;  %v3499_v38 = vmul.f32 %v9288_v63, %v11410_v49  ;;  %v3540_v46 = vmul.f32 %v11454_v1, %v3497_v59  ;;  %v3705_v9 = vld [vmem:[%s9804_s3 + $0x318] sm:$0xff]  ;;  %v3712_v63 = vld [vmem:[%s9804_s3 + $0x350] sm:$0xff] }
 0x861   : > { %4775 = vmatprep.subr.bf16.mxu0 %v8179_v17  ;;  %4498 = vmatprep.mubr.bf16.mxu1 %v11756_v7  ;;  %v8184_v17 = vcombine.low %v3696_v50, %v3700_v45  ;;  %v3539_v42 = vmul.f32 %v11446_v16, %v3496_v2  ;;  %v8186_v49 = vcombine.low %v3697_v37, %v3701_v0  ;;  %v3713_v37 = vld [vmem:[%s9804_s3 + $0x358] sm:$0xff] }
 0x862   : > { %4611 = vmatprep.mubr.bf16.mxu0 %v11756_v7  ;;  %4499 = vmatmul.mubr.bf16.gmra.mrb[52].mxu1 %v11760_v30  ;;  %v3542_v25 = vmul.f32 %v11454_v1, %v3499_v38  ;;  %v3541_v34 = vmul.f32 %v11446_v16, %v3498_v32  ;;  %v8193_v23 = vcombine.high %v3704_v3, %v3708_v12  ;;  %v3717_v0 = vld [vmem:[%s9804_s3 + $0x378] sm:$0xff] }
 0x863   : > { %4612 = vmatmul.mubr.bf16.gmra.mrb[180].mxu0 %v11760_v30  ;;  %4663 = vmatpush1.bf16.msra.mxu1 %v8176_v61  ;;  %v8195_v59 = vcombine.high %v3705_v9, %v3709_v27  ;;  %v11778_v52 = vadd.f32 %v11462_v62, %v3540_v46  ;;  %v3716_v61 = vld [vmem:[%s9804_s3 + $0x370] sm:$0xff]  ;;  %v11790_v2 = vadd.f32 %v11459_v20, %v3539_v42 }
 0x864   : > { %4776 = vmatpush1.bf16.msra.mxu0 %v8178_v28  ;;  %4664 = vmatprep.subr.bf16.mxu1 %v8185_v29  ;;  %v11781_v50 = vadd.f32 %v11462_v62, %v3542_v25  ;;  %v11784_v45 = vadd.f32 %v11459_v20, %v3541_v34  ;;  %v8192_v29 = vcombine.low %v3704_v3, %v3708_v12  ;;  %v3720_v12 = vld [vmem:[%s9804_s3 + $0x390] sm:$0xff]  ;;  %v3725_v34 = vld [vmem:[%s9804_s3 + $0x3b8] sm:$0xff] }
 0x865   : > { %4777 = vmatprep.subr.bf16.mxu0 %v8187_v10  ;;  %14784 = vst [vmem:[#allocation36_spill] sm:$0xff] %v11778_v52  ;;  %v9290_v28 = vpop.eup %9289  ;;  %14787 = vst [vmem:[#allocation39_spill] sm:$0xff] %v11790_v2  ;;  %v8194_v10 = vcombine.low %v3705_v9, %v3709_v27  ;;  %v8201_v3 = vcombine.high %v3712_v63, %v3716_v61 }
 0x866   : > { %14785 = vst [vmem:[#allocation37_spill] sm:$0xff] %v11781_v50  ;;  %14786 = vst [vmem:[#allocation38_spill] sm:$0xff] %v11784_v45  ;;  %v3500_v32 = vmul.f32 %v9290_v28, %v11421_v43  ;;  %v3501_v38 = vmul.f32 %v9290_v28, %v11424_v57  ;;  %v11796_v46 = vpack.c.bf16 %v11781_v50, %v11778_v52 }
 0x867   : > { %4665 = vmatpush1.bf16.msra.mxu1 %v8184_v17  ;;  %v11800_v42 = vpack.c.bf16 %v11784_v45, %v11790_v2  ;;  %v8203_v43 = vcombine.high %v3713_v37, %v3717_v0  ;;  %v3724_v17 = vld [vmem:[%s9804_s3 + $0x3b0] sm:$0xff] }
 0x868   : > { %4778 = vmatpush1.bf16.msra.mxu0 %v8186_v49  ;;  %v9292_v25 = vpop.eup %9291  ;;  %4666 = vmatprep.subr.bf16.mxu1 %v8193_v23  ;;  %v3544_v27 = vmul.f32 %v11454_v1, %v3501_v38  ;;  %v3721_v49 = vld [vmem:[%s9804_s3 + $0x398] sm:$0xff]  ;;  %v8200_v23 = vcombine.low %v3712_v63, %v3716_v61  ;;  %v8209_v38 = vcombine.high %v3720_v12, %v3724_v17 }
 0x869   : > { %4779 = vmatprep.subr.bf16.mxu0 %v8195_v59  ;;  %v3502_v57 = vmul.f32 %v9292_v25, %v11427_v56  ;;  %v3503_v9 = vmul.f32 %v9292_v25, %v11430_v11  ;;  %4508 = vmatprep.mubr.bf16.mxu1 %v11796_v46  ;;  %v3543_v56 = vmul.f32 %v11446_v16, %v3500_v32 }
 0x86a   : > { %4621 = vmatprep.mubr.bf16.mxu0 %v11796_v46  ;;  %4509 = vmatmul.mubr.bf16.gmra.mrb[56].mxu1 %v11800_v42  ;;  %v8202_v11 = vcombine.low %v3713_v37, %v3717_v0  ;;  %v8211_v25 = vcombine.high %v3721_v49, %v3725_v34  ;;  %v11817_v50 = vadd.f32 %v11462_v62, %v3544_v27  ;;  %v3728_v37 = vld [vmem:[%s9804_s3 + $0x3d0] sm:$0xff]  ;;  %v3729_v0 = vld [vmem:[%s9804_s3 + $0x3d8] sm:$0xff]  ;;  %v8941_v27 = vld [vmem:[%s9809_s2] ss:$8 sps:$4 sm:$0xff]  }
 0x86b   : > { %4622 = vmatmul.mubr.bf16.gmra.mrb[184].mxu0 %v11800_v42  ;;  %4667 = vmatpush1.bf16.msra.mxu1 %v8192_v29  ;;  %v3546_v59 = vmul.f32 %v11454_v1, %v3503_v9  ;;  %v3545_v28 = vmul.f32 %v11446_v16, %v3502_v57  ;;  %v11823_v61 = vadd.f32 %v11459_v20, %v3543_v56  ;;  %v3732_v1 = vld [vmem:[%s9804_s3 + $0x3f0] sm:$0xff]  ;;  %v3733_v16 = vld [vmem:[%s9804_s3 + $0x3f8] sm:$0xff]  ;;  %v8943_v9 = vld [vmem:[%s9809_s2 + $0x4] ss:$8 sps:$4 sm:$0xff]  }
 0x86c   : > { %4780 = vmatpush1.bf16.msra.mxu0 %v8194_v10  ;;  %4668 = vmatprep.subr.bf16.mxu1 %v8201_v3  ;;  %14788 = vst [vmem:[#allocation40_spill] sm:$0xff] %v11817_v50  ;;  %v8208_v32 = vcombine.low %v3720_v12, %v3724_v17  ;;  %v8210_v3 = vcombine.low %v3721_v49, %v3725_v34  ;;  %v8946_v17 = vld [vmem:[%s9809_s2 + $0x14] ss:$8 sps:$4 sm:$0xff]   ;;  %v8949_v49 = vld [vmem:[%s9809_s2 + $0x24] ss:$8 sps:$4 sm:$0xff]  }
 0x86d   : > { %4781 = vmatprep.subr.bf16.mxu0 %v8203_v43  ;;  %v11820_v63 = vadd.f32 %v11462_v62, %v3546_v59  ;;  %14790 = vst [vmem:[#allocation42_spill] sm:$0xff] %v11823_v61  ;;  %v11826_v29 = vadd.f32 %v11459_v20, %v3545_v28  ;;  %v8217_v20 = vcombine.high %v3728_v37, %v3732_v1  ;;  %v8947_v34 = vld [vmem:[%s9809_s2 + $0x20] ss:$8 sps:$4 sm:$0xff]   ;;  %v8964_v28 = vld [vmem:[%s9809_s2 + $0x74] ss:$8 sps:$4 sm:$0xff]  }
 0x86e   : > { %v8219_v43 = vcombine.high %v3729_v0, %v3733_v16  ;;  %v8216_v12 = vcombine.low %v3728_v37, %v3732_v1  ;;  %v8218_v57 = vcombine.low %v3729_v0, %v3733_v16  ;;  %v8953_v56 = vld [vmem:[%s9809_s2 + $0x40] ss:$8 sps:$4 sm:$0xff]   ;;  %v8976_v1 = vld [vmem:[%s9809_s2 + $0xb4] ss:$8 sps:$4 sm:$0xff]  }
 0x86f   : > { %14789 = vst [vmem:[#allocation41_spill] sm:$0xff] %v11820_v63  ;;  %14791 = vst [vmem:[#allocation43_spill] sm:$0xff] %v11826_v29  ;;  %4669 = vmatpush1.bf16.msra.mxu1 %v8200_v23  ;;  %v11834_v10 = vpack.c.bf16 %v11820_v63, %v11817_v50  ;;  %v11838_v62 = vpack.c.bf16 %v11826_v29, %v11823_v61  ;;  %v8952_v23 = vld [vmem:[%s9809_s2 + $0x34] ss:$8 sps:$4 sm:$0xff]   ;;  %v8959_v59 = vld [vmem:[%s9809_s2 + $0x60] ss:$8 sps:$4 sm:$0xff]  }
 0x870   : > { %4782 = vmatpush1.bf16.msra.mxu0 %v8202_v11  ;;  %4670 = vmatprep.subr.bf16.mxu1 %v8209_v38  ;;  %v8958_v11 = vld [vmem:[%s9809_s2 + $0x54] ss:$8 sps:$4 sm:$0xff]   ;;  %v8965_v38 = vld [vmem:[%s9809_s2 + $0x80] ss:$8 sps:$4 sm:$0xff]  }
 0x871   : > { %4783 = vmatprep.subr.bf16.mxu0 %v8211_v25  ;;  %4518 = vmatprep.mubr.bf16.mxu1 %v11834_v10  ;;  %v8970_v25 = vld [vmem:[%s9809_s2 + $0x94] ss:$8 sps:$4 sm:$0xff]   ;;  %v8971_v37 = vld [vmem:[%s9809_s2 + $0xa0] ss:$8 sps:$4 sm:$0xff]  }
 0x872   : > { %4631 = vmatprep.mubr.bf16.mxu0 %v11834_v10  ;;  %4519 = vmatmul.mubr.bf16.gmra.mrb[60].mxu1 %v11838_v62  ;;  %v8977_v0 = vld [vmem:[%s9809_s2 + $0xc0] ss:$8 sps:$4 sm:$0xff]   ;;  %v8982_v16 = vld [vmem:[%s9809_s2 + $0xd4] ss:$8 sps:$4 sm:$0xff]  }
 0x873   : > { %4632 = vmatmul.mubr.bf16.gmra.mrb[188].mxu0 %v11838_v62  ;;  %4671 = vmatpush1.bf16.msra.mxu1 %v8208_v32  ;;  %v8983_v32 = vld [vmem:[%s9809_s2 + $0xe0] ss:$8 sps:$4 sm:$0xff]  }
 0x874   : > { %4674 = vmatprep.mubr.bf16.mxu1 %v11490_v51  ;;  %4784 = vmatpush1.bf16.msra.mxu0 %v8210_v3  ;;  %v8988_v3 = vld [vmem:[%s9809_s2 + $0xf4] ss:$8 sps:$4 sm:$0xff]  }
 0x875   : > { %4787 = vmatprep.mubr.bf16.mxu0 %v11490_v51  ;;  %4672 = vmatprep.subr.bf16.mxu1 %v8217_v20  ;;  %v8944_v51 = vld [vmem:[%s9809_s2 + $0x10] ss:$8 sps:$4 sm:$0xff]   ;;  %v8991_v20 = vld [vmem:[%s9809_s2 + $0x104] ss:$8 sps:$4 sm:$0xff]  }
 0x876   : > { %4785 = vmatprep.subr.bf16.mxu0 %v8219_v43 }
 0x877   : > { %4673 = vmatpush1.bf16.msra.mxu1 %v8216_v12  ;;  %v14792_v12 = vsub.s32 2, %v10472_v35 }
 0x878   : > { %4786 = vmatpush1.bf16.msra.mxu0 %v8218_v57  ;;  %6864 = vmatprep.subr.bf16.mxu1 %v8943_v9 }
 0x87a   : > { %4675 = vmatmul.mubr.bf16.vlgmr.msra.gmra.mrb[64].mxu1 %v11494_v48 }
 0x87b   : > { %4788 = vmatmul.mubr.bf16.vlgmr.msra.gmra.mrb[192].mxu0 %v11494_v48  ;;  %4684 = vmatprep.mubr.bf16.mxu1 %v11546_v22  ;;  %v8950_v48 = vld [vmem:[%s9809_s2 + $0x30] ss:$8 sps:$4 sm:$0xff]  }
 0x87c   : > { %4797 = vmatprep.mubr.bf16.mxu0 %v11546_v22  ;;  %6865 = vmatpush1.bf16.msra.mxu1 %v8941_v27  ;;  %v8955_v22 = vld [vmem:[%s9809_s2 + $0x44] ss:$8 sps:$4 sm:$0xff]   ;;  %v14793_v27 = vsub.s32 3, %v10472_v35 }
 0x87d   : > { %6866 = vmatprep.subr.bf16.mxu1 %v8946_v17 }
 0x880   : > { %6867 = vmatpush1.bf16.msra.mxu1 %v8944_v51 }
 0x881   : > { %6868 = vmatprep.subr.bf16.mxu1 %v8949_v49 }
 0x882   : > { %4685 = vmatmul.mubr.bf16.gmra.mrb[68].mxu1 %v11550_v8 }
 0x883   : > { %4798 = vmatmul.mubr.bf16.gmra.mrb[196].mxu0 %v11550_v8  ;;  %4694 = vmatprep.mubr.bf16.mxu1 %v11602_v53  ;;  %v8956_v8 = vld [vmem:[%s9809_s2 + $0x50] ss:$8 sps:$4 sm:$0xff]  }
 0x884   : > { %4807 = vmatprep.mubr.bf16.mxu0 %v11602_v53  ;;  %6869 = vmatpush1.bf16.msra.mxu1 %v8947_v34  ;;  %v8961_v53 = vld [vmem:[%s9809_s2 + $0x64] ss:$8 sps:$4 sm:$0xff]  }
 0x885   : > { %6870 = vmatprep.subr.bf16.mxu1 %v8952_v23 }
 0x888   : > { %6871 = vmatpush1.bf16.msra.mxu1 %v8950_v48 }
 0x889   : > { %6872 = vmatprep.subr.bf16.mxu1 %v8955_v22 }
 0x88a   : > { %4695 = vmatmul.mubr.bf16.gmra.mrb[72].mxu1 %v11606_v26 }
 0x88b   : > { %4808 = vmatmul.mubr.bf16.gmra.mrb[200].mxu0 %v11606_v26  ;;  %4704 = vmatprep.mubr.bf16.mxu1 %v11658_v5  ;;  %v8962_v26 = vld [vmem:[%s9809_s2 + $0x70] ss:$8 sps:$4 sm:$0xff]  }
 0x88c   : > { %4817 = vmatprep.mubr.bf16.mxu0 %v11658_v5  ;;  %6873 = vmatpush1.bf16.msra.mxu1 %v8953_v56  ;;  %v8967_v5 = vld [vmem:[%s9809_s2 + $0x84] ss:$8 sps:$4 sm:$0xff]  }
 0x88d   : > { %6874 = vmatprep.subr.bf16.mxu1 %v8958_v11 }
 0x890   : > { %6875 = vmatpush1.bf16.msra.mxu1 %v8956_v8 }
 0x891   : > { %6876 = vmatprep.subr.bf16.mxu1 %v8961_v53 }
 0x892   : > { %4705 = vmatmul.mubr.bf16.gmra.mrb[76].mxu1 %v11662_v55 }
 0x893   : > { %4818 = vmatmul.mubr.bf16.gmra.mrb[204].mxu0 %v11662_v55  ;;  %4714 = vmatprep.mubr.bf16.mxu1 %v11710_v18  ;;  %v8968_v55 = vld [vmem:[%s9809_s2 + $0x90] ss:$8 sps:$4 sm:$0xff]  }
 0x894   : > { %4827 = vmatprep.mubr.bf16.mxu0 %v11710_v18  ;;  %6877 = vmatpush1.bf16.msra.mxu1 %v8959_v59  ;;  %v8973_v18 = vld [vmem:[%s9809_s2 + $0xa4] ss:$8 sps:$4 sm:$0xff]  }
 0x895   : > { %6878 = vmatprep.subr.bf16.mxu1 %v8964_v28 }
 0x898   : > { %6879 = vmatpush1.bf16.msra.mxu1 %v8962_v26 }
 0x899   : > { %6880 = vmatprep.subr.bf16.mxu1 %v8967_v5 }
 0x89a   : > { %4715 = vmatmul.mubr.bf16.gmra.mrb[80].mxu1 %v11714_v24 }
 0x89b   : > { %4828 = vmatmul.mubr.bf16.gmra.mrb[208].mxu0 %v11714_v24  ;;  %4724 = vmatprep.mubr.bf16.mxu1 %v11756_v7  ;;  %v8974_v24 = vld [vmem:[%s9809_s2 + $0xb0] ss:$8 sps:$4 sm:$0xff]  }
 0x89c   : > { %4837 = vmatprep.mubr.bf16.mxu0 %v11756_v7  ;;  %6881 = vmatpush1.bf16.msra.mxu1 %v8965_v38  ;;  %v8979_v7 = vld [vmem:[%s9809_s2 + $0xc4] ss:$8 sps:$4 sm:$0xff]  }
 0x89d   : > { %6882 = vmatprep.subr.bf16.mxu1 %v8970_v25  ;;  %v3762_v25 = vsub.s32 6, %v10472_v35 }
 0x8a0   : > { %6883 = vmatpush1.bf16.msra.mxu1 %v8968_v55  ;;  %v3766_v55 = vsub.s32 7, %v10472_v35 }
 0x8a1   : > { %6884 = vmatprep.subr.bf16.mxu1 %v8973_v18 }
 0x8a2   : > { %4725 = vmatmul.mubr.bf16.gmra.mrb[84].mxu1 %v11760_v30 }
 0x8a3   : > { %4838 = vmatmul.mubr.bf16.gmra.mrb[212].mxu0 %v11760_v30  ;;  %4734 = vmatprep.mubr.bf16.mxu1 %v11796_v46  ;;  %v8980_v30 = vld [vmem:[%s9809_s2 + $0xd0] ss:$8 sps:$4 sm:$0xff]  }
 0x8a4   : > { %4847 = vmatprep.mubr.bf16.mxu0 %v11796_v46  ;;  %6885 = vmatpush1.bf16.msra.mxu1 %v8971_v37  ;;  %v8985_v46 = vld [vmem:[%s9809_s2 + $0xe4] ss:$8 sps:$4 sm:$0xff]  }
 0x8a5   : > { %6886 = vmatprep.subr.bf16.mxu1 %v8976_v1 }
 0x8a8   : > { %6887 = vmatpush1.bf16.msra.mxu1 %v8974_v24 }
 0x8a9   : > { %6888 = vmatprep.subr.bf16.mxu1 %v8979_v7 }
 0x8aa   : > { %4735 = vmatmul.mubr.bf16.gmra.mrb[88].mxu1 %v11800_v42 }
 0x8ab   : > { %4848 = vmatmul.mubr.bf16.gmra.mrb[216].mxu0 %v11800_v42  ;;  %4744 = vmatprep.mubr.bf16.mxu1 %v11834_v10  ;;  %v8986_v42 = vld [vmem:[%s9809_s2 + $0xf0] ss:$8 sps:$4 sm:$0xff]  }
 0x8ac   : > { %4857 = vmatprep.mubr.bf16.mxu0 %v11834_v10  ;;  %6889 = vmatpush1.bf16.msra.mxu1 %v8977_v0  ;;  %v3734_v10 = vld [vmem:[%s9814_s30] sm:$0xff] }
 0x8ad   : > { %6890 = vmatprep.subr.bf16.mxu1 %v8982_v16  ;;  %v11911_v43 = vrot.slane %v3734_v10, %v10475_v14  ;;  %v11915_v57 = vrot.slane %v3734_v10, %v14792_v12  ;;  %v11918_v9 = vrot.slane %v3734_v10, %v10481_v39 }
 0x8b0   : > { %6891 = vmatpush1.bf16.msra.mxu1 %v8980_v30 }
 0x8b1   : > { %6892 = vmatprep.subr.bf16.mxu1 %v8985_v46 }
 0x8b2   : > { %4745 = vmatmul.mubr.bf16.gmra.mrb[92].mxu1 %v11838_v62 }
 0x8b3   : > { %4858 = vmatmul.mubr.bf16.gmra.mrb[220].mxu0 %v11838_v62  ;;  %v11922_v62 = vrot.slane %v3734_v10, %v14793_v27 }
 0x8b4   : > { %6893 = vmatpush1.bf16.msra.mxu1 %v8983_v32  ;;  %v14795_v32 = vsub.s32 4, %v10472_v35 }
 0x8b5   : > { %6894 = vmatprep.subr.bf16.mxu1 %v8988_v3 }
 0x8b6   : > { %v11943_v3 = vrot.slane %v3734_v10, %v14795_v32 }
 0x8b8   : > { %6895 = vmatpush1.bf16.msra.mxu1 %v8986_v42  ;;  %14796 = vst [vmem:[#allocation45_spill] sm:$0xff] %v11943_v3 }
 0x8b9   : > { %6977 = vmatprep.subr.bf16.mxu1 %v8991_v20 }
 0x90c   : > { %v4450_v17 = vpop.f32.mrb[32].mxu1  ;;  %v4563_v51 = vpop.f32.mrb[160].mxu0 }
 0x90d   : > { %v4451_v49 = vadd.f32 %v4450_v17, %v11911_v43  ;;  %v4564_v34 = vadd.f32 %v4563_v51, %v11915_v57  ;;  %v4452_v23 = vpop.f32.mrb[33].mxu1  ;;  %v4565_v48 = vpop.f32.mrb[161].mxu0  ;;  %v14798_v51 = vsub.s32 5, %v10472_v35 }
 0x90e   : > { %v11927_v22 = vadd.f32 %v4452_v23, %v11918_v9  ;;  %v11930_v56 = vadd.f32 %v4565_v48, %v11922_v62  ;;  %v4454_v11 = vpop.f32.mrb[34].mxu1  ;;  %v4567_v8 = vpop.f32.mrb[162].mxu0 }
 0x90f   : > { %v4996_v53 = vmul.f32 0.044715, %v4451_v49  ;;  %v4998_v59 = vmul.f32 0.044715, %v4564_v34  ;;  %v4455_v28 = vadd.f32 %v4454_v11, %v11911_v43  ;;  %v4568_v26 = vadd.f32 %v4567_v8, %v11915_v57  ;;  %v4456_v5 = vpop.f32.mrb[35].mxu1  ;;  %v4569_v38 = vpop.f32.mrb[163].mxu0 }
 0x910   : > { %14794 = vst [vmem:[#allocation44_spill] sm:$0xff] %v11930_v56  ;;  %v4997_v1 = vmul.f32 0.044715, %v11927_v22  ;;  %v11938_v24 = vadd.f32 %v4456_v5, %v11918_v9  ;;  %v4999_v7 = vmul.f32 0.044715, %v11930_v56  ;;  %v11947_v12 = vadd.f32 %v4569_v38, %v11922_v62 }
 0x911   : > { %v5124_v18 = vmul.f32 %v4996_v53, %v4451_v49  ;;  %v5126_v37 = vmul.f32 %v4998_v59, %v4564_v34  ;;  %v5004_v0 = vmul.f32 0.044715, %v4455_v28  ;;  %v5006_v46 = vmul.f32 0.044715, %v4568_v26 }
 0x912   : > { %v5005_v20 = vmul.f32 0.044715, %v11938_v24  ;;  %14797 = vst [vmem:[#allocation46_spill] sm:$0xff] %v11947_v12  ;;  %v11951_v23 = vrot.slane %v3734_v10, %v14798_v51  ;;  %v5125_v48 = vmul.f32 %v4997_v1, %v11927_v22  ;;  %v11954_v59 = vrot.slane %v3734_v10, %v3762_v25 }
 0x913   : > { %v5252_v16 = vmul.f32 %v5124_v18, %v4451_v49  ;;  %v5254_v30 = vmul.f32 %v5126_v37, %v4564_v34  ;;  %v5132_v42 = vmul.f32 %v5004_v0, %v4455_v28  ;;  %v5134_v11 = vmul.f32 %v5006_v46, %v4568_v26 }
 0x914   : > { %14799 = vst [vmem:[#allocation47_spill] sm:$0xff] %v11951_v23  ;;  %14800 = vst [vmem:[#allocation48_spill] sm:$0xff] %v11954_v59  ;;  %v11956_v5 = vrot.slane %v3734_v10, %v3766_v55  ;;  %v5127_v18 = vmul.f32 %v4999_v7, %v11930_v56  ;;  %v11965_v51 = vmul.f32 0.5, %v4451_v49  ;;  %v11967_v10 = vmul.f32 0.5, %v4564_v34 }
 0x915   : > { %v4460_v27 = vpop.f32.mrb[36].mxu1  ;;  %v4573_v17 = vpop.f32.mrb[164].mxu0  ;;  %v5260_v37 = vmul.f32 %v5132_v42, %v4455_v28  ;;  %v5380_v1 = vadd.f32 %v5252_v16, %v4451_v49  ;;  %v5382_v46 = vadd.f32 %v5254_v30, %v4564_v34  ;;  %v5262_v63 = vmul.f32 %v5134_v11, %v4568_v26 }
 0x916   : > { %v4462_v8 = vpop.f32.mrb[37].mxu1  ;;  %v4575_v53 = vpop.f32.mrb[165].mxu0  ;;  %14801 = vst [vmem:[#allocation49_spill] sm:$0xff] %v11956_v5  ;;  %v11960_v38 = vadd.f32 %v4460_v27, %v11911_v43  ;;  %v11963_v0 = vadd.f32 %v4573_v17, %v11915_v57  ;;  %14803 = vst [vmem:[#allocation51_spill] sm:$0xff] %v11967_v10  ;;  %v11969_v55 = vmul.f32 0.5, %v4455_v28  ;;  %v5133_v7 = vmul.f32 %v5005_v20, %v11938_v24 }
 0x917   : > { %v4464_v35 = vpop.f32.mrb[38].mxu1  ;;  %v4577_v32 = vpop.f32.mrb[166].mxu0  ;;  %v5007_v42 = vmul.f32 0.044715, %v11947_v12  ;;  %v5388_v27 = vadd.f32 %v5260_v37, %v4455_v28  ;;  %v11976_v61 = vadd.f32 %v4462_v8, %v11918_v9  ;;  %v11979_v49 = vmul.f32 %v5125_v48, %v11927_v22 }
 0x918   : > { %14802 = vst [vmem:[#allocation50_spill] sm:$0xff] %v11963_v0  ;;  %v4466_v25 = vpop.f32.mrb[39].mxu1  ;;  %v4579_v29 = vpop.f32.mrb[167].mxu0  ;;  %v5012_v17 = vmul.f32 0.044715, %v11960_v38  ;;  %v11982_v34 = vmul.f32 %v5127_v18, %v11930_v56  ;;  %v11984_v16 = vmul.f32 0.5, %v4568_v26  ;;  %v5390_v30 = vadd.f32 %v5262_v63, %v4568_v26 }
 0x919   : > { %v5014_v50 = vmul.f32 0.044715, %v11963_v0  ;;  %v5508_v20 = vmul.f32 0.7978846, %v5380_v1  ;;  %v5510_v11 = vmul.f32 0.7978846, %v5382_v46  ;;  %v11987_v28 = vadd.f32 %v4575_v53, %v11922_v62 }
 0x91a   : > { %14804 = vst [vmem:[#allocation52_spill] sm:$0xff] %v11982_v34  ;;  %14805 = vst [vmem:[#allocation53_spill] sm:$0xff] %v11984_v16  ;;  %v11990_v37 = vadd.f32 %v4464_v35, %v11911_v43  ;;  %v11993_v8 = vmul.f32 %v5133_v7, %v11938_v24  ;;  %v5135_v48 = vmul.f32 %v5007_v42, %v11947_v12  ;;  %v5013_v45 = vmul.f32 0.044715, %v11976_v61 }
 0x91b   : > { %14806 = vst [vmem:[#allocation54_spill] sm:$0xff] %v11987_v28  ;;  %v11998_v18 = vadd.f32 %v4577_v32, %v11915_v57  ;;  %v5516_v26 = vmul.f32 0.7978846, %v5388_v27  ;;  %v5140_v1 = vmul.f32 %v5012_v17, %v11960_v38  ;;  %v5142_v53 = vmul.f32 %v5014_v50, %v11963_v0 }
 0x91c   : > { %v5015_v35 = vmul.f32 0.044715, %v11987_v28  ;;  %v5518_v7 = vmul.f32 0.7978846, %v5390_v30  ;;  %v12004_v4 = vadd.f32 %v4466_v25, %v11918_v9  ;;  %v12007_v42 = vadd.f32 %v4579_v29, %v11922_v62 }
 0x91d   : > { %14807 = vst [vmem:[#allocation55_spill] sm:$0xff] %v11998_v18  ;;  %v4470_v52 = vpop.f32.mrb[40].mxu1  ;;  %9293 = vtanh.f32 %v5508_v20  ;;  %v5020_v17 = vmul.f32 0.044715, %v11990_v37  ;;  %v5022_v50 = vmul.f32 0.044715, %v11998_v18  ;;  %v12018_v25 = vmul.f32 %v5135_v48, %v11947_v12 }
 0x91e   : > { %v4583_v63 = vpop.f32.mrb[168].mxu0  ;;  %v4472_v46 = vpop.f32.mrb[41].mxu1  ;;  %14808 = vst [vmem:[#allocation56_spill] sm:$0xff] %v12007_v42  ;;  %v12010_v32 = vadd.f32 %v4470_v52, %v11911_v43  ;;  %9295 = vtanh.f32 %v5510_v11  ;;  %v5141_v29 = vmul.f32 %v5013_v45, %v11976_v61  ;;  %v5021_v52 = vmul.f32 0.044715, %v12004_v4 }
 0x91f   : > { %v4585_v2 = vpop.f32.mrb[169].mxu0  ;;  %v4474_v21 = vpop.f32.mrb[42].mxu1  ;;  %v12015_v33 = vadd.f32 %v4583_v63, %v11915_v57  ;;  %14810 = vst [vmem:[#allocation58_spill] sm:$0xff] %v12018_v25  ;;  %v5143_v60 = vmul.f32 %v5015_v35, %v11987_v28  ;;  %v5023_v20 = vmul.f32 0.044715, %v12007_v42  ;;  %v12026_v41 = vadd.f32 %v4472_v46, %v11918_v9 }
 0x920   : > { %v4587_v27 = vpop.f32.mrb[170].mxu0  ;;  %v4476_v30 = vpop.f32.mrb[43].mxu1  ;;  %v5028_v44 = vmul.f32 0.044715, %v12010_v32  ;;  %9297 = vtanh.f32 %v5516_v26  ;;  %v12029_v63 = vmul.f32 %v5140_v1, %v11960_v38  ;;  %v12032_v11 = vmul.f32 %v5142_v53, %v11963_v0 }
 0x921   : > { %14809 = vst [vmem:[#allocation57_spill] sm:$0xff] %v12015_v33  ;;  %v4589_v6 = vpop.f32.mrb[171].mxu0  ;;  %v5030_v45 = vmul.f32 0.044715, %v12015_v33  ;;  %9299 = vtanh.f32 %v5518_v7  ;;  %v5148_v48 = vmul.f32 %v5020_v17, %v11990_v37  ;;  %v5150_v35 = vmul.f32 %v5022_v50, %v11998_v18 }
 0x922   : > { %14811 = vst [vmem:[#allocation59_spill] sm:$0xff] %v12032_v11  ;;  %v12038_v47 = vadd.f32 %v4585_v2, %v11922_v62  ;;  %v5149_v46 = vmul.f32 %v5021_v52, %v12004_v4  ;;  %v5029_v26 = vmul.f32 0.044715, %v12026_v41  ;;  %v12043_v1 = vadd.f32 %v4474_v21, %v11911_v43 }
 0x923   : > { %v12046_v53 = vadd.f32 %v4587_v27, %v11915_v57  ;;  %v12049_v7 = vmul.f32 %v5141_v29, %v11976_v61  ;;  %v12052_v17 = vmul.f32 %v5143_v60, %v11987_v28  ;;  %v5151_v2 = vmul.f32 %v5023_v20, %v12007_v42 }
 0x924   : > { %14812 = vst [vmem:[#allocation60_spill] sm:$0xff] %v12038_v47  ;;  %v5156_v50 = vmul.f32 %v5028_v44, %v12010_v32  ;;  %v5158_v21 = vmul.f32 %v5030_v45, %v12015_v33  ;;  %v12058_v13 = vadd.f32 %v4476_v30, %v11918_v9  ;;  %v12061_v27 = vadd.f32 %v4589_v6, %v11922_v62 }
 0x925   : > { %14813 = vst [vmem:[#allocation61_spill] sm:$0xff] %v12046_v53  ;;  %v4480_v19 = vpop.f32.mrb[44].mxu1  ;;  %14814 = vst [vmem:[#allocation62_spill] sm:$0xff] %v12052_v17  ;;  %v12067_v40 = vmul.f32 %v5148_v48, %v11990_v37  ;;  %v12070_v44 = vmul.f32 %v5150_v35, %v11998_v18  ;;  %v5031_v20 = vmul.f32 0.044715, %v12038_v47  ;;  %v12077_v6 = vmul.f32 %v5149_v46, %v12004_v4 }
 0x926   : > { %v4593_v58 = vpop.f32.mrb[172].mxu0  ;;  %v4482_v52 = vpop.f32.mrb[45].mxu1  ;;  %14815 = vst [vmem:[#allocation63_spill] sm:$0xff] %v12061_v27  ;;  %v12064_v29 = vadd.f32 %v4480_v19, %v11911_v43  ;;  %v5157_v19 = vmul.f32 %v5029_v26, %v12026_v41  ;;  %v5036_v54 = vmul.f32 0.044715, %v12043_v1  ;;  %v12085_v35 = vmul.f32 %v5151_v2, %v12007_v42 }
 0x927   : > { %v4595_v31 = vpop.f32.mrb[173].mxu0  ;;  %v4484_v15 = vpop.f32.mrb[46].mxu1  ;;  %14817 = vst [vmem:[#allocation65_spill] sm:$0xff] %v12070_v44  ;;  %v12074_v45 = vadd.f32 %v4593_v58, %v11915_v57  ;;  %v5038_v48 = vmul.f32 0.044715, %v12046_v53  ;;  %v12090_v44 = vadd.f32 %v4482_v52, %v11918_v9  ;;  %v12095_v26 = vmul.f32 %v5156_v50, %v12010_v32 }
 0x928   : > { %14816 = vst [vmem:[#allocation64_spill] sm:$0xff] %v12064_v29  ;;  %v4597_v60 = vpop.f32.mrb[174].mxu0  ;;  %v4486_v30 = vpop.f32.mrb[47].mxu1  ;;  %14819 = vst [vmem:[#allocation67_spill] sm:$0xff] %v12085_v35  ;;  %v5037_v14 = vmul.f32 0.044715, %v12058_v13  ;;  %v12098_v18 = vmul.f32 %v5158_v21, %v12015_v33  ;;  %v5159_v0 = vmul.f32 %v5031_v20, %v12038_v47  ;;  %v12105_v42 = vadd.f32 %v4595_v31, %v11922_v62 }
 0x929   : > { %14818 = vst [vmem:[#allocation66_spill] sm:$0xff] %v12074_v45  ;;  %v4599_v36 = vpop.f32.mrb[175].mxu0  ;;  %v12082_v39 = vpop.eup %9293  ;;  %v5039_v58 = vmul.f32 0.044715, %v12061_v27  ;;  %v5044_v11 = vmul.f32 0.044715, %v12064_v29  ;;  %v12108_v52 = vadd.f32 %v4484_v15, %v11911_v43  ;;  %v12111_v50 = vmul.f32 %v5157_v19, %v12026_v41 }
 0x92a   : > { %v12092_v46 = vpop.eup %9295  ;;  %14821 = vst [vmem:[#allocation69_spill] sm:$0xff] %v12098_v18  ;;  %v5046_v2 = vmul.f32 0.044715, %v12074_v45  ;;  %v5045_v35 = vmul.f32 0.044715, %v12090_v44  ;;  %14822 = vst [vmem:[#allocation70_spill] sm:$0xff] %v12105_v42  ;;  %v5164_v21 = vmul.f32 %v5036_v54, %v12043_v1  ;;  %v5166_v18 = vmul.f32 %v5038_v48, %v12046_v53 }
 0x92b   : > { %14820 = vst [vmem:[#allocation68_spill] sm:$0xff] %v12092_v46  ;;  %14823 = vst [vmem:[#allocation71_spill] sm:$0xff] %v12108_v52  ;;  %v9298_v17 = vpop.eup %9297  ;;  %v12116_v33 = vadd.f32 %v4597_v60, %v11915_v57  ;;  %v5165_v31 = vmul.f32 %v5037_v14, %v12058_v13  ;;  %v5167_v15 = vmul.f32 %v5039_v58, %v12061_v27  ;;  %v5047_v10 = vmul.f32 0.044715, %v12105_v42 }
 0x92c   : > { %v12118_v16 = vpop.eup %9299  ;;  %v5052_v19 = vmul.f32 0.044715, %v12108_v52  ;;  %v5172_v54 = vmul.f32 %v5044_v11, %v12064_v29  ;;  %v5174_v48 = vmul.f32 %v5046_v2, %v12074_v45  ;;  %v12128_v12 = vadd.f32 %v4486_v30, %v11918_v9 }
 0x92d   : > { %14824 = vst [vmem:[#allocation72_spill] sm:$0xff] %v12116_v33  ;;  %v4490_v20 = vpop.f32.mrb[48].mxu1  ;;  %14825 = vst [vmem:[#allocation73_spill] sm:$0xff] %v12118_v16  ;;  %v5054_v60 = vmul.f32 0.044715, %v12116_v33  ;;  %v12131_v14 = vmul.f32 %v5159_v0, %v12038_v47  ;;  %v5173_v58 = vmul.f32 %v5045_v35, %v12090_v44  ;;  %v12135_v56 = vadd.f32 %v4599_v36, %v11922_v62 }
 0x92e   : > { %v4603_v28 = vpop.f32.mrb[176].mxu0  ;;  %v4492_v46 = vpop.f32.mrb[49].mxu1  ;;  %14826 = vst [vmem:[#allocation74_spill] sm:$0xff] %v12128_v12  ;;  %v12138_v5 = vadd.f32 %v4490_v20, %v11911_v43  ;;  %v5175_v23 = vmul.f32 %v5047_v10, %v12105_v42  ;;  %v5180_v30 = vmul.f32 %v5052_v19, %v12108_v52  ;;  %v12147_v0 = vmul.f32 %v5164_v21, %v12043_v1 }
 0x92f   : > { %v4605_v25 = vpop.f32.mrb[177].mxu0  ;;  %v4494_v16 = vpop.f32.mrb[50].mxu1  ;;  %14827 = vst [vmem:[#allocation75_spill] sm:$0xff] %v12131_v14  ;;  %14828 = vst [vmem:[#allocation76_spill] sm:$0xff] %v12135_v56  ;;  %v5182_v59 = vmul.f32 %v5054_v60, %v12116_v33  ;;  %v12144_v3 = vadd.f32 %v4603_v28, %v11915_v57  ;;  %v12150_v36 = vmul.f32 %v5166_v18, %v12046_v53  ;;  %v5053_v35 = vmul.f32 0.044715, %v12128_v12 }
 0x930   : > { %v4607_v34 = vpop.f32.mrb[178].mxu0  ;;  %14829 = vst [vmem:[#allocation77_spill] sm:$0xff] %v12138_v5  ;;  %v4496_v11 = vpop.f32.mrb[51].mxu1  ;;  %v12154_v20 = vadd.f32 %v4492_v46, %v11918_v9  ;;  %v12157_v10 = vmul.f32 %v5165_v31, %v12058_v13  ;;  %v12160_v19 = vmul.f32 %v5167_v15, %v12061_v27  ;;  %v12163_v28 = vmul.f32 %v5172_v54, %v12064_v29 }
 0x931   : > { %v4609_v2 = vpop.f32.mrb[179].mxu0  ;;  %14830 = vst [vmem:[#allocation78_spill] sm:$0xff] %v12144_v3  ;;  %14831 = vst [vmem:[#allocation79_spill] sm:$0xff] %v12150_v36  ;;  %v12166_v21 = vmul.f32 %v5174_v48, %v12074_v45  ;;  %v12169_v18 = vmul.f32 %v5173_v58, %v12090_v44  ;;  %v5055_v60 = vmul.f32 0.044715, %v12135_v56  ;;  %v12174_v36 = vadd.f32 %v4605_v25, %v11922_v62 }
 0x932   : > { %14832 = vst [vmem:[#allocation80_spill] sm:$0xff] %v12154_v20  ;;  %14833 = vst [vmem:[#allocation81_spill] sm:$0xff] %v12160_v19  ;;  %v5060_v46 = vmul.f32 0.044715, %v12138_v5  ;;  %v12177_v31 = vmul.f32 %v5175_v23, %v12105_v42  ;;  %v12180_v15 = vmul.f32 %v5180_v30, %v12108_v52  ;;  %v12183_v54 = vmul.f32 %v5182_v59, %v12116_v33 }
 0x933   : > { %14834 = vst [vmem:[#allocation82_spill] sm:$0xff] %v12163_v28  ;;  %14835 = vst [vmem:[#allocation83_spill] sm:$0xff] %v12166_v21  ;;  %v5062_v48 = vmul.f32 0.044715, %v12144_v3  ;;  %v5181_v45 = vmul.f32 %v5053_v35, %v12128_v12  ;;  %v5061_v53 = vmul.f32 0.044715, %v12154_v20  ;;  %v5381_v23 = vadd.f32 %v11979_v49, %v11927_v22 }
 0x934   : > { %14836 = vst [vmem:[#allocation84_spill] sm:$0xff] %v12174_v36  ;;  %14837 = vst [vmem:[#allocation85_spill] sm:$0xff] %v12177_v31  ;;  %v5063_v25 = vmul.f32 0.044715, %v12174_v36  ;;  %v5389_v30 = vadd.f32 %v11993_v8, %v11938_v24  ;;  %v12194_v59 = vadd.f32 %v4494_v16, %v11911_v43  ;;  %v5764_v35 = vadd.f32 1.0, %v12082_v39 }
 0x935   : > { %14838 = vst [vmem:[#allocation86_spill] sm:$0xff] %v12180_v15  ;;  %14839 = vst [vmem:[#allocation87_spill] sm:$0xff] %v12183_v54  ;;  %v4500_v58 = vpop.f32.mrb[52].mxu1  ;;  %v12197_v54 = vadd.f32 %v4607_v34, %v11915_v57  ;;  %v5183_v27 = vmul.f32 %v5055_v60, %v12135_v56  ;;  %v5188_v14 = vmul.f32 %v5060_v46, %v12138_v5  ;;  %v5509_v49 = vmul.f32 0.7978846, %v5381_v23 }
 0x936   : > { %v4613_v21 = vpop.f32.mrb[180].mxu0  ;;  %v4502_v31 = vpop.f32.mrb[53].mxu1  ;;  %14840 = vst [vmem:[#allocation88_spill] sm:$0xff] %v12194_v59  ;;  %v5772_v47 = vadd.f32 1.0, %v9298_v17  ;;  %v5190_v16 = vmul.f32 %v5062_v48, %v12144_v3  ;;  %v5517_v8 = vmul.f32 0.7978846, %v5389_v30  ;;  %v12210_v39 = vmul.f32 %v5764_v35, %v11965_v51 }
 0x937   : > { %v4615_v42 = vpop.f32.mrb[181].mxu0  ;;  %14841 = vst [vmem:[#allocation89_spill] sm:$0xff] %v12197_v54  ;;  %v4504_v33 = vpop.f32.mrb[54].mxu1  ;;  %v5068_v34 = vmul.f32 0.044715, %v12194_v59  ;;  %9301 = vtanh.f32 %v5509_v49  ;;  %v12216_v17 = vadd.f32 %v4496_v11, %v11918_v9  ;;  %v5189_v46 = vmul.f32 %v5061_v53, %v12154_v20 }
 0x938   : > { %v4617_v19 = vpop.f32.mrb[182].mxu0  ;;  %v12202_v15 = vpop.f32.mrb[55].mxu1  ;;  %v5070_v28 = vmul.f32 0.044715, %v12197_v54  ;;  %v12213_v60 = vmul.f32 %v5772_v47, %v11969_v55  ;;  %v5191_v23 = vmul.f32 %v5063_v25, %v12174_v36  ;;  %9303 = vtanh.f32 %v5517_v8 }
 0x939   : > { %v12204_v52 = vpop.f32.mrb[183].mxu0  ;;  %14842 = vst [vmem:[#allocation90_spill] sm:$0xff] %v12216_v17  ;;  %v12221_v48 = vadd.f32 %v4609_v2, %v11922_v62  ;;  %v5069_v51 = vmul.f32 0.044715, %v12216_v17  ;;  %v12227_v35 = vadd.f32 %v4500_v58, %v11911_v43  ;;  %v12230_v47 = vadd.f32 %v4613_v21, %v11915_v57 }
 0x93a   : > { %v12233_v55 = vmul.f32 %v5181_v45, %v12128_v12  ;;  %v4869_v53 = vmul.f32 0.5, %v11927_v22  ;;  %v5196_v11 = vmul.f32 %v5068_v34, %v12194_v59  ;;  %v5198_v2 = vmul.f32 %v5070_v28, %v12197_v54 }
 0x93b   : > { %14843 = vst [vmem:[#allocation91_spill] sm:$0xff] %v12221_v48  ;;  %14844 = vst [vmem:[#allocation92_spill] sm:$0xff] %v12227_v35  ;;  %v12243_v8 = vmul.f32 %v5183_v27, %v12135_v56  ;;  %v12246_v58 = vmul.f32 %v5188_v14, %v12138_v5  ;;  %v5071_v21 = vmul.f32 0.044715, %v12221_v48  ;;  %v12250_v45 = vadd.f32 %v4502_v31, %v11918_v9 }
 0x93c   : > { %14845 = vst [vmem:[#allocation93_spill] sm:$0xff] %v12230_v47  ;;  %14846 = vst [vmem:[#allocation94_spill] sm:$0xff] %v12233_v55  ;;  %v12257_v28 = vmul.f32 %v5190_v16, %v12144_v3  ;;  %v12260_v30 = vmul.f32 %v5189_v46, %v12154_v20  ;;  %v4877_v27 = vmul.f32 0.5, %v11938_v24  ;;  %v12264_v14 = vadd.f32 %v4615_v42, %v11922_v62 }
 0x93d   : > { %v12238_v25 = vpop.f32.mrb[56].mxu1  ;;  %14847 = vst [vmem:[#allocation95_spill] sm:$0xff] %v12243_v8  ;;  %14848 = vst [vmem:[#allocation96_spill] sm:$0xff] %v12246_v58  ;;  %v12271_v31 = vmul.f32 %v5191_v23, %v12174_v36  ;;  %v5197_v58 = vmul.f32 %v5069_v51, %v12216_v17  ;;  %v5076_v16 = vmul.f32 0.044715, %v12227_v35  ;;  %v12281_v24 = vmul.f32 %v5196_v11, %v12194_v59 }
 0x93e   : > { %v12240_v49 = vpop.f32.mrb[184].mxu0  ;;  %v12252_v22 = vpop.f32.mrb[57].mxu1  ;;  %14849 = vst [vmem:[#allocation97_spill] sm:$0xff] %v12257_v28  ;;  %14850 = vst [vmem:[#allocation98_spill] sm:$0xff] %v12260_v30  ;;  %v5078_v28 = vmul.f32 0.044715, %v12230_v47  ;;  %v12284_v42 = vmul.f32 %v5198_v2, %v12197_v54  ;;  %v5397_v23 = vadd.f32 %v12049_v7, %v11976_v61  ;;  %v5405_v51 = vadd.f32 %v12077_v6, %v12004_v4 }
 0x93f   : > { %v12254_v34 = vpop.f32.mrb[185].mxu0  ;;  %14851 = vst [vmem:[#allocation99_spill] sm:$0xff] %v12264_v14  ;;  %v12266_v8 = vpop.f32.mrb[58].mxu1  ;;  %14852 = vst [vmem:[#allocation100_spill] sm:$0xff] %v12271_v31  ;;  %v5199_v31 = vmul.f32 %v5071_v21, %v12221_v48  ;;  %v5077_v36 = vmul.f32 0.044715, %v12250_v45  ;;  %v12296_v30 = vadd.f32 %v4504_v33, %v11911_v43  ;;  %v12300_v54 = vadd.f32 %v4617_v19, %v11915_v57 }
 0x940   : > { %v12268_v56 = vpop.f32.mrb[186].mxu0  ;;  %v12276_v46 = vpop.f32.mrb[59].mxu1  ;;  %14853 = vst [vmem:[#allocation101_spill] sm:$0xff] %v12281_v24  ;;  %14854 = vst [vmem:[#allocation102_spill] sm:$0xff] %v12284_v42  ;;  %v12293_v5 = vmul.f32 0.5, %v11976_v61  ;;  %v12303_v6 = vmul.f32 %v5197_v58, %v12216_v17  ;;  %v5204_v21 = vmul.f32 %v5076_v16, %v12227_v35  ;;  %v5206_v24 = vmul.f32 %v5078_v28, %v12230_v47 }
 0x941   : > { %v12278_v3 = vpop.f32.mrb[187].mxu0  ;;  %14855 = vst [vmem:[#allocation103_spill] sm:$0xff] %v12296_v30  ;;  %v5079_v11 = vmul.f32 0.044715, %v12264_v14  ;;  %v5525_v2 = vmul.f32 0.7978846, %v5397_v23  ;;  %v9302_v7 = vpop.eup %9301  ;;  %v5396_v19 = vadd.f32 %v12029_v63, %v11960_v38  ;;  %v5205_v16 = vmul.f32 %v5077_v36, %v12250_v45 }
 0x942   : > { %v5533_v42 = vmul.f32 0.7978846, %v5405_v51  ;;  %14856 = vst [vmem:[#allocation104_spill] sm:$0xff] %v12300_v54  ;;  %14857 = vst [vmem:[#allocation105_spill] sm:$0xff] %v12303_v6  ;;  %v12308_v61 = vmul.f32 0.5, %v12004_v4  ;;  %v9304_v33 = vpop.eup %9303  ;;  %v5765_v59 = vadd.f32 1.0, %v9302_v7  ;;  %v5404_v4 = vadd.f32 %v12067_v40, %v11990_v37 }
 0x943   : > { %9305 = vtanh.f32 %v5525_v2  ;;  %v5084_v23 = vmul.f32 0.044715, %v12296_v30  ;;  %v5773_v58 = vadd.f32 1.0, %v9304_v33  ;;  %v5207_v2 = vmul.f32 %v5079_v11, %v12264_v14 }
 0x944   : > { %9307 = vtanh.f32 %v5533_v42  ;;  %v5086_v6 = vmul.f32 0.044715, %v12300_v54  ;;  %v5524_v63 = vmul.f32 0.7978846, %v5396_v19  ;;  %v12328_v17 = vadd.f32 %v12202_v15, %v11918_v9 }
 0x945   : > { %v12313_v51 = vpop.f32.mrb[60].mxu1  ;;  %v5893_v40 = vmul.f32 %v5765_v59, %v4869_v53  ;;  %v5901_v42 = vmul.f32 %v5773_v58, %v4877_v27  ;;  %v5532_v29 = vmul.f32 0.7978846, %v5404_v4  ;;  %v12336_v55 = vadd.f32 %v12204_v52, %v11922_v62  ;;  %v8989_v53 = vld [vmem:[%s9809_s2 + $0x100] ss:$8 sps:$4 sm:$0xff]  }
 0x946   : > { %v12315_v20 = vpop.f32.mrb[188].mxu0  ;;  %v12320_v28 = vpop.f32.mrb[61].mxu1  ;;  %14858 = vst [vmem:[#allocation106_spill] sm:$0xff] %v12328_v17  ;;  %v5212_v19 = vmul.f32 %v5084_v23, %v12296_v30  ;;  %9309 = vtanh.f32 %v5524_v63  ;;  %v5085_v15 = vmul.f32 0.044715, %v12328_v17  ;;  %v12350_v27 = vmul.f32 %v5199_v31, %v12221_v48 }
 0x947   : > { %v12322_v7 = vpop.f32.mrb[189].mxu0  ;;  %v12330_v33 = vpop.f32.mrb[62].mxu1  ;;  %14860 = vst [vmem:[#allocation108_spill] sm:$0xff] %v12336_v55  ;;  %v6021_v59 = vpack.c.bf16 %v5901_v42, %v5893_v40  ;;  %9311 = vtanh.f32 %v5532_v29  ;;  %v12354_v52 = vadd.f32 %v12240_v49, %v11915_v57  ;;  %v8994_v58 = vld [vmem:[%s9809_s2 + $0x114] ss:$8 sps:$4 sm:$0xff]   ;;  %v12358_v23 = vmul.f32 %v5204_v21, %v12227_v35 }
 0x948   : > { %v12332_v36 = vpop.f32.mrb[190].mxu0  ;;  %v12338_v11 = vpop.f32.mrb[63].mxu1  ;;  %14862 = vst [vmem:[#allocation110_spill] sm:$0xff] %v12350_v27  ;;  %v12361_v4 = vmul.f32 %v5206_v24, %v12230_v47  ;;  %v12366_v63 = vadd.f32 %v12252_v22, %v11918_v9  ;;  %v12369_v29 = vmul.f32 %v5205_v16, %v12250_v45  ;;  %v12372_v49 = vmul.f32 %v5207_v2, %v12264_v14 }
 0x949   : > { %14859 = vst [vmem:[#allocation107_spill] sm:$0xff] %v12332_v36  ;;  %v12340_v12 = vpop.f32.mrb[191].mxu0  ;;  %v12346_v36 = vadd.f32 %v12238_v25, %v11911_v43  ;;  %14863 = vst [vmem:[#allocation111_spill] sm:$0xff] %v12354_v52  ;;  %v5214_v25 = vmul.f32 %v5086_v6, %v12300_v54  ;;  %6896 = vmatprep.mubr.bf16.mxu1 %v6021_v59  ;;  %v12375_v31 = vmul.f32 0.5, %v11960_v38  ;;  %v5087_v24 = vmul.f32 0.044715, %v12336_v55 }
 0x94a   : > { %14864 = vst [vmem:[#allocation112_spill] sm:$0xff] %v12358_v23  ;;  %14865 = vst [vmem:[#allocation113_spill] sm:$0xff] %v12361_v4  ;;  %v14868_v21 = vpack.c.bf16 %v12213_v60, %v12210_v39  ;;  %v8992_v6 = vld [vmem:[%s9809_s2 + $0x110] ss:$8 sps:$4 sm:$0xff]   ;;  %v12383_v22 = vmul.f32 %v5212_v19, %v12296_v30  ;;  %v12386_v40 = vmul.f32 0.5, %v11990_v37  ;;  %v5213_v16 = vmul.f32 %v5085_v15, %v12328_v17 }
 0x94b   : > { %14861 = vst [vmem:[#allocation109_spill] sm:$0xff] %v12346_v36  ;;  %14866 = vst [vmem:[#allocation114_spill] sm:$0xff] %v12369_v29  ;;  %v5092_v2 = vmul.f32 0.044715, %v12346_v36  ;;  %v8997_v38 = vld [vmem:[%s9809_s2 + $0x124] ss:$8 sps:$4 sm:$0xff]   ;;  %v12396_v39 = vadd.f32 %v12254_v34, %v11922_v62  ;;  %v5413_v60 = vadd.f32 %v12111_v50, %v12026_v41  ;;  %v5421_v37 = vadd.f32 %v12157_v10, %v12058_v13 }
 0x94c   : > { %14867 = vst [vmem:[#allocation115_spill] sm:$0xff] %v12372_v49  ;;  %6897 = vmatmul.mubr.bf16.vlgmr.msra.gmra.mrb[96].mxu1 %v14868_v21  ;;  %14869 = vst [vmem:[#allocation116_spill] sm:$0xff] %v12383_v22  ;;  %v5094_v59 = vmul.f32 0.044715, %v12354_v52  ;;  %v5093_v4 = vmul.f32 0.044715, %v12366_v63  ;;  %v12415_v50 = vadd.f32 %v12266_v8, %v11911_v43 }
 0x94d   : > { %v12390_v42 = vpop.f32.mrb[64].mxu1  ;;  %6978 = vmatpush1.bf16.msra.mxu1 %v8989_v53  ;;  %14870 = vst [vmem:[#allocation117_spill] sm:$0xff] %v12396_v39  ;;  %v9306_v21 = vpop.eup %9305  ;;  %v12407_v53 = vmul.f32 %v5214_v25, %v12300_v54  ;;  %v12411_v34 = vmul.f32 0.5, %v12026_v41  ;;  %v5541_v25 = vmul.f32 0.7978846, %v5413_v60  ;;  %v12425_v41 = vmul.f32 %v5213_v16, %v12328_v17 }
 0x94e   : > { %v12402_v19 = vpop.f32.mrb[192].mxu0  ;;  %v12404_v15 = vpop.f32.mrb[65].mxu1  ;;  %6979 = vmatprep.subr.bf16.mxu1 %v8994_v58  ;;  %14872 = vst [vmem:[#allocation119_spill] sm:$0xff] %v12415_v50  ;;  %v5781_v14 = vadd.f32 1.0, %v9306_v21  ;;  %v5215_v58 = vmul.f32 %v5087_v24, %v12336_v55  ;;  %v5220_v8 = vmul.f32 %v5092_v2, %v12346_v36  ;;  %v12429_v48 = vmul.f32 0.5, %v12058_v13 }
 0x94f   : > { %14871 = vst [vmem:[#allocation118_spill] sm:$0xff] %v12407_v53  ;;  %v12417_v10 = vpop.f32.mrb[193].mxu0  ;;  %v12419_v47 = vpop.f32.mrb[66].mxu1  ;;  %v5549_v53 = vmul.f32 0.7978846, %v5421_v37  ;;  %14873 = vst [vmem:[#allocation120_spill] sm:$0xff] %v12425_v41  ;;  %9313 = vtanh.f32 %v5541_v25  ;;  %v12440_v16 = vadd.f32 %v12268_v56, %v11915_v57  ;;  %v5221_v25 = vmul.f32 %v5093_v4, %v12366_v63 }
 0x950   : > { %v9308_v49 = vpop.eup %9307  ;;  %v12422_v54 = vpop.f32.mrb[194].mxu0  ;;  %v8995_v24 = vld [vmem:[%s9809_s2 + $0x120] ss:$8 sps:$4 sm:$0xff]   ;;  %v5095_v60 = vmul.f32 0.044715, %v12396_v39  ;;  %v5909_v13 = vmul.f32 %v5781_v14, %v12293_v5  ;;  %v5412_v41 = vadd.f32 %v12095_v26, %v12010_v32  ;;  %v5420_v56 = vadd.f32 %v12147_v0, %v12043_v1 }
 0x951   : > { %v5789_v27 = vadd.f32 1.0, %v9308_v49  ;;  %v12431_v22 = vpop.f32.mrb[67].mxu1  ;;  %v12433_v30 = vpop.f32.mrb[195].mxu0  ;;  %6980 = vmatpush1.bf16.msra.mxu1 %v8992_v6  ;;  %v5100_v49 = vmul.f32 0.044715, %v12415_v50  ;;  %14874 = vst [vmem:[#allocation121_spill] sm:$0xff] %v12440_v16  ;;  %v5222_v6 = vmul.f32 %v5094_v59, %v12354_v52  ;;  %9315 = vtanh.f32 %v5549_v53 }
 0x952   : > { %v9310_v2 = vpop.eup %9309  ;;  %6981 = vmatprep.subr.bf16.mxu1 %v8997_v38  ;;  %v9000_v21 = vld [vmem:[%s9809_s2 + $0x134] ss:$8 sps:$4 sm:$0xff]   ;;  %v8998_v5 = vld [vmem:[%s9809_s2 + $0x130] ss:$8 sps:$4 sm:$0xff]   ;;  %v5102_v14 = vmul.f32 0.044715, %v12440_v16  ;;  %v5223_v4 = vmul.f32 %v5095_v60, %v12396_v39 }
 0x953   : > { %v5917_v37 = vmul.f32 %v5789_v27, %v12308_v61  ;;  %v9312_v23 = vpop.eup %9311  ;;  %v5780_v35 = vadd.f32 1.0, %v9310_v2  ;;  %v12455_v61 = vadd.f32 %v12276_v46, %v11918_v9  ;;  %v5228_v26 = vmul.f32 %v5100_v49, %v12415_v50  ;;  %v9003_v46 = vld [vmem:[%s9809_s2 + $0x144] ss:$8 sps:$4 sm:$0xff]  }
 0x954   : > { %v5788_v29 = vadd.f32 1.0, %v9312_v23  ;;  %v5540_v38 = vmul.f32 0.7978846, %v5412_v41  ;;  %v5548_v59 = vmul.f32 0.7978846, %v5420_v56  ;;  %v12494_v49 = vmul.f32 %v5215_v58, %v12336_v55 }
 0x955   : > { %v6029_v17 = vpack.c.bf16 %v5917_v37, %v5909_v13  ;;  %v12457_v27 = vpop.f32.mrb[68].mxu1  ;;  %6982 = vmatpush1.bf16.msra.mxu1 %v8995_v24  ;;  %v5908_v53 = vmul.f32 %v5780_v35, %v12375_v31  ;;  %v5101_v13 = vmul.f32 0.044715, %v12455_v61  ;;  %v12471_v24 = vadd.f32 %v12278_v3, %v11922_v62  ;;  %v9001_v56 = vld [vmem:[%s9809_s2 + $0x140] ss:$8 sps:$4 sm:$0xff]  }
 0x956   : > { %v12461_v0 = vpop.f32.mrb[196].mxu0  ;;  %v12463_v23 = vpop.f32.mrb[69].mxu1  ;;  %v5916_v2 = vmul.f32 %v5788_v29, %v12386_v40  ;;  %6983 = vmatprep.subr.bf16.mxu1 %v9000_v21  ;;  %9317 = vtanh.f32 %v5540_v38  ;;  %v12483_v35 = vadd.f32 %v12315_v20, %v11915_v57  ;;  %v12487_v29 = vadd.f32 %v12320_v28, %v11918_v9  ;;  %14878 = vst [vmem:[#allocation125_spill] sm:$0xff] %v12494_v49 }
 0x957   : > { %6906 = vmatprep.mubr.bf16.mxu1 %v6029_v17  ;;  %14875 = vst [vmem:[#allocation122_spill] sm:$0xff] %v12471_v24  ;;  %v12473_v60 = vpop.f32.mrb[197].mxu0  ;;  %v12475_v41 = vpop.f32.mrb[70].mxu1  ;;  %v12479_v17 = vadd.f32 %v12313_v51, %v11911_v43  ;;  %v12497_v51 = vmul.f32 %v5220_v8, %v12346_v36  ;;  %9319 = vtanh.f32 %v5548_v59  ;;  %v12502_v20 = vmul.f32 %v5222_v6, %v12354_v52  ;;  %v14885_v52 = vld [vmem:[#allocation94_spill] sm:$0xff] }
 0x958   : > { %14877 = vst [vmem:[#allocation124_spill] sm:$0xff] %v12483_v35  ;;  %v12489_v3 = vpop.f32.mrb[198].mxu0  ;;  %v12491_v31 = vpop.f32.mrb[71].mxu1  ;;  %v6028_v40 = vpack.c.bf16 %v5916_v2, %v5908_v53  ;;  %v12505_v28 = vmul.f32 %v5221_v25, %v12366_v63  ;;  %v12508_v21 = vmul.f32 %v5223_v4, %v12396_v39  ;;  %v5230_v58 = vmul.f32 %v5102_v14, %v12440_v16 }
 0x959   : > { %14876 = vst [vmem:[#allocation123_spill] sm:$0xff] %v12479_v17  ;;  %14879 = vst [vmem:[#allocation126_spill] sm:$0xff] %v12497_v51  ;;  %v12499_v37 = vpop.f32.mrb[199].mxu0  ;;  %6984 = vmatpush1.bf16.msra.mxu1 %v8998_v5  ;;  %v12513_v8 = vmul.f32 0.5, %v12010_v32  ;;  %v12516_v38 = vmul.f32 0.5, %v12043_v1  ;;  %v5229_v6 = vmul.f32 %v5101_v13, %v12455_v61  ;;  %v9314_v4 = vpop.eup %9313  ;;  %v12522_v59 = vmul.f32 %v5228_v26, %v12415_v50 }
 0x95a   : > { %14880 = vst [vmem:[#allocation127_spill] sm:$0xff] %v12502_v20  ;;  %14881 = vst [vmem:[#allocation128_spill] sm:$0xff] %v12508_v21  ;;  %6907 = vmatmul.mubr.bf16.gmra.mrb[100].mxu1 %v6028_v40  ;;  %6985 = vmatprep.subr.bf16.mxu1 %v9003_v46  ;;  %v5103_v25 = vmul.f32 0.044715, %v12471_v24  ;;  %v9006_v5 = vld [vmem:[%s9809_s2 + $0x154] ss:$8 sps:$4 sm:$0xff]   ;;  %v12530_v46 = vadd.f32 %v12322_v7, %v11922_v62  ;;  %v5429_v13 = vadd.f32 %v12169_v18, %v12090_v44 }
 0x95b   : > { %14882 = vst [vmem:[#allocation129_spill] sm:$0xff] %v12522_v59  ;;  %v5108_v14 = vmul.f32 0.044715, %v12479_v17  ;;  %v5110_v53 = vmul.f32 0.044715, %v12483_v35  ;;  %v9316_v2 = vpop.eup %9315  ;;  %v5797_v1 = vadd.f32 1.0, %v9314_v4  ;;  %v12540_v55 = vmul.f32 %v5230_v58, %v12440_v16 }
 0x95c   : > { %v5109_v32 = vmul.f32 0.044715, %v12487_v29  ;;  %v9004_v40 = vld [vmem:[%s9809_s2 + $0x150] ss:$8 sps:$4 sm:$0xff]   ;;  %14883 = vst [vmem:[#allocation130_spill] sm:$0xff] %v12530_v46  ;;  %v14884_v20 = vld [vmem:[#allocation74_spill] sm:$0xff]  ;;  %v5231_v50 = vmul.f32 %v5103_v25, %v12471_v24  ;;  %v12564_v16 = vadd.f32 %v12330_v33, %v11911_v43 }
 0x95d   : > { %v5437_v26 = vadd.f32 %v14885_v52, %v14884_v20  ;;  %v9009_v21 = vld [vmem:[%s9809_s2 + $0x164] ss:$8 sps:$4 sm:$0xff]   ;;  %v12537_v39 = vpop.f32.mrb[72].mxu1  ;;  %v5805_v49 = vadd.f32 1.0, %v9316_v2  ;;  %14886 = vst [vmem:[#allocation74_spill] sm:$0xff] %v12540_v55  ;;  %6986 = vmatpush1.bf16.msra.mxu1 %v9001_v56  ;;  %v12543_v4 = vmul.f32 0.5, %v12090_v44  ;;  %v12553_v52 = vmul.f32 %v5229_v6, %v12455_v61 }
 0x95e   : > { %v12546_v7 = vmul.f32 0.5, %v14884_v20  ;;  %v12548_v59 = vpop.f32.mrb[200].mxu0  ;;  %v12550_v18 = vpop.f32.mrb[73].mxu1  ;;  %6987 = vmatprep.subr.bf16.mxu1 %v9006_v5  ;;  %v5557_v2 = vmul.f32 0.7978846, %v5429_v13  ;;  %v5925_v44 = vmul.f32 %v5797_v1, %v12411_v34  ;;  %14889 = vst [vmem:[#allocation132_spill] sm:$0xff] %v12564_v16  ;;  %v5236_v13 = vmul.f32 %v5108_v14, %v12479_v17 }
 0x95f   : > { %14887 = vst [vmem:[#allocation94_spill] sm:$0xff] %v12553_v52  ;;  %v5565_v58 = vmul.f32 0.7978846, %v5437_v26  ;;  %v12556_v55 = vpop.f32.mrb[201].mxu0  ;;  %v12558_v56 = vpop.f32.mrb[74].mxu1  ;;  %v5933_v20 = vmul.f32 %v5805_v49, %v12429_v48  ;;  %v14890_v6 = vld [vmem:[#allocation107_spill] sm:$0xff] }
 0x960   : > { %14888 = vst [vmem:[#allocation131_spill] sm:$0xff] %v12558_v56  ;;  %v12568_v51 = vadd.f32 %v14890_v6, %v11915_v57  ;;  %v12570_v25 = vpop.f32.mrb[202].mxu0  ;;  %v12572_v5 = vpop.f32.mrb[75].mxu1  ;;  %v5111_v26 = vmul.f32 0.044715, %v12530_v46  ;;  %9321 = vtanh.f32 %v5557_v2  ;;  %v14894_v34 = vld [vmem:[#allocation64_spill] sm:$0xff]  ;;  %v5238_v57 = vmul.f32 %v5110_v53, %v12483_v35 }
 0x961   : > { %14892 = vst [vmem:[#allocation133_spill] sm:$0xff] %v12570_v25  ;;  %14893 = vst [vmem:[#allocation134_spill] sm:$0xff] %v12572_v5  ;;  %v14895_v48 = vld [vmem:[#allocation82_spill] sm:$0xff]  ;;  %v12578_v1 = vpop.f32.mrb[203].mxu0  ;;  %v9318_v43 = vpop.eup %9317  ;;  %v6037_v33 = vpack.c.bf16 %v5933_v20, %v5925_v44  ;;  %6988 = vmatpush1.bf16.msra.mxu1 %v9004_v40  ;;  %9323 = vtanh.f32 %v5565_v58  ;;  %v5116_v6 = vmul.f32 0.044715, %v12564_v16  ;;  %v5237_v53 = vmul.f32 %v5109_v32, %v12487_v29 }
 0x962   : > { %14891 = vst [vmem:[#allocation107_spill] sm:$0xff] %v12568_v51  ;;  %v5428_v49 = vadd.f32 %v14895_v48, %v14894_v34  ;;  %14896 = vst [vmem:[#allocation64_spill] sm:$0xff] %v12578_v1  ;;  %v9007_v5 = vld [vmem:[%s9809_s2 + $0x160] ss:$8 sps:$4 sm:$0xff]   ;;  %v9320_v36 = vpop.eup %9319  ;;  %v5796_v14 = vadd.f32 1.0, %v9318_v43  ;;  %6989 = vmatprep.subr.bf16.mxu1 %v9009_v21  ;;  %v12587_v48 = vadd.f32 %v12338_v11, %v11918_v9 }
 0x963   : > { %v14897_v25 = vld [vmem:[#allocation71_spill] sm:$0xff]  ;;  %v14898_v56 = vld [vmem:[#allocation86_spill] sm:$0xff]  ;;  %v9012_v1 = vld [vmem:[%s9809_s2 + $0x174] ss:$8 sps:$4 sm:$0xff]   ;;  %6916 = vmatprep.mubr.bf16.mxu1 %v6037_v33  ;;  %v5804_v40 = vadd.f32 1.0, %v9320_v36  ;;  %v12594_v44 = vadd.f32 %v12340_v12, %v11922_v62  ;;  %v5239_v21 = vmul.f32 %v5111_v26, %v12530_v46  ;;  %v12605_v32 = vmul.f32 %v5236_v13, %v12479_v17 }
 0x964   : > { %v5436_v2 = vadd.f32 %v14898_v56, %v14897_v25  ;;  %v5556_v52 = vmul.f32 0.7978846, %v5428_v49  ;;  %v5118_v58 = vmul.f32 0.044715, %v12568_v51  ;;  %v12597_v56 = vmul.f32 %v5231_v50, %v12471_v24  ;;  %v14902_v26 = vld [vmem:[#allocation45_spill] sm:$0xff]  ;;  %v14916_v24 = vld [vmem:[#allocation98_spill] sm:$0xff] }
 0x965   : > { %14899 = vst [vmem:[#allocation82_spill] sm:$0xff] %v12594_v44  ;;  %v12600_v9 = vpop.f32.mrb[76].mxu1  ;;  %v5924_v36 = vmul.f32 %v5796_v14, %v12513_v8  ;;  %v5932_v11 = vmul.f32 %v5804_v40, %v12516_v38  ;;  %14901 = vst [vmem:[#allocation86_spill] sm:$0xff] %v12605_v32  ;;  %v5117_v49 = vmul.f32 0.044715, %v12587_v48  ;;  %6990 = vmatpush1.bf16.msra.mxu1 %v9007_v5  ;;  %v14903_v38 = vld [vmem:[#allocation48_spill] sm:$0xff] }
 0x966   : > { %14900 = vst [vmem:[#allocation71_spill] sm:$0xff] %v12597_v56  ;;  %v5564_v20 = vmul.f32 0.7978846, %v5436_v2  ;;  %9325 = vtanh.f32 %v5556_v52  ;;  %v12608_v62 = vpop.f32.mrb[204].mxu0  ;;  %v12610_v12 = vpop.f32.mrb[77].mxu1  ;;  %v5244_v50 = vmul.f32 %v5116_v6, %v12564_v16  ;;  %6991 = vmatprep.subr.bf16.mxu1 %v9012_v1  ;;  %v12616_v8 = vadd.f32 %v12390_v42, %v14902_v26  ;;  %v14912_v56 = vld [vmem:[#allocation49_spill] sm:$0xff] }
 0x967   : > { %v9010_v52 = vld [vmem:[%s9809_s2 + $0x170] ss:$8 sps:$4 sm:$0xff]   ;;  %v12620_v13 = vadd.f32 %v12402_v19, %v14903_v38  ;;  %v12622_v43 = vpop.f32.mrb[205].mxu0  ;;  %v12624_v5 = vpop.f32.mrb[78].mxu1  ;;  %v6036_v33 = vpack.c.bf16 %v5932_v11, %v5924_v36  ;;  %v12627_v14 = vmul.f32 %v5238_v57, %v12483_v35  ;;  %v5246_v6 = vmul.f32 %v5118_v58, %v12568_v51  ;;  %v9015_v2 = vld [vmem:[%s9809_s2 + $0x184] ss:$8 sps:$4 sm:$0xff]  }
 0x968   : > { %9327 = vtanh.f32 %v5564_v20  ;;  %14904 = vst [vmem:[#allocation45_spill] sm:$0xff] %v12624_v5  ;;  %v5119_v1 = vmul.f32 0.044715, %v12594_v44  ;;  %v12632_v40 = vpop.f32.mrb[206].mxu0  ;;  %v12634_v42 = vpop.f32.mrb[79].mxu1  ;;  %v12637_v19 = vmul.f32 %v5237_v53, %v12487_v29  ;;  %v12640_v20 = vmul.f32 %v5239_v21, %v12530_v46  ;;  %v14910_v35 = vld [vmem:[#allocation47_spill] sm:$0xff] }
 0x969   : > { %14905 = vst [vmem:[#allocation48_spill] sm:$0xff] %v12627_v14  ;;  %14906 = vst [vmem:[#allocation135_spill] sm:$0xff] %v12632_v40  ;;  %v12643_v36 = vmul.f32 0.5, %v14894_v34  ;;  %v5000_v57 = vmul.f32 0.044715, %v12616_v8  ;;  %v12646_v58 = vpop.f32.mrb[207].mxu0  ;;  %6917 = vmatmul.mubr.bf16.gmra.mrb[104].mxu1 %v6036_v33  ;;  %v5245_v11 = vmul.f32 %v5117_v49, %v12587_v48  ;;  %v12652_v53 = vadd.f32 %v12404_v15, %v14910_v35 }
 0x96a   : > { %14907 = vst [vmem:[#allocation136_spill] sm:$0xff] %v12634_v42  ;;  %14908 = vst [vmem:[#allocation137_spill] sm:$0xff] %v12640_v20  ;;  %v5002_v14 = vmul.f32 0.044715, %v12620_v13  ;;  %v12656_v21 = vadd.f32 %v12417_v10, %v14912_v56  ;;  %v9322_v34 = vpop.eup %9321  ;;  %v12659_v20 = vmul.f32 %v5244_v50, %v12564_v16  ;;  %v4924_v46 = vmul.f32 0.5, %v14897_v25  ;;  %6992 = vmatpush1.bf16.msra.mxu1 %v9010_v52  ;;  %v14915_v33 = vld [vmem:[#allocation80_spill] sm:$0xff] }
 0x96b   : > { %14909 = vst [vmem:[#allocation138_spill] sm:$0xff] %v12646_v58  ;;  %14911 = vst [vmem:[#allocation47_spill] sm:$0xff] %v12652_v53  ;;  %v5128_v49 = vmul.f32 %v5000_v57, %v12616_v8  ;;  %v5445_v58 = vadd.f32 %v14916_v24, %v14915_v33  ;;  %v9013_v42 = vld [vmem:[%s9809_s2 + $0x180] ss:$8 sps:$4 sm:$0xff]   ;;  %v9324_v32 = vpop.eup %9323  ;;  %v5813_v15 = vadd.f32 1.0, %v9322_v34  ;;  %v12667_v17 = vmul.f32 %v5246_v6, %v12568_v51  ;;  %v14919_v16 = vld [vmem:[#allocation105_spill] sm:$0xff] }
 0x96c   : > { %14913 = vst [vmem:[#allocation49_spill] sm:$0xff] %v12656_v21  ;;  %14914 = vst [vmem:[#allocation139_spill] sm:$0xff] %v12659_v20  ;;  %v12670_v10 = vmul.f32 %v5119_v1, %v12594_v44  ;;  %v5130_v50 = vmul.f32 %v5002_v14, %v12620_v13  ;;  %6993 = vmatprep.subr.bf16.mxu1 %v9015_v2  ;;  %v9018_v20 = vld [vmem:[%s9809_s2 + $0x194] ss:$8 sps:$4 sm:$0xff]   ;;  %v5821_v25 = vadd.f32 1.0, %v9324_v32  ;;  %v14918_v57 = vld [vmem:[#allocation90_spill] sm:$0xff] }
 0x96d   : > { %14917 = vst [vmem:[#allocation80_spill] sm:$0xff] %v12667_v17  ;;  %v5256_v52 = vmul.f32 %v5128_v49, %v12616_v8  ;;  %v5453_v24 = vadd.f32 %v14919_v16, %v14918_v57  ;;  %v5573_v40 = vmul.f32 0.7978846, %v5445_v58  ;;  %v12677_v5 = vpop.f32.mrb[80].mxu1  ;;  %v5941_v6 = vmul.f32 %v5813_v15, %v12543_v4  ;;  %v9016_v4 = vld [vmem:[%s9809_s2 + $0x190] ss:$8 sps:$4 sm:$0xff]  }
 0x96e   : > { %14920 = vst [vmem:[#allocation98_spill] sm:$0xff] %v12677_v5  ;;  %v12681_v34 = vmul.f32 %v5245_v11, %v12587_v48  ;;  %v5001_v1 = vmul.f32 0.044715, %v12652_v53  ;;  %v5003_v14 = vmul.f32 0.044715, %v12656_v21  ;;  %v12685_v2 = vpop.f32.mrb[208].mxu0  ;;  %v5949_v16 = vmul.f32 %v5821_v25, %v12546_v7  ;;  %6994 = vmatpush1.bf16.msra.mxu1 %v9013_v42 }
 0x96f   : > { %14921 = vst [vmem:[#allocation90_spill] sm:$0xff] %v12685_v2  ;;  %v12687_v32 = vpop.f32.mrb[81].mxu1  ;;  %v5258_v58 = vmul.f32 %v5130_v50, %v12620_v13  ;;  %v5581_v17 = vmul.f32 0.7978846, %v5453_v24  ;;  %9329 = vtanh.f32 %v5573_v40  ;;  %v12692_v11 = vpop.f32.mrb[209].mxu0  ;;  %v5384_v5 = vadd.f32 %v5256_v52, %v12616_v8  ;;  %6995 = vmatprep.subr.bf16.mxu1 %v9018_v20 }
 0x970   : > { %v9326_v49 = vpop.eup %9325  ;;  %14922 = vst [vmem:[#allocation105_spill] sm:$0xff] %v12692_v11  ;;  %v12694_v15 = vpop.f32.mrb[82].mxu1  ;;  %v12699_v2 = vadd.f32 %v12419_v47, %v14902_v26  ;;  %v12703_v7 = vadd.f32 %v12422_v54, %v14903_v38  ;;  %v9021_v50 = vld [vmem:[%s9809_s2 + $0x1a4] ss:$8 sps:$4 sm:$0xff]   ;;  %v6045_v24 = vpack.c.bf16 %v5949_v16, %v5941_v6  ;;  %v12714_v52 = vmul.f32 0.5, %v12620_v13 }
 0x971   : > { %14923 = vst [vmem:[#allocation140_spill] sm:$0xff] %v12694_v15  ;;  %v5812_v51 = vadd.f32 1.0, %v9326_v49  ;;  %v12706_v40 = vpop.f32.mrb[210].mxu0  ;;  %v12708_v42 = vpop.f32.mrb[83].mxu1  ;;  %v12711_v49 = vmul.f32 0.5, %v12616_v8  ;;  %9331 = vtanh.f32 %v5581_v17  ;;  %v5129_v20 = vmul.f32 %v5001_v1, %v12652_v53  ;;  %v14932_v15 = vld [vmem:[#allocation101_spill] sm:$0xff] }
 0x972   : > { %14924 = vst [vmem:[#allocation141_spill] sm:$0xff] %v12706_v40  ;;  %14925 = vst [vmem:[#allocation142_spill] sm:$0xff] %v12708_v42  ;;  %v9328_v25 = vpop.eup %9327  ;;  %v12716_v47 = vpop.f32.mrb[211].mxu0  ;;  %v12720_v40 = vmul.f32 0.5, %v14915_v33  ;;  %v12723_v42 = vmul.f32 0.5, %v14918_v57  ;;  %6926 = vmatprep.mubr.bf16.mxu1 %v6045_v24  ;;  %v5386_v8 = vadd.f32 %v5258_v58, %v12620_v13  ;;  %v5131_v6 = vmul.f32 %v5003_v14, %v12656_v21  ;;  %v14930_v57 = vld [vmem:[#allocation96_spill] sm:$0xff] }
 0x973   : > { %14926 = vst [vmem:[#allocation143_spill] sm:$0xff] %v12711_v49  ;;  %14927 = vst [vmem:[#allocation144_spill] sm:$0xff] %v12714_v52  ;;  %v5820_v54 = vadd.f32 1.0, %v9328_v25  ;;  %v5008_v17 = vmul.f32 0.044715, %v12699_v2  ;;  %6996 = vmatpush1.bf16.msra.mxu1 %v9016_v4  ;;  %v5940_v1 = vmul.f32 %v5812_v51, %v12643_v36  ;;  %v14929_v49 = vld [vmem:[#allocation77_spill] sm:$0xff]  ;;  %v12740_v4 = vadd.f32 %v12431_v22, %v14910_v35 }
 0x974   : > { %14928 = vst [vmem:[#allocation145_spill] sm:$0xff] %v12716_v47  ;;  %v5010_v16 = vmul.f32 0.044715, %v12703_v7  ;;  %v9019_v25 = vld [vmem:[%s9809_s2 + $0x1a0] ss:$8 sps:$4 sm:$0xff]   ;;  %v5444_v47 = vadd.f32 %v14930_v57, %v14929_v49  ;;  %6997 = vmatprep.subr.bf16.mxu1 %v9021_v50  ;;  %v14931_v58 = vld [vmem:[#allocation88_spill] sm:$0xff]  ;;  %v12747_v50 = vadd.f32 %v12433_v30, %v14912_v56 }
 0x975   : > { %v5948_v33 = vmul.f32 %v5820_v54, %v4924_v46  ;;  %v5512_v52 = vmul.f32 0.7978846, %v5384_v5  ;;  %v9024_v24 = vld [vmem:[%s9809_s2 + $0x1b4] ss:$8 sps:$4 sm:$0xff]   ;;  %v5136_v13 = vmul.f32 %v5008_v17, %v12699_v2  ;;  %v5452_v11 = vadd.f32 %v14932_v15, %v14931_v58  ;;  %14933 = vst [vmem:[#allocation77_spill] sm:$0xff] %v12740_v4  ;;  %v12743_v36 = vpop.f32.mrb[84].mxu1 }
 0x976   : > { %v5138_v14 = vmul.f32 %v5010_v16, %v12703_v7  ;;  %v9022_v51 = vld [vmem:[%s9809_s2 + $0x1b0] ss:$8 sps:$4 sm:$0xff]   ;;  %14934 = vst [vmem:[#allocation96_spill] sm:$0xff] %v12743_v36  ;;  %v5572_v5 = vmul.f32 0.7978846, %v5444_v47  ;;  %14935 = vst [vmem:[#allocation88_spill] sm:$0xff] %v12747_v50  ;;  %v12751_v54 = vadd.f32 %v12457_v27, %v14902_v26  ;;  %v12767_v27 = vmul.f32 %v12670_v10, %v12594_v44 }
 0x977   : > { %v6044_v46 = vpack.c.bf16 %v5948_v33, %v5940_v1  ;;  %v9027_v17 = vld [vmem:[%s9809_s2 + $0x1c4] ss:$8 sps:$4 sm:$0xff]   ;;  %v12754_v16 = vpop.f32.mrb[212].mxu0  ;;  %v12756_v15 = vpop.f32.mrb[85].mxu1  ;;  %v5264_v22 = vmul.f32 %v5136_v13, %v12699_v2  ;;  %v5580_v36 = vmul.f32 0.7978846, %v5452_v11  ;;  %6998 = vmatpush1.bf16.msra.mxu1 %v9019_v25  ;;  %v12775_v25 = vmul.f32 %v5129_v20, %v12652_v53 }
 0x978   : > { %14936 = vst [vmem:[#allocation101_spill] sm:$0xff] %v12751_v54  ;;  %14937 = vst [vmem:[#allocation146_spill] sm:$0xff] %v12756_v15  ;;  %v5266_v57 = vmul.f32 %v5138_v14, %v12703_v7  ;;  %v5009_v47 = vmul.f32 0.044715, %v12740_v4  ;;  %v12761_v1 = vpop.f32.mrb[213].mxu0  ;;  %v12763_v30 = vpop.f32.mrb[86].mxu1  ;;  %9333 = vtanh.f32 %v5572_v5  ;;  %6999 = vmatprep.subr.bf16.mxu1 %v9024_v24 }
 0x979   : > { %6927 = vmatmul.mubr.bf16.gmra.mrb[108].mxu1 %v6044_v46  ;;  %14938 = vst [vmem:[#allocation147_spill] sm:$0xff] %v12767_v27  ;;  %v5514_v33 = vmul.f32 0.7978846, %v5386_v8  ;;  %v5011_v15 = vmul.f32 0.044715, %v12747_v50  ;;  %v12770_v13 = vpop.f32.mrb[214].mxu0  ;;  %v9330_v14 = vpop.eup %9329  ;;  %v5392_v46 = vadd.f32 %v5264_v22, %v12699_v2  ;;  %9335 = vtanh.f32 %v5580_v36 }
 0x97a   : > { %v12772_v11 = vpop.f32.mrb[87].mxu1  ;;  %14940 = vst [vmem:[#allocation149_spill] sm:$0xff] %v12775_v25  ;;  %v5016_v10 = vmul.f32 0.044715, %v12751_v54  ;;  %v12779_v27 = vpop.f32.mrb[215].mxu0  ;;  %v12782_v8 = vmul.f32 %v5131_v6, %v12656_v21  ;;  %v5829_v24 = vadd.f32 1.0, %v9330_v14  ;;  %v5394_v5 = vadd.f32 %v5266_v57, %v12703_v7 }
 0x97b   : > { %14939 = vst [vmem:[#allocation148_spill] sm:$0xff] %v12772_v11  ;;  %v12786_v44 = vmul.f32 0.5, %v14929_v49  ;;  %v9332_v11 = vpop.eup %9331  ;;  %9337 = vtanh.f32 %v5512_v52  ;;  %v5137_v20 = vmul.f32 %v5009_v47, %v12740_v4  ;;  %v5139_v36 = vmul.f32 %v5011_v15, %v12747_v50  ;;  %7000 = vmatpush1.bf16.msra.mxu1 %v9022_v51  ;;  %v9025_v6 = vld [vmem:[%s9809_s2 + $0x1c0] ss:$8 sps:$4 sm:$0xff]   ;;  %v9030_v52 = vld [vmem:[%s9809_s2 + $0x1d4] ss:$8 sps:$4 sm:$0xff]  }
 0x97c   : > { %14941 = vst [vmem:[#allocation150_spill] sm:$0xff] %v12782_v8  ;;  %v12792_v22 = vadd.f32 %v12461_v0, %v14903_v38  ;;  %9339 = vtanh.f32 %v5514_v33  ;;  %v5837_v8 = vadd.f32 1.0, %v9332_v11  ;;  %v12796_v14 = vmul.f32 0.5, %v12699_v2  ;;  %7001 = vmatprep.subr.bf16.mxu1 %v9027_v17  ;;  %v14951_v21 = vld [vmem:[#allocation120_spill] sm:$0xff] }
 0x97d   : > { %v12799_v49 = vmul.f32 0.5, %v12703_v7  ;;  %v5520_v57 = vmul.f32 0.7978846, %v5392_v46  ;;  %v4940_v15 = vmul.f32 0.5, %v14931_v58  ;;  %v5144_v47 = vmul.f32 %v5016_v10, %v12751_v54  ;;  %v12808_v51 = vpop.f32.mrb[88].mxu1 }
 0x97e   : > { %14942 = vst [vmem:[#allocation151_spill] sm:$0xff] %v12792_v22  ;;  %14943 = vst [vmem:[#allocation152_spill] sm:$0xff] %v12796_v14  ;;  %v12806_v0 = vadd.f32 %v12463_v23, %v14910_v35  ;;  %v5957_v2 = vmul.f32 %v5829_v24, %v12720_v40  ;;  %v5965_v33 = vmul.f32 %v5837_v8, %v12723_v42  ;;  %v5522_v7 = vmul.f32 0.7978846, %v5394_v5  ;;  %v12816_v11 = vpop.f32.mrb[216].mxu0  ;;  %v12818_v58 = vpop.f32.mrb[89].mxu1 }
 0x97f   : > { %14944 = vst [vmem:[#allocation153_spill] sm:$0xff] %v12799_v49  ;;  %v12814_v17 = vadd.f32 %v12473_v60, %v14912_v56  ;;  %v12821_v46 = vmul.f32 %v5137_v20, %v12740_v4  ;;  %v12824_v23 = vmul.f32 %v5139_v36, %v12747_v50  ;;  %v5018_v40 = vmul.f32 0.044715, %v12792_v22  ;;  %v14949_v42 = vld [vmem:[#allocation114_spill] sm:$0xff]  ;;  %7002 = vmatpush1.bf16.msra.mxu1 %v9025_v6  ;;  %v9028_v8 = vld [vmem:[%s9809_s2 + $0x1d0] ss:$8 sps:$4 sm:$0xff]  }
 0x980   : > { %14945 = vst [vmem:[#allocation154_spill] sm:$0xff] %v12806_v0  ;;  %v5461_v10 = vadd.f32 %v14949_v42, %v12250_v45  ;;  %v12830_v60 = vpop.f32.mrb[217].mxu0  ;;  %v12832_v24 = vpop.f32.mrb[90].mxu1  ;;  %v6053_v5 = vpack.c.bf16 %v5965_v33, %v5957_v2  ;;  %v14950_v49 = vld [vmem:[#allocation106_spill] sm:$0xff]  ;;  %v12838_v20 = vadd.f32 %v12475_v41, %v14902_v26  ;;  %v12842_v36 = vadd.f32 %v12489_v3, %v14903_v38  ;;  %v14959_v4 = vld [vmem:[#allocation112_spill] sm:$0xff] }
 0x981   : > { %14946 = vst [vmem:[#allocation155_spill] sm:$0xff] %v12814_v17  ;;  %14947 = vst [vmem:[#allocation156_spill] sm:$0xff] %v12821_v46  ;;  %v5469_v14 = vadd.f32 %v14951_v21, %v14950_v49  ;;  %7003 = vmatprep.subr.bf16.mxu1 %v9030_v52  ;;  %v9033_v42 = vld [vmem:[%s9809_s2 + $0x1e4] ss:$8 sps:$4 sm:$0xff]   ;;  %v12845_v6 = vpop.f32.mrb[218].mxu0  ;;  %9341 = vtanh.f32 %v5520_v57  ;;  %v12850_v2 = vmul.f32 %v5144_v47, %v12751_v54  ;;  %v14958_v46 = vld [vmem:[#allocation92_spill] sm:$0xff] }
 0x982   : > { %14948 = vst [vmem:[#allocation157_spill] sm:$0xff] %v12824_v23  ;;  %14952 = vst [vmem:[#allocation114_spill] sm:$0xff] %v12838_v20  ;;  %v12847_v23 = vpop.f32.mrb[91].mxu1  ;;  %v5017_v21 = vmul.f32 0.044715, %v12806_v0  ;;  %v12853_v33 = vpop.f32.mrb[219].mxu0  ;;  %6936 = vmatprep.mubr.bf16.mxu1 %v6053_v5  ;;  %9343 = vtanh.f32 %v5522_v7  ;;  %v5460_v25 = vadd.f32 %v14959_v4, %v14958_v46  ;;  %v5146_v47 = vmul.f32 %v5018_v40, %v12792_v22 }
 0x983   : > { %14953 = vst [vmem:[#allocation106_spill] sm:$0xff] %v12842_v36  ;;  %14954 = vst [vmem:[#allocation120_spill] sm:$0xff] %v12845_v6  ;;  %v5589_v41 = vmul.f32 0.7978846, %v5461_v10  ;;  %v9334_v50 = vpop.eup %9333  ;;  %v5019_v3 = vmul.f32 0.044715, %v12814_v17  ;;  %7004 = vmatpush1.bf16.msra.mxu1 %v9028_v8  ;;  %v12873_v8 = vadd.f32 %v12491_v31, %v14910_v35 }
 0x984   : > { %14955 = vst [vmem:[#allocation158_spill] sm:$0xff] %v12847_v23  ;;  %14956 = vst [vmem:[#allocation159_spill] sm:$0xff] %v12850_v2  ;;  %v5597_v52 = vmul.f32 0.7978846, %v5469_v14  ;;  %v9336_v57 = vpop.eup %9335  ;;  %v5828_v53 = vadd.f32 1.0, %v9334_v50  ;;  %v12860_v2 = vmul.f32 0.5, %v12250_v45  ;;  %7005 = vmatprep.subr.bf16.mxu1 %v9033_v42  ;;  %v5145_v50 = vmul.f32 %v5017_v21, %v12806_v0 }
 0x985   : > { %14957 = vst [vmem:[#allocation160_spill] sm:$0xff] %v12853_v33  ;;  %9345 = vtanh.f32 %v5589_v41  ;;  %v9031_v10 = vld [vmem:[%s9809_s2 + $0x1e0] ss:$8 sps:$4 sm:$0xff]   ;;  %v9036_v54 = vld [vmem:[%s9809_s2 + $0x1f4] ss:$8 sps:$4 sm:$0xff]   ;;  %v5836_v33 = vadd.f32 1.0, %v9336_v57  ;;  %v12866_v4 = vpop.eup %9337  ;;  %v5147_v42 = vmul.f32 %v5019_v3, %v12814_v17  ;;  %v12883_v21 = vadd.f32 %v12499_v37, %v14912_v56 }
 0x986   : > { %9347 = vtanh.f32 %v5597_v52  ;;  %v5024_v7 = vmul.f32 0.044715, %v12838_v20  ;;  %v5026_v14 = vmul.f32 0.044715, %v12842_v36  ;;  %14960 = vst [vmem:[#allocation92_spill] sm:$0xff] %v12866_v4  ;;  %v14961_v40 = vld [vmem:[#allocation103_spill] sm:$0xff]  ;;  %v12877_v52 = vpop.eup %9339  ;;  %v5956_v57 = vmul.f32 %v5828_v53, %v12786_v44 }
 0x987   : > { %v14962_v5 = vld [vmem:[#allocation116_spill] sm:$0xff]  ;;  %v5588_v23 = vmul.f32 0.7978846, %v5460_v25  ;;  %14963 = vst [vmem:[#allocation112_spill] sm:$0xff] %v12873_v8  ;;  %v12875_v41 = vpop.f32.mrb[92].mxu1  ;;  %v5964_v6 = vmul.f32 %v5836_v33, %v4940_v15  ;;  %14966 = vst [vmem:[#allocation161_spill] sm:$0xff] %v12883_v21  ;;  %v12893_v44 = vadd.f32 %v12537_v39, %v14902_v26  ;;  %7006 = vmatpush1.bf16.msra.mxu1 %v9031_v10 }
 0x988   : > { %v5468_v45 = vadd.f32 %v14962_v5, %v14961_v40  ;;  %14964 = vst [vmem:[#allocation103_spill] sm:$0xff] %v12875_v41  ;;  %14965 = vst [vmem:[#allocation116_spill] sm:$0xff] %v12877_v52  ;;  %v9034_v5 = vld [vmem:[%s9809_s2 + $0x1f0] ss:$8 sps:$4 sm:$0xff]   ;;  %v12886_v25 = vpop.f32.mrb[220].mxu0  ;;  %v12888_v4 = vpop.f32.mrb[93].mxu1  ;;  %v5152_v33 = vmul.f32 %v5024_v7, %v12838_v20  ;;  %v5154_v3 = vmul.f32 %v5026_v14, %v12842_v36  ;;  %7007 = vmatprep.subr.bf16.mxu1 %v9036_v54 }
 0x989   : > { %14967 = vst [vmem:[#allocation162_spill] sm:$0xff] %v12888_v4  ;;  %9349 = vtanh.f32 %v5588_v23  ;;  %v5025_v41 = vmul.f32 0.044715, %v12873_v8  ;;  %v12895_v53 = vpop.f32.mrb[221].mxu0  ;;  %v12897_v15 = vpop.f32.mrb[94].mxu1  ;;  %v6052_v37 = vpack.c.bf16 %v5964_v6, %v5956_v57  ;;  %v4957_v39 = vmul.f32 0.5, %v14950_v49 }
 0x98a   : > { %v5596_v31 = vmul.f32 0.7978846, %v5468_v45  ;;  %v5027_v52 = vmul.f32 0.044715, %v12883_v21  ;;  %v9039_v23 = vld [vmem:[%s9809_s2 + $0x204] ss:$8 sps:$4 sm:$0xff]   ;;  %v12910_v10 = vadd.f32 %v12548_v59, %v14903_v38  ;;  %v12914_v6 = vadd.f32 %v12550_v18, %v14910_v35 }
 0x98b   : > { %v12903_v45 = vpop.f32.mrb[222].mxu0  ;;  %v12905_v4 = vpop.f32.mrb[95].mxu1  ;;  %6937 = vmatmul.mubr.bf16.gmra.mrb[112].mxu1 %v6052_v37  ;;  %v12919_v54 = vmul.f32 %v5146_v47, %v12792_v22  ;;  %v12922_v14 = vmul.f32 %v5145_v50, %v12806_v0  ;;  %v4948_v49 = vmul.f32 0.5, %v14958_v46  ;;  %v5153_v57 = vmul.f32 %v5025_v41, %v12873_v8 }
 0x98c   : > { %14968 = vst [vmem:[#allocation163_spill] sm:$0xff] %v12903_v45  ;;  %14969 = vst [vmem:[#allocation164_spill] sm:$0xff] %v12905_v4  ;;  %9351 = vtanh.f32 %v5596_v31  ;;  %v12916_v7 = vpop.f32.mrb[223].mxu0  ;;  %v12926_v31 = vpop.eup %9341  ;;  %v12929_v59 = vmul.f32 %v5147_v42, %v12814_v17  ;;  %v4956_v18 = vmul.f32 0.5, %v14961_v40  ;;  %v12935_v47 = vadd.f32 %v12556_v55, %v14912_v56  ;;  %7008 = vmatpush1.bf16.msra.mxu1 %v9034_v5  ;;  %v14980_v5 = vld [vmem:[#allocation94_spill] sm:$0xff] }
 0x98d   : > { %14970 = vst [vmem:[#allocation165_spill] sm:$0xff] %v12910_v10  ;;  %14971 = vst [vmem:[#allocation166_spill] sm:$0xff] %v12916_v7  ;;  %v5032_v7 = vmul.f32 0.044715, %v12893_v44  ;;  %v12937_v50 = vpop.eup %9343  ;;  %v12940_v46 = vmul.f32 %v5152_v33, %v12838_v20  ;;  %v12943_v41 = vmul.f32 %v5154_v3, %v12842_v36  ;;  %v5155_v42 = vmul.f32 %v5027_v52, %v12883_v21  ;;  %v14981_v33 = vld [vmem:[#allocation131_spill] sm:$0xff]  ;;  %v14989_v45 = vld [vmem:[#allocation134_spill] sm:$0xff] }
 0x98e   : > { %14972 = vst [vmem:[#allocation167_spill] sm:$0xff] %v12919_v54  ;;  %14973 = vst [vmem:[#allocation168_spill] sm:$0xff] %v12922_v14  ;;  %v5477_v40 = vadd.f32 %v12505_v28, %v12366_v63  ;;  %7090 = vmatprep.subr.bf16.mxu1 %v9039_v23  ;;  %v5034_v54 = vmul.f32 0.044715, %v12910_v10  ;;  %v5033_v55 = vmul.f32 0.044715, %v12914_v6  ;;  %v5485_v22 = vadd.f32 %v14980_v5, %v12455_v61 }
 0x98f   : > { %14974 = vst [vmem:[#allocation169_spill] sm:$0xff] %v12926_v31  ;;  %14975 = vst [vmem:[#allocation170_spill] sm:$0xff] %v12929_v59  ;;  %v9346_v37 = vpop.eup %9345  ;;  %v12954_v59 = vadd.f32 %v14981_v33, %v14902_v26  ;;  %v12957_v52 = vmul.f32 %v5153_v57, %v12873_v8  ;;  %v12960_v28 = vmul.f32 0.5, %v12366_v63  ;;  %v5160_v17 = vmul.f32 %v5032_v7, %v12893_v44  ;;  %v14988_v14 = vld [vmem:[#allocation129_spill] sm:$0xff] }
 0x990   : > { %14976 = vst [vmem:[#allocation171_spill] sm:$0xff] %v12935_v47  ;;  %14977 = vst [vmem:[#allocation172_spill] sm:$0xff] %v12937_v50  ;;  %v9348_v3 = vpop.eup %9347  ;;  %v5605_v23 = vmul.f32 0.7978846, %v5477_v40  ;;  %v5035_v50 = vmul.f32 0.044715, %v12935_v47 }
 0x991   : > { %14978 = vst [vmem:[#allocation173_spill] sm:$0xff] %v12940_v46  ;;  %14979 = vst [vmem:[#allocation174_spill] sm:$0xff] %v12943_v41  ;;  %v5845_v41 = vadd.f32 1.0, %v9346_v37  ;;  %v5853_v36 = vadd.f32 1.0, %v9348_v3  ;;  %v5613_v46 = vmul.f32 0.7978846, %v5485_v22  ;;  %v5162_v3 = vmul.f32 %v5034_v54, %v12910_v10 }
 0x992   : > { %14982 = vst [vmem:[#allocation94_spill] sm:$0xff] %v12957_v52  ;;  %v12965_v5 = vmul.f32 0.5, %v12455_v61  ;;  %9353 = vtanh.f32 %v5605_v23  ;;  %v5040_v33 = vmul.f32 0.044715, %v12954_v59  ;;  %v14983_v37 = vld [vmem:[#allocation133_spill] sm:$0xff]  ;;  %v5161_v22 = vmul.f32 %v5033_v55, %v12914_v6  ;;  %v14986_v61 = vld [vmem:[#allocation126_spill] sm:$0xff] }
 0x993   : > { %v12970_v57 = vadd.f32 %v14983_v37, %v14903_v38  ;;  %v9350_v20 = vpop.eup %9349  ;;  %v5973_v63 = vmul.f32 %v5845_v41, %v12860_v2  ;;  %v5981_v40 = vmul.f32 %v5853_v36, %v4957_v39  ;;  %9355 = vtanh.f32 %v5613_v46  ;;  %v14985_v52 = vld [vmem:[#allocation109_spill] sm:$0xff]  ;;  %v14987_v23 = vld [vmem:[#allocation119_spill] sm:$0xff]  ;;  %v14990_v36 = vld [vmem:[#allocation64_spill] sm:$0xff] }
 0x994   : > { %v5844_v7 = vadd.f32 1.0, %v9350_v20  ;;  %v5476_v8 = vadd.f32 %v14986_v61, %v14985_v52  ;;  %v5484_v0 = vadd.f32 %v14988_v14, %v14987_v23  ;;  %v5163_v37 = vmul.f32 %v5035_v50, %v12935_v47 }
 0x995   : > { %14984 = vst [vmem:[#allocation131_spill] sm:$0xff] %v12970_v57  ;;  %v6061_v4 = vpack.c.bf16 %v5981_v40, %v5973_v63  ;;  %v12982_v2 = vadd.f32 %v14989_v45, %v14910_v35  ;;  %v12986_v39 = vadd.f32 %v14990_v36, %v14912_v56  ;;  %v5168_v54 = vmul.f32 %v5040_v33, %v12954_v59 }
 0x996   : > { %v9352_v31 = vpop.eup %9351  ;;  %v5042_v46 = vmul.f32 0.044715, %v12970_v57  ;;  %v5604_v41 = vmul.f32 0.7978846, %v5476_v8  ;;  %v5972_v14 = vmul.f32 %v5844_v7, %v4948_v49  ;;  %v5612_v55 = vmul.f32 0.7978846, %v5484_v0 }
 0x997   : > { %14991 = vst [vmem:[#allocation133_spill] sm:$0xff] %v12986_v39  ;;  %v5852_v20 = vadd.f32 1.0, %v9352_v31  ;;  %6946 = vmatprep.mubr.bf16.mxu1 %v6061_v4  ;;  %v5041_v63 = vmul.f32 0.044715, %v12982_v2  ;;  %v5043_v50 = vmul.f32 0.044715, %v12986_v39  ;;  %v12994_v45 = vadd.f32 %v12600_v9, %v14902_v26 }
 0x998   : > { %9357 = vtanh.f32 %v5604_v41  ;;  %v12998_v31 = vadd.f32 %v12608_v62, %v14903_v38  ;;  %v13001_v33 = vmul.f32 %v5155_v42, %v12883_v21  ;;  %v13004_v4 = vmul.f32 %v5160_v17, %v12893_v44 }
 0x999   : > { %v5980_v40 = vmul.f32 %v5852_v20, %v4956_v18  ;;  %14992 = vst [vmem:[#allocation109_spill] sm:$0xff] %v12994_v45  ;;  %v13007_v0 = vmul.f32 %v5162_v3, %v12910_v10  ;;  %9359 = vtanh.f32 %v5612_v55  ;;  %v5170_v49 = vmul.f32 %v5042_v46, %v12970_v57 }
 0x99a   : > { %14993 = vst [vmem:[#allocation126_spill] sm:$0xff] %v12998_v31  ;;  %14994 = vst [vmem:[#allocation119_spill] sm:$0xff] %v13001_v33  ;;  %v5169_v9 = vmul.f32 %v5041_v63, %v12982_v2  ;;  %v13013_v18 = vadd.f32 %v12610_v12, %v14910_v35  ;;  %v13016_v62 = vmul.f32 %v5161_v22, %v12914_v6  ;;  %v4964_v17 = vmul.f32 0.5, %v14985_v52  ;;  %v15031_v33 = vld [vmem:[#allocation73_spill] sm:$0xff] }
 0x99b   : > { %14995 = vst [vmem:[#allocation129_spill] sm:$0xff] %v13007_v0  ;;  %v6060_v8 = vpack.c.bf16 %v5980_v40, %v5972_v14  ;;  %v13019_v42 = vmul.f32 %v5163_v37, %v12935_v47  ;;  %v5171_v3 = vmul.f32 %v5043_v50, %v12986_v39  ;;  %v13024_v61 = vmul.f32 %v5168_v54, %v12954_v59  ;;  %v15000_v40 = vld [vmem:[#allocation45_spill] sm:$0xff]  ;;  %v15030_v47 = vld [vmem:[#allocation68_spill] sm:$0xff] }
 0x99c   : > { %v9354_v7 = vpop.eup %9353  ;;  %v4972_v36 = vmul.f32 0.5, %v14987_v23  ;;  %v5048_v12 = vmul.f32 0.044715, %v12994_v45  ;;  %v5050_v20 = vmul.f32 0.044715, %v12998_v31  ;;  %v13031_v37 = vadd.f32 %v12622_v43, %v14912_v56 }
 0x99d   : > { %14996 = vst [vmem:[#allocation134_spill] sm:$0xff] %v13019_v42  ;;  %6947 = vmatmul.mubr.bf16.gmra.mrb[116].mxu1 %v6060_v8  ;;  %v9356_v22 = vpop.eup %9355  ;;  %v5861_v46 = vadd.f32 1.0, %v9354_v7  ;;  %v5493_v52 = vadd.f32 %v12637_v19, %v12487_v29  ;;  %v5501_v41 = vadd.f32 %v12681_v34, %v12587_v48  ;;  %v13038_v14 = vmul.f32 %v5170_v49, %v12970_v57  ;;  %v15007_v57 = vld [vmem:[#allocation139_spill] sm:$0xff]  ;;  %v15014_v42 = vld [vmem:[#allocation52_spill] sm:$0xff] }
 0x99e   : > { %14997 = vst [vmem:[#allocation64_spill] sm:$0xff] %v13031_v37  ;;  %v5869_v54 = vadd.f32 1.0, %v9356_v22  ;;  %v13041_v23 = vmul.f32 %v5169_v9, %v12982_v2  ;;  %v5049_v55 = vmul.f32 0.044715, %v13013_v18  ;;  %v13045_v63 = vmul.f32 %v5171_v3, %v12986_v39  ;;  %v15002_v22 = vld [vmem:[#allocation135_spill] sm:$0xff] }
 0x99f   : > { %14998 = vst [vmem:[#allocation175_spill] sm:$0xff] %v13038_v14  ;;  %v5621_v43 = vmul.f32 0.7978846, %v5493_v52  ;;  %v5629_v50 = vmul.f32 0.7978846, %v5501_v41  ;;  %v13049_v19 = vadd.f32 %v15000_v40, %v14902_v26  ;;  %v5989_v34 = vmul.f32 %v5861_v46, %v12960_v28  ;;  %v15005_v46 = vld [vmem:[#allocation86_spill] sm:$0xff] }
 0x9a0   : > { %14999 = vst [vmem:[#allocation176_spill] sm:$0xff] %v13045_v63  ;;  %v5997_v8 = vmul.f32 %v5869_v54, %v12965_v5  ;;  %v5176_v49 = vmul.f32 %v5048_v12, %v12994_v45  ;;  %v13055_v9 = vmul.f32 0.5, %v12487_v29  ;;  %v5178_v7 = vmul.f32 %v5050_v20, %v12998_v31  ;;  %v15004_v5 = vld [vmem:[#allocation123_spill] sm:$0xff]  ;;  %v15006_v20 = vld [vmem:[#allocation132_spill] sm:$0xff] }
 0x9a1   : > { %15001 = vst [vmem:[#allocation45_spill] sm:$0xff] %v13049_v19  ;;  %v5051_v3 = vmul.f32 0.044715, %v13031_v37  ;;  %9361 = vtanh.f32 %v5621_v43  ;;  %v13061_v52 = vadd.f32 %v15002_v22, %v14903_v38  ;;  %v5177_v28 = vmul.f32 %v5049_v55, %v13013_v18  ;;  %v15008_v43 = vld [vmem:[#allocation136_spill] sm:$0xff] }
 0x9a2   : > { %v9358_v41 = vpop.eup %9357  ;;  %v6069_v40 = vpack.c.bf16 %v5997_v8, %v5989_v34  ;;  %9363 = vtanh.f32 %v5629_v50  ;;  %v5492_v12 = vadd.f32 %v15005_v46, %v15004_v5  ;;  %v5056_v14 = vmul.f32 0.044715, %v13049_v19  ;;  %v15009_v50 = vld [vmem:[#allocation138_spill] sm:$0xff] }
 0x9a3   : > { %15003 = vst [vmem:[#allocation135_spill] sm:$0xff] %v13061_v52  ;;  %v9360_v54 = vpop.eup %9359  ;;  %v5860_v29 = vadd.f32 1.0, %v9358_v41  ;;  %v5500_v0 = vadd.f32 %v15007_v57, %v15006_v20  ;;  %v13071_v10 = vadd.f32 %v15008_v43, %v14910_v35  ;;  %v4989_v34 = vmul.f32 0.5, %v12587_v48 }
 0x9a4   : > { %6956 = vmatprep.mubr.bf16.mxu1 %v6069_v40  ;;  %v5868_v22 = vadd.f32 1.0, %v9360_v54  ;;  %v5620_v55 = vmul.f32 0.7978846, %v5492_v12  ;;  %v13076_v8 = vadd.f32 %v15009_v50, %v14912_v56  ;;  %v13079_v41 = vmul.f32 %v5176_v49, %v12994_v45  ;;  %v15013_v50 = vld [vmem:[#allocation44_spill] sm:$0xff] }
 0x9a5   : > { %v5179_v46 = vmul.f32 %v5051_v3, %v13031_v37  ;;  %v5058_v57 = vmul.f32 0.044715, %v13061_v52  ;;  %v5628_v63 = vmul.f32 0.7978846, %v5500_v0  ;;  %v5988_v39 = vmul.f32 %v5860_v29, %v4964_v17  ;;  %v15015_v17 = vld [vmem:[#allocation46_spill] sm:$0xff] }
 0x9a6   : > { %15010 = vst [vmem:[#allocation123_spill] sm:$0xff] %v13076_v8  ;;  %15011 = vst [vmem:[#allocation86_spill] sm:$0xff] %v13079_v41  ;;  %v5996_v43 = vmul.f32 %v5868_v22, %v4972_v36  ;;  %v13084_v40 = vmul.f32 %v5178_v7, %v12998_v31  ;;  %9365 = vtanh.f32 %v5620_v55  ;;  %v13087_v48 = vmul.f32 %v5177_v28, %v13013_v18  ;;  %v15016_v36 = vld [vmem:[#allocation58_spill] sm:$0xff] }
 0x9a7   : > { %v5184_v12 = vmul.f32 %v5056_v14, %v13049_v19  ;;  %9367 = vtanh.f32 %v5628_v63  ;;  %v5057_v49 = vmul.f32 0.044715, %v13071_v10  ;;  %v5059_v3 = vmul.f32 0.044715, %v13076_v8  ;;  %v15018_v22 = vld [vmem:[#allocation98_spill] sm:$0xff] }
 0x9a8   : > { %15012 = vst [vmem:[#allocation132_spill] sm:$0xff] %v13084_v40  ;;  %v6068_v54 = vpack.c.bf16 %v5996_v43, %v5988_v39  ;;  %v5383_v0 = vadd.f32 %v15014_v42, %v15013_v50  ;;  %v5391_v29 = vadd.f32 %v15016_v36, %v15015_v17  ;;  %v13097_v7 = vmul.f32 %v5179_v46, %v13031_v37  ;;  %v15019_v63 = vld [vmem:[#allocation90_spill] sm:$0xff]  ;;  %v15021_v46 = vld [vmem:[#allocation105_spill] sm:$0xff] }
 0x9a9   : > { %v5186_v28 = vmul.f32 %v5058_v57, %v13061_v52  ;;  %v13102_v14 = vadd.f32 %v15018_v22, %v14902_v26  ;;  %v13106_v39 = vadd.f32 %v15019_v63, %v14903_v38  ;;  %v13110_v42 = vadd.f32 %v12687_v32, %v14910_v35  ;;  %v15039_v41 = vld [vmem:[#allocation62_spill] sm:$0xff] }
 0x9aa   : > { %15017 = vst [vmem:[#allocation139_spill] sm:$0xff] %v13097_v7  ;;  %6957 = vmatmul.mubr.bf16.gmra.mrb[120].mxu1 %v6068_v54  ;;  %v5511_v55 = vmul.f32 0.7978846, %v5383_v0  ;;  %v5519_v43 = vmul.f32 0.7978846, %v5391_v29  ;;  %v13114_v36 = vadd.f32 %v15021_v46, %v14912_v56  ;;  %v13117_v40 = vmul.f32 %v5184_v12, %v13049_v19  ;;  %v15038_v19 = vld [vmem:[#allocation54_spill] sm:$0xff] }
 0x9ab   : > { %15020 = vst [vmem:[#allocation136_spill] sm:$0xff] %v13106_v39  ;;  %v9362_v57 = vpop.eup %9361  ;;  %v4980_v22 = vmul.f32 0.5, %v15004_v5  ;;  %v4988_v63 = vmul.f32 0.5, %v15006_v20  ;;  %v5185_v54 = vmul.f32 %v5057_v49, %v13071_v10  ;;  %v5187_v31 = vmul.f32 %v5059_v3, %v13076_v8 }
 0x9ac   : > { %15022 = vst [vmem:[#allocation138_spill] sm:$0xff] %v13114_v36  ;;  %15023 = vst [vmem:[#allocation44_spill] sm:$0xff] %v13117_v40  ;;  %v9364_v0 = vpop.eup %9363  ;;  %v5877_v29 = vadd.f32 1.0, %v9362_v57  ;;  %9369 = vtanh.f32 %v5511_v55  ;;  %v5064_v32 = vmul.f32 0.044715, %v13102_v14  ;;  %v13125_v46 = vmul.f32 %v5186_v28, %v13061_v52  ;;  %v15026_v28 = vld [vmem:[#allocation140_spill] sm:$0xff] }
 0x9ad   : > { %v5885_v7 = vadd.f32 1.0, %v9364_v0  ;;  %9371 = vtanh.f32 %v5519_v43  ;;  %v5066_v12 = vmul.f32 0.044715, %v13106_v39  ;;  %v4871_v5 = vmul.f32 0.5, %v15013_v50 }
 0x9ae   : > { %15024 = vst [vmem:[#allocation52_spill] sm:$0xff] %v13125_v46  ;;  %v4879_v20 = vmul.f32 0.5, %v15015_v17  ;;  %v5065_v49 = vmul.f32 0.044715, %v13110_v42  ;;  %v5067_v57 = vmul.f32 0.044715, %v13114_v36  ;;  %v6005_v3 = vmul.f32 %v5877_v29, %v13055_v9 }
 0x9af   : > { %v6013_v55 = vmul.f32 %v5885_v7, %v4989_v34  ;;  %v13134_v37 = vmul.f32 %v5185_v54, %v13071_v10  ;;  %v13138_v0 = vadd.f32 %v15026_v28, %v14902_v26  ;;  %v13141_v46 = vmul.f32 %v5187_v31, %v13076_v8  ;;  %v15028_v17 = vld [vmem:[#allocation141_spill] sm:$0xff] }
 0x9b0   : > { %v9366_v43 = vpop.eup %9365  ;;  %v5192_v50 = vmul.f32 %v5064_v32, %v13102_v14  ;;  %v13146_v52 = vadd.f32 %v15028_v17, %v14903_v38  ;;  %v5766_v9 = vadd.f32 1.0, %v15030_v47  ;;  %v5194_v29 = vmul.f32 %v5066_v12, %v13106_v39  ;;  %v15032_v32 = vld [vmem:[#allocation142_spill] sm:$0xff]  ;;  %v15033_v47 = vld [vmem:[#allocation51_spill] sm:$0xff]  ;;  %v15035_v12 = vld [vmem:[#allocation145_spill] sm:$0xff] }
 0x9b1   : > { %15025 = vst [vmem:[#allocation46_spill] sm:$0xff] %v13134_v37  ;;  %15027 = vst [vmem:[#allocation58_spill] sm:$0xff] %v13141_v46  ;;  %v9368_v34 = vpop.eup %9367  ;;  %v6077_v7 = vpack.c.bf16 %v6013_v55, %v6005_v3  ;;  %v5876_v54 = vadd.f32 1.0, %v9366_v43  ;;  %v5774_v28 = vadd.f32 1.0, %v15031_v33  ;;  %v5193_v40 = vmul.f32 %v5065_v49, %v13110_v42  ;;  %v15034_v3 = vld [vmem:[#allocation53_spill] sm:$0xff] }
 0x9b2   : > { %15029 = vst [vmem:[#allocation98_spill] sm:$0xff] %v13146_v52  ;;  %v5884_v21 = vadd.f32 1.0, %v9368_v34  ;;  %v5195_v31 = vmul.f32 %v5067_v57, %v13114_v36  ;;  %v13155_v46 = vadd.f32 %v15032_v32, %v14910_v35  ;;  %v5072_v17 = vmul.f32 0.044715, %v13138_v0 }
 0x9b3   : > { %6966 = vmatprep.mubr.bf16.mxu1 %v6077_v7  ;;  %v5894_v8 = vmul.f32 %v5766_v9, %v15033_v47  ;;  %v5902_v55 = vmul.f32 %v5774_v28, %v15034_v3  ;;  %v13162_v43 = vadd.f32 %v15035_v12, %v14912_v56  ;;  %v6004_v33 = vmul.f32 %v5876_v54, %v4980_v22  ;;  %v15040_v9 = vld [vmem:[#allocation56_spill] sm:$0xff]  ;;  %v15041_v47 = vld [vmem:[#allocation67_spill] sm:$0xff] }
 0x9b4   : > { %v6012_v34 = vmul.f32 %v5884_v21, %v4988_v63  ;;  %v13165_v49 = vmul.f32 %v5192_v50, %v13102_v14  ;;  %v5074_v57 = vmul.f32 0.044715, %v13146_v52  ;;  %v5073_v7 = vmul.f32 0.044715, %v13155_v46  ;;  %v15042_v21 = vld [vmem:[#allocation96_spill] sm:$0xff] }
 0x9b5   : > { %15036 = vst [vmem:[#allocation90_spill] sm:$0xff] %v13162_v43  ;;  %v6022_v32 = vpack.c.bf16 %v5902_v55, %v5894_v8  ;;  %v5399_v45 = vadd.f32 %v15039_v41, %v15038_v19  ;;  %v5407_v28 = vadd.f32 %v15041_v47, %v15040_v9  ;;  %v5075_v12 = vmul.f32 0.044715, %v13162_v43 }
 0x9b6   : > { %15037 = vst [vmem:[#allocation105_spill] sm:$0xff] %v13165_v49  ;;  %v9370_v3 = vpop.eup %9369  ;;  %v6076_v37 = vpack.c.bf16 %v6012_v34, %v6004_v33  ;;  %v13176_v22 = vadd.f32 %v15042_v21, %v14902_v26  ;;  %v13180_v63 = vadd.f32 %v12754_v16, %v14903_v38  ;;  %v13183_v54 = vmul.f32 %v5194_v29, %v13106_v39  ;;  %v15046_v29 = vld [vmem:[#allocation146_spill] sm:$0xff]  ;;  %v15063_v39 = vld [vmem:[#allocation63_spill] sm:$0xff] }
 0x9b7   : > { %v9372_v8 = vpop.eup %9371  ;;  %v5767_v50 = vadd.f32 1.0, %v9370_v3  ;;  %v5527_v41 = vmul.f32 0.7978846, %v5399_v45  ;;  %v5535_v55 = vmul.f32 0.7978846, %v5407_v28  ;;  %v5200_v33 = vmul.f32 %v5072_v17, %v13138_v0 }
 0x9b8   : > { %15043 = vst [vmem:[#allocation140_spill] sm:$0xff] %v13176_v22  ;;  %15044 = vst [vmem:[#allocation141_spill] sm:$0xff] %v13180_v63  ;;  %6967 = vmatmul.mubr.bf16.gmra.mrb[124].mxu1 %v6076_v37  ;;  %v5775_v47 = vadd.f32 1.0, %v9372_v8  ;;  %v5202_v34 = vmul.f32 %v5074_v57, %v13146_v52  ;;  %v5080_v21 = vmul.f32 0.044715, %v13176_v22  ;;  %v13189_v49 = vmul.f32 %v5193_v40, %v13110_v42 }
 0x9b9   : > { %15045 = vst [vmem:[#allocation68_spill] sm:$0xff] %v13183_v54  ;;  %9373 = vtanh.f32 %v5527_v41  ;;  %v5082_v16 = vmul.f32 0.044715, %v13180_v63  ;;  %v13194_v3 = vadd.f32 %v15046_v29, %v14910_v35  ;;  %v5895_v45 = vmul.f32 %v5767_v50, %v4871_v5 }
 0x9ba   : > { %v5903_v37 = vmul.f32 %v5775_v47, %v4879_v20  ;;  %v13197_v28 = vmul.f32 %v5195_v31, %v13114_v36  ;;  %9375 = vtanh.f32 %v5535_v55  ;;  %v5201_v17 = vmul.f32 %v5073_v7, %v13155_v46  ;;  %v9037_v31 = vld [vmem:[%s9809_s2 + $0x200] ss:$8 sps:$4 sm:$0xff]   ;;  %v9042_v55 = vld [vmem:[%s9809_s2 + $0x214] ss:$8 sps:$4 sm:$0xff]  }
 0x9bb   : > { %v5203_v40 = vmul.f32 %v5075_v12, %v13162_v43  ;;  %v5208_v57 = vmul.f32 %v5080_v21, %v13176_v22  ;;  %v13204_v8 = vadd.f32 %v12761_v1, %v14912_v56  ;;  %v13207_v29 = vmul.f32 %v5200_v33, %v13138_v0  ;;  %v15052_v33 = vld [vmem:[#allocation50_spill] sm:$0xff]  ;;  %v15054_v21 = vld [vmem:[#allocation55_spill] sm:$0xff] }
 0x9bc   : > { %15047 = vst [vmem:[#allocation73_spill] sm:$0xff] %v13197_v28  ;;  %v6023_v41 = vpack.c.bf16 %v5903_v37, %v5895_v45  ;;  %v13210_v5 = vmul.f32 %v5202_v34, %v13146_v52  ;;  %v13214_v20 = vadd.f32 %v12763_v30, %v14902_v26  ;;  %v4887_v7 = vmul.f32 0.5, %v15038_v19  ;;  %v15053_v34 = vld [vmem:[#allocation59_spill] sm:$0xff]  ;;  %v15055_v45 = vld [vmem:[#allocation65_spill] sm:$0xff]  ;;  %v15056_v19 = vld [vmem:[#allocation148_spill] sm:$0xff] }
 0x9bd   : > { %15048 = vst [vmem:[#allocation142_spill] sm:$0xff] %v13204_v8  ;;  %15049 = vst [vmem:[#allocation51_spill] sm:$0xff] %v13207_v29  ;;  %v5210_v12 = vmul.f32 %v5082_v16, %v13180_v63  ;;  %v5081_v50 = vmul.f32 0.044715, %v13194_v3  ;;  %v13222_v1 = vadd.f32 %v12770_v13, %v14903_v38  ;;  %v5083_v47 = vmul.f32 0.044715, %v13204_v8 }
 0x9be   : > { %15050 = vst [vmem:[#allocation53_spill] sm:$0xff] %v13210_v5  ;;  %7009 = vmatprep.mubr.bf16.mxu1 %v6023_v41  ;;  %v5398_v30 = vadd.f32 %v15053_v34, %v15052_v33  ;;  %v5406_v37 = vadd.f32 %v15055_v45, %v15054_v21  ;;  %v13232_v16 = vadd.f32 %v15056_v19, %v14910_v35  ;;  %v4895_v41 = vmul.f32 0.5, %v15040_v9 }
 0x9bf   : > { %15051 = vst [vmem:[#allocation145_spill] sm:$0xff] %v13222_v1  ;;  %v13235_v5 = vmul.f32 %v5201_v17, %v13155_v46  ;;  %v13238_v13 = vmul.f32 %v5203_v40, %v13162_v43  ;;  %v13242_v52 = vmul.f32 %v5208_v57, %v13176_v22  ;;  %v5088_v34 = vmul.f32 0.044715, %v13214_v20  ;;  %v9040_v17 = vld [vmem:[%s9809_s2 + $0x210] ss:$8 sps:$4 sm:$0xff]  }
 0x9c0   : > { %7010 = vmatmul.mubr.bf16.vlgmr.msra.gmra.mrb[96].mxu1 %v6022_v32  ;;  %v5526_v45 = vmul.f32 0.7978846, %v5398_v30  ;;  %v5534_v54 = vmul.f32 0.7978846, %v5406_v37  ;;  %v13247_v19 = vadd.f32 %v12779_v27, %v14912_v56  ;;  %v13251_v40 = vmul.f32 %v5210_v12, %v13180_v63  ;;  %v9045_v27 = vld [vmem:[%s9809_s2 + $0x224] ss:$8 sps:$4 sm:$0xff]  }
 0x9c1   : > { %15057 = vst [vmem:[#allocation54_spill] sm:$0xff] %v13238_v13  ;;  %15058 = vst [vmem:[#allocation62_spill] sm:$0xff] %v13242_v52  ;;  %7091 = vmatpush1.bf16.msra.mxu1 %v9037_v31  ;;  %v5209_v9 = vmul.f32 %v5081_v50, %v13194_v3  ;;  %v5090_v57 = vmul.f32 0.044715, %v13222_v1  ;;  %v13256_v32 = vmul.f32 0.5, %v15052_v33  ;;  %v5211_v30 = vmul.f32 %v5083_v47, %v13204_v8  ;;  %v15062_v50 = vld [vmem:[#allocation75_spill] sm:$0xff] }
 0x9c2   : > { %15059 = vst [vmem:[#allocation56_spill] sm:$0xff] %v13247_v19  ;;  %15060 = vst [vmem:[#allocation67_spill] sm:$0xff] %v13251_v40  ;;  %7092 = vmatprep.subr.bf16.mxu1 %v9042_v55  ;;  %v13260_v37 = vmul.f32 0.5, %v15054_v21  ;;  %9377 = vtanh.f32 %v5526_v45  ;;  %v5089_v31 = vmul.f32 0.044715, %v13232_v16  ;;  %v15061_v40 = vld [vmem:[#allocation60_spill] sm:$0xff]  ;;  %v13270_v55 = vadd.f32 %v12808_v51, %v14902_v26 }
 0x9c3   : > { %v9374_v12 = vpop.eup %9373  ;;  %9379 = vtanh.f32 %v5534_v54  ;;  %v5415_v63 = vadd.f32 %v15062_v50, %v15061_v40  ;;  %v15064_v13 = vld [vmem:[#allocation81_spill] sm:$0xff]  ;;  %v5216_v21 = vmul.f32 %v5088_v34, %v13214_v20  ;;  %v9043_v45 = vld [vmem:[%s9809_s2 + $0x220] ss:$8 sps:$4 sm:$0xff]   ;;  %v5091_v28 = vmul.f32 0.044715, %v13247_v19 }
 0x9c4   : > { %v5423_v43 = vadd.f32 %v15064_v13, %v15063_v39  ;;  %15065 = vst [vmem:[#allocation96_spill] sm:$0xff] %v13270_v55  ;;  %v9376_v47 = vpop.eup %9375  ;;  %v5783_v33 = vadd.f32 1.0, %v9374_v12  ;;  %v13277_v54 = vadd.f32 %v12816_v11, %v14903_v38  ;;  %v13281_v52 = vadd.f32 %v12818_v58, %v14910_v35  ;;  %v9048_v12 = vld [vmem:[%s9809_s2 + $0x234] ss:$8 sps:$4 sm:$0xff]  }
 0x9c5   : > { %v5791_v50 = vadd.f32 1.0, %v9376_v47  ;;  %7093 = vmatpush1.bf16.msra.mxu1 %v9040_v17  ;;  %v5543_v36 = vmul.f32 0.7978846, %v5415_v63  ;;  %v5218_v51 = vmul.f32 %v5090_v57, %v13222_v1  ;;  %v5217_v34 = vmul.f32 %v5089_v31, %v13232_v16 }
 0x9c6   : > { %15066 = vst [vmem:[#allocation146_spill] sm:$0xff] %v13277_v54  ;;  %v5551_v13 = vmul.f32 0.7978846, %v5423_v43  ;;  %15067 = vst [vmem:[#allocation50_spill] sm:$0xff] %v13281_v52  ;;  %7094 = vmatprep.subr.bf16.mxu1 %v9045_v27  ;;  %v5096_v22 = vmul.f32 0.044715, %v13270_v55  ;;  %v5911_v29 = vmul.f32 %v5783_v33, %v4887_v7  ;;  %v13290_v58 = vmul.f32 %v5209_v9, %v13194_v3 }
 0x9c7   : > { %v5098_v11 = vmul.f32 0.044715, %v13277_v54  ;;  %v5919_v47 = vmul.f32 %v5791_v50, %v4895_v41  ;;  %9381 = vtanh.f32 %v5543_v36  ;;  %v5097_v43 = vmul.f32 0.044715, %v13281_v52  ;;  %v9046_v7 = vld [vmem:[%s9809_s2 + $0x230] ss:$8 sps:$4 sm:$0xff]  }
 0x9c8   : > { %v5219_v63 = vmul.f32 %v5091_v28, %v13247_v19  ;;  %9383 = vtanh.f32 %v5551_v13  ;;  %v13295_v17 = vadd.f32 %v12830_v60, %v14912_v56  ;;  %v13298_v27 = vmul.f32 %v5211_v30, %v13204_v8  ;;  %v9051_v30 = vld [vmem:[%s9809_s2 + $0x244] ss:$8 sps:$4 sm:$0xff]   ;;  %v15072_v33 = vld [vmem:[#allocation120_spill] sm:$0xff]  ;;  %v15075_v13 = vld [vmem:[#allocation57_spill] sm:$0xff] }
 0x9c9   : > { %v6031_v57 = vpack.c.bf16 %v5919_v47, %v5911_v29  ;;  %7095 = vmatpush1.bf16.msra.mxu1 %v9043_v45  ;;  %v5224_v36 = vmul.f32 %v5096_v22, %v13270_v55  ;;  %v13304_v41 = vadd.f32 %v12832_v24, %v14902_v26  ;;  %v13307_v9 = vmul.f32 %v5216_v21, %v13214_v20 }
 0x9ca   : > { %15068 = vst [vmem:[#allocation59_spill] sm:$0xff] %v13295_v17  ;;  %15069 = vst [vmem:[#allocation55_spill] sm:$0xff] %v13298_v27  ;;  %v13310_v28 = vmul.f32 %v5218_v51, %v13222_v1  ;;  %v4903_v60 = vmul.f32 0.5, %v15061_v40  ;;  %7096 = vmatprep.subr.bf16.mxu1 %v9048_v12  ;;  %v5226_v29 = vmul.f32 %v5098_v11, %v13277_v54  ;;  %v4911_v24 = vmul.f32 0.5, %v15063_v39  ;;  %v15076_v51 = vld [vmem:[#allocation69_spill] sm:$0xff]  ;;  %v15078_v11 = vld [vmem:[#allocation79_spill] sm:$0xff] }
 0x9cb   : > { %15070 = vst [vmem:[#allocation65_spill] sm:$0xff] %v13304_v41  ;;  %7019 = vmatprep.mubr.bf16.mxu1 %v6031_v57  ;;  %v13316_v22 = vmul.f32 %v5217_v34, %v13232_v16  ;;  %v5225_v31 = vmul.f32 %v5097_v43, %v13281_v52  ;;  %v13322_v21 = vadd.f32 %v15072_v33, %v14903_v38  ;;  %v5099_v50 = vmul.f32 0.044715, %v13295_v17  ;;  %v15077_v34 = vld [vmem:[#allocation61_spill] sm:$0xff]  ;;  %v9049_v57 = vld [vmem:[%s9809_s2 + $0x240] ss:$8 sps:$4 sm:$0xff]  }
 0x9cc   : > { %15071 = vst [vmem:[#allocation148_spill] sm:$0xff] %v13310_v28  ;;  %v9378_v45 = vpop.eup %9377  ;;  %v13325_v40 = vmul.f32 %v5219_v63, %v13247_v19  ;;  %v5414_v12 = vadd.f32 %v15076_v51, %v15075_v13  ;;  %v5422_v47 = vadd.f32 %v15078_v11, %v15077_v34  ;;  %v13334_v43 = vmul.f32 %v5224_v36, %v13270_v55  ;;  %v15080_v63 = vld [vmem:[#allocation158_spill] sm:$0xff] }
 0x9cd   : > { %15073 = vst [vmem:[#allocation60_spill] sm:$0xff] %v13322_v21  ;;  %v9380_v39 = vpop.eup %9379  ;;  %v5782_v28 = vadd.f32 1.0, %v9378_v45  ;;  %7097 = vmatpush1.bf16.msra.mxu1 %v9046_v7  ;;  %v5104_v33 = vmul.f32 0.044715, %v13304_v41  ;;  %v13339_v1 = vadd.f32 %v15080_v63, %v14910_v35  ;;  %v13343_v51 = vmul.f32 %v5226_v29, %v13277_v54  ;;  %v15084_v63 = vld [vmem:[#allocation160_spill] sm:$0xff] }
 0x9ce   : > { %15074 = vst [vmem:[#allocation75_spill] sm:$0xff] %v13325_v40  ;;  %15079 = vst [vmem:[#allocation63_spill] sm:$0xff] %v13334_v43  ;;  %v9054_v40 = vld [vmem:[%s9809_s2 + $0x254] ss:$8 sps:$4 sm:$0xff]   ;;  %v5790_v19 = vadd.f32 1.0, %v9380_v39  ;;  %7098 = vmatprep.subr.bf16.mxu1 %v9051_v30  ;;  %v13346_v7 = vmul.f32 %v5225_v31, %v13281_v52  ;;  %v13350_v45 = vmul.f32 0.5, %v15075_v13  ;;  %v13354_v8 = vadd.f32 %v15084_v63, %v14912_v56 }
 0x9cf   : > { %15081 = vst [vmem:[#allocation81_spill] sm:$0xff] %v13339_v1  ;;  %15082 = vst [vmem:[#allocation120_spill] sm:$0xff] %v13343_v51  ;;  %v5542_v27 = vmul.f32 0.7978846, %v5414_v12  ;;  %v5550_v11 = vmul.f32 0.7978846, %v5422_v47  ;;  %v5910_v39 = vmul.f32 %v5782_v28, %v13256_v32  ;;  %v5227_v12 = vmul.f32 %v5099_v50, %v13295_v17 }
 0x9d0   : > { %15083 = vst [vmem:[#allocation57_spill] sm:$0xff] %v13346_v7  ;;  %v5106_v36 = vmul.f32 0.044715, %v13322_v21  ;;  %15085 = vst [vmem:[#allocation69_spill] sm:$0xff] %v13354_v8  ;;  %v5918_v29 = vmul.f32 %v5790_v19, %v13260_v37  ;;  %v5232_v31 = vmul.f32 %v5104_v33, %v13304_v41  ;;  %v5105_v47 = vmul.f32 0.044715, %v13339_v1 }
 0x9d1   : > { %9385 = vtanh.f32 %v5542_v27  ;;  %v9382_v30 = vpop.eup %9381  ;;  %v15086_v13 = vld [vmem:[#allocation70_spill] sm:$0xff]  ;;  %v15087_v51 = vld [vmem:[#allocation85_spill] sm:$0xff]  ;;  %7099 = vmatpush1.bf16.msra.mxu1 %v9049_v57  ;;  %v15088_v28 = vld [vmem:[#allocation76_spill] sm:$0xff] }
 0x9d2   : > { %9387 = vtanh.f32 %v5550_v11  ;;  %v5431_v54 = vadd.f32 %v15087_v51, %v15086_v13  ;;  %v9052_v63 = vld [vmem:[%s9809_s2 + $0x250] ss:$8 sps:$4 sm:$0xff]   ;;  %v9384_v43 = vpop.eup %9383  ;;  %v6030_v55 = vpack.c.bf16 %v5918_v29, %v5910_v39  ;;  %v5799_v32 = vadd.f32 1.0, %v9382_v30  ;;  %v15089_v19 = vld [vmem:[#allocation95_spill] sm:$0xff]  ;;  %7100 = vmatprep.subr.bf16.mxu1 %v9054_v40 }
 0x9d3   : > { %v5439_v37 = vadd.f32 %v15089_v19, %v15088_v28  ;;  %v15090_v27 = vld [vmem:[#allocation103_spill] sm:$0xff]  ;;  %v5807_v11 = vadd.f32 1.0, %v9384_v43  ;;  %v5234_v7 = vmul.f32 %v5106_v36, %v13322_v21  ;;  %v5107_v51 = vmul.f32 0.044715, %v13354_v8  ;;  %v15093_v43 = vld [vmem:[#allocation162_spill] sm:$0xff] }
 0x9d4   : > { %v13368_v50 = vadd.f32 %v15090_v27, %v14902_v26  ;;  %v9057_v33 = vld [vmem:[%s9809_s2 + $0x264] ss:$8 sps:$4 sm:$0xff]   ;;  %v5559_v57 = vmul.f32 0.7978846, %v5431_v54  ;;  %7020 = vmatmul.mubr.bf16.gmra.mrb[100].mxu1 %v6030_v55  ;;  %v5927_v39 = vmul.f32 %v5799_v32, %v4903_v60  ;;  %v13376_v40 = vadd.f32 %v12886_v25, %v14903_v38  ;;  %v9055_v55 = vld [vmem:[%s9809_s2 + $0x260] ss:$8 sps:$4 sm:$0xff]  }
 0x9d5   : > { %v5567_v29 = vmul.f32 0.7978846, %v5439_v37  ;;  %v5935_v19 = vmul.f32 %v5807_v11, %v4911_v24  ;;  %7101 = vmatpush1.bf16.msra.mxu1 %v9052_v63  ;;  %v13380_v27 = vadd.f32 %v15093_v43, %v14910_v35  ;;  %v13384_v54 = vadd.f32 %v12895_v53, %v14912_v56  ;;  %v9060_v24 = vld [vmem:[%s9809_s2 + $0x274] ss:$8 sps:$4 sm:$0xff]   ;;  %v15097_v53 = vld [vmem:[#allocation163_spill] sm:$0xff] }
 0x9d6   : > { %15091 = vst [vmem:[#allocation61_spill] sm:$0xff] %v13368_v50  ;;  %v5112_v30 = vmul.f32 0.044715, %v13368_v50  ;;  %15092 = vst [vmem:[#allocation79_spill] sm:$0xff] %v13376_v40  ;;  %9389 = vtanh.f32 %v5559_v57  ;;  %v4910_v60 = vmul.f32 0.5, %v15077_v34  ;;  %v5233_v36 = vmul.f32 %v5105_v47, %v13339_v1  ;;  %7102 = vmatprep.subr.bf16.mxu1 %v9057_v33  ;;  %v15105_v43 = vld [vmem:[#allocation72_spill] sm:$0xff] }
 0x9d7   : > { %15094 = vst [vmem:[#allocation158_spill] sm:$0xff] %v13380_v27  ;;  %15095 = vst [vmem:[#allocation160_spill] sm:$0xff] %v13384_v54  ;;  %9391 = vtanh.f32 %v5567_v29  ;;  %v13391_v25 = vadd.f32 %v12897_v15, %v14902_v26  ;;  %v6039_v63 = vpack.c.bf16 %v5935_v19, %v5927_v39  ;;  %v5235_v32 = vmul.f32 %v5107_v51, %v13354_v8  ;;  %v9058_v33 = vld [vmem:[%s9809_s2 + $0x270] ss:$8 sps:$4 sm:$0xff]   ;;  %v15103_v29 = vld [vmem:[#allocation66_spill] sm:$0xff] }
 0x9d8   : > { %v5114_v37 = vmul.f32 0.044715, %v13376_v40  ;;  %v13398_v11 = vadd.f32 %v15097_v53, %v14903_v38  ;;  %v13401_v34 = vmul.f32 %v5227_v12, %v13295_v17  ;;  %v13404_v47 = vmul.f32 %v5232_v31, %v13304_v41  ;;  %v15104_v19 = vld [vmem:[#allocation83_spill] sm:$0xff]  ;;  %v15144_v41 = vld [vmem:[#allocation82_spill] sm:$0xff] }
 0x9d9   : > { %15096 = vst [vmem:[#allocation70_spill] sm:$0xff] %v13391_v25  ;;  %v13407_v26 = vmul.f32 %v5234_v7, %v13322_v21  ;;  %v5240_v15 = vmul.f32 %v5112_v30, %v13368_v50  ;;  %7029 = vmatprep.mubr.bf16.mxu1 %v6039_v63  ;;  %v4919_v51 = vmul.f32 0.5, %v15086_v13  ;;  %v4927_v57 = vmul.f32 0.5, %v15088_v28  ;;  %7103 = vmatpush1.bf16.msra.mxu1 %v9055_v55  ;;  %v15106_v63 = vld [vmem:[#allocation87_spill] sm:$0xff] }
 0x9da   : > { %15098 = vst [vmem:[#allocation85_spill] sm:$0xff] %v13398_v11  ;;  %15099 = vst [vmem:[#allocation76_spill] sm:$0xff] %v13401_v34  ;;  %v5113_v38 = vmul.f32 0.044715, %v13380_v27  ;;  %v5115_v12 = vmul.f32 0.044715, %v13384_v54  ;;  %v13416_v31 = vmul.f32 %v5233_v36, %v13339_v1  ;;  %v5430_v30 = vadd.f32 %v15104_v19, %v15103_v29  ;;  %7104 = vmatprep.subr.bf16.mxu1 %v9060_v24 }
 0x9db   : > { %15100 = vst [vmem:[#allocation95_spill] sm:$0xff] %v13404_v47  ;;  %15101 = vst [vmem:[#allocation103_spill] sm:$0xff] %v13407_v26  ;;  %v9386_v39 = vpop.eup %9385  ;;  %v5120_v7 = vmul.f32 0.044715, %v13391_v25  ;;  %v5438_v53 = vadd.f32 %v15106_v63, %v15105_v43  ;;  %v9063_v13 = vld [vmem:[%s9809_s2 + $0x284] ss:$8 sps:$4 sm:$0xff]   ;;  %v13425_v21 = vmul.f32 %v5235_v32, %v13354_v8  ;;  %v5242_v55 = vmul.f32 %v5114_v37, %v13376_v40 }
 0x9dc   : > { %15102 = vst [vmem:[#allocation162_spill] sm:$0xff] %v13416_v31  ;;  %v9388_v28 = vpop.eup %9387  ;;  %v5798_v26 = vadd.f32 1.0, %v9386_v39  ;;  %v5122_v36 = vmul.f32 0.044715, %v13398_v11  ;;  %v13430_v17 = vmul.f32 %v5240_v15, %v13368_v50  ;;  %v5558_v19 = vmul.f32 0.7978846, %v5430_v30 }
 0x9dd   : > { %15107 = vst [vmem:[#allocation163_spill] sm:$0xff] %v13425_v21  ;;  %v5806_v34 = vadd.f32 1.0, %v9388_v28  ;;  %v5566_v47 = vmul.f32 0.7978846, %v5438_v53  ;;  %v5241_v24 = vmul.f32 %v5113_v38, %v13380_v27  ;;  %v5243_v63 = vmul.f32 %v5115_v12, %v13384_v54  ;;  %7105 = vmatpush1.bf16.msra.mxu1 %v9058_v33  ;;  %v9061_v37 = vld [vmem:[%s9809_s2 + $0x280] ss:$8 sps:$4 sm:$0xff]  }
 0x9de   : > { %15108 = vst [vmem:[#allocation66_spill] sm:$0xff] %v13430_v17  ;;  %v13435_v39 = vmul.f32 0.5, %v15103_v29  ;;  %v13438_v32 = vmul.f32 0.5, %v15105_v43  ;;  %v5926_v21 = vmul.f32 %v5798_v26, %v13350_v45  ;;  %v5248_v15 = vmul.f32 %v5120_v7, %v13391_v25  ;;  %7106 = vmatprep.subr.bf16.mxu1 %v9063_v13  ;;  %v9066_v30 = vld [vmem:[%s9809_s2 + $0x294] ss:$8 sps:$4 sm:$0xff]   ;;  %v15114_v26 = vld [vmem:[#allocation91_spill] sm:$0xff] }
 0x9df   : > { %v5934_v28 = vmul.f32 %v5806_v34, %v4910_v60  ;;  %9393 = vtanh.f32 %v5558_v19  ;;  %v13445_v12 = vmul.f32 %v5242_v55, %v13376_v40  ;;  %v5250_v29 = vmul.f32 %v5122_v36, %v13398_v11  ;;  %v15110_v43 = vld [vmem:[#allocation84_spill] sm:$0xff]  ;;  %v15115_v7 = vld [vmem:[#allocation110_spill] sm:$0xff]  ;;  %v15125_v40 = vld [vmem:[#allocation99_spill] sm:$0xff] }
 0x9e0   : > { %v9390_v38 = vpop.eup %9389  ;;  %9395 = vtanh.f32 %v5566_v47  ;;  %v15111_v53 = vld [vmem:[#allocation100_spill] sm:$0xff]  ;;  %v5455_v13 = vadd.f32 %v15115_v7, %v15114_v26  ;;  %v13457_v55 = vmul.f32 %v5241_v24, %v13380_v27  ;;  %v13460_v47 = vmul.f32 %v5243_v63, %v13384_v54  ;;  %v9069_v24 = vld [vmem:[%s9809_s2 + $0x2a4] ss:$8 sps:$4 sm:$0xff]  }
 0x9e1   : > { %15109 = vst [vmem:[#allocation83_spill] sm:$0xff] %v13445_v12  ;;  %v5447_v33 = vadd.f32 %v15111_v53, %v15110_v43  ;;  %v9392_v8 = vpop.eup %9391  ;;  %v6038_v17 = vpack.c.bf16 %v5934_v28, %v5926_v21  ;;  %v5815_v45 = vadd.f32 1.0, %v9390_v38  ;;  %v15112_v60 = vld [vmem:[#allocation164_spill] sm:$0xff]  ;;  %7107 = vmatpush1.bf16.msra.mxu1 %v9061_v37  ;;  %v13464_v21 = vmul.f32 %v5248_v15, %v13391_v25  ;;  %v15123_v15 = vld [vmem:[#allocation89_spill] sm:$0xff]  ;;  %v15136_v25 = vld [vmem:[#allocation122_spill] sm:$0xff] }
 0x9e2   : > { %v13452_v34 = vadd.f32 %v15112_v60, %v14910_v35  ;;  %v5823_v19 = vadd.f32 1.0, %v9392_v8  ;;  %15116 = vst [vmem:[#allocation87_spill] sm:$0xff] %v13457_v55  ;;  %15117 = vst [vmem:[#allocation84_spill] sm:$0xff] %v13460_v47  ;;  %v9064_v53 = vld [vmem:[%s9809_s2 + $0x290] ss:$8 sps:$4 sm:$0xff]   ;;  %v15119_v35 = vld [vmem:[#allocation166_spill] sm:$0xff]  ;;  %7108 = vmatprep.subr.bf16.mxu1 %v9066_v30  ;;  %v13474_v37 = vmul.f32 %v5250_v29, %v13398_v11 }
 0x9e3   : > { %v5575_v36 = vmul.f32 0.7978846, %v5447_v33  ;;  %7030 = vmatmul.mubr.bf16.gmra.mrb[104].mxu1 %v6038_v17  ;;  %15118 = vst [vmem:[#allocation100_spill] sm:$0xff] %v13464_v21  ;;  %v13468_v28 = vadd.f32 %v15119_v35, %v14912_v56  ;;  %v5583_v38 = vmul.f32 0.7978846, %v5455_v13  ;;  %v15120_v60 = vld [vmem:[#allocation78_spill] sm:$0xff]  ;;  %v5943_v63 = vmul.f32 %v5815_v45, %v4919_v51 }
 0x9e4   : > { %15113 = vst [vmem:[#allocation72_spill] sm:$0xff] %v13452_v34  ;;  %v15121_v8 = vld [vmem:[#allocation97_spill] sm:$0xff]  ;;  %v5951_v33 = vmul.f32 %v5823_v19, %v4927_v57  ;;  %15122 = vst [vmem:[#allocation164_spill] sm:$0xff] %v13474_v37  ;;  %v5121_v17 = vmul.f32 0.044715, %v13452_v34  ;;  %v15124_v56 = vld [vmem:[#allocation102_spill] sm:$0xff] }
 0x9e5   : > { %v5446_v7 = vadd.f32 %v15121_v8, %v15120_v60  ;;  %9397 = vtanh.f32 %v5575_v36  ;;  %v5454_v35 = vadd.f32 %v15124_v56, %v15123_v15  ;;  %v4935_v8 = vmul.f32 0.5, %v15110_v43  ;;  %v15126_v30 = vld [vmem:[#allocation115_spill] sm:$0xff]  ;;  %v15127_v54 = vld [vmem:[#allocation108_spill] sm:$0xff]  ;;  %v15128_v51 = vld [vmem:[#allocation125_spill] sm:$0xff]  ;;  %7109 = vmatpush1.bf16.msra.mxu1 %v9064_v53 }
 0x9e6   : > { %9399 = vtanh.f32 %v5583_v38  ;;  %v6047_v12 = vpack.c.bf16 %v5951_v33, %v5943_v63  ;;  %v5463_v47 = vadd.f32 %v15126_v30, %v15125_v40  ;;  %v5471_v57 = vadd.f32 %v15128_v51, %v15127_v54  ;;  %v9067_v29 = vld [vmem:[%s9809_s2 + $0x2a0] ss:$8 sps:$4 sm:$0xff]   ;;  %v9072_v45 = vld [vmem:[%s9809_s2 + $0x2b4] ss:$8 sps:$4 sm:$0xff]   ;;  %7110 = vmatprep.subr.bf16.mxu1 %v9069_v24 }
 0x9e7   : > { %v5574_v13 = vmul.f32 0.7978846, %v5446_v7  ;;  %v13487_v19 = vmul.f32 0.044715, %v13468_v28  ;;  %v4943_v36 = vmul.f32 0.5, %v15114_v26  ;;  %v15129_v63 = vld [vmem:[#allocation93_spill] sm:$0xff]  ;;  %v13495_v11 = vmul.f32 %v5121_v17, %v13452_v34 }
 0x9e8   : > { %v5582_v38 = vmul.f32 0.7978846, %v5454_v35  ;;  %7039 = vmatprep.mubr.bf16.mxu1 %v6047_v12  ;;  %v5591_v43 = vmul.f32 0.7978846, %v5463_v47  ;;  %v5599_v7 = vmul.f32 0.7978846, %v5471_v57 }
 0x9e9   : > { %9401 = vtanh.f32 %v5574_v13  ;;  %v15130_v33 = vld [vmem:[#allocation113_spill] sm:$0xff]  ;;  %v15131_v30 = vld [vmem:[#allocation104_spill] sm:$0xff]  ;;  %v15132_v51 = vld [vmem:[#allocation118_spill] sm:$0xff]  ;;  %v9394_v37 = vpop.eup %9393  ;;  %15133 = vst [vmem:[#allocation91_spill] sm:$0xff] %v13495_v11  ;;  %v13498_v21 = vmul.f32 0.5, %v15120_v60  ;;  %7111 = vmatpush1.bf16.msra.mxu1 %v9067_v29  ;;  %v4951_v27 = vmul.f32 0.5, %v15125_v40 }
 0x9ea   : > { %v5462_v56 = vadd.f32 %v15130_v33, %v15129_v63  ;;  %v5470_v53 = vadd.f32 %v15132_v51, %v15131_v30  ;;  %9403 = vtanh.f32 %v5582_v38  ;;  %v15134_v26 = vld [vmem:[#allocation117_spill] sm:$0xff]  ;;  %v15135_v24 = vld [vmem:[#allocation128_spill] sm:$0xff]  ;;  %v9396_v35 = vpop.eup %9395  ;;  %v5814_v13 = vadd.f32 1.0, %v9394_v37  ;;  %v15137_v17 = vld [vmem:[#allocation71_spill] sm:$0xff]  ;;  %7112 = vmatprep.subr.bf16.mxu1 %v9072_v45 }
 0x9eb   : > { %v5479_v12 = vadd.f32 %v15135_v24, %v15134_v26  ;;  %v9070_v47 = vld [vmem:[%s9809_s2 + $0x2b0] ss:$8 sps:$4 sm:$0xff]   ;;  %9405 = vtanh.f32 %v5591_v43  ;;  %v5822_v51 = vadd.f32 1.0, %v9396_v35  ;;  %v5487_v50 = vadd.f32 %v15137_v17, %v15136_v25  ;;  %v9075_v60 = vld [vmem:[%s9809_s2 + $0x2c4] ss:$8 sps:$4 sm:$0xff]  }
 0x9ec   : > { %v5590_v57 = vmul.f32 0.7978846, %v5462_v56  ;;  %v5598_v33 = vmul.f32 0.7978846, %v5470_v53  ;;  %9407 = vtanh.f32 %v5599_v7  ;;  %v5942_v38 = vmul.f32 %v5814_v13, %v13435_v39  ;;  %v15138_v43 = vld [vmem:[#allocation111_spill] sm:$0xff]  ;;  %v15140_v39 = vld [vmem:[#allocation121_spill] sm:$0xff] }
 0x9ed   : > { %v5607_v55 = vmul.f32 0.7978846, %v5479_v12  ;;  %v4942_v24 = vmul.f32 0.5, %v15123_v15  ;;  %v5950_v37 = vmul.f32 %v5822_v51, %v13438_v32  ;;  %v5615_v29 = vmul.f32 0.7978846, %v5487_v50  ;;  %v15139_v7 = vld [vmem:[#allocation127_spill] sm:$0xff]  ;;  %7113 = vmatpush1.bf16.msra.mxu1 %v9070_v47 }
 0x9ee   : > { %9409 = vtanh.f32 %v5590_v57  ;;  %v5478_v56 = vadd.f32 %v15139_v7, %v15138_v43  ;;  %v4959_v45 = vmul.f32 0.5, %v15127_v54  ;;  %v13514_v12 = vmul.f32 0.5, %v15129_v63  ;;  %v15141_v15 = vld [vmem:[#allocation74_spill] sm:$0xff]  ;;  %7114 = vmatprep.subr.bf16.mxu1 %v9075_v60  ;;  %v15143_v7 = vld [vmem:[#allocation137_spill] sm:$0xff]  ;;  %v15149_v1 = vld [vmem:[#allocation80_spill] sm:$0xff] }
 0x9ef   : > { %9411 = vtanh.f32 %v5598_v33  ;;  %v9398_v53 = vpop.eup %9397  ;;  %v5486_v40 = vadd.f32 %v15141_v15, %v15140_v39  ;;  %v9073_v35 = vld [vmem:[%s9809_s2 + $0x2c0] ss:$8 sps:$4 sm:$0xff]   ;;  %v6046_v32 = vpack.c.bf16 %v5950_v37, %v5942_v38  ;;  %v9078_v33 = vld [vmem:[%s9809_s2 + $0x2d4] ss:$8 sps:$4 sm:$0xff]   ;;  %v4958_v38 = vmul.f32 0.5, %v15131_v30 }
 0x9f0   : > { %9413 = vtanh.f32 %v5607_v55  ;;  %v9400_v13 = vpop.eup %9399  ;;  %v5831_v57 = vadd.f32 1.0, %v9398_v53  ;;  %v5606_v50 = vmul.f32 0.7978846, %v5478_v56  ;;  %v15142_v54 = vld [vmem:[#allocation130_spill] sm:$0xff]  ;;  %v15145_v55 = vld [vmem:[#allocation147_spill] sm:$0xff]  ;;  %v4967_v37 = vmul.f32 0.5, %v15134_v26 }
 0x9f1   : > { %9415 = vtanh.f32 %v5615_v29  ;;  %v5839_v51 = vadd.f32 1.0, %v9400_v13  ;;  %v5614_v17 = vmul.f32 0.7978846, %v5486_v40  ;;  %v5495_v63 = vadd.f32 %v15143_v7, %v15142_v54  ;;  %7040 = vmatmul.mubr.bf16.gmra.mrb[108].mxu1 %v6046_v32  ;;  %v9076_v53 = vld [vmem:[%s9809_s2 + $0x2d0] ss:$8 sps:$4 sm:$0xff]  }
 0x9f2   : > { %v5503_v47 = vadd.f32 %v15145_v55, %v15144_v41  ;;  %v5959_v15 = vmul.f32 %v5831_v57, %v4935_v8  ;;  %9417 = vtanh.f32 %v5606_v50  ;;  %7115 = vmatpush1.bf16.msra.mxu1 %v9073_v35  ;;  %v4975_v13 = vmul.f32 0.5, %v15136_v25  ;;  %v15146_v55 = vld [vmem:[#allocation124_spill] sm:$0xff]  ;;  %v15148_v57 = vld [vmem:[#allocation107_spill] sm:$0xff] }
 0x9f3   : > { %v9402_v31 = vpop.eup %9401  ;;  %v5967_v60 = vmul.f32 %v5839_v51, %v4943_v36  ;;  %9419 = vtanh.f32 %v5614_v17  ;;  %v5623_v56 = vmul.f32 0.7978846, %v5495_v63  ;;  %7116 = vmatprep.subr.bf16.mxu1 %v9078_v33  ;;  %v15147_v32 = vld [vmem:[#allocation48_spill] sm:$0xff]  ;;  %v5502_v30 = vadd.f32 %v15149_v1, %v15148_v57  ;;  %v9081_v11 = vld [vmem:[%s9809_s2 + $0x2e4] ss:$8 sps:$4 sm:$0xff]  }
 0x9f4   : > { %v5830_v29 = vadd.f32 1.0, %v9402_v31  ;;  %v9404_v40 = vpop.eup %9403  ;;  %v5631_v7 = vmul.f32 0.7978846, %v5503_v47  ;;  %v5494_v8 = vadd.f32 %v15147_v32, %v15146_v55  ;;  %v4966_v31 = vmul.f32 0.5, %v15138_v43  ;;  %v15150_v32 = vld [vmem:[#allocation47_spill] sm:$0xff] }
 0x9f5   : > { %v9406_v26 = vpop.eup %9405  ;;  %v6055_v50 = vpack.c.bf16 %v5967_v60, %v5959_v15  ;;  %v5838_v36 = vadd.f32 1.0, %v9404_v40  ;;  %9421 = vtanh.f32 %v5623_v56  ;;  %v5630_v17 = vmul.f32 0.7978846, %v5502_v30  ;;  %v15151_v15 = vld [vmem:[#allocation149_spill] sm:$0xff]  ;;  %v9079_v34 = vld [vmem:[%s9809_s2 + $0x2e0] ss:$8 sps:$4 sm:$0xff]  }
 0x9f6   : > { %v9408_v35 = vpop.eup %9407  ;;  %v5847_v51 = vadd.f32 1.0, %v9406_v26  ;;  %9423 = vtanh.f32 %v5631_v7  ;;  %v5622_v25 = vmul.f32 0.7978846, %v5494_v8  ;;  %v5958_v63 = vmul.f32 %v5830_v29, %v13498_v21  ;;  %7117 = vmatpush1.bf16.msra.mxu1 %v9076_v53  ;;  %v15152_v7 = vld [vmem:[#allocation77_spill] sm:$0xff]  ;;  %v15153_v8 = vld [vmem:[#allocation156_spill] sm:$0xff] }
 0x9f7   : > { %7049 = vmatprep.mubr.bf16.mxu1 %v6055_v50  ;;  %v5966_v47 = vmul.f32 %v5838_v36, %v4942_v24  ;;  %v5855_v1 = vadd.f32 1.0, %v9408_v35  ;;  %v5385_v60 = vadd.f32 %v15151_v15, %v15150_v32  ;;  %7118 = vmatprep.subr.bf16.mxu1 %v9081_v11  ;;  %v5393_v30 = vadd.f32 %v15153_v8, %v15152_v7  ;;  %v9084_v24 = vld [vmem:[%s9809_s2 + $0x2f4] ss:$8 sps:$4 sm:$0xff]  }
 0x9f8   : > { %v9410_v33 = vpop.eup %9409  ;;  %v5975_v43 = vmul.f32 %v5847_v51, %v4951_v27  ;;  %9425 = vtanh.f32 %v5622_v25 }
 0x9f9   : > { %v9412_v40 = vpop.eup %9411  ;;  %v5846_v56 = vadd.f32 1.0, %v9410_v33  ;;  %v6054_v50 = vpack.c.bf16 %v5966_v47, %v5958_v63  ;;  %v5983_v52 = vmul.f32 %v5855_v1, %v4959_v45  ;;  %9427 = vtanh.f32 %v5630_v17  ;;  %v15154_v33 = vld [vmem:[#allocation92_spill] sm:$0xff]  ;;  %v15155_v47 = vld [vmem:[#allocation169_spill] sm:$0xff] }
 0x9fa   : > { %v9414_v26 = vpop.eup %9413  ;;  %v5854_v21 = vadd.f32 1.0, %v9412_v40  ;;  %v5513_v35 = vmul.f32 0.7978846, %v5385_v60  ;;  %v5521_v27 = vmul.f32 0.7978846, %v5393_v30  ;;  %v5768_v15 = vadd.f32 1.0, %v15154_v33  ;;  %7119 = vmatpush1.bf16.msra.mxu1 %v9079_v34 }
 0x9fb   : > { %v9416_v29 = vpop.eup %9415  ;;  %v5974_v53 = vmul.f32 %v5846_v56, %v13514_v12  ;;  %v5863_v36 = vadd.f32 1.0, %v9414_v26  ;;  %7050 = vmatmul.mubr.bf16.gmra.mrb[112].mxu1 %v6054_v50  ;;  %v6063_v51 = vpack.c.bf16 %v5983_v52, %v5975_v43  ;;  %v4974_v45 = vmul.f32 0.5, %v15140_v39  ;;  %v9082_v17 = vld [vmem:[%s9809_s2 + $0x2f0] ss:$8 sps:$4 sm:$0xff]   ;;  %7120 = vmatprep.subr.bf16.mxu1 %v9084_v24  ;;  %v9087_v52 = vld [vmem:[%s9809_s2 + $0x304] ss:$8 sps:$4 sm:$0xff]  }
 0x9fc   : > { %v5982_v25 = vmul.f32 %v5854_v21, %v4958_v38  ;;  %v5871_v11 = vadd.f32 1.0, %v9416_v29  ;;  %v9418_v8 = vpop.eup %9417  ;;  %9429 = vtanh.f32 %v5513_v35  ;;  %v5776_v1 = vadd.f32 1.0, %v15155_v47  ;;  %v15156_v30 = vld [vmem:[#allocation143_spill] sm:$0xff]  ;;  %v15157_v39 = vld [vmem:[#allocation152_spill] sm:$0xff]  ;;  %v15158_v29 = vld [vmem:[#allocation154_spill] sm:$0xff] }
 0x9fd   : > { %v5991_v63 = vmul.f32 %v5863_v36, %v4967_v37  ;;  %v9420_v12 = vpop.eup %9419  ;;  %7059 = vmatprep.mubr.bf16.mxu1 %v6063_v51  ;;  %v5862_v56 = vadd.f32 1.0, %v9418_v8  ;;  %9431 = vtanh.f32 %v5521_v27  ;;  %v4983_v43 = vmul.f32 0.5, %v15142_v54  ;;  %v15160_v36 = vld [vmem:[#allocation112_spill] sm:$0xff]  ;;  %v15161_v35 = vld [vmem:[#allocation94_spill] sm:$0xff] }
 0x9fe   : > { %v6062_v60 = vpack.c.bf16 %v5982_v25, %v5974_v53  ;;  %v5999_v40 = vmul.f32 %v5871_v11, %v4975_v13  ;;  %v5870_v38 = vadd.f32 1.0, %v9420_v12  ;;  %v13549_v37 = vmul.f32 %v5768_v15, %v15156_v30  ;;  %v15159_v53 = vld [vmem:[#allocation168_spill] sm:$0xff]  ;;  %7121 = vmatpush1.bf16.msra.mxu1 %v9082_v17  ;;  %v15162_v12 = vld [vmem:[#allocation101_spill] sm:$0xff] }
 0x9ff   : > { %v13552_v34 = vmul.f32 %v5776_v1, %v15157_v39  ;;  %v9422_v26 = vpop.eup %9421  ;;  %v4991_v21 = vmul.f32 0.5, %v15144_v41  ;;  %v5401_v13 = vadd.f32 %v15159_v53, %v15158_v29  ;;  %v5409_v24 = vadd.f32 %v15161_v35, %v15160_v36  ;;  %7203 = vmatprep.subr.bf16.mxu1 %v9087_v52 }
 0xa00   : > { %v6071_v50 = vpack.c.bf16 %v5999_v40, %v5991_v63  ;;  %v9424_v27 = vpop.eup %9423  ;;  %v5990_v51 = vmul.f32 %v5862_v56, %v4966_v31  ;;  %v5998_v25 = vmul.f32 %v5870_v38, %v4974_v45  ;;  %v5879_v54 = vadd.f32 1.0, %v9422_v26  ;;  %v15163_v40 = vld [vmem:[#allocation159_spill] sm:$0xff]  ;;  %v15164_v31 = vld [vmem:[#allocation114_spill] sm:$0xff]  ;;  %v15165_v45 = vld [vmem:[#allocation173_spill] sm:$0xff] }
 0xa01   : > { %v6024_v11 = vpack.c.bf16 %v13552_v34, %v13549_v37  ;;  %v5887_v33 = vadd.f32 1.0, %v9424_v27  ;;  %v4982_v15 = vmul.f32 0.5, %v15146_v55  ;;  %v5529_v8 = vmul.f32 0.7978846, %v5401_v13 }
 0xa02   : > { %v5537_v41 = vmul.f32 0.7978846, %v5409_v24  ;;  %v9426_v63 = vpop.eup %9425  ;;  %v6070_v47 = vpack.c.bf16 %v5998_v25, %v5990_v51  ;;  %v4990_v1 = vmul.f32 0.5, %v15148_v57  ;;  %v5400_v30 = vadd.f32 %v15163_v40, %v15162_v12 }
 0xa03   : > { %v5408_v56 = vadd.f32 %v15165_v45, %v15164_v31  ;;  %v9428_v17 = vpop.eup %9427  ;;  %7060 = vmatmul.mubr.bf16.gmra.mrb[116].mxu1 %v6062_v60  ;;  %v6007_v38 = vmul.f32 %v5879_v54, %v4983_v43  ;;  %v6015_v39 = vmul.f32 %v5887_v33, %v4991_v21  ;;  %v5878_v26 = vadd.f32 1.0, %v9426_v63 }
 0xa04   : > { %9433 = vtanh.f32 %v5529_v8  ;;  %7069 = vmatprep.mubr.bf16.mxu1 %v6071_v50  ;;  %v5886_v55 = vadd.f32 1.0, %v9428_v17  ;;  %v5528_v52 = vmul.f32 0.7978846, %v5400_v30  ;;  %v13569_v57 = vmul.f32 %v13487_v19, %v13468_v28 }
 0xa05   : > { %9435 = vtanh.f32 %v5537_v41  ;;  %v5536_v53 = vmul.f32 0.7978846, %v5408_v56  ;;  %v6079_v13 = vpack.c.bf16 %v6015_v39, %v6007_v38  ;;  %v4873_v35 = vmul.f32 0.5, %v15150_v32  ;;  %v15168_v56 = vld [vmem:[#allocation86_spill] sm:$0xff] }
 0xa06   : > { %v5417_v24 = vadd.f32 %v13016_v62, %v12914_v6  ;;  %v9430_v60 = vpop.eup %9429  ;;  %v6006_v43 = vmul.f32 %v5878_v26, %v4982_v15  ;;  %v6014_v21 = vmul.f32 %v5886_v55, %v4990_v1  ;;  %9437 = vtanh.f32 %v5528_v52  ;;  %v15170_v26 = vld [vmem:[#allocation44_spill] sm:$0xff] }
 0xa07   : > { %v5425_v50 = vadd.f32 %v13041_v23, %v12982_v2  ;;  %v9432_v27 = vpop.eup %9431  ;;  %v4881_v51 = vmul.f32 0.5, %v15152_v7  ;;  %v5769_v25 = vadd.f32 1.0, %v9430_v60  ;;  %9439 = vtanh.f32 %v5536_v53 }
 0xa08   : > { %v5545_v19 = vmul.f32 0.7978846, %v5417_v24  ;;  %v6078_v54 = vpack.c.bf16 %v6014_v21, %v6006_v43  ;;  %v5777_v33 = vadd.f32 1.0, %v9432_v27  ;;  %v5416_v32 = vadd.f32 %v13004_v4, %v12893_v44  ;;  %v15166_v4 = vld [vmem:[#allocation46_spill] sm:$0xff] }
 0xa09   : > { %v5553_v8 = vmul.f32 0.7978846, %v5425_v50  ;;  %v4889_v62 = vmul.f32 0.5, %v15158_v29  ;;  %v4897_v15 = vmul.f32 0.5, %v15160_v36  ;;  %v5424_v23 = vadd.f32 %v13024_v61, %v12954_v59  ;;  %v15167_v61 = vld [vmem:[#allocation109_spill] sm:$0xff] }
 0xa0a   : > { %9441 = vtanh.f32 %v5545_v19  ;;  %v5897_v41 = vmul.f32 %v5769_v25, %v4873_v35  ;;  %v5905_v63 = vmul.f32 %v5777_v33, %v4881_v51  ;;  %v5544_v7 = vmul.f32 0.7978846, %v5416_v32 }
 0xa0b   : > { %9443 = vtanh.f32 %v5553_v8  ;;  %7070 = vmatmul.mubr.bf16.gmra.mrb[120].mxu1 %v6070_v47  ;;  %v4888_v1 = vmul.f32 0.5, %v15162_v12  ;;  %v5552_v40 = vmul.f32 0.7978846, %v5424_v23  ;;  %v5433_v30 = vadd.f32 %v13087_v48, %v13013_v18  ;;  %v15169_v12 = vld [vmem:[#allocation45_spill] sm:$0xff] }
 0xa0c   : > { %v5441_v29 = vadd.f32 %v15166_v4, %v13071_v10  ;;  %7079 = vmatprep.mubr.bf16.mxu1 %v6079_v13  ;;  %v6025_v36 = vpack.c.bf16 %v5905_v63, %v5897_v41  ;;  %v4896_v45 = vmul.f32 0.5, %v15164_v31  ;;  %9445 = vtanh.f32 %v5544_v7  ;;  %v15172_v63 = vld [vmem:[#allocation51_spill] sm:$0xff] }
 0xa0d   : > { %v5432_v17 = vadd.f32 %v15168_v56, %v15167_v61  ;;  %9447 = vtanh.f32 %v5552_v40  ;;  %v5561_v47 = vmul.f32 0.7978846, %v5433_v30  ;;  %v5440_v55 = vadd.f32 %v15170_v26, %v15169_v12 }
 0xa0e   : > { %v9434_v38 = vpop.eup %9433  ;;  %v5569_v39 = vmul.f32 0.7978846, %v5441_v29  ;;  %v4905_v53 = vmul.f32 0.5, %v12914_v6  ;;  %v4913_v13 = vmul.f32 0.5, %v12982_v2  ;;  %v5449_v60 = vadd.f32 %v13189_v49, %v13110_v42 }
 0xa0f   : > { %v9436_v52 = vpop.eup %9435  ;;  %v5785_v48 = vadd.f32 1.0, %v9434_v38  ;;  %v5560_v35 = vmul.f32 0.7978846, %v5432_v17  ;;  %9449 = vtanh.f32 %v5561_v47  ;;  %v5568_v31 = vmul.f32 0.7978846, %v5440_v55 }
 0xa10   : > { %v5793_v24 = vadd.f32 1.0, %v9436_v52  ;;  %v9438_v43 = vpop.eup %9437  ;;  %v4904_v50 = vmul.f32 0.5, %v12893_v44  ;;  %9451 = vtanh.f32 %v5569_v39  ;;  %v5457_v27 = vadd.f32 %v13235_v5, %v13155_v46  ;;  %v15171_v44 = vld [vmem:[#allocation105_spill] sm:$0xff] }
 0xa11   : > { %v5913_v21 = vmul.f32 %v5785_v48, %v4889_v62  ;;  %v9440_v51 = vpop.eup %9439  ;;  %v5784_v6 = vadd.f32 1.0, %v9438_v43  ;;  %9453 = vtanh.f32 %v5560_v35  ;;  %v5577_v2 = vmul.f32 0.7978846, %v5449_v60  ;;  %v9090_v52 = vld [vmem:[%s9809_s2 + $0x314] ss:$8 sps:$4 sm:$0xff]  }
 0xa12   : > { %v5921_v25 = vmul.f32 %v5793_v24, %v4897_v15  ;;  %v5792_v19 = vadd.f32 1.0, %v9440_v51  ;;  %v4912_v33 = vmul.f32 0.5, %v12954_v59  ;;  %9455 = vtanh.f32 %v5568_v31  ;;  %v15173_v31 = vld [vmem:[#allocation140_spill] sm:$0xff] }
 0xa13   : > { %v5585_v8 = vmul.f32 0.7978846, %v5457_v27  ;;  %7080 = vmatmul.mubr.bf16.gmra.mrb[124].mxu1 %v6078_v54  ;;  %v13601_v62 = vmul.f32 %v5784_v6, %v4888_v1  ;;  %9457 = vtanh.f32 %v5577_v2  ;;  %v5448_v23 = vadd.f32 %v15171_v44, %v13102_v14  ;;  %v9088_v51 = vld [vmem:[%s9809_s2 + $0x310] ss:$8 sps:$4 sm:$0xff]   ;;  %v15175_v44 = vld [vmem:[#allocation50_spill] sm:$0xff] }
 0xa14   : > { %v9442_v32 = vpop.eup %9441  ;;  %v6033_v49 = vpack.c.bf16 %v5921_v25, %v5913_v21  ;;  %7122 = vmatprep.mubr.bf16.mxu1 %v6025_v36  ;;  %v13605_v15 = vmul.f32 %v5792_v19, %v4896_v45  ;;  %v5456_v59 = vadd.f32 %v15172_v63, %v13138_v0  ;;  %v4921_v54 = vmul.f32 0.5, %v13013_v18  ;;  %v9085_v18 = vld [vmem:[%s9809_s2 + $0x300] ss:$8 sps:$4 sm:$0xff]  }
 0xa15   : > { %v9444_v5 = vpop.eup %9443  ;;  %v5801_v41 = vadd.f32 1.0, %v9442_v32  ;;  %9459 = vtanh.f32 %v5585_v8  ;;  %v4929_v1 = vmul.f32 0.5, %v13071_v10  ;;  %v5576_v40 = vmul.f32 0.7978846, %v5448_v23  ;;  %v15176_v23 = vld [vmem:[#allocation57_spill] sm:$0xff] }
 0xa16   : > { %v5809_v7 = vadd.f32 1.0, %v9444_v5  ;;  %v9446_v30 = vpop.eup %9445  ;;  %v6032_v4 = vpack.c.bf16 %v13605_v15, %v13601_v62  ;;  %v5584_v36 = vmul.f32 0.7978846, %v5456_v59  ;;  %v5465_v45 = vadd.f32 %v13290_v58, %v13194_v3  ;;  %v15177_v59 = vld [vmem:[#allocation72_spill] sm:$0xff]  ;;  %v9099_v15 = vld [vmem:[%s9809_s2 + $0x344] ss:$8 sps:$4 sm:$0xff]  }
 0xa17   : > { %v13613_v29 = vmul.f32 %v5801_v41, %v4905_v53  ;;  %v9448_v56 = vpop.eup %9447  ;;  %v5800_v38 = vadd.f32 1.0, %v9446_v30  ;;  %9461 = vtanh.f32 %v5576_v40  ;;  %v5473_v10 = vadd.f32 %v13316_v22, %v13232_v16  ;;  %v15179_v30 = vld [vmem:[#allocation81_spill] sm:$0xff] }
 0xa18   : > { %v13617_v17 = vmul.f32 %v5809_v7, %v4913_v13  ;;  %v5808_v47 = vadd.f32 1.0, %v9448_v56  ;;  %v4920_v39 = vmul.f32 0.5, %v15167_v61  ;;  %9463 = vtanh.f32 %v5584_v36  ;;  %v15174_v61 = vld [vmem:[#allocation62_spill] sm:$0xff]  ;;  %v15178_v7 = vld [vmem:[#allocation91_spill] sm:$0xff] }
 0xa19   : > { %v5593_v26 = vmul.f32 0.7978846, %v5465_v45  ;;  %v9450_v55 = vpop.eup %9449  ;;  %v13626_v58 = vmul.f32 %v5800_v38, %v4904_v50  ;;  %v4928_v53 = vmul.f32 0.5, %v15169_v12  ;;  %v5601_v13 = vmul.f32 0.7978846, %v5473_v10 }
 0xa1a   : > { %v6041_v48 = vpack.c.bf16 %v13617_v17, %v13613_v29  ;;  %v9452_v35 = vpop.eup %9451  ;;  %v13629_v24 = vmul.f32 %v5808_v47, %v4912_v33  ;;  %v5817_v22 = vadd.f32 1.0, %v9450_v55  ;;  %v5464_v60 = vadd.f32 %v15174_v61, %v15173_v31  ;;  %v15180_v29 = vld [vmem:[#allocation162_spill] sm:$0xff]  ;;  %v9096_v17 = vld [vmem:[%s9809_s2 + $0x334] ss:$8 sps:$4 sm:$0xff]  }
 0xa1b   : > { %9465 = vtanh.f32 %v5593_v26  ;;  %v9454_v43 = vpop.eup %9453  ;;  %7123 = vmatmul.mubr.bf16.vlgmr.msra.gmra.mrb[96].mxu1 %v6024_v11  ;;  %v5825_v21 = vadd.f32 1.0, %v9452_v35  ;;  %v4937_v50 = vmul.f32 0.5, %v13110_v42  ;;  %v5472_v12 = vadd.f32 %v13307_v9, %v13214_v20  ;;  %v9093_v11 = vld [vmem:[%s9809_s2 + $0x324] ss:$8 sps:$4 sm:$0xff]   ;;  %v15181_v47 = vld [vmem:[#allocation96_spill] sm:$0xff] }
 0xa1c   : > { %9467 = vtanh.f32 %v5601_v13  ;;  %v9456_v27 = vpop.eup %9455  ;;  %7132 = vmatprep.mubr.bf16.mxu1 %v6033_v49  ;;  %7204 = vmatpush1.bf16.msra.mxu1 %v9085_v18  ;;  %v6040_v25 = vpack.c.bf16 %v13629_v24, %v13626_v58  ;;  %v5816_v6 = vadd.f32 1.0, %v9454_v43  ;;  %v4945_v2 = vmul.f32 0.5, %v13155_v46  ;;  %v15184_v13 = vld [vmem:[#allocation95_spill] sm:$0xff]  ;;  %v15195_v58 = vld [vmem:[#allocation116_spill] sm:$0xff] }
 0xa1d   : > { %v5592_v37 = vmul.f32 0.7978846, %v5464_v60  ;;  %v9458_v34 = vpop.eup %9457  ;;  %7205 = vmatprep.subr.bf16.mxu1 %v9090_v52  ;;  %v13644_v42 = vmul.f32 %v5817_v22, %v4921_v54  ;;  %v13646_v19 = vmul.f32 %v5825_v21, %v4929_v1  ;;  %v5824_v9 = vadd.f32 1.0, %v9456_v27  ;;  %v9091_v1 = vld [vmem:[%s9809_s2 + $0x320] ss:$8 sps:$4 sm:$0xff]  }
 0xa1e   : > { %v5600_v33 = vmul.f32 0.7978846, %v5472_v12  ;;  %v13648_v32 = vmul.f32 %v5816_v6, %v4920_v39  ;;  %v5833_v49 = vadd.f32 1.0, %v9458_v34  ;;  %v5481_v46 = vadd.f32 %v15176_v23, %v15175_v44  ;;  %v15182_v39 = vld [vmem:[#allocation63_spill] sm:$0xff] }
 0xa1f   : > { %v9460_v8 = vpop.eup %9459  ;;  %9469 = vtanh.f32 %v5592_v37  ;;  %v6049_v5 = vpack.c.bf16 %v13646_v19, %v13644_v42  ;;  %v13654_v41 = vmul.f32 %v5824_v9, %v4928_v53  ;;  %v5377_v54 = vmul.f32 %v15178_v7, %v15177_v59  ;;  %v15183_v53 = vld [vmem:[#allocation65_spill] sm:$0xff]  ;;  %v9097_v23 = vld [vmem:[%s9809_s2 + $0x340] ss:$8 sps:$4 sm:$0xff]  }
 0xa20   : > { %v5841_v63 = vadd.f32 1.0, %v9460_v8  ;;  %9471 = vtanh.f32 %v5600_v33  ;;  %7206 = vmatpush1.bf16.msra.mxu1 %v9088_v51  ;;  %v4936_v40 = vmul.f32 0.5, %v13102_v14  ;;  %v5489_v36 = vadd.f32 %v15180_v29, %v15179_v30  ;;  %v15188_v7 = vld [vmem:[#allocation66_spill] sm:$0xff]  ;;  %v15190_v29 = vld [vmem:[#allocation100_spill] sm:$0xff] }
 0xa21   : > { %v5609_v45 = vmul.f32 0.7978846, %v5481_v46  ;;  %v9462_v56 = vpop.eup %9461  ;;  %7207 = vmatprep.subr.bf16.mxu1 %v9093_v11  ;;  %v6048_v38 = vpack.c.bf16 %v13654_v41, %v13648_v32  ;;  %v13665_v10 = vmul.f32 %v5833_v49, %v4937_v50  ;;  %v5480_v26 = vadd.f32 %v15182_v39, %v15181_v47  ;;  %v9094_v50 = vld [vmem:[%s9809_s2 + $0x330] ss:$8 sps:$4 sm:$0xff]  }
 0xa22   : > { %v13667_v18 = vmul.f32 %v5841_v63, %v4945_v2  ;;  %v9464_v55 = vpop.eup %9463  ;;  %v5832_v14 = vadd.f32 1.0, %v9462_v56  ;;  %v5617_v52 = vmul.f32 0.7978846, %v5489_v36  ;;  %v5488_v35 = vadd.f32 %v15184_v13, %v15183_v53  ;;  %v15186_v2 = vld [vmem:[#allocation87_spill] sm:$0xff]  ;;  %v15192_v13 = vld [vmem:[#allocation150_spill] sm:$0xff] }
 0xa23   : > { %9473 = vtanh.f32 %v5609_v45  ;;  %7133 = vmatmul.mubr.bf16.gmra.mrb[100].mxu1 %v6032_v4  ;;  %v4944_v61 = vmul.f32 0.5, %v13138_v0  ;;  %v5840_v60 = vadd.f32 1.0, %v9464_v55  ;;  %v5608_v43 = vmul.f32 0.7978846, %v5480_v26  ;;  %v15185_v0 = vld [vmem:[#allocation158_spill] sm:$0xff] }
 0xa24   : > { %v6057_v22 = vpack.c.bf16 %v13667_v18, %v13665_v10  ;;  %7142 = vmatprep.mubr.bf16.mxu1 %v6041_v48  ;;  %7208 = vmatpush1.bf16.msra.mxu1 %v9091_v1  ;;  %v13680_v12 = vmul.f32 %v5832_v14, %v4936_v40  ;;  %v4953_v27 = vmul.f32 0.5, %v13194_v3  ;;  %9475 = vtanh.f32 %v5617_v52  ;;  %v15189_v40 = vld [vmem:[#allocation70_spill] sm:$0xff]  ;;  %v9102_v45 = vld [vmem:[%s9809_s2 + $0x354] ss:$8 sps:$4 sm:$0xff]  }
 0xa25   : > { %v9466_v21 = vpop.eup %9465  ;;  %v5616_v51 = vmul.f32 0.7978846, %v5488_v35  ;;  %7209 = vmatprep.subr.bf16.mxu1 %v9096_v17  ;;  %v13684_v4 = vmul.f32 %v5840_v60, %v4944_v61  ;;  %9477 = vtanh.f32 %v5608_v43  ;;  %v5497_v37 = vadd.f32 %v15186_v2, %v15185_v0  ;;  %v15193_v61 = vld [vmem:[#allocation88_spill] sm:$0xff]  ;;  %v15194_v60 = vld [vmem:[#allocation157_spill] sm:$0xff]  ;;  %v15208_v18 = vld [vmem:[#allocation134_spill] sm:$0xff] }
 0xa26   : > { %v9468_v62 = vpop.eup %9467  ;;  %v5849_v6 = vadd.f32 1.0, %v9466_v21  ;;  %v4961_v48 = vmul.f32 0.5, %v13232_v16  ;;  %v5505_v3 = vadd.f32 %v5377_v54, %v15177_v59  ;;  %v4952_v33 = vmul.f32 0.5, %v15173_v31  ;;  %v15187_v16 = vld [vmem:[#allocation61_spill] sm:$0xff] }
 0xa27   : > { %v5857_v34 = vadd.f32 1.0, %v9468_v62  ;;  %9479 = vtanh.f32 %v5616_v51  ;;  %v6056_v11 = vpack.c.bf16 %v13684_v4, %v13680_v12  ;;  %v5625_v8 = vmul.f32 0.7978846, %v5497_v37  ;;  %v9100_v21 = vld [vmem:[%s9809_s2 + $0x350] ss:$8 sps:$4 sm:$0xff]  }
 0xa28   : > { %v13692_v9 = vmul.f32 %v5849_v6, %v4953_v27  ;;  %7210 = vmatpush1.bf16.msra.mxu1 %v9094_v50  ;;  %v5633_v63 = vmul.f32 0.7978846, %v5505_v3  ;;  %v5496_v1 = vadd.f32 %v15188_v7, %v15187_v16  ;;  %v5504_v54 = vadd.f32 %v15190_v29, %v15189_v40  ;;  %v9105_v50 = vld [vmem:[%s9809_s2 + $0x364] ss:$8 sps:$4 sm:$0xff]  }
 0xa29   : > { %v9470_v49 = vpop.eup %9469  ;;  %v13696_v46 = vmul.f32 %v5857_v34, %v4961_v48  ;;  %7211 = vmatprep.subr.bf16.mxu1 %v9099_v15  ;;  %v4960_v56 = vmul.f32 0.5, %v13214_v20  ;;  %v4969_v17 = vmul.f32 0.5, %v15175_v44  ;;  %9481 = vtanh.f32 %v5625_v8  ;;  %v15191_v20 = vld [vmem:[#allocation49_spill] sm:$0xff]  ;;  %v15200_v29 = vld [vmem:[#allocation170_spill] sm:$0xff] }
 0xa2a   : > { %v9472_v36 = vpop.eup %9471  ;;  %v5848_v31 = vadd.f32 1.0, %v9470_v49  ;;  %9483 = vtanh.f32 %v5633_v63  ;;  %v5624_v55 = vmul.f32 0.7978846, %v5496_v1  ;;  %v5632_v52 = vmul.f32 0.7978846, %v5504_v54  ;;  %v15198_v48 = vld [vmem:[#allocation153_spill] sm:$0xff] }
 0xa2b   : > { %v6065_v39 = vpack.c.bf16 %v13696_v46, %v13692_v9  ;;  %v5856_v26 = vadd.f32 1.0, %v9472_v36  ;;  %7143 = vmatmul.mubr.bf16.gmra.mrb[104].mxu1 %v6040_v25  ;;  %v5387_v35 = vadd.f32 %v15192_v13, %v15191_v20  ;;  %v5395_v44 = vadd.f32 %v15194_v60, %v15193_v61  ;;  %v15196_v25 = vld [vmem:[#allocation172_spill] sm:$0xff]  ;;  %v9103_v63 = vld [vmem:[%s9809_s2 + $0x360] ss:$8 sps:$4 sm:$0xff]  }
 0xa2c   : > { %v13710_v14 = vmul.f32 %v5848_v31, %v4952_v33  ;;  %7152 = vmatprep.mubr.bf16.mxu1 %v6049_v5  ;;  %7212 = vmatpush1.bf16.msra.mxu1 %v9097_v23  ;;  %9485 = vtanh.f32 %v5624_v55  ;;  %v5770_v24 = vadd.f32 1.0, %v15195_v58  ;;  %v5778_v51 = vadd.f32 1.0, %v15196_v25  ;;  %v15197_v5 = vld [vmem:[#allocation144_spill] sm:$0xff]  ;;  %v15199_v1 = vld [vmem:[#allocation155_spill] sm:$0xff]  ;;  %v15205_v58 = vld [vmem:[#allocation106_spill] sm:$0xff] }
 0xa2d   : > { %v9474_v43 = vpop.eup %9473  ;;  %v13721_v27 = vmul.f32 %v5856_v26, %v4960_v56  ;;  %7213 = vmatprep.subr.bf16.mxu1 %v9102_v45  ;;  %9487 = vtanh.f32 %v5632_v52  ;;  %v5515_v15 = vmul.f32 0.7978846, %v5387_v35  ;;  %v5523_v6 = vmul.f32 0.7978846, %v5395_v44  ;;  %v9108_v36 = vld [vmem:[%s9809_s2 + $0x374] ss:$8 sps:$4 sm:$0xff]  }
 0xa2e   : > { %v5865_v62 = vadd.f32 1.0, %v9474_v43  ;;  %v9476_v2 = vpop.eup %9475  ;;  %v4977_v19 = vmul.f32 0.5, %v15179_v30  ;;  %v13729_v37 = vmul.f32 %v5770_v24, %v15197_v5  ;;  %v13732_v34 = vmul.f32 %v5778_v51, %v15198_v48  ;;  %v15202_v31 = vld [vmem:[#allocation119_spill] sm:$0xff]  ;;  %v15206_v24 = vld [vmem:[#allocation174_spill] sm:$0xff]  ;;  %v9106_v51 = vld [vmem:[%s9809_s2 + $0x370] ss:$8 sps:$4 sm:$0xff]  }
 0xa2f   : > { %v6064_v42 = vpack.c.bf16 %v13721_v27, %v13710_v14  ;;  %v9478_v3 = vpop.eup %9477  ;;  %v5873_v33 = vadd.f32 1.0, %v9476_v2  ;;  %v4968_v8 = vmul.f32 0.5, %v15181_v47  ;;  %v4976_v49 = vmul.f32 0.5, %v15183_v53  ;;  %v15201_v53 = vld [vmem:[#allocation161_spill] sm:$0xff]  ;;  %v15203_v35 = vld [vmem:[#allocation151_spill] sm:$0xff]  ;;  %v15218_v9 = vld [vmem:[#allocation58_spill] sm:$0xff] }
 0xa30   : > { %9489 = vtanh.f32 %v5515_v15  ;;  %7214 = vmatpush1.bf16.msra.mxu1 %v9100_v21  ;;  %v5864_v7 = vadd.f32 1.0, %v9478_v3  ;;  %v6026_v30 = vpack.c.bf16 %v13732_v34, %v13729_v37  ;;  %v5403_v54 = vadd.f32 %v15200_v29, %v15199_v1  ;;  %v15204_v60 = vld [vmem:[#allocation167_spill] sm:$0xff] }
 0xa31   : > { %v9480_v23 = vpop.eup %9479  ;;  %9491 = vtanh.f32 %v5523_v6  ;;  %7215 = vmatprep.subr.bf16.mxu1 %v9105_v50  ;;  %v13742_v45 = vmul.f32 %v5865_v62, %v4969_v17  ;;  %v13744_v56 = vmul.f32 %v5873_v33, %v4977_v19  ;;  %v5411_v26 = vadd.f32 %v15202_v31, %v15201_v53  ;;  %v9109_v3 = vld [vmem:[%s9809_s2 + $0x380] ss:$8 sps:$4 sm:$0xff]  }
 0xa32   : > { %v5872_v47 = vadd.f32 1.0, %v9480_v23  ;;  %v13748_v55 = vmul.f32 %v5864_v7, %v4968_v8  ;;  %v4985_v52 = vmul.f32 0.5, %v15185_v0  ;;  %v5531_v13 = vmul.f32 0.7978846, %v5403_v54  ;;  %v15210_v23 = vld [vmem:[#allocation176_spill] sm:$0xff] }
 0xa33   : > { %v5402_v44 = vadd.f32 %v15204_v60, %v15203_v35  ;;  %v9482_v43 = vpop.eup %9481  ;;  %7153 = vmatmul.mubr.bf16.gmra.mrb[108].mxu1 %v6048_v38  ;;  %v6073_v17 = vpack.c.bf16 %v13744_v56, %v13742_v45  ;;  %v5539_v50 = vmul.f32 0.7978846, %v5411_v26  ;;  %v5410_v25 = vadd.f32 %v15206_v24, %v15205_v58  ;;  %v9111_v38 = vld [vmem:[%s9809_s2 + $0x384] ss:$8 sps:$4 sm:$0xff]   ;;  %v15212_v60 = vld [vmem:[#allocation129_spill] sm:$0xff] }
 0xa34   : > { %v13758_v21 = vmul.f32 %v5872_v47, %v4976_v49  ;;  %v9484_v0 = vpop.eup %9483  ;;  %7162 = vmatprep.mubr.bf16.mxu1 %v6057_v22  ;;  %7216 = vmatpush1.bf16.msra.mxu1 %v9103_v63  ;;  %v4993_v62 = vmul.f32 0.5, %v15177_v59  ;;  %v5881_v32 = vadd.f32 1.0, %v9482_v43  ;;  %9493 = vtanh.f32 %v5531_v13  ;;  %v15207_v59 = vld [vmem:[#allocation171_spill] sm:$0xff]  ;;  %v15209_v49 = vld [vmem:[#allocation133_spill] sm:$0xff] }
 0xa35   : > { %v5530_v41 = vmul.f32 0.7978846, %v5402_v44  ;;  %7217 = vmatprep.subr.bf16.mxu1 %v9108_v36  ;;  %v5889_v6 = vadd.f32 1.0, %v9484_v0  ;;  %9495 = vtanh.f32 %v5539_v50  ;;  %v5538_v2 = vmul.f32 0.7978846, %v5410_v25  ;;  %v15211_v13 = vld [vmem:[#allocation165_spill] sm:$0xff] }
 0xa36   : > { %v6072_v15 = vpack.c.bf16 %v13758_v21, %v13748_v55  ;;  %v9486_v19 = vpop.eup %9485  ;;  %v13770_v5 = vmul.f32 %v5881_v32, %v4985_v52  ;;  %v4984_v10 = vmul.f32 0.5, %v15187_v16  ;;  %v5419_v22 = vadd.f32 %v15208_v18, %v15207_v59  ;;  %v9114_v47 = vld [vmem:[%s9809_s2 + $0x394] ss:$8 sps:$4 sm:$0xff]   ;;  %v15214_v24 = vld [vmem:[#allocation175_spill] sm:$0xff] }
 0xa37   : > { %9497 = vtanh.f32 %v5530_v41  ;;  %v9488_v48 = vpop.eup %9487  ;;  %v13776_v33 = vmul.f32 %v5889_v6, %v4993_v62  ;;  %v5880_v8 = vadd.f32 1.0, %v9486_v19  ;;  %v5427_v63 = vadd.f32 %v15210_v23, %v15209_v49  ;;  %v9112_v41 = vld [vmem:[%s9809_s2 + $0x390] ss:$8 sps:$4 sm:$0xff]   ;;  %v15216_v6 = vld [vmem:[#allocation139_spill] sm:$0xff] }
 0xa38   : > { %9499 = vtanh.f32 %v5538_v2  ;;  %7218 = vmatpush1.bf16.msra.mxu1 %v9106_v51  ;;  %v4992_v7 = vmul.f32 0.5, %v15189_v40  ;;  %v5888_v29 = vadd.f32 1.0, %v9488_v48  ;;  %v4875_v16 = vmul.f32 0.5, %v15191_v20  ;;  %v15213_v20 = vld [vmem:[#allocation131_spill] sm:$0xff]  ;;  %v15220_v48 = vld [vmem:[#allocation132_spill] sm:$0xff]  ;;  %v15237_v21 = vld [vmem:[#allocation145_spill] sm:$0xff] }
 0xa39   : > { %v5547_v54 = vmul.f32 0.7978846, %v5419_v22  ;;  %7219 = vmatprep.subr.bf16.mxu1 %v9111_v38  ;;  %v6081_v31 = vpack.c.bf16 %v13776_v33, %v13770_v5  ;;  %v13785_v26 = vmul.f32 %v5880_v8, %v4984_v10  ;;  %v5555_v52 = vmul.f32 0.7978846, %v5427_v63  ;;  %v15217_v19 = vld [vmem:[#allocation123_spill] sm:$0xff]  ;;  %v15219_v22 = vld [vmem:[#allocation126_spill] sm:$0xff] }
 0xa3a   : > { %v9490_v36 = vpop.eup %9489  ;;  %v5418_v44 = vadd.f32 %v15212_v60, %v15211_v13  ;;  %v13789_v50 = vmul.f32 %v5888_v29, %v4992_v7  ;;  %v5426_v25 = vadd.f32 %v15214_v24, %v15213_v20  ;;  %v4883_v0 = vmul.f32 0.5, %v15193_v61 }
 0xa3b   : > { %v9492_v43 = vpop.eup %9491  ;;  %v5771_v40 = vadd.f32 1.0, %v9490_v36  ;;  %9501 = vtanh.f32 %v5547_v54  ;;  %7163 = vmatmul.mubr.bf16.gmra.mrb[112].mxu1 %v6056_v11  ;;  %v13799_v32 = vmul.f32 %v13569_v57, %v13468_v28  ;;  %v9117_v11 = vld [vmem:[%s9809_s2 + $0x3a4] ss:$8 sps:$4 sm:$0xff]   ;;  %v15215_v57 = vld [vmem:[#allocation64_spill] sm:$0xff]  ;;  %v5443_v46 = vadd.f32 %v15218_v9, %v15217_v19  ;;  %v9115_v54 = vld [vmem:[%s9809_s2 + $0x3a0] ss:$8 sps:$4 sm:$0xff]  }
 0xa3c   : > { %v5779_v51 = vadd.f32 1.0, %v9492_v43  ;;  %9503 = vtanh.f32 %v5555_v52  ;;  %v5546_v62 = vmul.f32 0.7978846, %v5418_v44  ;;  %7172 = vmatprep.mubr.bf16.mxu1 %v6065_v39  ;;  %7220 = vmatpush1.bf16.msra.mxu1 %v9109_v3  ;;  %v6080_v38 = vpack.c.bf16 %v13789_v50, %v13785_v26  ;;  %v9120_v43 = vld [vmem:[%s9809_s2 + $0x3b4] ss:$8 sps:$4 sm:$0xff]  }
 0xa3d   : > { %v13807_v12 = vmul.f32 %v5771_v40, %v4875_v16  ;;  %v5554_v4 = vmul.f32 0.7978846, %v5426_v25  ;;  %7221 = vmatprep.subr.bf16.mxu1 %v9114_v47  ;;  %v5435_v2 = vadd.f32 %v15216_v6, %v15215_v57  ;;  %v4891_v10 = vmul.f32 0.5, %v15199_v1  ;;  %v15221_v47 = vld [vmem:[#allocation135_spill] sm:$0xff]  ;;  %v15225_v6 = vld [vmem:[#allocation90_spill] sm:$0xff] }
 0xa3e   : > { %v13810_v61 = vmul.f32 %v5779_v51, %v4883_v0  ;;  %9505 = vtanh.f32 %v5546_v62  ;;  %v9494_v39 = vpop.eup %9493  ;;  %v4899_v18 = vmul.f32 0.5, %v15201_v53  ;;  %v5434_v3 = vadd.f32 %v15220_v48, %v15219_v22  ;;  %v15222_v53 = vld [vmem:[#allocation52_spill] sm:$0xff] }
 0xa3f   : > { %9507 = vtanh.f32 %v5554_v4  ;;  %v9496_v8 = vpop.eup %9495  ;;  %v5787_v63 = vadd.f32 1.0, %v9494_v39  ;;  %v5563_v7 = vmul.f32 0.7978846, %v5435_v2  ;;  %v5571_v29 = vmul.f32 0.7978846, %v5443_v46  ;;  %v15224_v4 = vld [vmem:[#allocation73_spill] sm:$0xff] }
 0xa40   : > { %v6027_v23 = vpack.c.bf16 %v13810_v61, %v13807_v12  ;;  %7222 = vmatpush1.bf16.msra.mxu1 %v9112_v41  ;;  %v5795_v36 = vadd.f32 1.0, %v9496_v8  ;;  %v4890_v1 = vmul.f32 0.5, %v15203_v35  ;;  %v5442_v52 = vadd.f32 %v15222_v53, %v15221_v47  ;;  %v15223_v41 = vld [vmem:[#allocation138_spill] sm:$0xff]  ;;  %v9118_v46 = vld [vmem:[%s9809_s2 + $0x3b0] ss:$8 sps:$4 sm:$0xff]  }
 0xa41   : > { %v9498_v16 = vpop.eup %9497  ;;  %v5562_v60 = vmul.f32 0.7978846, %v5434_v3  ;;  %7223 = vmatprep.subr.bf16.mxu1 %v9117_v11  ;;  %v13827_v40 = vmul.f32 %v5787_v63, %v4891_v10  ;;  %v4898_v24 = vmul.f32 0.5, %v15205_v58  ;;  %9509 = vtanh.f32 %v5563_v7  ;;  %v15226_v58 = vld [vmem:[#allocation54_spill] sm:$0xff]  ;;  %v15227_v3 = vld [vmem:[#allocation136_spill] sm:$0xff] }
 0xa42   : > { %v9500_v44 = vpop.eup %9499  ;;  %v5786_v25 = vadd.f32 1.0, %v9498_v16  ;;  %v13830_v0 = vmul.f32 %v5795_v36, %v4899_v18  ;;  %9511 = vtanh.f32 %v5571_v29  ;;  %v5570_v35 = vmul.f32 0.7978846, %v5442_v52  ;;  %v9123_v39 = vld [vmem:[%s9809_s2 + $0x3c4] ss:$8 sps:$4 sm:$0xff]   ;;  %v15228_v8 = vld [vmem:[#allocation68_spill] sm:$0xff] }
 0xa43   : > { %v5794_v51 = vadd.f32 1.0, %v9500_v44  ;;  %7173 = vmatmul.mubr.bf16.gmra.mrb[116].mxu1 %v6064_v42  ;;  %v4907_v62 = vmul.f32 0.5, %v15207_v59  ;;  %9513 = vtanh.f32 %v5562_v60  ;;  %v5451_v11 = vadd.f32 %v15224_v4, %v15223_v41  ;;  %v15229_v7 = vld [vmem:[#allocation98_spill] sm:$0xff]  ;;  %v15230_v29 = vld [vmem:[#allocation53_spill] sm:$0xff]  ;;  %v15248_v12 = vld [vmem:[#allocation84_spill] sm:$0xff] }
 0xa44   : > { %v5459_v2 = vadd.f32 %v15226_v58, %v15225_v6  ;;  %7182 = vmatprep.mubr.bf16.mxu1 %v6073_v17  ;;  %7224 = vmatpush1.bf16.msra.mxu1 %v9115_v54  ;;  %v6035_v14 = vpack.c.bf16 %v13830_v0, %v13827_v40  ;;  %v13847_v27 = vmul.f32 %v5786_v25, %v4890_v1  ;;  %9515 = vtanh.f32 %v5570_v35  ;;  %v9121_v52 = vld [vmem:[%s9809_s2 + $0x3c0] ss:$8 sps:$4 sm:$0xff]  }
 0xa45   : > { %v9502_v9 = vpop.eup %9501  ;;  %v13849_v42 = vmul.f32 %v5794_v51, %v4898_v24  ;;  %7225 = vmatprep.subr.bf16.mxu1 %v9120_v43  ;;  %v4915_v10 = vmul.f32 0.5, %v15209_v49  ;;  %v5579_v48 = vmul.f32 0.7978846, %v5451_v11  ;;  %v5450_v63 = vadd.f32 %v15228_v8, %v15227_v3  ;;  %v9126_v24 = vld [vmem:[%s9809_s2 + $0x3d4] ss:$8 sps:$4 sm:$0xff]   ;;  %v15231_v35 = vld [vmem:[#allocation142_spill] sm:$0xff] }
 0xa46   : > { %v9504_v59 = vpop.eup %9503  ;;  %v5803_v18 = vadd.f32 1.0, %v9502_v9  ;;  %v5587_v45 = vmul.f32 0.7978846, %v5459_v2  ;;  %v5458_v16 = vadd.f32 %v15230_v29, %v15229_v7  ;;  %v4906_v1 = vmul.f32 0.5, %v15211_v13  ;;  %v15233_v13 = vld [vmem:[#allocation56_spill] sm:$0xff]  ;;  %v15234_v11 = vld [vmem:[#allocation75_spill] sm:$0xff] }
 0xa47   : > { %v6034_v56 = vpack.c.bf16 %v13849_v42, %v13847_v27  ;;  %v5811_v17 = vadd.f32 1.0, %v9504_v59  ;;  %v4914_v49 = vmul.f32 0.5, %v15213_v20  ;;  %9517 = vtanh.f32 %v5579_v48  ;;  %v9124_v48 = vld [vmem:[%s9809_s2 + $0x3d0] ss:$8 sps:$4 sm:$0xff]   ;;  %v15236_v8 = vld [vmem:[#allocation67_spill] sm:$0xff] }
 0xa48   : > { %v9506_v54 = vpop.eup %9505  ;;  %v13858_v36 = vmul.f32 %v5803_v18, %v4907_v62  ;;  %7226 = vmatpush1.bf16.msra.mxu1 %v9118_v46  ;;  %9519 = vtanh.f32 %v5587_v45  ;;  %v5578_v43 = vmul.f32 0.7978846, %v5450_v63  ;;  %v5586_v51 = vmul.f32 0.7978846, %v5458_v16  ;;  %v15232_v62 = vld [vmem:[#allocation55_spill] sm:$0xff] }
 0xa49   : > { %v9508_v53 = vpop.eup %9507  ;;  %v13863_v60 = vmul.f32 %v5811_v17, %v4915_v10  ;;  %v5802_v44 = vadd.f32 1.0, %v9506_v54  ;;  %7227 = vmatprep.subr.bf16.mxu1 %v9123_v39  ;;  %v5467_v4 = vadd.f32 %v15232_v62, %v15231_v35  ;;  %v5475_v20 = vadd.f32 %v15234_v11, %v15233_v13  ;;  %v15235_v17 = vld [vmem:[#allocation141_spill] sm:$0xff]  ;;  %v9129_v16 = vld [vmem:[%s9809_s2 + $0x3e4] ss:$8 sps:$4 sm:$0xff]  }
 0xa4a   : > { %v5810_v25 = vadd.f32 1.0, %v9508_v53  ;;  %v4923_v9 = vmul.f32 0.5, %v15215_v57  ;;  %9521 = vtanh.f32 %v5578_v43  ;;  %v4931_v57 = vmul.f32 0.5, %v15217_v19 }
 0xa4b   : > { %v6043_v58 = vpack.c.bf16 %v13863_v60, %v13858_v36  ;;  %v13872_v2 = vmul.f32 %v5802_v44, %v4906_v1  ;;  %v9510_v46 = vpop.eup %9509  ;;  %7183 = vmatmul.mubr.bf16.gmra.mrb[120].mxu1 %v6072_v15  ;;  %9523 = vtanh.f32 %v5586_v51  ;;  %v5595_v59 = vmul.f32 0.7978846, %v5467_v4  ;;  %v15238_v15 = vld [vmem:[#allocation148_spill] sm:$0xff]  ;;  %v15241_v4 = vld [vmem:[#allocation69_spill] sm:$0xff] }
 0xa4c   : > { %v13878_v39 = vmul.f32 %v5810_v25, %v4914_v49  ;;  %v5603_v10 = vmul.f32 0.7978846, %v5475_v20  ;;  %v9512_v18 = vpop.eup %9511  ;;  %7192 = vmatprep.mubr.bf16.mxu1 %v6081_v31  ;;  %7228 = vmatpush1.bf16.msra.mxu1 %v9121_v52  ;;  %v5819_v45 = vadd.f32 1.0, %v9510_v46  ;;  %v5466_v55 = vadd.f32 %v15236_v8, %v15235_v17  ;;  %v15240_v51 = vld [vmem:[#allocation76_spill] sm:$0xff] }
 0xa4d   : > { %v5474_v63 = vadd.f32 %v15238_v15, %v15237_v21  ;;  %v9514_v29 = vpop.eup %9513  ;;  %7229 = vmatprep.subr.bf16.mxu1 %v9126_v24  ;;  %v5827_v5 = vadd.f32 1.0, %v9512_v18  ;;  %v4922_v33 = vmul.f32 0.5, %v15219_v22  ;;  %9525 = vtanh.f32 %v5595_v59  ;;  %v9127_v24 = vld [vmem:[%s9809_s2 + $0x3e0] ss:$8 sps:$4 sm:$0xff]   ;;  %v9132_v46 = vld [vmem:[%s9809_s2 + $0x3f4] ss:$8 sps:$4 sm:$0xff]  }
 0xa4e   : > { %v6042_v54 = vpack.c.bf16 %v13878_v39, %v13872_v2  ;;  %v9516_v31 = vpop.eup %9515  ;;  %v4930_v19 = vmul.f32 0.5, %v15221_v47  ;;  %v5818_v1 = vadd.f32 1.0, %v9514_v29  ;;  %9527 = vtanh.f32 %v5603_v10  ;;  %v15239_v22 = vld [vmem:[#allocation59_spill] sm:$0xff]  ;;  %v15243_v15 = vld [vmem:[#allocation146_spill] sm:$0xff] }
 0xa4f   : > { %v5594_v49 = vmul.f32 0.7978846, %v5466_v55  ;;  %v13894_v53 = vmul.f32 %v5819_v45, %v4923_v9  ;;  %v13896_v52 = vmul.f32 %v5827_v5, %v4931_v57  ;;  %v5826_v44 = vadd.f32 1.0, %v9516_v31  ;;  %v15242_v47 = vld [vmem:[#allocation163_spill] sm:$0xff]  ;;  %v6212_v2 = vld [vmem:[%s715_s1] sm:$0x3] }
 0xa50   : > { %v5602_v43 = vmul.f32 0.7978846, %v5474_v63  ;;  %7230 = vmatpush1.bf16.msra.mxu1 %v9124_v48  ;;  %v4939_v25 = vmul.f32 0.5, %v15223_v41  ;;  %v5483_v62 = vadd.f32 %v15240_v51, %v15239_v22  ;;  %v5491_v11 = vadd.f32 %v15242_v47, %v15241_v4  ;;  %v15244_v63 = vld [vmem:[#allocation120_spill] sm:$0xff]  ;;  %v15246_v5 = vld [vmem:[#allocation103_spill] sm:$0xff]  ;;  %v15253_v39 = vld [vmem:[#allocation10_spill] sm:$0xff] }
 0xa51   : > { %9529 = vtanh.f32 %v5594_v49  ;;  %v9518_v20 = vpop.eup %9517  ;;  %7231 = vmatprep.subr.bf16.mxu1 %v9129_v16  ;;  %v6051_v9 = vpack.c.bf16 %v13896_v52, %v13894_v53  ;;  %v13907_v59 = vmul.f32 %v5818_v1, %v4922_v33  ;;  %v13909_v10 = vmul.f32 %v5826_v44, %v4930_v19  ;;  %v15245_v16 = vld [vmem:[#allocation60_spill] sm:$0xff]  ;;  %v15254_v53 = vld [vmem:[#allocation11_spill] sm:$0xff] }
 0xa52   : > { %9531 = vtanh.f32 %v5602_v43  ;;  %v9520_v41 = vpop.eup %9519  ;;  %v4947_v18 = vmul.f32 0.5, %v15225_v6  ;;  %v5835_v48 = vadd.f32 1.0, %v9518_v20  ;;  %v5611_v57 = vmul.f32 0.7978846, %v5483_v62  ;;  %v9130_v6 = vld [vmem:[%s9809_s2 + $0x3f0] ss:$8 sps:$4 sm:$0xff]  }
 0xa53   : > { %v5619_v45 = vmul.f32 0.7978846, %v5491_v11  ;;  %7193 = vmatmul.mubr.bf16.gmra.mrb[124].mxu1 %v6080_v38  ;;  %v6050_v8 = vpack.c.bf16 %v13909_v10, %v13907_v59  ;;  %v5843_v55 = vadd.f32 1.0, %v9520_v41  ;;  %v5482_v29 = vadd.f32 %v15244_v63, %v15243_v15  ;;  %v15247_v51 = vld [vmem:[#allocation160_spill] sm:$0xff] }
 0xa54   : > { %v5490_v33 = vadd.f32 %v15246_v5, %v15245_v16  ;;  %v9522_v31 = vpop.eup %9521  ;;  %7232 = vmatpush1.bf16.msra.mxu1 %v9127_v24  ;;  %7235 = vmatprep.mubr.bf16.mxu1 %v6027_v23  ;;  %v13925_v19 = vmul.f32 %v5835_v48, %v4939_v25  ;;  %v4938_v26 = vmul.f32 0.5, %v15227_v3  ;;  %v4946_v50 = vmul.f32 0.5, %v15229_v7  ;;  %v15249_v48 = vld [vmem:[#allocation79_spill] sm:$0xff]  ;;  %v15252_v5 = vld [vmem:[#allocation164_spill] sm:$0xff] }
 0xa55   : > { %9533 = vtanh.f32 %v5611_v57  ;;  %v9524_v38 = vpop.eup %9523  ;;  %7233 = vmatprep.subr.bf16.mxu1 %v9132_v46  ;;  %v13929_v1 = vmul.f32 %v5843_v55, %v4947_v18  ;;  %v5834_v49 = vadd.f32 1.0, %v9522_v31  ;;  %v5610_v44 = vmul.f32 0.7978846, %v5482_v29  ;;  %v15250_v57 = vld [vmem:[#allocation83_spill] sm:$0xff]  ;;  %v15251_v29 = vld [vmem:[#allocation85_spill] sm:$0xff] }
 0xa56   : > { %9535 = vtanh.f32 %v5619_v45  ;;  %v5842_v43 = vadd.f32 1.0, %v9524_v38  ;;  %v5618_v24 = vmul.f32 0.7978846, %v5490_v33  ;;  %v5499_v61 = vadd.f32 %v15248_v12, %v15247_v51 }
 0xa57   : > { %v5507_v23 = vadd.f32 %v13799_v32, %v13468_v28  ;;  %v9526_v25 = vpop.eup %9525  ;;  %v6059_v3 = vpack.c.bf16 %v13929_v1, %v13925_v19  ;;  %v13937_v7 = vmul.f32 %v5834_v49, %v4938_v26  ;;  %v4955_v62 = vmul.f32 0.5, %v15231_v35  ;;  %v15255_v1 = vld [vmem:[#allocation14_spill] sm:$0xff] }
 0xa58   : > { %9537 = vtanh.f32 %v5610_v44  ;;  %v9528_v47 = vpop.eup %9527  ;;  %7234 = vmatpush1.bf16.msra.mxu1 %v9130_v6  ;;  %v13940_v11 = vmul.f32 %v5842_v43, %v4946_v50  ;;  %v5851_v20 = vadd.f32 1.0, %v9526_v25  ;;  %v5627_v46 = vmul.f32 0.7978846, %v5499_v61 }
 0xa59   : > { %9539 = vtanh.f32 %v5618_v24  ;;  %v4963_v41 = vmul.f32 0.5, %v15233_v13  ;;  %v5859_v18 = vadd.f32 1.0, %v9528_v47  ;;  %v5635_v32 = vmul.f32 0.7978846, %v5507_v23 }
 0xa5a   : > { %v5498_v45 = vadd.f32 %v15250_v57, %v15249_v48  ;;  %v6058_v63 = vpack.c.bf16 %v13940_v11, %v13937_v7  ;;  %v13947_v35 = vmul.f32 %v5851_v20, %v4955_v62  ;;  %9541 = vtanh.f32 %v5627_v46 }
 0xa5b   : > { %v9530_v55 = vpop.eup %9529  ;;  %v5506_v33 = vadd.f32 %v15252_v5, %v15251_v29  ;;  %7236 = vmatmul.mubr.bf16.vlgmr.msra.gmra.mrb[96].mxu1 %v6026_v30  ;;  %v5987_v13 = vmul.f32 %v5859_v18, %v4963_v41  ;;  %9543 = vtanh.f32 %v5635_v32  ;;  %v4954_v50 = vmul.f32 0.5, %v15235_v17 }
 0xa5c   : > { %v9532_v31 = vpop.eup %9531  ;;  %v5850_v6 = vadd.f32 1.0, %v9530_v55  ;;  %v5626_v26 = vmul.f32 0.7978846, %v5498_v45  ;;  %7245 = vmatprep.mubr.bf16.mxu1 %v6035_v14  ;;  %v4962_v38 = vmul.f32 0.5, %v15237_v21  ;;  %v4971_v23 = vmul.f32 0.5, %v15239_v22 }
 0xa5d   : > { %v5858_v49 = vadd.f32 1.0, %v9532_v31  ;;  %v5634_v44 = vmul.f32 0.7978846, %v5506_v33  ;;  %v6067_v43 = vpack.c.bf16 %v5987_v13, %v13947_v35  ;;  %v4979_v40 = vmul.f32 0.5, %v15241_v4  ;;  %v15257_v13 = vld [vmem:[#allocation15_spill] sm:$0xff] }
 0xa5e   : > { %9545 = vtanh.f32 %v5626_v26  ;;  %v5978_v37 = vmul.f32 %v5850_v6, %v4954_v50  ;;  %v4970_v62 = vmul.f32 0.5, %v15243_v15  ;;  %v4978_v47 = vmul.f32 0.5, %v15245_v16  ;;  %v15258_v26 = vld [vmem:[#allocation13_spill] sm:$0xff] }
 0xa5f   : > { %v9534_v24 = vpop.eup %9533  ;;  %v5986_v34 = vmul.f32 %v5858_v49, %v4962_v38  ;;  %9547 = vtanh.f32 %v5634_v44  ;;  %v4987_v32 = vmul.f32 0.5, %v15247_v51  ;;  %v4995_v27 = vmul.f32 0.5, %v13468_v28 }
 0xa60   : > { %v9536_v30 = vpop.eup %9535  ;;  %v5867_v12 = vadd.f32 1.0, %v9534_v24  ;;  %v4986_v35 = vmul.f32 0.5, %v15249_v48  ;;  %v4994_v36 = vmul.f32 0.5, %v15251_v29  ;;  %v13995_v52 = vrot.slane %v6212_v2, %v15254_v53  ;;  %v15256_v29 = vld [vmem:[#allocation12_spill] sm:$0xff] }
 0xa61   : > { %v6066_v61 = vpack.c.bf16 %v5986_v34, %v5978_v37  ;;  %v5875_v0 = vadd.f32 1.0, %v9536_v30  ;;  %v15259_v30 = vld [vmem:[#allocation19_spill] sm:$0xff] }
 0xa62   : > { %v9538_v14 = vpop.eup %9537  ;;  %v5995_v21 = vmul.f32 %v5867_v12, %v4971_v23 }
 0xa63   : > { %v9540_v17 = vpop.eup %9539  ;;  %v6003_v25 = vmul.f32 %v5875_v0, %v4979_v40  ;;  %v5866_v7 = vadd.f32 1.0, %v9538_v14  ;;  %7246 = vmatmul.mubr.bf16.gmra.mrb[100].mxu1 %v6034_v56  ;;  %v15260_v40 = vld [vmem:[#allocation16_spill] sm:$0xff] }
 0xa64   : > { %v5874_v11 = vadd.f32 1.0, %v9540_v17  ;;  %v9542_v20 = vpop.eup %9541  ;;  %7255 = vmatprep.mubr.bf16.mxu1 %v6043_v58  ;;  %v15261_v17 = vld [vmem:[#allocation18_spill] sm:$0xff] }
 0xa65   : > { %v6075_v22 = vpack.c.bf16 %v6003_v25, %v5995_v21  ;;  %v9544_v4 = vpop.eup %9543  ;;  %v5994_v46 = vmul.f32 %v5866_v7, %v4970_v62  ;;  %v5883_v18 = vadd.f32 1.0, %v9542_v20  ;;  %v15262_v25 = vld [vmem:[#allocation17_spill] sm:$0xff] }
 0xa66   : > { %v6002_v41 = vmul.f32 %v5874_v11, %v4978_v47  ;;  %v5891_v42 = vadd.f32 1.0, %v9544_v4 }
 0xa67   : > { %v6011_v16 = vmul.f32 %v5883_v18, %v4987_v32 }
 0xa68   : > { %v9546_v56 = vpop.eup %9545  ;;  %v6074_v15 = vpack.c.bf16 %v6002_v41, %v5994_v46  ;;  %v6019_v45 = vmul.f32 %v5891_v42, %v4995_v27  ;;  %v15263_v41 = vld [vmem:[#allocation23_spill] sm:$0xff]  ;;  %v15264_v42 = vld [vmem:[#allocation20_spill] sm:$0xff] }
 0xa69   : > { %v9548_v57 = vpop.eup %9547  ;;  %v5882_v55 = vadd.f32 1.0, %v9546_v56 }
 0xa6a   : > { %v5890_v60 = vadd.f32 1.0, %v9548_v57  ;;  %v6083_v58 = vpack.c.bf16 %v6019_v45, %v6011_v16  ;;  %v15265_v57 = vld [vmem:[#allocation22_spill] sm:$0xff]  ;;  %v15266_v45 = vld [vmem:[#allocation21_spill] sm:$0xff] }
 0xa6b   : > { %7256 = vmatmul.mubr.bf16.gmra.mrb[104].mxu1 %v6042_v54  ;;  %v6010_v51 = vmul.f32 %v5882_v55, %v4986_v35  ;;  %v13992_v54 = vrot.slane %v6212_v2, %v15253_v39  ;;  %v15267_v2 = vld [vmem:[#allocation27_spill] sm:$0xff] }
 0xa6c   : > { %v6018_v28 = vmul.f32 %v5890_v60, %v4994_v36  ;;  %7265 = vmatprep.mubr.bf16.mxu1 %v6051_v9 }
 0xa6e   : > { %v6082_v5 = vpack.c.bf16 %v6018_v28, %v6010_v51 }
 0xa73   : > { %7266 = vmatmul.mubr.bf16.gmra.mrb[108].mxu1 %v6050_v8 }
 0xa74   : > { %7275 = vmatprep.mubr.bf16.mxu1 %v6059_v3 }
 0xa7b   : > { %7276 = vmatmul.mubr.bf16.gmra.mrb[112].mxu1 %v6058_v63 }
 0xa7c   : > { %7285 = vmatprep.mubr.bf16.mxu1 %v6067_v43 }
 0xa83   : > { %7286 = vmatmul.mubr.bf16.gmra.mrb[116].mxu1 %v6066_v61 }
 0xa84   : > { %7295 = vmatprep.mubr.bf16.mxu1 %v6075_v22 }
 0xa8b   : > { %7296 = vmatmul.mubr.bf16.gmra.mrb[120].mxu1 %v6074_v15 }
 0xa8c   : > { %7305 = vmatprep.mubr.bf16.mxu1 %v6083_v58 }
 0xa93   : > { %7306 = vmatmul.mubr.bf16.gmra.mrb[124].mxu1 %v6082_v5 }
 0xb2e   : > { %v7237_v9 = vpop.f32.mrb[96].mxu1 }
 0xb2f   : > { %v8547_v59 = vadd.f32 %v7237_v9, %v13992_v54  ;;  %v7239_v10 = vpop.f32.mrb[97].mxu1 }
 0xb30   : > { %v8548_v8 = vadd.f32 %v7239_v10, %v13995_v52  ;;  %v7241_v19 = vpop.f32.mrb[98].mxu1 }
 0xb31   : > { %v14000_v3 = vadd.f32 %v8547_v59, %v15255_v1  ;;  %v8549_v48 = vadd.f32 %v7241_v19, %v13992_v54  ;;  %v7243_v63 = vpop.f32.mrb[99].mxu1 }
 0xb32   : > { %v14004_v33 = vadd.f32 %v8548_v8, %v15256_v29  ;;  %v8550_v31 = vadd.f32 %v7243_v63, %v13995_v52  ;;  %v15268_v8 = vld [vmem:[#allocation24_spill] sm:$0xff]  ;;  %v15270_v29 = vld [vmem:[#allocation25_spill] sm:$0xff] }
 0xb33   : > { %v14008_v6 = vadd.f32 %v8549_v48, %v15257_v13  ;;  %v15269_v48 = vld [vmem:[#allocation26_spill] sm:$0xff] }
 0xb34   : > { %v14011_v50 = vadd.f32 %v8550_v31, %v15258_v26  ;;  %v7350_v38 = vadd.f32 %v14004_v33, %v14000_v3 }
 0xb36   : > { %v7247_v49 = vpop.f32.mrb[100].mxu1  ;;  %7351 = vadd.xlane.f32.xlu0 %v7350_v38  ;;  %v7353_v44 = vadd.f32 %v14011_v50, %v14008_v6 }
 0xb37   : > { %v8551_v43 = vadd.f32 %v7247_v49, %v13992_v54  ;;  %v7249_v24 = vpop.f32.mrb[101].mxu1 }
 0xb38   : > { %v8552_v37 = vadd.f32 %v7249_v24, %v13995_v52  ;;  %v7251_v34 = vpop.f32.mrb[102].mxu1  ;;  %7354 = vadd.xlane.f32.xlu1 %v7353_v44 }
 0xb39   : > { %v14020_v12 = vadd.f32 %v8551_v43, %v15259_v30  ;;  %v8553_v61 = vadd.f32 %v7251_v34, %v13992_v54  ;;  %v7253_v23 = vpop.f32.mrb[103].mxu1 }
 0xb3a   : > { %v14024_v0 = vadd.f32 %v8552_v37, %v15260_v40  ;;  %v8554_v14 = vadd.f32 %v7253_v23, %v13995_v52  ;;  %v15271_v37 = vld [vmem:[#allocation31_spill] sm:$0xff]  ;;  %v15272_v23 = vld [vmem:[#allocation28_spill] sm:$0xff] }
 0xb3b   : > { %v14028_v21 = vadd.f32 %v8553_v61, %v15261_v17  ;;  %v15273_v17 = vld [vmem:[#allocation30_spill] sm:$0xff] }
 0xb3c   : > { %v14031_v7 = vadd.f32 %v8554_v14, %v15262_v25  ;;  %v7356_v62 = vadd.f32 %v14024_v0, %v14020_v12 }
 0xb3e   : > { %v7257_v47 = vpop.f32.mrb[104].mxu1  ;;  %7357 = vadd.xlane.f32.xlu0 %v7356_v62  ;;  %v7359_v11 = vadd.f32 %v14031_v7, %v14028_v21  ;;  %v15274_v62 = vld [vmem:[#allocation29_spill] sm:$0xff] }
 0xb3f   : > { %v8555_v20 = vadd.f32 %v7257_v47, %v13992_v54  ;;  %v7259_v22 = vpop.f32.mrb[105].mxu1 }
 0xb40   : > { %v8556_v4 = vadd.f32 %v7259_v22, %v13995_v52  ;;  %v7261_v46 = vpop.f32.mrb[106].mxu1  ;;  %7360 = vadd.xlane.f32.xlu1 %v7359_v11 }
 0xb41   : > { %v14040_v18 = vadd.f32 %v8555_v20, %v15263_v41  ;;  %v8557_v32 = vadd.f32 %v7261_v46, %v13992_v54  ;;  %v7263_v27 = vpop.f32.mrb[107].mxu1 }
 0xb42   : > { %v14044_v56 = vadd.f32 %v8556_v4, %v15264_v42  ;;  %v8558_v15 = vadd.f32 %v7263_v27, %v13995_v52  ;;  %v15275_v27 = vld [vmem:[#allocation35_spill] sm:$0xff] }
 0xb43   : > { %v14048_v16 = vadd.f32 %v8557_v32, %v15265_v57 }
 0xb44   : > { %v14051_v55 = vadd.f32 %v8558_v15, %v15266_v45  ;;  %v7362_v35 = vadd.f32 %v14044_v56, %v14040_v18  ;;  %v15276_v45 = vld [vmem:[#allocation32_spill] sm:$0xff] }
 0xb46   : > { %v7267_v36 = vpop.f32.mrb[108].mxu1  ;;  %7363 = vadd.xlane.f32.xlu0 %v7362_v35  ;;  %v7365_v60 = vadd.f32 %v14051_v55, %v14048_v16 }
 0xb47   : > { %v8559_v58 = vadd.f32 %v7267_v36, %v13992_v54  ;;  %v7269_v51 = vpop.f32.mrb[109].mxu1 }
 0xb48   : > { %v8560_v28 = vadd.f32 %v7269_v51, %v13995_v52  ;;  %v7271_v5 = vpop.f32.mrb[110].mxu1  ;;  %7366 = vadd.xlane.f32.xlu1 %v7365_v60  ;;  %v15277_v60 = vld [vmem:[#allocation34_spill] sm:$0xff]  ;;  %v15278_v51 = vld [vmem:[#allocation33_spill] sm:$0xff] }
 0xb49   : > { %v14060_v9 = vadd.f32 %v8559_v58, %v15267_v2  ;;  %v8561_v59 = vadd.f32 %v7271_v5, %v13992_v54  ;;  %v7273_v10 = vpop.f32.mrb[111].mxu1 }
 0xb4a   : > { %v14064_v19 = vadd.f32 %v8560_v28, %v15268_v8  ;;  %v8562_v1 = vadd.f32 %v7273_v10, %v13995_v52 }
 0xb4b   : > { %v14068_v63 = vadd.f32 %v8561_v59, %v15269_v48 }
 0xb4c   : > { %v14071_v31 = vadd.f32 %v8562_v1, %v15270_v29  ;;  %v7368_v13 = vadd.f32 %v14064_v19, %v14060_v9  ;;  %v15279_v29 = vld [vmem:[#allocation39_spill] sm:$0xff] }
 0xb4e   : > { %v7277_v26 = vpop.f32.mrb[112].mxu1  ;;  %7369 = vadd.xlane.f32.xlu0 %v7368_v13  ;;  %v7371_v38 = vadd.f32 %v14071_v31, %v14068_v63 }
 0xb4f   : > { %v8563_v49 = vadd.f32 %v7277_v26, %v13992_v54  ;;  %v7279_v44 = vpop.f32.mrb[113].mxu1 }
 0xb50   : > { %v8564_v43 = vadd.f32 %v7279_v44, %v13995_v52  ;;  %v7281_v24 = vpop.f32.mrb[114].mxu1  ;;  %7372 = vadd.xlane.f32.xlu1 %v7371_v38 }
 0xb51   : > { %v14080_v34 = vadd.f32 %v8563_v49, %v15271_v37  ;;  %v8565_v30 = vadd.f32 %v7281_v24, %v13992_v54  ;;  %v7283_v61 = vpop.f32.mrb[115].mxu1  ;;  %v15280_v49 = vld [vmem:[#allocation36_spill] sm:$0xff]  ;;  %v15281_v24 = vld [vmem:[#allocation38_spill] sm:$0xff] }
 0xb52   : > { %v14084_v40 = vadd.f32 %v8564_v43, %v15272_v23  ;;  %v8566_v14 = vadd.f32 %v7283_v61, %v13995_v52 }
 0xb53   : > { %v14088_v25 = vadd.f32 %v8565_v30, %v15273_v17  ;;  %v15282_v30 = vld [vmem:[#allocation37_spill] sm:$0xff] }
 0xb54   : > { %v14091_v47 = vadd.f32 %v8566_v14, %v15274_v62  ;;  %v7374_v11 = vadd.f32 %v14084_v40, %v14080_v34 }
 0xb56   : > { %v7287_v20 = vpop.f32.mrb[116].mxu1  ;;  %7375 = vadd.xlane.f32.xlu0 %v7374_v11  ;;  %v7377_v22 = vadd.f32 %v14091_v47, %v14088_v25 }
 0xb57   : > { %v8567_v4 = vadd.f32 %v7287_v20, %v13992_v54  ;;  %v7289_v46 = vpop.f32.mrb[117].mxu1 }
 0xb58   : > { %v8568_v41 = vadd.f32 %v7289_v46, %v13995_v52  ;;  %v7291_v32 = vpop.f32.mrb[118].mxu1  ;;  %7378 = vadd.xlane.f32.xlu1 %v7377_v22 }
 0xb59   : > { %v14100_v42 = vadd.f32 %v8567_v4, %v15275_v27  ;;  %v8569_v15 = vadd.f32 %v7291_v32, %v13992_v54  ;;  %v7293_v57 = vpop.f32.mrb[119].mxu1  ;;  %v15283_v4 = vld [vmem:[#allocation42_spill] sm:$0xff]  ;;  %v15284_v27 = vld [vmem:[#allocation40_spill] sm:$0xff] }
 0xb5a   : > { %v14104_v35 = vadd.f32 %v8568_v41, %v15276_v45  ;;  %v8570_v36 = vadd.f32 %v7293_v57, %v13995_v52  ;;  %v15285_v45 = vld [vmem:[#allocation43_spill] sm:$0xff] }
 0xb5b   : > { %v14108_v58 = vadd.f32 %v8569_v15, %v15277_v60  ;;  %v15286_v60 = vld [vmem:[#allocation41_spill] sm:$0xff] }
 0xb5c   : > { %v14111_v28 = vadd.f32 %v8570_v36, %v15278_v51  ;;  %v7380_v5 = vadd.f32 %v14104_v35, %v14100_v42 }
 0xb5e   : > { %v7297_v2 = vpop.f32.mrb[120].mxu1  ;;  %7381 = vadd.xlane.f32.xlu0 %v7380_v5  ;;  %v7383_v59 = vadd.f32 %v14111_v28, %v14108_v58 }
 0xb5f   : > { %v8571_v10 = vadd.f32 %v7297_v2, %v13992_v54  ;;  %v7299_v8 = vpop.f32.mrb[121].mxu1 }
 0xb60   : > { %v8572_v1 = vadd.f32 %v7299_v8, %v13995_v52  ;;  %v7301_v48 = vpop.f32.mrb[122].mxu1  ;;  %7384 = vadd.xlane.f32.xlu1 %v7383_v59 }
 0xb61   : > { %v14120_v13 = vadd.f32 %v8571_v10, %v15279_v29  ;;  %v8573_v26 = vadd.f32 %v7301_v48, %v13992_v54  ;;  %v7303_v38 = vpop.f32.mrb[123].mxu1 }
 0xb62   : > { %v14124_v44 = vadd.f32 %v8572_v1, %v15280_v49  ;;  %v8574_v43 = vadd.f32 %v7303_v38, %v13995_v52 }
 0xb63   : > { %v14128_v37 = vadd.f32 %v8573_v26, %v15281_v24 }
 0xb64   : > { %v14131_v61 = vadd.f32 %v8574_v43, %v15282_v30  ;;  %v7386_v23 = vadd.f32 %v14124_v44, %v14120_v13 }
 0xb66   : > { %v7307_v14 = vpop.f32.mrb[124].mxu1  ;;  %7387 = vadd.xlane.f32.xlu0 %v7386_v23  ;;  %v7389_v17 = vadd.f32 %v14131_v61, %v14128_v37 }
 0xb67   : > { %v8575_v62 = vadd.f32 %v7307_v14, %v13992_v54  ;;  %v7309_v11 = vpop.f32.mrb[125].mxu1 }
 0xb68   : > { %v8576_v20 = vadd.f32 %v7309_v11, %v13995_v52  ;;  %v7311_v22 = vpop.f32.mrb[126].mxu1  ;;  %7390 = vadd.xlane.f32.xlu1 %v7389_v17 }
 0xb69   : > { %v14140_v46 = vadd.f32 %v8575_v62, %v15283_v4  ;;  %v8577_v41 = vadd.f32 %v7311_v22, %v13992_v54  ;;  %v7313_v32 = vpop.f32.mrb[127].mxu1 }
 0xb6a   : > { %v14144_v15 = vadd.f32 %v8576_v20, %v15284_v27  ;;  %v8578_v57 = vadd.f32 %v7313_v32, %v13995_v52 }
 0xb6b   : > { %v14148_v36 = vadd.f32 %v8577_v41, %v15285_v45 }
 0xb6c   : > { %v14151_v51 = vadd.f32 %v8578_v57, %v15286_v60  ;;  %v7392_v5 = vadd.f32 %v14144_v15, %v14140_v46 }
 0xb6e   : > { %7393 = vadd.xlane.f32.xlu0 %v7392_v5  ;;  %v7395_v2 = vadd.f32 %v14151_v51, %v14148_v36 }
 0xb70   : > { %7396 = vadd.xlane.f32.xlu1 %v7395_v2 }
 0xbc3   : > { %v7352_v54 = vpop.xlane.xlu0 %7351 }
 0xbc4   : > { %v7398_v59 = vmul.f32 0.00390625, %v7352_v54 }
 0xbc5   : > { %v7355_v10 = vpop.xlane.xlu1 %7354 }
 0xbc6   : > { %v14158_v8 = vsub.f32 %v14000_v3, %v7398_v59  ;;  %v14161_v52 = vsub.f32 %v14004_v33, %v7398_v59  ;;  %v7399_v1 = vmul.f32 0.00390625, %v7355_v10 }
 0xbc8   : > { %v7446_v48 = vmul.f32 %v14158_v8, %v14158_v8  ;;  %v7447_v29 = vmul.f32 %v14161_v52, %v14161_v52  ;;  %v14168_v26 = vsub.f32 %v14008_v6, %v7399_v1  ;;  %v14171_v38 = vsub.f32 %v14011_v50, %v7399_v1 }
 0xbca   : > { %v7448_v3 = vmul.f32 %v14168_v26, %v14168_v26  ;;  %v7449_v33 = vmul.f32 %v14171_v38, %v14171_v38  ;;  %v7478_v49 = vadd.f32 %v7447_v29, %v7446_v48 }
 0xbcb   : > { %v7358_v43 = vpop.xlane.xlu0 %7357 }
 0xbcc   : > { %v7400_v24 = vmul.f32 0.00390625, %v7358_v43  ;;  %7479 = vadd.xlane.f32.xlu0 %v7478_v49  ;;  %v7481_v30 = vadd.f32 %v7449_v33, %v7448_v3 }
 0xbcd   : > { %v7361_v23 = vpop.xlane.xlu1 %7360 }
 0xbce   : > { %v14178_v14 = vsub.f32 %v14020_v12, %v7400_v24  ;;  %v14181_v6 = vsub.f32 %v14024_v0, %v7400_v24  ;;  %v7401_v50 = vmul.f32 0.00390625, %v7361_v23  ;;  %7482 = vadd.xlane.f32.xlu1 %v7481_v30 }
 0xbd0   : > { %v7450_v17 = vmul.f32 %v14178_v14, %v14178_v14  ;;  %v7451_v62 = vmul.f32 %v14181_v6, %v14181_v6  ;;  %v14188_v11 = vsub.f32 %v14028_v21, %v7401_v50  ;;  %v14191_v20 = vsub.f32 %v14031_v7, %v7401_v50 }
 0xbd2   : > { %v7452_v12 = vmul.f32 %v14188_v11, %v14188_v11  ;;  %v7453_v0 = vmul.f32 %v14191_v20, %v14191_v20  ;;  %v7484_v22 = vadd.f32 %v7451_v62, %v7450_v17 }
 0xbd3   : > { %v7364_v4 = vpop.xlane.xlu0 %7363 }
 0xbd4   : > { %v7402_v41 = vmul.f32 0.00390625, %v7364_v4  ;;  %7485 = vadd.xlane.f32.xlu0 %v7484_v22  ;;  %v7487_v32 = vadd.f32 %v7453_v0, %v7452_v12 }
 0xbd5   : > { %v7367_v27 = vpop.xlane.xlu1 %7366 }
 0xbd6   : > { %v14198_v57 = vsub.f32 %v14040_v18, %v7402_v41  ;;  %v14201_v21 = vsub.f32 %v14044_v56, %v7402_v41  ;;  %v7403_v7 = vmul.f32 0.00390625, %v7367_v27  ;;  %7488 = vadd.xlane.f32.xlu1 %v7487_v32 }
 0xbd8   : > { %v7454_v45 = vmul.f32 %v14198_v57, %v14198_v57  ;;  %v7455_v60 = vmul.f32 %v14201_v21, %v14201_v21  ;;  %v14208_v5 = vsub.f32 %v14048_v16, %v7403_v7  ;;  %v14211_v2 = vsub.f32 %v14051_v55, %v7403_v7 }
 0xbda   : > { %v7456_v18 = vmul.f32 %v14208_v5, %v14208_v5  ;;  %v7457_v56 = vmul.f32 %v14211_v2, %v14211_v2  ;;  %v7490_v54 = vadd.f32 %v7455_v60, %v7454_v45 }
 0xbdb   : > { %v7370_v59 = vpop.xlane.xlu0 %7369 }
 0xbdc   : > { %v7404_v10 = vmul.f32 0.00390625, %v7370_v59  ;;  %7491 = vadd.xlane.f32.xlu0 %v7490_v54  ;;  %v7493_v1 = vadd.f32 %v7457_v56, %v7456_v18 }
 0xbdd   : > { %v7373_v48 = vpop.xlane.xlu1 %7372 }
 0xbde   : > { %v14218_v29 = vsub.f32 %v14060_v9, %v7404_v10  ;;  %v14221_v16 = vsub.f32 %v14064_v19, %v7404_v10  ;;  %v7405_v55 = vmul.f32 0.00390625, %v7373_v48  ;;  %7494 = vadd.xlane.f32.xlu1 %v7493_v1 }
 0xbe0   : > { %v7458_v3 = vmul.f32 %v14218_v29, %v14218_v29  ;;  %v7459_v33 = vmul.f32 %v14221_v16, %v14221_v16  ;;  %v14228_v49 = vsub.f32 %v14068_v63, %v7405_v55  ;;  %v14231_v43 = vsub.f32 %v14071_v31, %v7405_v55 }
 0xbe2   : > { %v7460_v9 = vmul.f32 %v14228_v49, %v14228_v49  ;;  %v7461_v19 = vmul.f32 %v14231_v43, %v14231_v43  ;;  %v7496_v24 = vadd.f32 %v7459_v33, %v7458_v3 }
 0xbe3   : > { %v7376_v30 = vpop.xlane.xlu0 %7375 }
 0xbe4   : > { %v7406_v23 = vmul.f32 0.00390625, %v7376_v30  ;;  %7497 = vadd.xlane.f32.xlu0 %v7496_v24  ;;  %v7499_v50 = vadd.f32 %v7461_v19, %v7460_v9 }
 0xbe5   : > { %v7379_v17 = vpop.xlane.xlu1 %7378 }
 0xbe6   : > { %v14238_v62 = vsub.f32 %v14080_v34, %v7406_v23  ;;  %v14241_v63 = vsub.f32 %v14084_v40, %v7406_v23  ;;  %v7407_v31 = vmul.f32 0.00390625, %v7379_v17  ;;  %7500 = vadd.xlane.f32.xlu1 %v7499_v50 }
 0xbe8   : > { %v7462_v12 = vmul.f32 %v14238_v62, %v14238_v62  ;;  %v7463_v0 = vmul.f32 %v14241_v63, %v14241_v63  ;;  %v14248_v22 = vsub.f32 %v14088_v25, %v7407_v31  ;;  %v14251_v4 = vsub.f32 %v14091_v47, %v7407_v31 }
 0xbea   : > { %v7464_v34 = vmul.f32 %v14248_v22, %v14248_v22  ;;  %v7465_v40 = vmul.f32 %v14251_v4, %v14251_v4  ;;  %v7502_v41 = vadd.f32 %v7463_v0, %v7462_v12 }
 0xbeb   : > { %v7382_v32 = vpop.xlane.xlu0 %7381 }
 0xbec   : > { %v7408_v27 = vmul.f32 0.00390625, %v7382_v32  ;;  %7503 = vadd.xlane.f32.xlu0 %v7502_v41  ;;  %v7505_v7 = vadd.f32 %v7465_v40, %v7464_v34 }
 0xbed   : > { %v7385_v45 = vpop.xlane.xlu1 %7384 }
 0xbee   : > { %v14258_v60 = vsub.f32 %v14100_v42, %v7408_v27  ;;  %v14261_v25 = vsub.f32 %v14104_v35, %v7408_v27  ;;  %v7409_v47 = vmul.f32 0.00390625, %v7385_v45  ;;  %7506 = vadd.xlane.f32.xlu1 %v7505_v7 }
 0xbf0   : > { %v7466_v18 = vmul.f32 %v14258_v60, %v14258_v60  ;;  %v7467_v56 = vmul.f32 %v14261_v25, %v14261_v25  ;;  %v14268_v54 = vsub.f32 %v14108_v58, %v7409_v47  ;;  %v14271_v59 = vsub.f32 %v14111_v28, %v7409_v47 }
 0xbf2   : > { %v7468_v42 = vmul.f32 %v14268_v54, %v14268_v54  ;;  %v7469_v35 = vmul.f32 %v14271_v59, %v14271_v59  ;;  %v7508_v10 = vadd.f32 %v7467_v56, %v7466_v18 }
 0xbf3   : > { %v7388_v1 = vpop.xlane.xlu0 %7387 }
 0xbf4   : > { %v7410_v48 = vmul.f32 0.00390625, %v7388_v1  ;;  %7509 = vadd.xlane.f32.xlu0 %v7508_v10  ;;  %v7511_v55 = vadd.f32 %v7469_v35, %v7468_v42  ;;  %v7348_v1 = vld [vmem:[%s719_s0] sm:$0x3] }
 0xbf5   : > { %v7391_v3 = vpop.xlane.xlu1 %7390 }
 0xbf6   : > { %v14278_v33 = vsub.f32 %v14120_v13, %v7410_v48  ;;  %v14281_v58 = vsub.f32 %v14124_v44, %v7410_v48  ;;  %v7411_v28 = vmul.f32 0.00390625, %v7391_v3  ;;  %7512 = vadd.xlane.f32.xlu1 %v7511_v55  ;;  %v7349_v3 = vld [vmem:[%s723_s22] sm:$0x3] }
 0xbf8   : > { %v7470_v9 = vmul.f32 %v14278_v33, %v14278_v33  ;;  %v7471_v19 = vmul.f32 %v14281_v58, %v14281_v58  ;;  %v14288_v24 = vsub.f32 %v14128_v37, %v7411_v28  ;;  %v14291_v30 = vsub.f32 %v14131_v61, %v7411_v28 }
 0xbfa   : > { %v7472_v13 = vmul.f32 %v14288_v24, %v14288_v24  ;;  %v7473_v44 = vmul.f32 %v14291_v30, %v14291_v30  ;;  %v7514_v23 = vadd.f32 %v7471_v19, %v7470_v9  ;;  %v14328_v9 = vrot.slane %v7348_v1, %v15253_v39 }
 0xbfb   : > { %v7394_v50 = vpop.xlane.xlu0 %7393  ;;  %v14331_v19 = vrot.slane %v7348_v1, %v15254_v53 }
 0xbfc   : > { %v7412_v17 = vmul.f32 0.00390625, %v7394_v50  ;;  %7515 = vadd.xlane.f32.xlu0 %v7514_v23  ;;  %v7517_v31 = vadd.f32 %v7473_v44, %v7472_v13  ;;  %v14334_v44 = vrot.slane %v7349_v3, %v15253_v39  ;;  %v14337_v23 = vrot.slane %v7349_v3, %v15254_v53 }
 0xbfd   : > { %v7397_v12 = vpop.xlane.xlu1 %7396 }
 0xbfe   : > { %v14298_v0 = vsub.f32 %v14140_v46, %v7412_v17  ;;  %v14301_v37 = vsub.f32 %v14144_v15, %v7412_v17  ;;  %v7413_v61 = vmul.f32 0.00390625, %v7397_v12  ;;  %7518 = vadd.xlane.f32.xlu1 %v7517_v31 }
 0xc00   : > { %v7474_v34 = vmul.f32 %v14298_v0, %v14298_v0  ;;  %v7475_v40 = vmul.f32 %v14301_v37, %v14301_v37  ;;  %v14308_v41 = vsub.f32 %v14148_v36, %v7413_v61  ;;  %v14311_v32 = vsub.f32 %v14151_v51, %v7413_v61 }
 0xc02   : > { %v7476_v46 = vmul.f32 %v14308_v41, %v14308_v41  ;;  %v7477_v15 = vmul.f32 %v14311_v32, %v14311_v32  ;;  %v7520_v27 = vadd.f32 %v7475_v40, %v7474_v34 }
 0xc04   : > { %7521 = vadd.xlane.f32.xlu0 %v7520_v27  ;;  %v7523_v7 = vadd.f32 %v7477_v15, %v7476_v46 }
 0xc06   : > { %7524 = vadd.xlane.f32.xlu1 %v7523_v7 }
 0xc59   : > { %v7480_v45 = vpop.xlane.xlu0 %7479 }
 0xc5a   : > { %v7526_v47 = vmul.f32 0.00390625, %v7480_v45 }
 0xc5b   : > { %v7483_v18 = vpop.xlane.xlu1 %7482 }
 0xc5c   : > { %v7542_v36 = vadd.f32 1e-12, %v7526_v47  ;;  %v7527_v56 = vmul.f32 0.00390625, %v7483_v18 }
 0xc5e   : > { %9549 = vrsqrt.f32 %v7542_v36  ;;  %v7543_v51 = vadd.f32 1e-12, %v7527_v56 }
 0xc60   : > { %9551 = vrsqrt.f32 %v7543_v51 }
 0xc61   : > { %v7486_v42 = vpop.xlane.xlu0 %7485 }
 0xc62   : > { %v7528_v35 = vmul.f32 0.00390625, %v7486_v42 }
 0xc63   : > { %v7489_v10 = vpop.xlane.xlu1 %7488 }
 0xc64   : > { %v7544_v48 = vadd.f32 1e-12, %v7528_v35  ;;  %v7529_v55 = vmul.f32 0.00390625, %v7489_v10 }
 0xc66   : > { %9553 = vrsqrt.f32 %v7544_v48  ;;  %v7545_v28 = vadd.f32 1e-12, %v7529_v55 }
 0xc68   : > { %v9550_v13 = vpop.eup %9549  ;;  %9555 = vrsqrt.f32 %v7545_v28 }
 0xc69   : > { %v7574_v50 = vmul.f32 %v9550_v13, %v14158_v8  ;;  %v7575_v17 = vmul.f32 %v9550_v13, %v14161_v52  ;;  %v7492_v31 = vpop.xlane.xlu0 %7491 }
 0xc6a   : > { %v9552_v12 = vpop.eup %9551  ;;  %v7530_v61 = vmul.f32 0.00390625, %v7492_v31 }
 0xc6b   : > { %v7617_v34 = vmul.f32 %v14328_v9, %v7574_v50  ;;  %v7618_v40 = vmul.f32 %v14331_v19, %v7575_v17  ;;  %v7576_v46 = vmul.f32 %v9552_v12, %v14168_v26  ;;  %v7577_v39 = vmul.f32 %v9552_v12, %v14171_v38  ;;  %v7495_v53 = vpop.xlane.xlu1 %7494 }
 0xc6c   : > { %v7546_v15 = vadd.f32 1e-12, %v7530_v61  ;;  %v7531_v8 = vmul.f32 0.00390625, %v7495_v53 }
 0xc6d   : > { %v7660_v52 = vadd.f32 %v14334_v44, %v7617_v34  ;;  %v7661_v27 = vadd.f32 %v14337_v23, %v7618_v40  ;;  %v7619_v7 = vmul.f32 %v14328_v9, %v7576_v46  ;;  %v7620_v45 = vmul.f32 %v14331_v19, %v7577_v39 }
 0xc6e   : > { %9557 = vrsqrt.f32 %v7546_v15  ;;  %v7547_v47 = vadd.f32 1e-12, %v7531_v8 }
 0xc6f   : > { %7692 = vst [vmem:[%s9831_s9] sm:$0xff] %v7660_v52  ;;  %7693 = vst [vmem:[%s9831_s9 + $0x8] sm:$0xff] %v7661_v27  ;;  %v7662_v26 = vadd.f32 %v14334_v44, %v7619_v7  ;;  %v7663_v38 = vadd.f32 %v14337_v23, %v7620_v45 }
 0xc70   : > { %v9554_v18 = vpop.eup %9553  ;;  %9559 = vrsqrt.f32 %v7547_v47 }
 0xc71   : > { %7694 = vst [vmem:[%s9831_s9 + $0x10] sm:$0xff] %v7662_v26  ;;  %7695 = vst [vmem:[%s9831_s9 + $0x18] sm:$0xff] %v7663_v38  ;;  %v7578_v36 = vmul.f32 %v9554_v18, %v14178_v14  ;;  %v7579_v56 = vmul.f32 %v9554_v18, %v14181_v6  ;;  %v7498_v51 = vpop.xlane.xlu0 %7497 }
 0xc72   : > { %v9556_v42 = vpop.eup %9555  ;;  %v7532_v35 = vmul.f32 0.00390625, %v7498_v51 }
 0xc73   : > { %v7621_v10 = vmul.f32 %v14328_v9, %v7578_v36  ;;  %v7622_v1 = vmul.f32 %v14331_v19, %v7579_v56  ;;  %v7580_v48 = vmul.f32 %v9556_v42, %v14188_v11  ;;  %v7581_v55 = vmul.f32 %v9556_v42, %v14191_v20  ;;  %v7501_v3 = vpop.xlane.xlu1 %7500 }
 0xc74   : > { %v7548_v28 = vadd.f32 1e-12, %v7532_v35  ;;  %v7533_v14 = vmul.f32 0.00390625, %v7501_v3 }
 0xc75   : > { %v7664_v6 = vadd.f32 %v14334_v44, %v7621_v10  ;;  %v7665_v13 = vadd.f32 %v14337_v23, %v7622_v1  ;;  %v7623_v50 = vmul.f32 %v14328_v9, %v7580_v48  ;;  %v7624_v17 = vmul.f32 %v14331_v19, %v7581_v55 }
 0xc76   : > { %9561 = vrsqrt.f32 %v7548_v28  ;;  %v7549_v31 = vadd.f32 1e-12, %v7533_v14 }
 0xc77   : > { %7696 = vst [vmem:[%s9831_s9 + $0x20] sm:$0xff] %v7664_v6  ;;  %7697 = vst [vmem:[%s9831_s9 + $0x28] sm:$0xff] %v7665_v13  ;;  %v7666_v11 = vadd.f32 %v14334_v44, %v7623_v50  ;;  %v7667_v20 = vadd.f32 %v14337_v23, %v7624_v17 }
 0xc78   : > { %v9558_v12 = vpop.eup %9557  ;;  %9563 = vrsqrt.f32 %v7549_v31 }
 0xc79   : > { %7698 = vst [vmem:[%s9831_s9 + $0x30] sm:$0xff] %v7666_v11  ;;  %7699 = vst [vmem:[%s9831_s9 + $0x38] sm:$0xff] %v7667_v20  ;;  %v7582_v61 = vmul.f32 %v9558_v12, %v14198_v57  ;;  %v7583_v34 = vmul.f32 %v9558_v12, %v14201_v21  ;;  %v7504_v40 = vpop.xlane.xlu0 %7503 }
 0xc7a   : > { %v9560_v46 = vpop.eup %9559  ;;  %v7534_v39 = vmul.f32 0.00390625, %v7504_v40 }
 0xc7b   : > { %v7625_v53 = vmul.f32 %v14328_v9, %v7582_v61  ;;  %v7626_v15 = vmul.f32 %v14331_v19, %v7583_v34  ;;  %v7584_v8 = vmul.f32 %v9560_v46, %v14208_v5  ;;  %v7585_v52 = vmul.f32 %v9560_v46, %v14211_v2  ;;  %v7507_v27 = vpop.xlane.xlu1 %7506 }
 0xc7c   : > { %v7550_v7 = vadd.f32 1e-12, %v7534_v39  ;;  %v7535_v57 = vmul.f32 0.00390625, %v7507_v27 }
 0xc7d   : > { %v7668_v21 = vadd.f32 %v14334_v44, %v7625_v53  ;;  %v7669_v45 = vadd.f32 %v14337_v23, %v7626_v15  ;;  %v7627_v47 = vmul.f32 %v14328_v9, %v7584_v8  ;;  %v7628_v26 = vmul.f32 %v14331_v19, %v7585_v52 }
 0xc7e   : > { %9565 = vrsqrt.f32 %v7550_v7  ;;  %v7551_v38 = vadd.f32 1e-12, %v7535_v57 }
 0xc7f   : > { %7700 = vst [vmem:[%s9831_s9 + $0x40] sm:$0xff] %v7668_v21  ;;  %7701 = vst [vmem:[%s9831_s9 + $0x48] sm:$0xff] %v7669_v45  ;;  %v7670_v5 = vadd.f32 %v14334_v44, %v7627_v47  ;;  %v7671_v2 = vadd.f32 %v14337_v23, %v7628_v26 }
 0xc80   : > { %v9562_v18 = vpop.eup %9561  ;;  %9567 = vrsqrt.f32 %v7551_v38 }
 0xc81   : > { %7702 = vst [vmem:[%s9831_s9 + $0x50] sm:$0xff] %v7670_v5  ;;  %7703 = vst [vmem:[%s9831_s9 + $0x58] sm:$0xff] %v7671_v2  ;;  %v7586_v36 = vmul.f32 %v9562_v18, %v14218_v29  ;;  %v7587_v56 = vmul.f32 %v9562_v18, %v14221_v16  ;;  %v7510_v51 = vpop.xlane.xlu0 %7509 }
 0xc82   : > { %v9564_v42 = vpop.eup %9563  ;;  %v7536_v35 = vmul.f32 0.00390625, %v7510_v51 }
 0xc83   : > { %v7629_v10 = vmul.f32 %v14328_v9, %v7586_v36  ;;  %v7630_v1 = vmul.f32 %v14331_v19, %v7587_v56  ;;  %v7588_v48 = vmul.f32 %v9564_v42, %v14228_v49  ;;  %v7589_v55 = vmul.f32 %v9564_v42, %v14231_v43  ;;  %v7513_v3 = vpop.xlane.xlu1 %7512 }
 0xc84   : > { %v7552_v28 = vadd.f32 1e-12, %v7536_v35  ;;  %v7537_v29 = vmul.f32 0.00390625, %v7513_v3 }
 0xc85   : > { %v7672_v16 = vadd.f32 %v14334_v44, %v7629_v10  ;;  %v7673_v14 = vadd.f32 %v14337_v23, %v7630_v1  ;;  %v7631_v6 = vmul.f32 %v14328_v9, %v7588_v48  ;;  %v7632_v13 = vmul.f32 %v14331_v19, %v7589_v55 }
 0xc86   : > { %9569 = vrsqrt.f32 %v7552_v28  ;;  %v7553_v50 = vadd.f32 1e-12, %v7537_v29 }
 0xc87   : > { %7704 = vst [vmem:[%s9831_s9 + $0x60] sm:$0xff] %v7672_v16  ;;  %7705 = vst [vmem:[%s9831_s9 + $0x68] sm:$0xff] %v7673_v14  ;;  %v7674_v49 = vadd.f32 %v14334_v44, %v7631_v6  ;;  %v7675_v43 = vadd.f32 %v14337_v23, %v7632_v13 }
 0xc88   : > { %v9566_v17 = vpop.eup %9565  ;;  %9571 = vrsqrt.f32 %v7553_v50 }
 0xc89   : > { %7706 = vst [vmem:[%s9831_s9 + $0x70] sm:$0xff] %v7674_v49  ;;  %7707 = vst [vmem:[%s9831_s9 + $0x78] sm:$0xff] %v7675_v43  ;;  %v7590_v31 = vmul.f32 %v9566_v17, %v14238_v62  ;;  %v7591_v11 = vmul.f32 %v9566_v17, %v14241_v63  ;;  %v7516_v20 = vpop.xlane.xlu0 %7515 }
 0xc8a   : > { %v9568_v12 = vpop.eup %9567  ;;  %v7538_v61 = vmul.f32 0.00390625, %v7516_v20 }
 0xc8b   : > { %v7633_v34 = vmul.f32 %v14328_v9, %v7590_v31  ;;  %v7634_v40 = vmul.f32 %v14331_v19, %v7591_v11  ;;  %v7592_v46 = vmul.f32 %v9568_v12, %v14248_v22  ;;  %v7593_v39 = vmul.f32 %v9568_v12, %v14251_v4  ;;  %v7519_v53 = vpop.xlane.xlu1 %7518 }
 0xc8c   : > { %v7554_v15 = vadd.f32 1e-12, %v7538_v61  ;;  %v7539_v62 = vmul.f32 0.00390625, %v7519_v53 }
 0xc8d   : > { %v7676_v63 = vadd.f32 %v14334_v44, %v7633_v34  ;;  %v7677_v8 = vadd.f32 %v14337_v23, %v7634_v40  ;;  %v7635_v52 = vmul.f32 %v14328_v9, %v7592_v46  ;;  %v7636_v27 = vmul.f32 %v14331_v19, %v7593_v39 }
 0xc8e   : > { %9573 = vrsqrt.f32 %v7554_v15  ;;  %v7555_v7 = vadd.f32 1e-12, %v7539_v62 }
 0xc8f   : > { %7708 = vst [vmem:[%s9831_s9 + $0x80] sm:$0xff] %v7676_v63  ;;  %7709 = vst [vmem:[%s9831_s9 + $0x88] sm:$0xff] %v7677_v8  ;;  %v7678_v22 = vadd.f32 %v14334_v44, %v7635_v52  ;;  %v7679_v4 = vadd.f32 %v14337_v23, %v7636_v27 }
 0xc90   : > { %v9570_v57 = vpop.eup %9569  ;;  %9575 = vrsqrt.f32 %v7555_v7 }
 0xc91   : > { %7710 = vst [vmem:[%s9831_s9 + $0x90] sm:$0xff] %v7678_v22  ;;  %7711 = vst [vmem:[%s9831_s9 + $0x98] sm:$0xff] %v7679_v4  ;;  %v7594_v21 = vmul.f32 %v9570_v57, %v14258_v60  ;;  %v7595_v45 = vmul.f32 %v9570_v57, %v14261_v25  ;;  %v7522_v47 = vpop.xlane.xlu0 %7521 }
 0xc92   : > { %v9572_v26 = vpop.eup %9571  ;;  %v7540_v38 = vmul.f32 0.00390625, %v7522_v47 }
 0xc93   : > { %v7637_v5 = vmul.f32 %v14328_v9, %v7594_v21  ;;  %v7638_v2 = vmul.f32 %v14331_v19, %v7595_v45  ;;  %v7596_v18 = vmul.f32 %v9572_v26, %v14268_v54  ;;  %v7597_v36 = vmul.f32 %v9572_v26, %v14271_v59  ;;  %v7525_v56 = vpop.xlane.xlu1 %7524 }
 0xc94   : > { %v7556_v51 = vadd.f32 1e-12, %v7540_v38  ;;  %v7541_v60 = vmul.f32 0.00390625, %v7525_v56 }
 0xc95   : > { %v7680_v25 = vadd.f32 %v14334_v44, %v7637_v5  ;;  %v7681_v42 = vadd.f32 %v14337_v23, %v7638_v2  ;;  %v7639_v35 = vmul.f32 %v14328_v9, %v7596_v18  ;;  %v7640_v10 = vmul.f32 %v14331_v19, %v7597_v36 }
 0xc96   : > { %9577 = vrsqrt.f32 %v7556_v51  ;;  %v7557_v1 = vadd.f32 1e-12, %v7541_v60 }
 0xc97   : > { %7712 = vst [vmem:[%s9831_s9 + $0xa0] sm:$0xff] %v7680_v25  ;;  %7713 = vst [vmem:[%s9831_s9 + $0xa8] sm:$0xff] %v7681_v42  ;;  %v7682_v54 = vadd.f32 %v14334_v44, %v7639_v35  ;;  %v7683_v59 = vadd.f32 %v14337_v23, %v7640_v10 }
 0xc98   : > { %v9574_v48 = vpop.eup %9573  ;;  %9579 = vrsqrt.f32 %v7557_v1 }
 0xc99   : > { %7714 = vst [vmem:[%s9831_s9 + $0xb0] sm:$0xff] %v7682_v54  ;;  %7715 = vst [vmem:[%s9831_s9 + $0xb8] sm:$0xff] %v7683_v59  ;;  %v7598_v55 = vmul.f32 %v9574_v48, %v14278_v33  ;;  %v7599_v3 = vmul.f32 %v9574_v48, %v14281_v58 }
 0xc9a   : > { %v9576_v28 = vpop.eup %9575 }
 0xc9b   : > { %v7641_v29 = vmul.f32 %v14328_v9, %v7598_v55  ;;  %v7642_v16 = vmul.f32 %v14331_v19, %v7599_v3  ;;  %v7600_v14 = vmul.f32 %v9576_v28, %v14288_v24  ;;  %v7601_v6 = vmul.f32 %v9576_v28, %v14291_v30 }
 0xc9d   : > { %v7684_v13 = vadd.f32 %v14334_v44, %v7641_v29  ;;  %v7685_v50 = vadd.f32 %v14337_v23, %v7642_v16  ;;  %v7643_v49 = vmul.f32 %v14328_v9, %v7600_v14  ;;  %v7644_v33 = vmul.f32 %v14331_v19, %v7601_v6 }
 0xc9f   : > { %7716 = vst [vmem:[%s9831_s9 + $0xc0] sm:$0xff] %v7684_v13  ;;  %7717 = vst [vmem:[%s9831_s9 + $0xc8] sm:$0xff] %v7685_v50  ;;  %v7686_v58 = vadd.f32 %v14334_v44, %v7643_v49  ;;  %v7687_v43 = vadd.f32 %v14337_v23, %v7644_v33 }
 0xca0   : > { %v9578_v17 = vpop.eup %9577 }
 0xca1   : > { %7718 = vst [vmem:[%s9831_s9 + $0xd0] sm:$0xff] %v7686_v58  ;;  %7719 = vst [vmem:[%s9831_s9 + $0xd8] sm:$0xff] %v7687_v43  ;;  %v7602_v24 = vmul.f32 %v9578_v17, %v14298_v0  ;;  %v7603_v30 = vmul.f32 %v9578_v17, %v14301_v37 }
 0xca2   : > { %v9580_v31 = vpop.eup %9579 }
 0xca3   : > { %v7645_v11 = vmul.f32 %v14328_v9, %v7602_v24  ;;  %v7646_v20 = vmul.f32 %v14331_v19, %v7603_v30  ;;  %v7604_v12 = vmul.f32 %v9580_v31, %v14308_v41  ;;  %v7605_v61 = vmul.f32 %v9580_v31, %v14311_v32 }
 0xca5   : > { %v7688_v34 = vadd.f32 %v14334_v44, %v7645_v11  ;;  %v7689_v40 = vadd.f32 %v14337_v23, %v7646_v20  ;;  %v7647_v46 = vmul.f32 %v14328_v9, %v7604_v12  ;;  %v7648_v0 = vmul.f32 %v14331_v19, %v7605_v61 }
 0xca7   : > { %7720 = vst [vmem:[%s9831_s9 + $0xe0] sm:$0xff] %v7688_v34  ;;  %7721 = vst [vmem:[%s9831_s9 + $0xe8] sm:$0xff] %v7689_v40  ;;  %v7690_v37 = vadd.f32 %v14334_v44, %v7647_v46  ;;  %v7691_v39 = vadd.f32 %v14337_v23, %v7648_v0 }
 0xca9   : > { %7722 = vst [vmem:[%s9831_s9 + $0xf0] sm:$0xff] %v7690_v37  ;;  %7723 = vst [vmem:[%s9831_s9 + $0xf8] sm:$0xff] %v7691_v39 }
 0xcaa PF: > { %s15287_s15 = sld [smem:[#allocation5_spill]]  ;;  %s15288_s18 = sld [smem:[#allocation3_spill]] }
 0xcab   : > { %s15289_s19 = sld [smem:[#allocation4_spill]]  ;;  %s15290_s20 = sld [smem:[#allocation6_spill]] }
 0xcac   : > { %s15291_s21 = sld [smem:[#allocation7_spill]] }
 0xcb0   : > { %s25_s22 = sadd.s32 1, %s15287_s15  }
 0xcb1   : > { %p22_p8 = scmp.ge.s32.totalorder %s25_s22, 6  }
 0xcb3   :  { %24 = sbr.rel (!%p22_p8) target bundleno = 9 (0x9), region = 150 }

</bundles_post_ra>
